<compile_context>
chip_gen: v7x
topology: tpu7x:2x2x1
jax: 0.10.0
libtpu: 0.0.40
codegen_flags: <defaults>
</compile_context>

<pallas_src>
import functools

import jax
import jax.numpy as jnp
from jax import lax
from jax.experimental import pallas as pl
from jax.experimental.pallas import tpu as pltpu

# ---- model dims (from the PyTorch module) -----------------------------------
IN_F = 162          # LSTM input size
H = 128             # LSTM hidden size
X_F = 373           # extra feature vector size
D = 512             # dense hidden size

TC_MAX = 64         # time-chunk cap (review: 16 was grid-overhead-bound)


# ---- the Pallas kernel -------------------------------------------------------
def _model_kernel(z_ref, x_ref,
                  w_ih_ref, w_hh_ref, b_lstm_ref,
                  w1h_ref, w1x_ref, b1_ref,
                  w2_ref, b2_ref, w3_ref, b3_ref,
                  w4_ref, b4_ref, w5_ref, b5_ref,
                  w6_ref, b6_ref,
                  o_ref,
                  h_sc, c_sc, xw_sc, gates_sc,
                  *, tc, t_total, rem):
    # grid = (batch_blocks [parallel], time_chunks [arbitrary])
    g = pl.program_id(1)
    Tc, Bb, F = z_ref.shape
    mm_dtype = w_ih_ref.dtype            # matmul dtype (bf16 default, f32 debug)

    @pl.when(g == 0)
    def _init():
        h_sc[...] = jnp.zeros_like(h_sc)
        c_sc[...] = jnp.zeros_like(c_sc)
        # x-only half of dense1 (no LSTM dependency): x @ W1_x + b1
        xw_sc[...] = (
            jnp.dot(x_ref[...].astype(mm_dtype), w1x_ref[...],
                    preferred_element_type=jnp.float32)
            + b1_ref[...])

    # Hoisted input projection for the whole chunk: one MXU matmul with
    # M = Tc*Bb rows instead of Tc tiny matmuls inside the recurrence.
    z2 = z_ref[...].reshape(Tc * Bb, F).astype(mm_dtype)
    gi = jnp.dot(z2, w_ih_ref[...], preferred_element_type=jnp.float32)
    gates_sc[...] = gi.reshape(Tc, Bb, 4 * H) + b_lstm_ref[...]

    # Recurrent part: only h @ W_hh per step.  fori_loop(unroll=True) bounds
    # vreg live ranges (gates_sc[t] is loaded right before use each step).
    # TODO(synk): on v5e/v6e, if the bundle dump shows W_hh re-pushed into the
    # MXU every step, drive it with pltpu.matmul_push_rhs once per chunk and
    # pltpu.matmul_acc_lhs / matmul_pop inside the loop.
    w_hh = w_hh_ref[...]

    def step(t, carry):
        h, c = carry
        gates = gates_sc[t] + jnp.dot(h.astype(mm_dtype), w_hh,
                                      preferred_element_type=jnp.float32)
        # PyTorch LSTM gate order: i, f, g, o
        i_g = jax.nn.sigmoid(gates[:, 0 * H:1 * H])
        f_g = jax.nn.sigmoid(gates[:, 1 * H:2 * H])
        g_g = jnp.tanh(gates[:, 2 * H:3 * H])
        o_g = jax.nn.sigmoid(gates[:, 3 * H:4 * H])
        c_new = f_g * c + i_g * g_g
        h_new = o_g * jnp.tanh(c_new)
        if rem:  # static: only emitted when T is not a multiple of Tc
            valid = (g * tc + t) < t_total   # mask zero-padded tail steps
            h_new = jnp.where(valid, h_new, h)
            c_new = jnp.where(valid, c_new, c)
        return h_new, c_new

    h, c = lax.fori_loop(0, Tc, step, (h_sc[...], c_sc[...]), unroll=True)
    h_sc[...] = h
    c_sc[...] = c

    @pl.when(g == pl.num_programs(1) - 1)
    def _epilogue():
        # TODO(synk): on v7x, the epilogue weights (w1h, w2..w5) could live in
        # HBM (memory_space=pl.ANY) and be DMA'd here / prefetched during the
        # last chunk to free VMEM while streaming long sequences.
        def dense_relu(v, w_ref, b_ref):
            return jnp.maximum(
                jnp.dot(v.astype(w_ref.dtype), w_ref[...],
                        preferred_element_type=jnp.float32) + b_ref[...],
                0.0)

        # dense1 = relu(h @ W1_h + (x @ W1_x + b1))   (concat removed)
        y = jnp.maximum(
            jnp.dot(h.astype(mm_dtype), w1h_ref[...],
                    preferred_element_type=jnp.float32) + xw_sc[...],
            0.0)
        y = dense_relu(y, w2_ref, b2_ref)
        y = dense_relu(y, w3_ref, b3_ref)
        y = dense_relu(y, w4_ref, b4_ref)
        y = dense_relu(y, w5_ref, b5_ref)
        # final 512 -> 1 layer as a lane reduction (avoids an N=1 MXU matmul)
        out = jnp.sum(y * w6_ref[...], axis=-1, keepdims=True) + b6_ref[...]
        o_ref[...] = out.astype(o_ref.dtype)


# ---- wrapper: layout glue + pallas_call --------------------------------------
@functools.partial(jax.jit, static_argnames=("matmul_dtype",))
def landlord_lstm_forward(z, x, params, matmul_dtype=jnp.bfloat16):
    """z: (B, T, 162) f32, x: (B, 373) f32 -> (values (B, 1) f32, action)."""
    B, T, _ = z.shape

    Tc = min(TC_MAX, T)
    n_chunks = -(-T // Tc)
    T_pad = n_chunks * Tc
    rem = T % Tc                       # 0 means no tail masking needed

    # 2-way batch-block split for large batches (both v7x TensorCores); at
    # B < 16 the batch is too small to split.
    Bb = B // 2 if (B >= 16 and B % 2 == 0) else B
    n_bblk = B // Bb

    # time-major so the grid streams (Tc, Bb, 162) chunks; NO feature padding
    # (full-extent 162 last block dim is legal; Mosaic masks K=162).
    # TODO(synk): for long-T serving, store z time-major upstream so this
    # transpose isn't a separate full HBM pass.
    z_tm = jnp.transpose(z, (1, 0, 2))                        # (T, B, 162)
    if T_pad != T:
        z_tm = jnp.pad(z_tm, ((0, T_pad - T), (0, 0), (0, 0)))

    mm = matmul_dtype
    # LSTM params: PyTorch (4H, in) -> transposed (in, 4H).
    w_ih = params["w_ih"].T.astype(mm)                                    # (162, 512)
    w_hh = params["w_hh"].T.astype(mm)                                    # (128, 512)
    b_lstm = (params["b_ih"] + params["b_hh"]).reshape(1, 4 * H)          # f32

    # dense1 split: rows [0:H) act on lstm h, rows [H:H+X_F) act on x.
    w1t = params["w1"].T                                                  # (501, 512)
    w1_h = w1t[:H].astype(mm)                                             # (128, 512)
    w1_x = w1t[H:].astype(mm)                                             # (373, 512)
    b1 = params["b1"].reshape(1, D)
    w2, b2 = params["w2"].T.astype(mm), params["b2"].reshape(1, D)
    w3, b3 = params["w3"].T.astype(mm), params["b3"].reshape(1, D)
    w4, b4 = params["w4"].T.astype(mm), params["b4"].reshape(1, D)
    w5, b5 = params["w5"].T.astype(mm), params["b5"].reshape(1, D)
    w6 = params["w6"].reshape(1, D)                                       # f32 row
    b6 = params["b6"].reshape(1, 1)

    weights = (w_ih, w_hh, b_lstm, w1_h, w1_x, b1,
               w2, b2, w3, b3, w4, b4, w5, b5, w6, b6)

    def full_spec(a):
        # whole array resident in VMEM, same block every grid step (no re-DMA)
        # TODO(synk): pipeline_mode=pl.Buffered(1) on these constant-index specs
        # would halve their VMEM residency (free headroom on v7x's 64 MiB).
        return pl.BlockSpec(a.shape, lambda b, g: (0,) * a.ndim)

    kernel = functools.partial(_model_kernel, tc=Tc, t_total=T, rem=rem)

    grid_spec = pltpu.PrefetchScalarGridSpec(
        num_scalar_prefetch=0,
        grid=(n_bblk, n_chunks),
        in_specs=[pl.BlockSpec((Tc, Bb, IN_F), lambda b, g: (g, b, 0)),   # z chunks
                  pl.BlockSpec((Bb, X_F), lambda b, g: (b, 0))]           # x
                 + [full_spec(w) for w in weights],
        out_specs=pl.BlockSpec((Bb, 1), lambda b, g: (b, 0)),
        scratch_shapes=[pltpu.VMEM((Bb, H), jnp.float32),           # h state
                        pltpu.VMEM((Bb, H), jnp.float32),           # c state
                        pltpu.VMEM((Bb, D), jnp.float32),           # x @ W1_x + b1
                        pltpu.VMEM((Tc, Bb, 4 * H), jnp.float32)])  # hoisted gates

    values = pl.pallas_call(
        kernel,
        out_shape=jax.ShapeDtypeStruct((B, 1), jnp.float32),
        grid_spec=grid_spec,
        compiler_params=pltpu.CompilerParams(
            dimension_semantics=("parallel", "arbitrary"),  # batch || , time seq
            vmem_limit_bytes=32 << 20),
    )(z_tm, x, *weights)

    # greedy action path of forward(return_value=False): argmax over batch dim
    # TODO(synk): epsilon-greedy random-action branch (np.random / flags) is
    # host-side control flow, left to the caller.
    action = jnp.argmax(values[:, 0], axis=0)
    return values, action


# ---- deterministic parameter init (synthetic; shapes from __init__) ----------
def init_params(key):
    ks = jax.random.split(key, 16)
    s = 0.05
    return {
        "w_ih": s * jax.random.normal(ks[0], (4 * H, IN_F), jnp.float32),
        "w_hh": s * jax.random.normal(ks[1], (4 * H, H), jnp.float32),
        "b_ih": s * jax.random.normal(ks[2], (4 * H,), jnp.float32),
        "b_hh": s * jax.random.normal(ks[3], (4 * H,), jnp.float32),
        "w1": s * jax.random.normal(ks[4], (D, H + X_F), jnp.float32),
        "b1": s * jax.random.normal(ks[5], (D,), jnp.float32),
        "w2": s * jax.random.normal(ks[6], (D, D), jnp.float32),
        "b2": s * jax.random.normal(ks[7], (D,), jnp.float32),
        "w3": s * jax.random.normal(ks[8], (D, D), jnp.float32),
        "b3": s * jax.random.normal(ks[9], (D,), jnp.float32),
        "w4": s * jax.random.normal(ks[10], (D, D), jnp.float32),
        "b4": s * jax.random.normal(ks[11], (D,), jnp.float32),
        "w5": s * jax.random.normal(ks[12], (D, D), jnp.float32),
        "b5": s * jax.random.normal(ks[13], (D,), jnp.float32),
        "w6": s * jax.random.normal(ks[14], (1, D), jnp.float32),
        "b6": s * jax.random.normal(ks[15], (1,), jnp.float32),
    }


# ---- pure-JAX reference (unpadded, f32-highest) for correctness check --------
def reference_forward(z, x, p):
    hp = lax.Precision.HIGHEST
    mm = lambda a, b: jnp.dot(a, b, precision=hp)
    B, T, _ = z.shape
    h = jnp.zeros((B, H), jnp.float32)
    c = jnp.zeros((B, H), jnp.float32)
    w_ih, w_hh = p["w_ih"].T, p["w_hh"].T
    b = (p["b_ih"] + p["b_hh"]).reshape(1, -1)
    for t in range(T):
        gates = mm(z[:, t, :], w_ih) + mm(h, w_hh) + b
        i = jax.nn.sigmoid(gates[:, 0 * H:1 * H])
        f = jax.nn.sigmoid(gates[:, 1 * H:2 * H])
        g = jnp.tanh(gates[:, 2 * H:3 * H])
        o = jax.nn.sigmoid(gates[:, 3 * H:4 * H])
        c = f * c + i * g
        h = o * jnp.tanh(c)
    y = jnp.concatenate([h, x], axis=-1)
    for k in range(1, 6):
        y = jax.nn.relu(mm(y, p[f"w{k}"].T) + p[f"b{k}"])
    return mm(y, p["w6"].T) + p["b6"]


if __name__ == "__main__":
    key = jax.random.PRNGKey(0)
    kz, kx, kp, kz2, kx2 = jax.random.split(key, 5)
    params = init_params(kp)

    # --- case 1: small shapes (B=8, T=8): single chunk, no remainder ----------
    B, T = 8, 8
    z = jax.random.normal(kz, (B, T, IN_F), jnp.float32)
    x = jax.random.normal(kx, (B, X_F), jnp.float32)
    ref = reference_forward(z, x, params)

    # f32 matmul path: bit-comparable to the reference
    v_f32, a_f32 = landlord_lstm_forward(z, x, params, matmul_dtype=jnp.float32)
    v_f32 = jax.block_until_ready(v_f32)
    assert v_f32.shape == (B, 1)
    assert jnp.max(jnp.abs(v_f32 - ref)) < 1e-4, "f32 kernel mismatch vs reference"
    assert int(a_f32) == int(jnp.argmax(ref[:, 0]))

    # default path: bf16 matmuls (f32 accumulation / gate math / cell state)
    v_bf16, _ = landlord_lstm_forward(z, x, params)
    v_bf16 = jax.block_until_ready(v_bf16)
    assert jnp.max(jnp.abs(v_bf16 - ref)) < 2.5e-1, "bf16 kernel drifted too far"

    # --- case 2: long sequence with masked remainder chunk + batch split ------
    # T=70 -> Tc=64 plus a zero-padded, step-masked tail; B=16 -> 2 batch blocks.
    B2, T2 = 16, 70
    z2 = jax.random.normal(kz2, (B2, T2, IN_F), jnp.float32)
    x2 = jax.random.normal(kx2, (B2, X_F), jnp.float32)
    ref2 = reference_forward(z2, x2, params)

    v2_f32, _ = landlord_lstm_forward(z2, x2, params, matmul_dtype=jnp.float32)
    v2_f32 = jax.block_until_ready(v2_f32)
    assert jnp.max(jnp.abs(v2_f32 - ref2)) < 5e-4, "f32 kernel mismatch (long T)"

    v2_bf16, a2 = landlord_lstm_forward(z2, x2, params)
    v2_bf16 = jax.block_until_ready(v2_bf16)
    assert jnp.max(jnp.abs(v2_bf16 - ref2)) < 2.5e-1, "bf16 drift too large (long T)"
    assert int(a2) == int(jnp.argmax(v2_bf16[:, 0]))

    print("KERNEL_OK")
</pallas_src>

<mosaic_0001>
module attributes {stable_mosaic.version = 11 : i64} {
  func.func @_model_kernel(%arg0: i32, %arg1: i32, %arg2: memref<8x8x162xf32, #tpu.memory_space<vmem>>, %arg3: memref<8x373xf32, #tpu.memory_space<vmem>>, %arg4: memref<162x512xf32, #tpu.memory_space<vmem>>, %arg5: memref<128x512xf32, #tpu.memory_space<vmem>>, %arg6: memref<1x512xf32, #tpu.memory_space<vmem>>, %arg7: memref<128x512xf32, #tpu.memory_space<vmem>>, %arg8: memref<373x512xf32, #tpu.memory_space<vmem>>, %arg9: memref<1x512xf32, #tpu.memory_space<vmem>>, %arg10: memref<512x512xf32, #tpu.memory_space<vmem>>, %arg11: memref<1x512xf32, #tpu.memory_space<vmem>>, %arg12: memref<512x512xf32, #tpu.memory_space<vmem>>, %arg13: memref<1x512xf32, #tpu.memory_space<vmem>>, %arg14: memref<512x512xf32, #tpu.memory_space<vmem>>, %arg15: memref<1x512xf32, #tpu.memory_space<vmem>>, %arg16: memref<512x512xf32, #tpu.memory_space<vmem>>, %arg17: memref<1x512xf32, #tpu.memory_space<vmem>>, %arg18: memref<1x512xf32, #tpu.memory_space<vmem>>, %arg19: memref<1x1xf32, #tpu.memory_space<vmem>>, %arg20: memref<8x1xf32, #tpu.memory_space<vmem>>, %arg21: memref<8x128xf32, #tpu.memory_space<vmem>>, %arg22: memref<8x128xf32, #tpu.memory_space<vmem>>, %arg23: memref<8x512xf32, #tpu.memory_space<vmem>>, %arg24: memref<8x8x512xf32, #tpu.memory_space<vmem>>) attributes {dimension_semantics = [#tpu.dimension_semantics<parallel>, #tpu.dimension_semantics<arbitrary>], iteration_bounds = array<i64: 1, 1>, scalar_prefetch = 0 : i64, scratch_operands = 4 : i64, tpu.core_type = #tpu.core_type<tc>, window_params = [{transform_indices = @transform_0, window_bounds = array<i64: 8, 8, 162>}, {transform_indices = @transform_1, window_bounds = array<i64: 8, 373>}, {pipeline_mode = #tpu.pipeline_mode<synchronous>, transform_indices = @transform_2, window_bounds = array<i64: 162, 512>}, {pipeline_mode = #tpu.pipeline_mode<synchronous>, transform_indices = @transform_3, window_bounds = array<i64: 128, 512>}, {pipeline_mode = #tpu.pipeline_mode<synchronous>, transform_indices = @transform_4, window_bounds = array<i64: 1, 512>}, {pipeline_mode = #tpu.pipeline_mode<synchronous>, transform_indices = @transform_5, window_bounds = array<i64: 128, 512>}, {pipeline_mode = #tpu.pipeline_mode<synchronous>, transform_indices = @transform_6, window_bounds = array<i64: 373, 512>}, {pipeline_mode = #tpu.pipeline_mode<synchronous>, transform_indices = @transform_7, window_bounds = array<i64: 1, 512>}, {pipeline_mode = #tpu.pipeline_mode<synchronous>, transform_indices = @transform_8, window_bounds = array<i64: 512, 512>}, {pipeline_mode = #tpu.pipeline_mode<synchronous>, transform_indices = @transform_9, window_bounds = array<i64: 1, 512>}, {pipeline_mode = #tpu.pipeline_mode<synchronous>, transform_indices = @transform_10, window_bounds = array<i64: 512, 512>}, {pipeline_mode = #tpu.pipeline_mode<synchronous>, transform_indices = @transform_11, window_bounds = array<i64: 1, 512>}, {pipeline_mode = #tpu.pipeline_mode<synchronous>, transform_indices = @transform_12, window_bounds = array<i64: 512, 512>}, {pipeline_mode = #tpu.pipeline_mode<synchronous>, transform_indices = @transform_13, window_bounds = array<i64: 1, 512>}, {pipeline_mode = #tpu.pipeline_mode<synchronous>, transform_indices = @transform_14, window_bounds = array<i64: 512, 512>}, {pipeline_mode = #tpu.pipeline_mode<synchronous>, transform_indices = @transform_15, window_bounds = array<i64: 1, 512>}, {pipeline_mode = #tpu.pipeline_mode<synchronous>, transform_indices = @transform_16, window_bounds = array<i64: 1, 512>}, {pipeline_mode = #tpu.pipeline_mode<synchronous>, transform_indices = @transform_17, window_bounds = array<i64: 1, 1>}, {transform_indices = @transform_18, window_bounds = array<i64: 8, 1>}]} {
    %c0_i32 = arith.constant 0 : i32
    %0 = arith.cmpi eq, %arg1, %c0_i32 : i32
    %1 = arith.extui %0 : i1 to i32
    %c0_i32_0 = arith.constant 0 : i32
    %2 = arith.cmpi ne, %1, %c0_i32_0 : i32
    scf.if %2 {
      %cst_71 = arith.constant 0.000000e+00 : f32
      %261 = vector.broadcast %cst_71 : f32 to vector<8x128xf32>
      %c0_72 = arith.constant 0 : index
      %c0_73 = arith.constant 0 : index
      %262 = vector.load %arg21[%c0_72, %c0_73] : memref<8x128xf32, #tpu.memory_space<vmem>>, vector<8x128xf32>
      tpu.vector_store %arg21[%c0_72, %c0_73], %261 {strides = array<i32>} : memref<8x128xf32, #tpu.memory_space<vmem>>, vector<8x128xf32>,
      %cst_74 = arith.constant 0.000000e+00 : f32
      %263 = vector.broadcast %cst_74 : f32 to vector<8x128xf32>
      %c0_75 = arith.constant 0 : index
      %c0_76 = arith.constant 0 : index
      %264 = vector.load %arg22[%c0_75, %c0_76] : memref<8x128xf32, #tpu.memory_space<vmem>>, vector<8x128xf32>
      tpu.vector_store %arg22[%c0_75, %c0_76], %263 {strides = array<i32>} : memref<8x128xf32, #tpu.memory_space<vmem>>, vector<8x128xf32>,
      %c0_77 = arith.constant 0 : index
      %c0_78 = arith.constant 0 : index
      %265 = vector.load %arg3[%c0_77, %c0_78] : memref<8x373xf32, #tpu.memory_space<vmem>>, vector<8x373xf32>
      %c0_79 = arith.constant 0 : index
      %c0_80 = arith.constant 0 : index
      %266 = vector.load %arg8[%c0_79, %c0_80] : memref<373x512xf32, #tpu.memory_space<vmem>>, vector<373x512xf32>
      %cst_81 = arith.constant dense<0.000000e+00> : vector<8x512xf32>
      %267 = tpu.matmul %265, %266, %cst_81 {dimension_numbers = #tpu.dot_dimension_numbers<[1], [0], [0], [1], [0, 0, 1, 1], [], []>} : vector<8x373xf32>, vector<373x512xf32>, vector<8x512xf32> -> vector<8x512xf32>
      %c0_82 = arith.constant 0 : index
      %c0_83 = arith.constant 0 : index
      %268 = vector.load %arg9[%c0_82, %c0_83] : memref<1x512xf32, #tpu.memory_space<vmem>>, vector<1x512xf32>
      %269 = vector.broadcast %268 : vector<1x512xf32> to vector<8x512xf32>
      %270 = arith.addf %267, %269 : vector<8x512xf32>
      %c0_84 = arith.constant 0 : index
      %c0_85 = arith.constant 0 : index
      %271 = vector.load %arg23[%c0_84, %c0_85] : memref<8x512xf32, #tpu.memory_space<vmem>>, vector<8x512xf32>
      tpu.vector_store %arg23[%c0_84, %c0_85], %270 {strides = array<i32>} : memref<8x512xf32, #tpu.memory_space<vmem>>, vector<8x512xf32>,
    } else {
    }
    %c0 = arith.constant 0 : index
    %c0_1 = arith.constant 0 : index
    %c0_2 = arith.constant 0 : index
    %3 = vector.load %arg2[%c0, %c0_1, %c0_2] : memref<8x8x162xf32, #tpu.memory_space<vmem>>, vector<8x8x162xf32>
    %4 = vector.shape_cast %3 : vector<8x8x162xf32> to vector<64x162xf32>
    %c0_3 = arith.constant 0 : index
    %c0_4 = arith.constant 0 : index
    %5 = vector.load %arg4[%c0_3, %c0_4] : memref<162x512xf32, #tpu.memory_space<vmem>>, vector<162x512xf32>
    %cst = arith.constant dense<0.000000e+00> : vector<64x512xf32>
    %6 = tpu.matmul %4, %5, %cst {dimension_numbers = #tpu.dot_dimension_numbers<[1], [0], [0], [1], [0, 0, 1, 1], [], []>} : vector<64x162xf32>, vector<162x512xf32>, vector<64x512xf32> -> vector<64x512xf32>
    %7 = vector.shape_cast %6 : vector<64x512xf32> to vector<8x8x512xf32>
    %c0_5 = arith.constant 0 : index
    %c0_6 = arith.constant 0 : index
    %8 = vector.load %arg6[%c0_5, %c0_6] : memref<1x512xf32, #tpu.memory_space<vmem>>, vector<1x512xf32>
    %9 = vector.shape_cast %8 : vector<1x512xf32> to vector<1x1x512xf32>
    %10 = vector.broadcast %9 : vector<1x1x512xf32> to vector<8x8x512xf32>
    %11 = arith.addf %7, %10 : vector<8x8x512xf32>
    %c0_7 = arith.constant 0 : index
    %c0_8 = arith.constant 0 : index
    %c0_9 = arith.constant 0 : index
    %12 = vector.load %arg24[%c0_7, %c0_8, %c0_9] : memref<8x8x512xf32, #tpu.memory_space<vmem>>, vector<8x8x512xf32>
    tpu.vector_store %arg24[%c0_7, %c0_8, %c0_9], %11 {strides = array<i32>} : memref<8x8x512xf32, #tpu.memory_space<vmem>>, vector<8x8x512xf32>,
    %c0_10 = arith.constant 0 : index
    %c0_11 = arith.constant 0 : index
    %13 = vector.load %arg5[%c0_10, %c0_11] : memref<128x512xf32, #tpu.memory_space<vmem>>, vector<128x512xf32>
    %c0_12 = arith.constant 0 : index
    %c0_13 = arith.constant 0 : index
    %14 = vector.load %arg21[%c0_12, %c0_13] : memref<8x128xf32, #tpu.memory_space<vmem>>, vector<8x128xf32>
    %c0_14 = arith.constant 0 : index
    %c0_15 = arith.constant 0 : index
    %15 = vector.load %arg22[%c0_14, %c0_15] : memref<8x128xf32, #tpu.memory_space<vmem>>, vector<8x128xf32>
    %c0_i32_16 = arith.constant 0 : i32
    %16 = arith.index_cast %c0_i32_16 : i32 to index
    %c0_17 = arith.constant 0 : index
    %c0_18 = arith.constant 0 : index
    %17 = vector.load %arg24[%16, %c0_17, %c0_18] : memref<8x8x512xf32, #tpu.memory_space<vmem>>, vector<1x8x512xf32>
    %18 = vector.shape_cast %17 : vector<1x8x512xf32> to vector<8x512xf32>
    %cst_19 = arith.constant dense<0.000000e+00> : vector<8x512xf32>
    %19 = tpu.matmul %14, %13, %cst_19 {dimension_numbers = #tpu.dot_dimension_numbers<[1], [0], [0], [1], [0, 0, 1, 1], [], []>} : vector<8x128xf32>, vector<128x512xf32>, vector<8x512xf32> -> vector<8x512xf32>
    %20 = arith.addf %18, %19 : vector<8x512xf32>
    %21 = vector.extract_strided_slice %20 {offsets = [0, 0], sizes = [8, 128], strides = [1, 1]} : vector<8x512xf32> to vector<8x128xf32>
    %22 = arith.negf %21 : vector<8x128xf32>
    %23 = math.exp %22 : vector<8x128xf32>
    %cst_20 = arith.constant 1.000000e+00 : f32
    %24 = vector.broadcast %cst_20 : f32 to vector<8x128xf32>
    %25 = arith.addf %24, %23 : vector<8x128xf32>
    %26 = arith.divf %24, %25 : vector<8x128xf32>
    %27 = vector.extract_strided_slice %20 {offsets = [0, 128], sizes = [8, 128], strides = [1, 1]} : vector<8x512xf32> to vector<8x128xf32>
    %28 = arith.negf %27 : vector<8x128xf32>
    %29 = math.exp %28 : vector<8x128xf32>
    %cst_21 = arith.constant 1.000000e+00 : f32
    %30 = vector.broadcast %cst_21 : f32 to vector<8x128xf32>
    %31 = arith.addf %30, %29 : vector<8x128xf32>
    %32 = arith.divf %30, %31 : vector<8x128xf32>
    %33 = vector.extract_strided_slice %20 {offsets = [0, 256], sizes = [8, 128], strides = [1, 1]} : vector<8x512xf32> to vector<8x128xf32>
    %34 = math.tanh %33 : vector<8x128xf32>
    %35 = vector.extract_strided_slice %20 {offsets = [0, 384], sizes = [8, 128], strides = [1, 1]} : vector<8x512xf32> to vector<8x128xf32>
    %36 = arith.negf %35 : vector<8x128xf32>
    %37 = math.exp %36 : vector<8x128xf32>
    %cst_22 = arith.constant 1.000000e+00 : f32
    %38 = vector.broadcast %cst_22 : f32 to vector<8x128xf32>
    %39 = arith.addf %38, %37 : vector<8x128xf32>
    %40 = arith.divf %38, %39 : vector<8x128xf32>
    %41 = arith.mulf %32, %15 : vector<8x128xf32>
    %42 = arith.mulf %26, %34 : vector<8x128xf32>
    %43 = arith.addf %41, %42 : vector<8x128xf32>
    %44 = math.tanh %43 : vector<8x128xf32>
    %45 = arith.mulf %40, %44 : vector<8x128xf32>
    %c1_i32 = arith.constant 1 : i32
    %46 = arith.index_cast %c1_i32 : i32 to index
    %c0_23 = arith.constant 0 : index
    %c0_24 = arith.constant 0 : index
    %47 = vector.load %arg24[%46, %c0_23, %c0_24] : memref<8x8x512xf32, #tpu.memory_space<vmem>>, vector<1x8x512xf32>
    %48 = vector.shape_cast %47 : vector<1x8x512xf32> to vector<8x512xf32>
    %cst_25 = arith.constant dense<0.000000e+00> : vector<8x512xf32>
    %49 = tpu.matmul %45, %13, %cst_25 {dimension_numbers = #tpu.dot_dimension_numbers<[1], [0], [0], [1], [0, 0, 1, 1], [], []>} : vector<8x128xf32>, vector<128x512xf32>, vector<8x512xf32> -> vector<8x512xf32>
    %50 = arith.addf %48, %49 : vector<8x512xf32>
    %51 = vector.extract_strided_slice %50 {offsets = [0, 0], sizes = [8, 128], strides = [1, 1]} : vector<8x512xf32> to vector<8x128xf32>
    %52 = arith.negf %51 : vector<8x128xf32>
    %53 = math.exp %52 : vector<8x128xf32>
    %cst_26 = arith.constant 1.000000e+00 : f32
    %54 = vector.broadcast %cst_26 : f32 to vector<8x128xf32>
    %55 = arith.addf %54, %53 : vector<8x128xf32>
    %56 = arith.divf %54, %55 : vector<8x128xf32>
    %57 = vector.extract_strided_slice %50 {offsets = [0, 128], sizes = [8, 128], strides = [1, 1]} : vector<8x512xf32> to vector<8x128xf32>
    %58 = arith.negf %57 : vector<8x128xf32>
    %59 = math.exp %58 : vector<8x128xf32>
    %cst_27 = arith.constant 1.000000e+00 : f32
    %60 = vector.broadcast %cst_27 : f32 to vector<8x128xf32>
    %61 = arith.addf %60, %59 : vector<8x128xf32>
    %62 = arith.divf %60, %61 : vector<8x128xf32>
    %63 = vector.extract_strided_slice %50 {offsets = [0, 256], sizes = [8, 128], strides = [1, 1]} : vector<8x512xf32> to vector<8x128xf32>
    %64 = math.tanh %63 : vector<8x128xf32>
    %65 = vector.extract_strided_slice %50 {offsets = [0, 384], sizes = [8, 128], strides = [1, 1]} : vector<8x512xf32> to vector<8x128xf32>
    %66 = arith.negf %65 : vector<8x128xf32>
    %67 = math.exp %66 : vector<8x128xf32>
    %cst_28 = arith.constant 1.000000e+00 : f32
    %68 = vector.broadcast %cst_28 : f32 to vector<8x128xf32>
    %69 = arith.addf %68, %67 : vector<8x128xf32>
    %70 = arith.divf %68, %69 : vector<8x128xf32>
    %71 = arith.mulf %62, %43 : vector<8x128xf32>
    %72 = arith.mulf %56, %64 : vector<8x128xf32>
    %73 = arith.addf %71, %72 : vector<8x128xf32>
    %74 = math.tanh %73 : vector<8x128xf32>
    %75 = arith.mulf %70, %74 : vector<8x128xf32>
    %c2_i32 = arith.constant 2 : i32
    %76 = arith.index_cast %c2_i32 : i32 to index
    %c0_29 = arith.constant 0 : index
    %c0_30 = arith.constant 0 : index
    %77 = vector.load %arg24[%76, %c0_29, %c0_30] : memref<8x8x512xf32, #tpu.memory_space<vmem>>, vector<1x8x512xf32>
    %78 = vector.shape_cast %77 : vector<1x8x512xf32> to vector<8x512xf32>
    %cst_31 = arith.constant dense<0.000000e+00> : vector<8x512xf32>
    %79 = tpu.matmul %75, %13, %cst_31 {dimension_numbers = #tpu.dot_dimension_numbers<[1], [0], [0], [1], [0, 0, 1, 1], [], []>} : vector<8x128xf32>, vector<128x512xf32>, vector<8x512xf32> -> vector<8x512xf32>
    %80 = arith.addf %78, %79 : vector<8x512xf32>
    %81 = vector.extract_strided_slice %80 {offsets = [0, 0], sizes = [8, 128], strides = [1, 1]} : vector<8x512xf32> to vector<8x128xf32>
    %82 = arith.negf %81 : vector<8x128xf32>
    %83 = math.exp %82 : vector<8x128xf32>
    %cst_32 = arith.constant 1.000000e+00 : f32
    %84 = vector.broadcast %cst_32 : f32 to vector<8x128xf32>
    %85 = arith.addf %84, %83 : vector<8x128xf32>
    %86 = arith.divf %84, %85 : vector<8x128xf32>
    %87 = vector.extract_strided_slice %80 {offsets = [0, 128], sizes = [8, 128], strides = [1, 1]} : vector<8x512xf32> to vector<8x128xf32>
    %88 = arith.negf %87 : vector<8x128xf32>
    %89 = math.exp %88 : vector<8x128xf32>
    %cst_33 = arith.constant 1.000000e+00 : f32
    %90 = vector.broadcast %cst_33 : f32 to vector<8x128xf32>
    %91 = arith.addf %90, %89 : vector<8x128xf32>
    %92 = arith.divf %90, %91 : vector<8x128xf32>
    %93 = vector.extract_strided_slice %80 {offsets = [0, 256], sizes = [8, 128], strides = [1, 1]} : vector<8x512xf32> to vector<8x128xf32>
    %94 = math.tanh %93 : vector<8x128xf32>
    %95 = vector.extract_strided_slice %80 {offsets = [0, 384], sizes = [8, 128], strides = [1, 1]} : vector<8x512xf32> to vector<8x128xf32>
    %96 = arith.negf %95 : vector<8x128xf32>
    %97 = math.exp %96 : vector<8x128xf32>
    %cst_34 = arith.constant 1.000000e+00 : f32
    %98 = vector.broadcast %cst_34 : f32 to vector<8x128xf32>
    %99 = arith.addf %98, %97 : vector<8x128xf32>
    %100 = arith.divf %98, %99 : vector<8x128xf32>
    %101 = arith.mulf %92, %73 : vector<8x128xf32>
    %102 = arith.mulf %86, %94 : vector<8x128xf32>
    %103 = arith.addf %101, %102 : vector<8x128xf32>
    %104 = math.tanh %103 : vector<8x128xf32>
    %105 = arith.mulf %100, %104 : vector<8x128xf32>
    %c3_i32 = arith.constant 3 : i32
    %106 = arith.index_cast %c3_i32 : i32 to index
    %c0_35 = arith.constant 0 : index
    %c0_36 = arith.constant 0 : index
    %107 = vector.load %arg24[%106, %c0_35, %c0_36] : memref<8x8x512xf32, #tpu.memory_space<vmem>>, vector<1x8x512xf32>
    %108 = vector.shape_cast %107 : vector<1x8x512xf32> to vector<8x512xf32>
    %cst_37 = arith.constant dense<0.000000e+00> : vector<8x512xf32>
    %109 = tpu.matmul %105, %13, %cst_37 {dimension_numbers = #tpu.dot_dimension_numbers<[1], [0], [0], [1], [0, 0, 1, 1], [], []>} : vector<8x128xf32>, vector<128x512xf32>, vector<8x512xf32> -> vector<8x512xf32>
    %110 = arith.addf %108, %109 : vector<8x512xf32>
    %111 = vector.extract_strided_slice %110 {offsets = [0, 0], sizes = [8, 128], strides = [1, 1]} : vector<8x512xf32> to vector<8x128xf32>
    %112 = arith.negf %111 : vector<8x128xf32>
    %113 = math.exp %112 : vector<8x128xf32>
    %cst_38 = arith.constant 1.000000e+00 : f32
    %114 = vector.broadcast %cst_38 : f32 to vector<8x128xf32>
    %115 = arith.addf %114, %113 : vector<8x128xf32>
    %116 = arith.divf %114, %115 : vector<8x128xf32>
    %117 = vector.extract_strided_slice %110 {offsets = [0, 128], sizes = [8, 128], strides = [1, 1]} : vector<8x512xf32> to vector<8x128xf32>
    %118 = arith.negf %117 : vector<8x128xf32>
    %119 = math.exp %118 : vector<8x128xf32>
    %cst_39 = arith.constant 1.000000e+00 : f32
    %120 = vector.broadcast %cst_39 : f32 to vector<8x128xf32>
    %121 = arith.addf %120, %119 : vector<8x128xf32>
    %122 = arith.divf %120, %121 : vector<8x128xf32>
    %123 = vector.extract_strided_slice %110 {offsets = [0, 256], sizes = [8, 128], strides = [1, 1]} : vector<8x512xf32> to vector<8x128xf32>
    %124 = math.tanh %123 : vector<8x128xf32>
    %125 = vector.extract_strided_slice %110 {offsets = [0, 384], sizes = [8, 128], strides = [1, 1]} : vector<8x512xf32> to vector<8x128xf32>
    %126 = arith.negf %125 : vector<8x128xf32>
    %127 = math.exp %126 : vector<8x128xf32>
    %cst_40 = arith.constant 1.000000e+00 : f32
    %128 = vector.broadcast %cst_40 : f32 to vector<8x128xf32>
    %129 = arith.addf %128, %127 : vector<8x128xf32>
    %130 = arith.divf %128, %129 : vector<8x128xf32>
    %131 = arith.mulf %122, %103 : vector<8x128xf32>
    %132 = arith.mulf %116, %124 : vector<8x128xf32>
    %133 = arith.addf %131, %132 : vector<8x128xf32>
    %134 = math.tanh %133 : vector<8x128xf32>
    %135 = arith.mulf %130, %134 : vector<8x128xf32>
    %c4_i32 = arith.constant 4 : i32
    %136 = arith.index_cast %c4_i32 : i32 to index
    %c0_41 = arith.constant 0 : index
    %c0_42 = arith.constant 0 : index
    %137 = vector.load %arg24[%136, %c0_41, %c0_42] : memref<8x8x512xf32, #tpu.memory_space<vmem>>, vector<1x8x512xf32>
    %138 = vector.shape_cast %137 : vector<1x8x512xf32> to vector<8x512xf32>
    %cst_43 = arith.constant dense<0.000000e+00> : vector<8x512xf32>
    %139 = tpu.matmul %135, %13, %cst_43 {dimension_numbers = #tpu.dot_dimension_numbers<[1], [0], [0], [1], [0, 0, 1, 1], [], []>} : vector<8x128xf32>, vector<128x512xf32>, vector<8x512xf32> -> vector<8x512xf32>
    %140 = arith.addf %138, %139 : vector<8x512xf32>
    %141 = vector.extract_strided_slice %140 {offsets = [0, 0], sizes = [8, 128], strides = [1, 1]} : vector<8x512xf32> to vector<8x128xf32>
    %142 = arith.negf %141 : vector<8x128xf32>
    %143 = math.exp %142 : vector<8x128xf32>
    %cst_44 = arith.constant 1.000000e+00 : f32
    %144 = vector.broadcast %cst_44 : f32 to vector<8x128xf32>
    %145 = arith.addf %144, %143 : vector<8x128xf32>
    %146 = arith.divf %144, %145 : vector<8x128xf32>
    %147 = vector.extract_strided_slice %140 {offsets = [0, 128], sizes = [8, 128], strides = [1, 1]} : vector<8x512xf32> to vector<8x128xf32>
    %148 = arith.negf %147 : vector<8x128xf32>
    %149 = math.exp %148 : vector<8x128xf32>
    %cst_45 = arith.constant 1.000000e+00 : f32
    %150 = vector.broadcast %cst_45 : f32 to vector<8x128xf32>
    %151 = arith.addf %150, %149 : vector<8x128xf32>
    %152 = arith.divf %150, %151 : vector<8x128xf32>
    %153 = vector.extract_strided_slice %140 {offsets = [0, 256], sizes = [8, 128], strides = [1, 1]} : vector<8x512xf32> to vector<8x128xf32>
    %154 = math.tanh %153 : vector<8x128xf32>
    %155 = vector.extract_strided_slice %140 {offsets = [0, 384], sizes = [8, 128], strides = [1, 1]} : vector<8x512xf32> to vector<8x128xf32>
    %156 = arith.negf %155 : vector<8x128xf32>
    %157 = math.exp %156 : vector<8x128xf32>
    %cst_46 = arith.constant 1.000000e+00 : f32
    %158 = vector.broadcast %cst_46 : f32 to vector<8x128xf32>
    %159 = arith.addf %158, %157 : vector<8x128xf32>
    %160 = arith.divf %158, %159 : vector<8x128xf32>
    %161 = arith.mulf %152, %133 : vector<8x128xf32>
    %162 = arith.mulf %146, %154 : vector<8x128xf32>
    %163 = arith.addf %161, %162 : vector<8x128xf32>
    %164 = math.tanh %163 : vector<8x128xf32>
    %165 = arith.mulf %160, %164 : vector<8x128xf32>
    %c5_i32 = arith.constant 5 : i32
    %166 = arith.index_cast %c5_i32 : i32 to index
    %c0_47 = arith.constant 0 : index
    %c0_48 = arith.constant 0 : index
    %167 = vector.load %arg24[%166, %c0_47, %c0_48] : memref<8x8x512xf32, #tpu.memory_space<vmem>>, vector<1x8x512xf32>
    %168 = vector.shape_cast %167 : vector<1x8x512xf32> to vector<8x512xf32>
    %cst_49 = arith.constant dense<0.000000e+00> : vector<8x512xf32>
    %169 = tpu.matmul %165, %13, %cst_49 {dimension_numbers = #tpu.dot_dimension_numbers<[1], [0], [0], [1], [0, 0, 1, 1], [], []>} : vector<8x128xf32>, vector<128x512xf32>, vector<8x512xf32> -> vector<8x512xf32>
    %170 = arith.addf %168, %169 : vector<8x512xf32>
    %171 = vector.extract_strided_slice %170 {offsets = [0, 0], sizes = [8, 128], strides = [1, 1]} : vector<8x512xf32> to vector<8x128xf32>
    %172 = arith.negf %171 : vector<8x128xf32>
    %173 = math.exp %172 : vector<8x128xf32>
    %cst_50 = arith.constant 1.000000e+00 : f32
    %174 = vector.broadcast %cst_50 : f32 to vector<8x128xf32>
    %175 = arith.addf %174, %173 : vector<8x128xf32>
    %176 = arith.divf %174, %175 : vector<8x128xf32>
    %177 = vector.extract_strided_slice %170 {offsets = [0, 128], sizes = [8, 128], strides = [1, 1]} : vector<8x512xf32> to vector<8x128xf32>
    %178 = arith.negf %177 : vector<8x128xf32>
    %179 = math.exp %178 : vector<8x128xf32>
    %cst_51 = arith.constant 1.000000e+00 : f32
    %180 = vector.broadcast %cst_51 : f32 to vector<8x128xf32>
    %181 = arith.addf %180, %179 : vector<8x128xf32>
    %182 = arith.divf %180, %181 : vector<8x128xf32>
    %183 = vector.extract_strided_slice %170 {offsets = [0, 256], sizes = [8, 128], strides = [1, 1]} : vector<8x512xf32> to vector<8x128xf32>
    %184 = math.tanh %183 : vector<8x128xf32>
    %185 = vector.extract_strided_slice %170 {offsets = [0, 384], sizes = [8, 128], strides = [1, 1]} : vector<8x512xf32> to vector<8x128xf32>
    %186 = arith.negf %185 : vector<8x128xf32>
    %187 = math.exp %186 : vector<8x128xf32>
    %cst_52 = arith.constant 1.000000e+00 : f32
    %188 = vector.broadcast %cst_52 : f32 to vector<8x128xf32>
    %189 = arith.addf %188, %187 : vector<8x128xf32>
    %190 = arith.divf %188, %189 : vector<8x128xf32>
    %191 = arith.mulf %182, %163 : vector<8x128xf32>
    %192 = arith.mulf %176, %184 : vector<8x128xf32>
    %193 = arith.addf %191, %192 : vector<8x128xf32>
    %194 = math.tanh %193 : vector<8x128xf32>
    %195 = arith.mulf %190, %194 : vector<8x128xf32>
    %c6_i32 = arith.constant 6 : i32
    %196 = arith.index_cast %c6_i32 : i32 to index
    %c0_53 = arith.constant 0 : index
    %c0_54 = arith.constant 0 : index
    %197 = vector.load %arg24[%196, %c0_53, %c0_54] : memref<8x8x512xf32, #tpu.memory_space<vmem>>, vector<1x8x512xf32>
    %198 = vector.shape_cast %197 : vector<1x8x512xf32> to vector<8x512xf32>
    %cst_55 = arith.constant dense<0.000000e+00> : vector<8x512xf32>
    %199 = tpu.matmul %195, %13, %cst_55 {dimension_numbers = #tpu.dot_dimension_numbers<[1], [0], [0], [1], [0, 0, 1, 1], [], []>} : vector<8x128xf32>, vector<128x512xf32>, vector<8x512xf32> -> vector<8x512xf32>
    %200 = arith.addf %198, %199 : vector<8x512xf32>
    %201 = vector.extract_strided_slice %200 {offsets = [0, 0], sizes = [8, 128], strides = [1, 1]} : vector<8x512xf32> to vector<8x128xf32>
    %202 = arith.negf %201 : vector<8x128xf32>
    %203 = math.exp %202 : vector<8x128xf32>
    %cst_56 = arith.constant 1.000000e+00 : f32
    %204 = vector.broadcast %cst_56 : f32 to vector<8x128xf32>
    %205 = arith.addf %204, %203 : vector<8x128xf32>
    %206 = arith.divf %204, %205 : vector<8x128xf32>
    %207 = vector.extract_strided_slice %200 {offsets = [0, 128], sizes = [8, 128], strides = [1, 1]} : vector<8x512xf32> to vector<8x128xf32>
    %208 = arith.negf %207 : vector<8x128xf32>
    %209 = math.exp %208 : vector<8x128xf32>
    %cst_57 = arith.constant 1.000000e+00 : f32
    %210 = vector.broadcast %cst_57 : f32 to vector<8x128xf32>
    %211 = arith.addf %210, %209 : vector<8x128xf32>
    %212 = arith.divf %210, %211 : vector<8x128xf32>
    %213 = vector.extract_strided_slice %200 {offsets = [0, 256], sizes = [8, 128], strides = [1, 1]} : vector<8x512xf32> to vector<8x128xf32>
    %214 = math.tanh %213 : vector<8x128xf32>
    %215 = vector.extract_strided_slice %200 {offsets = [0, 384], sizes = [8, 128], strides = [1, 1]} : vector<8x512xf32> to vector<8x128xf32>
    %216 = arith.negf %215 : vector<8x128xf32>
    %217 = math.exp %216 : vector<8x128xf32>
    %cst_58 = arith.constant 1.000000e+00 : f32
    %218 = vector.broadcast %cst_58 : f32 to vector<8x128xf32>
    %219 = arith.addf %218, %217 : vector<8x128xf32>
    %220 = arith.divf %218, %219 : vector<8x128xf32>
    %221 = arith.mulf %212, %193 : vector<8x128xf32>
    %222 = arith.mulf %206, %214 : vector<8x128xf32>
    %223 = arith.addf %221, %222 : vector<8x128xf32>
    %224 = math.tanh %223 : vector<8x128xf32>
    %225 = arith.mulf %220, %224 : vector<8x128xf32>
    %c7_i32 = arith.constant 7 : i32
    %226 = arith.index_cast %c7_i32 : i32 to index
    %c0_59 = arith.constant 0 : index
    %c0_60 = arith.constant 0 : index
    %227 = vector.load %arg24[%226, %c0_59, %c0_60] : memref<8x8x512xf32, #tpu.memory_space<vmem>>, vector<1x8x512xf32>
    %228 = vector.shape_cast %227 : vector<1x8x512xf32> to vector<8x512xf32>
    %cst_61 = arith.constant dense<0.000000e+00> : vector<8x512xf32>
    %229 = tpu.matmul %225, %13, %cst_61 {dimension_numbers = #tpu.dot_dimension_numbers<[1], [0], [0], [1], [0, 0, 1, 1], [], []>} : vector<8x128xf32>, vector<128x512xf32>, vector<8x512xf32> -> vector<8x512xf32>
    %230 = arith.addf %228, %229 : vector<8x512xf32>
    %231 = vector.extract_strided_slice %230 {offsets = [0, 0], sizes = [8, 128], strides = [1, 1]} : vector<8x512xf32> to vector<8x128xf32>
    %232 = arith.negf %231 : vector<8x128xf32>
    %233 = math.exp %232 : vector<8x128xf32>
    %cst_62 = arith.constant 1.000000e+00 : f32
    %234 = vector.broadcast %cst_62 : f32 to vector<8x128xf32>
    %235 = arith.addf %234, %233 : vector<8x128xf32>
    %236 = arith.divf %234, %235 : vector<8x128xf32>
    %237 = vector.extract_strided_slice %230 {offsets = [0, 128], sizes = [8, 128], strides = [1, 1]} : vector<8x512xf32> to vector<8x128xf32>
    %238 = arith.negf %237 : vector<8x128xf32>
    %239 = math.exp %238 : vector<8x128xf32>
    %cst_63 = arith.constant 1.000000e+00 : f32
    %240 = vector.broadcast %cst_63 : f32 to vector<8x128xf32>
    %241 = arith.addf %240, %239 : vector<8x128xf32>
    %242 = arith.divf %240, %241 : vector<8x128xf32>
    %243 = vector.extract_strided_slice %230 {offsets = [0, 256], sizes = [8, 128], strides = [1, 1]} : vector<8x512xf32> to vector<8x128xf32>
    %244 = math.tanh %243 : vector<8x128xf32>
    %245 = vector.extract_strided_slice %230 {offsets = [0, 384], sizes = [8, 128], strides = [1, 1]} : vector<8x512xf32> to vector<8x128xf32>
    %246 = arith.negf %245 : vector<8x128xf32>
    %247 = math.exp %246 : vector<8x128xf32>
    %cst_64 = arith.constant 1.000000e+00 : f32
    %248 = vector.broadcast %cst_64 : f32 to vector<8x128xf32>
    %249 = arith.addf %248, %247 : vector<8x128xf32>
    %250 = arith.divf %248, %249 : vector<8x128xf32>
    %251 = arith.mulf %242, %223 : vector<8x128xf32>
    %252 = arith.mulf %236, %244 : vector<8x128xf32>
    %253 = arith.addf %251, %252 : vector<8x128xf32>
    %254 = math.tanh %253 : vector<8x128xf32>
    %255 = arith.mulf %250, %254 : vector<8x128xf32>
    %c8_i32 = arith.constant 8 : i32
    %c0_65 = arith.constant 0 : index
    %c0_66 = arith.constant 0 : index
    %256 = vector.load %arg21[%c0_65, %c0_66] : memref<8x128xf32, #tpu.memory_space<vmem>>, vector<8x128xf32>
    tpu.vector_store %arg21[%c0_65, %c0_66], %255 {strides = array<i32>} : memref<8x128xf32, #tpu.memory_space<vmem>>, vector<8x128xf32>,
    %c0_67 = arith.constant 0 : index
    %c0_68 = arith.constant 0 : index
    %257 = vector.load %arg22[%c0_67, %c0_68] : memref<8x128xf32, #tpu.memory_space<vmem>>, vector<8x128xf32>
    tpu.vector_store %arg22[%c0_67, %c0_68], %253 {strides = array<i32>} : memref<8x128xf32, #tpu.memory_space<vmem>>, vector<8x128xf32>,
    %c0_i32_69 = arith.constant 0 : i32
    %258 = arith.cmpi eq, %arg1, %c0_i32_69 : i32
    %259 = arith.extui %258 : i1 to i32
    %c0_i32_70 = arith.constant 0 : i32
    %260 = arith.cmpi ne, %259, %c0_i32_70 : i32
    scf.if %260 {
      %c0_71 = arith.constant 0 : index
      %c0_72 = arith.constant 0 : index
      %261 = vector.load %arg7[%c0_71, %c0_72] : memref<128x512xf32, #tpu.memory_space<vmem>>, vector<128x512xf32>
      %cst_73 = arith.constant dense<0.000000e+00> : vector<8x512xf32>
      %262 = tpu.matmul %255, %261, %cst_73 {dimension_numbers = #tpu.dot_dimension_numbers<[1], [0], [0], [1], [0, 0, 1, 1], [], []>} : vector<8x128xf32>, vector<128x512xf32>, vector<8x512xf32> -> vector<8x512xf32>
      %c0_74 = arith.constant 0 : index
      %c0_75 = arith.constant 0 : index
      %263 = vector.load %arg23[%c0_74, %c0_75] : memref<8x512xf32, #tpu.memory_space<vmem>>, vector<8x512xf32>
      %264 = arith.addf %262, %263 : vector<8x512xf32>
      %cst_76 = arith.constant 0.000000e+00 : f32
      %265 = vector.broadcast %cst_76 : f32 to vector<8x512xf32>
      %266 = arith.maximumf %264, %265 : vector<8x512xf32>
      %c0_77 = arith.constant 0 : index
      %c0_78 = arith.constant 0 : index
      %267 = vector.load %arg10[%c0_77, %c0_78] : memref<512x512xf32, #tpu.memory_space<vmem>>, vector<512x512xf32>
      %cst_79 = arith.constant dense<0.000000e+00> : vector<8x512xf32>
      %268 = tpu.matmul %266, %267, %cst_79 {dimension_numbers = #tpu.dot_dimension_numbers<[1], [0], [0], [1], [0, 0, 1, 1], [], []>} : vector<8x512xf32>, vector<512x512xf32>, vector<8x512xf32> -> vector<8x512xf32>
      %c0_80 = arith.constant 0 : index
      %c0_81 = arith.constant 0 : index
      %269 = vector.load %arg11[%c0_80, %c0_81] : memref<1x512xf32, #tpu.memory_space<vmem>>, vector<1x512xf32>
      %270 = vector.broadcast %269 : vector<1x512xf32> to vector<8x512xf32>
      %271 = arith.addf %268, %270 : vector<8x512xf32>
      %cst_82 = arith.constant 0.000000e+00 : f32
      %272 = vector.broadcast %cst_82 : f32 to vector<8x512xf32>
      %273 = arith.maximumf %271, %272 : vector<8x512xf32>
      %c0_83 = arith.constant 0 : index
      %c0_84 = arith.constant 0 : index
      %274 = vector.load %arg12[%c0_83, %c0_84] : memref<512x512xf32, #tpu.memory_space<vmem>>, vector<512x512xf32>
      %cst_85 = arith.constant dense<0.000000e+00> : vector<8x512xf32>
      %275 = tpu.matmul %273, %274, %cst_85 {dimension_numbers = #tpu.dot_dimension_numbers<[1], [0], [0], [1], [0, 0, 1, 1], [], []>} : vector<8x512xf32>, vector<512x512xf32>, vector<8x512xf32> -> vector<8x512xf32>
      %c0_86 = arith.constant 0 : index
      %c0_87 = arith.constant 0 : index
      %276 = vector.load %arg13[%c0_86, %c0_87] : memref<1x512xf32, #tpu.memory_space<vmem>>, vector<1x512xf32>
      %277 = vector.broadcast %276 : vector<1x512xf32> to vector<8x512xf32>
      %278 = arith.addf %275, %277 : vector<8x512xf32>
      %cst_88 = arith.constant 0.000000e+00 : f32
      %279 = vector.broadcast %cst_88 : f32 to vector<8x512xf32>
      %280 = arith.maximumf %278, %279 : vector<8x512xf32>
      %c0_89 = arith.constant 0 : index
      %c0_90 = arith.constant 0 : index
      %281 = vector.load %arg14[%c0_89, %c0_90] : memref<512x512xf32, #tpu.memory_space<vmem>>, vector<512x512xf32>
      %cst_91 = arith.constant dense<0.000000e+00> : vector<8x512xf32>
      %282 = tpu.matmul %280, %281, %cst_91 {dimension_numbers = #tpu.dot_dimension_numbers<[1], [0], [0], [1], [0, 0, 1, 1], [], []>} : vector<8x512xf32>, vector<512x512xf32>, vector<8x512xf32> -> vector<8x512xf32>
      %c0_92 = arith.constant 0 : index
      %c0_93 = arith.constant 0 : index
      %283 = vector.load %arg15[%c0_92, %c0_93] : memref<1x512xf32, #tpu.memory_space<vmem>>, vector<1x512xf32>
      %284 = vector.broadcast %283 : vector<1x512xf32> to vector<8x512xf32>
      %285 = arith.addf %282, %284 : vector<8x512xf32>
      %cst_94 = arith.constant 0.000000e+00 : f32
      %286 = vector.broadcast %cst_94 : f32 to vector<8x512xf32>
      %287 = arith.maximumf %285, %286 : vector<8x512xf32>
      %c0_95 = arith.constant 0 : index
      %c0_96 = arith.constant 0 : index
      %288 = vector.load %arg16[%c0_95, %c0_96] : memref<512x512xf32, #tpu.memory_space<vmem>>, vector<512x512xf32>
      %cst_97 = arith.constant dense<0.000000e+00> : vector<8x512xf32>
      %289 = tpu.matmul %287, %288, %cst_97 {dimension_numbers = #tpu.dot_dimension_numbers<[1], [0], [0], [1], [0, 0, 1, 1], [], []>} : vector<8x512xf32>, vector<512x512xf32>, vector<8x512xf32> -> vector<8x512xf32>
      %c0_98 = arith.constant 0 : index
      %c0_99 = arith.constant 0 : index
      %290 = vector.load %arg17[%c0_98, %c0_99] : memref<1x512xf32, #tpu.memory_space<vmem>>, vector<1x512xf32>
      %291 = vector.broadcast %290 : vector<1x512xf32> to vector<8x512xf32>
      %292 = arith.addf %289, %291 : vector<8x512xf32>
      %cst_100 = arith.constant 0.000000e+00 : f32
      %293 = vector.broadcast %cst_100 : f32 to vector<8x512xf32>
      %294 = arith.maximumf %292, %293 : vector<8x512xf32>
      %c0_101 = arith.constant 0 : index
      %c0_102 = arith.constant 0 : index
      %295 = vector.load %arg18[%c0_101, %c0_102] : memref<1x512xf32, #tpu.memory_space<vmem>>, vector<1x512xf32>
      %296 = vector.broadcast %295 : vector<1x512xf32> to vector<8x512xf32>
      %297 = arith.mulf %294, %296 : vector<8x512xf32>
      %cst_103 = arith.constant dense<0.000000e+00> : vector<8xf32>
      %298 = vector.multi_reduction <add>, %297, %cst_103 [1] : vector<8x512xf32> to vector<8xf32>
      %299 = vector.shape_cast %298 : vector<8xf32> to vector<8x1xf32>
      %c0_104 = arith.constant 0 : index
      %c0_105 = arith.constant 0 : index
      %300 = vector.load %arg19[%c0_104, %c0_105] : memref<1x1xf32, #tpu.memory_space<vmem>>, vector<1x1xf32>
      %301 = vector.broadcast %300 : vector<1x1xf32> to vector<8x1xf32>
      %302 = arith.addf %299, %301 : vector<8x1xf32>
      %c0_106 = arith.constant 0 : index
      %c0_107 = arith.constant 0 : index
      %303 = vector.load %arg20[%c0_106, %c0_107] : memref<8x1xf32, #tpu.memory_space<vmem>>, vector<8x1xf32>
      tpu.vector_store %arg20[%c0_106, %c0_107], %302 {strides = array<i32>} : memref<8x1xf32, #tpu.memory_space<vmem>>, vector<8x1xf32>,
    } else {
    }
    return
  }
  func.func @transform_0(%arg0: i32, %arg1: i32) -> (i32, i32, i32) {
    %c0_i32 = arith.constant 0 : i32
    %c0_i32_0 = arith.constant 0 : i32
    return %arg1, %arg0, %c0_i32 : i32, i32, i32
  }
  func.func @transform_1(%arg0: i32, %arg1: i32) -> (i32, i32) {
    %c0_i32 = arith.constant 0 : i32
    %c0_i32_0 = arith.constant 0 : i32
    return %arg0, %c0_i32 : i32, i32
  }
  func.func @transform_2(%arg0: i32, %arg1: i32) -> (i32, i32) {
    %c0_i32 = arith.constant 0 : i32
    %c0_i32_0 = arith.constant 0 : i32
    %c0_i32_1 = arith.constant 0 : i32
    return %c0_i32, %c0_i32_0 : i32, i32
  }
  func.func @transform_3(%arg0: i32, %arg1: i32) -> (i32, i32) {
    %c0_i32 = arith.constant 0 : i32
    %c0_i32_0 = arith.constant 0 : i32
    %c0_i32_1 = arith.constant 0 : i32
    return %c0_i32, %c0_i32_0 : i32, i32
  }
  func.func @transform_4(%arg0: i32, %arg1: i32) -> (i32, i32) {
    %c0_i32 = arith.constant 0 : i32
    %c0_i32_0 = arith.constant 0 : i32
    %c0_i32_1 = arith.constant 0 : i32
    return %c0_i32, %c0_i32_0 : i32, i32
  }
  func.func @transform_5(%arg0: i32, %arg1: i32) -> (i32, i32) {
    %c0_i32 = arith.constant 0 : i32
    %c0_i32_0 = arith.constant 0 : i32
    %c0_i32_1 = arith.constant 0 : i32
    return %c0_i32, %c0_i32_0 : i32, i32
  }
  func.func @transform_6(%arg0: i32, %arg1: i32) -> (i32, i32) {
    %c0_i32 = arith.constant 0 : i32
    %c0_i32_0 = arith.constant 0 : i32
    %c0_i32_1 = arith.constant 0 : i32
    return %c0_i32, %c0_i32_0 : i32, i32
  }
  func.func @transform_7(%arg0: i32, %arg1: i32) -> (i32, i32) {
    %c0_i32 = arith.constant 0 : i32
    %c0_i32_0 = arith.constant 0 : i32
    %c0_i32_1 = arith.constant 0 : i32
    return %c0_i32, %c0_i32_0 : i32, i32
  }
  func.func @transform_8(%arg0: i32, %arg1: i32) -> (i32, i32) {
    %c0_i32 = arith.constant 0 : i32
    %c0_i32_0 = arith.constant 0 : i32
    %c0_i32_1 = arith.constant 0 : i32
    return %c0_i32, %c0_i32_0 : i32, i32
  }
  func.func @transform_9(%arg0: i32, %arg1: i32) -> (i32, i32) {
    %c0_i32 = arith.constant 0 : i32
    %c0_i32_0 = arith.constant 0 : i32
    %c0_i32_1 = arith.constant 0 : i32
    return %c0_i32, %c0_i32_0 : i32, i32
  }
  func.func @transform_10(%arg0: i32, %arg1: i32) -> (i32, i32) {
    %c0_i32 = arith.constant 0 : i32
    %c0_i32_0 = arith.constant 0 : i32
    %c0_i32_1 = arith.constant 0 : i32
    return %c0_i32, %c0_i32_0 : i32, i32
  }
  func.func @transform_11(%arg0: i32, %arg1: i32) -> (i32, i32) {
    %c0_i32 = arith.constant 0 : i32
    %c0_i32_0 = arith.constant 0 : i32
    %c0_i32_1 = arith.constant 0 : i32
    return %c0_i32, %c0_i32_0 : i32, i32
  }
  func.func @transform_12(%arg0: i32, %arg1: i32) -> (i32, i32) {
    %c0_i32 = arith.constant 0 : i32
    %c0_i32_0 = arith.constant 0 : i32
    %c0_i32_1 = arith.constant 0 : i32
    return %c0_i32, %c0_i32_0 : i32, i32
  }
  func.func @transform_13(%arg0: i32, %arg1: i32) -> (i32, i32) {
    %c0_i32 = arith.constant 0 : i32
    %c0_i32_0 = arith.constant 0 : i32
    %c0_i32_1 = arith.constant 0 : i32
    return %c0_i32, %c0_i32_0 : i32, i32
  }
  func.func @transform_14(%arg0: i32, %arg1: i32) -> (i32, i32) {
    %c0_i32 = arith.constant 0 : i32
    %c0_i32_0 = arith.constant 0 : i32
    %c0_i32_1 = arith.constant 0 : i32
    return %c0_i32, %c0_i32_0 : i32, i32
  }
  func.func @transform_15(%arg0: i32, %arg1: i32) -> (i32, i32) {
    %c0_i32 = arith.constant 0 : i32
    %c0_i32_0 = arith.constant 0 : i32
    %c0_i32_1 = arith.constant 0 : i32
    return %c0_i32, %c0_i32_0 : i32, i32
  }
  func.func @transform_16(%arg0: i32, %arg1: i32) -> (i32, i32) {
    %c0_i32 = arith.constant 0 : i32
    %c0_i32_0 = arith.constant 0 : i32
    %c0_i32_1 = arith.constant 0 : i32
    return %c0_i32, %c0_i32_0 : i32, i32
  }
  func.func @transform_17(%arg0: i32, %arg1: i32) -> (i32, i32) {
    %c0_i32 = arith.constant 0 : i32
    %c0_i32_0 = arith.constant 0 : i32
    %c0_i32_1 = arith.constant 0 : i32
    return %c0_i32, %c0_i32_0 : i32, i32
  }
  func.func @transform_18(%arg0: i32, %arg1: i32) -> (i32, i32) {
    %c0_i32 = arith.constant 0 : i32
    %c0_i32_0 = arith.constant 0 : i32
    return %arg0, %c0_i32 : i32, i32
  }
}

</mosaic_0001>

<bundles_post_ra>
// kernel: landlord_lstm_forward.1
= control target key start
LH: loop header
LB: loop body
LE: loop exit
PB: predicated region body
PF: predicated region fallthrough
CT: control target
= control target key end

     0   :  { %vm284_vm0 = vcmask 1044480   ;;  %vm280_vm1 = vcmask 957440   ;;  %vm685_vm2 = vcmask 277504   ;;  %vm710_vm3 = vcmask 1041408   ;;  %s12140_s6 = inlined_call_operand.vmem [shape: f32[373,512], index: 6, kind: input, shape index: {}]   ;;  %s12141_s1 = inlined_call_operand.vmem [shape: f32[8,373], index: 1, kind: input, shape index: {}]   ;;  %s12142_s2 = inlined_call_operand.vmem [shape: f32[162,512], index: 2, kind: input, shape index: {}]   ;;  %s12143_s0 = inlined_call_operand.vmem [shape: f32[8,8,162], index: 0, kind: input, shape index: {}]   ;;  %s12144_s3 = inlined_call_operand.vmem [shape: f32[128,512], index: 3, kind: input, shape index: {}]   ;;  %s12145_s4 = inlined_call_operand.vmem [shape: f32[1,512], index: 4, kind: input, shape index: {}]   ;;  %s12146_s5 = inlined_call_operand.vmem [shape: f32[128,512], index: 5, kind: input, shape index: {}]   ;;  %s12147_s8 = inlined_call_operand.vmem [shape: f32[512,512], index: 8, kind: input, shape index: {}]   ;;  %s12148_s7 = inlined_call_operand.vmem [shape: f32[1,512], index: 7, kind: input, shape index: {}]   ;;  %s12149_s10 = inlined_call_operand.vmem [shape: f32[512,512], index: 10, kind: input, shape index: {}]   ;;  %s12150_s9 = inlined_call_operand.vmem [shape: f32[1,512], index: 9, kind: input, shape index: {}]   ;;  %s12151_s12 = inlined_call_operand.vmem [shape: f32[512,512], index: 12, kind: input, shape index: {}]   ;;  %s12152_s11 = inlined_call_operand.vmem [shape: f32[1,512], index: 11, kind: input, shape index: {}]   ;;  %s12153_s14 = inlined_call_operand.vmem [shape: f32[512,512], index: 14, kind: input, shape index: {}]   ;;  %s12154_s13 = inlined_call_operand.vmem [shape: f32[1,512], index: 13, kind: input, shape index: {}]   ;;  %s12155_s17 = inlined_call_operand.<no memory space> [shape: f32[1,1], index: 17, kind: input, shape index: {}]   ;;  %s12156_s15 = inlined_call_operand.vmem [shape: f32[1,512], index: 15, kind: input, shape index: {}]   ;;  %s12157_s16 = inlined_call_operand.vmem [shape: f32[1,512], index: 16, kind: input, shape index: {}]   ;;  %s12158_s18 = inlined_call_operand.vmem [shape: f32[8,1], index: 18, kind: output, shape index: {}]  }
   0x1   :  { %12162 = sst [smem:[#allocation7_spill]] %s12140_s6  ;;  %vm5022_vm4 = vcmask 7168  }
   0x2   :  { %12163 = sst [smem:[#allocation8_spill]] %s12141_s1  ;;  %s12165_s29 = sld [smem:[#allocation7_spill]] }
   0x3   :  { %12164 = sst [smem:[#allocation9_spill]] %s12142_s2  ;;  %s12166_s30 = sld [smem:[#allocation8_spill]] }
   0x4   :  { %s12167_s27 = sld [smem:[#allocation9_spill]] }
   0x8   :  { %v71_v0 = vld [vmem:[%s12165_s29 + $0x8] sm:$0xff]  ;;  %v73_v2 = vld [vmem:[%s12165_s29 + $0x18] sm:$0xff]  ;;  %v70_v5 = vld [vmem:[%s12165_s29] sm:$0xff] }
   0x9   :  { %v75_v1 = vld [vmem:[%s12165_s29 + $0x28] sm:$0xff]  ;;  %v77_v4 = vld [vmem:[%s12165_s29 + $0x38] sm:$0xff]  ;;  %v74_v6 = vld [vmem:[%s12165_s29 + $0x20] sm:$0xff] }
   0xa   :  { %v5079_v3 = vpack.c.bf16 %v75_v1, %v71_v0  ;;  %v5171_v7 = vpack.c.bf16 %v77_v4, %v73_v2  ;;  %v5081_v8 = vpack.c.bf16 %v74_v6, %v70_v5  ;;  %v72_v9 = vld [vmem:[%s12165_s29 + $0x10] sm:$0xff]  ;;  %v79_v11 = vld [vmem:[%s12165_s29 + $0x48] sm:$0xff]  ;;  %v81_v14 = vld [vmem:[%s12165_s29 + $0x58] sm:$0xff] }
   0xb   :  { %v76_v10 = vld [vmem:[%s12165_s29 + $0x30] sm:$0xff]  ;;  %v83_v13 = vld [vmem:[%s12165_s29 + $0x68] sm:$0xff]  ;;  %v85_v15 = vld [vmem:[%s12165_s29 + $0x78] sm:$0xff] }
   0xc   :  { %5080 = vmatprep.subr.bf16.mxu0 %v5079_v3  ;;  %v5173_v12 = vpack.c.bf16 %v76_v10, %v72_v9  ;;  %5172 = vmatprep.subr.bf16.mxu1 %v5171_v7  ;;  %v5083_v16 = vpack.c.bf16 %v83_v13, %v79_v11  ;;  %v5175_v17 = vpack.c.bf16 %v85_v15, %v81_v14  ;;  %v78_v18 = vld [vmem:[%s12165_s29 + $0x40] sm:$0xff]  ;;  %v80_v20 = vld [vmem:[%s12165_s29 + $0x50] sm:$0xff]  ;;  %v87_v23 = vld [vmem:[%s12165_s29 + $0x88] sm:$0xff] }
   0xd   :  { %5082 = vmatpush1.bf16.msra.mxu0 %v5081_v8  ;;  %v82_v19 = vld [vmem:[%s12165_s29 + $0x60] sm:$0xff]  ;;  %v84_v22 = vld [vmem:[%s12165_s29 + $0x70] sm:$0xff]  ;;  %v91_v24 = vld [vmem:[%s12165_s29 + $0xa8] sm:$0xff] }
   0xe   :  { %5174 = vmatpush1.bf16.msra.mxu1 %v5173_v12  ;;  %v5085_v21 = vpack.c.bf16 %v82_v19, %v78_v18  ;;  %5084 = vmatprep.subr.bf16.mxu0 %v5083_v16  ;;  %v5177_v25 = vpack.c.bf16 %v84_v22, %v80_v20  ;;  %v5087_v26 = vpack.c.bf16 %v91_v24, %v87_v23  ;;  %v89_v27 = vld [vmem:[%s12165_s29 + $0x98] sm:$0xff]  ;;  %v86_v29 = vld [vmem:[%s12165_s29 + $0x80] sm:$0xff]  ;;  %v88_v32 = vld [vmem:[%s12165_s29 + $0x90] sm:$0xff] }
   0xf   :  { %5176 = vmatprep.subr.bf16.mxu1 %v5175_v17  ;;  %v93_v28 = vld [vmem:[%s12165_s29 + $0xb8] sm:$0xff]  ;;  %v90_v31 = vld [vmem:[%s12165_s29 + $0xa0] sm:$0xff]  ;;  %v92_v33 = vld [vmem:[%s12165_s29 + $0xb0] sm:$0xff] }
  0x10   :  { %v5179_v30 = vpack.c.bf16 %v93_v28, %v89_v27  ;;  %v5089_v34 = vpack.c.bf16 %v90_v31, %v86_v29  ;;  %v95_v35 = vld [vmem:[%s12165_s29 + $0xc8] sm:$0xff]  ;;  %v97_v37 = vld [vmem:[%s12165_s29 + $0xd8] sm:$0xff]  ;;  %v5181_v38 = vpack.c.bf16 %v92_v33, %v88_v32  ;;  %v94_v41 = vld [vmem:[%s12165_s29 + $0xc0] sm:$0xff] }
  0x11   :  { %5086 = vmatpush1.bf16.msra.mxu0 %v5085_v21  ;;  %v99_v36 = vld [vmem:[%s12165_s29 + $0xe8] sm:$0xff]  ;;  %v101_v40 = vld [vmem:[%s12165_s29 + $0xf8] sm:$0xff]  ;;  %v98_v42 = vld [vmem:[%s12165_s29 + $0xe0] sm:$0xff] }
  0x12   :  { %5178 = vmatpush1.bf16.msra.mxu1 %v5177_v25  ;;  %5088 = vmatprep.subr.bf16.mxu0 %v5087_v26  ;;  %v5091_v39 = vpack.c.bf16 %v99_v36, %v95_v35  ;;  %v5183_v43 = vpack.c.bf16 %v101_v40, %v97_v37  ;;  %v96_v44 = vld [vmem:[%s12165_s29 + $0xd0] sm:$0xff]  ;;  %v103_v46 = vld [vmem:[%s12165_s29 + $0x108] sm:$0xff]  ;;  %v105_v48 = vld [vmem:[%s12165_s29 + $0x118] sm:$0xff]  ;;  %v5093_v50 = vpack.c.bf16 %v98_v42, %v94_v41 }
  0x13   :  { %5180 = vmatprep.subr.bf16.mxu1 %v5179_v30  ;;  %v100_v45 = vld [vmem:[%s12165_s29 + $0xf0] sm:$0xff]  ;;  %v107_v47 = vld [vmem:[%s12165_s29 + $0x128] sm:$0xff]  ;;  %v109_v49 = vld [vmem:[%s12165_s29 + $0x138] sm:$0xff] }
  0x14   :  { %v5185_v51 = vpack.c.bf16 %v100_v45, %v96_v44  ;;  %v5095_v52 = vpack.c.bf16 %v107_v47, %v103_v46  ;;  %v102_v53 = vld [vmem:[%s12165_s29 + $0x100] sm:$0xff]  ;;  %v104_v55 = vld [vmem:[%s12165_s29 + $0x110] sm:$0xff]  ;;  %v5187_v56 = vpack.c.bf16 %v109_v49, %v105_v48  ;;  %v111_v58 = vld [vmem:[%s12165_s29 + $0x148] sm:$0xff] }
  0x15   :  { %5090 = vmatpush1.bf16.msra.mxu0 %v5089_v34  ;;  %v106_v54 = vld [vmem:[%s12165_s29 + $0x120] sm:$0xff]  ;;  %v108_v57 = vld [vmem:[%s12165_s29 + $0x130] sm:$0xff]  ;;  %v115_v59 = vld [vmem:[%s12165_s29 + $0x168] sm:$0xff] }
  0x16   :  { %5182 = vmatpush1.bf16.msra.mxu1 %v5181_v38  ;;  %5092 = vmatprep.subr.bf16.mxu0 %v5091_v39  ;;  %v113_v60 = vld [vmem:[%s12165_s29 + $0x158] sm:$0xff]  ;;  %v5097_v62 = vpack.c.bf16 %v106_v54, %v102_v53  ;;  %v5189_v63 = vpack.c.bf16 %v108_v57, %v104_v55  ;;  %v5099_v0 = vpack.c.bf16 %v115_v59, %v111_v58  ;;  %v110_v1 = vld [vmem:[%s12165_s29 + $0x140] sm:$0xff]  ;;  %v112_v3 = vld [vmem:[%s12165_s29 + $0x150] sm:$0xff] }
  0x17   :  { %5184 = vmatprep.subr.bf16.mxu1 %v5183_v43  ;;  %v117_v61 = vld [vmem:[%s12165_s29 + $0x178] sm:$0xff]  ;;  %v114_v2 = vld [vmem:[%s12165_s29 + $0x160] sm:$0xff]  ;;  %v116_v5 = vld [vmem:[%s12165_s29 + $0x170] sm:$0xff] }
  0x18   :  { %v5191_v4 = vpack.c.bf16 %v117_v61, %v113_v60  ;;  %v119_v6 = vld [vmem:[%s12165_s29 + $0x188] sm:$0xff]  ;;  %v121_v8 = vld [vmem:[%s12165_s29 + $0x198] sm:$0xff]  ;;  %v5101_v10 = vpack.c.bf16 %v114_v2, %v110_v1  ;;  %v5193_v11 = vpack.c.bf16 %v116_v5, %v112_v3  ;;  %v118_v13 = vld [vmem:[%s12165_s29 + $0x180] sm:$0xff] }
  0x19   :  { %5094 = vmatpush1.bf16.msra.mxu0 %v5093_v50  ;;  %v123_v7 = vld [vmem:[%s12165_s29 + $0x1a8] sm:$0xff]  ;;  %v125_v9 = vld [vmem:[%s12165_s29 + $0x1b8] sm:$0xff]  ;;  %v122_v14 = vld [vmem:[%s12165_s29 + $0x1a0] sm:$0xff] }
  0x1a   :  { %5186 = vmatpush1.bf16.msra.mxu1 %v5185_v51  ;;  %5096 = vmatprep.subr.bf16.mxu0 %v5095_v52  ;;  %v5103_v12 = vpack.c.bf16 %v123_v7, %v119_v6  ;;  %v120_v15 = vld [vmem:[%s12165_s29 + $0x190] sm:$0xff]  ;;  %v5195_v16 = vpack.c.bf16 %v125_v9, %v121_v8  ;;  %v127_v18 = vld [vmem:[%s12165_s29 + $0x1c8] sm:$0xff]  ;;  %v129_v20 = vld [vmem:[%s12165_s29 + $0x1d8] sm:$0xff]  ;;  %v5105_v22 = vpack.c.bf16 %v122_v14, %v118_v13 }
  0x1b   :  { %5188 = vmatprep.subr.bf16.mxu1 %v5187_v56  ;;  %v124_v17 = vld [vmem:[%s12165_s29 + $0x1b0] sm:$0xff]  ;;  %v131_v19 = vld [vmem:[%s12165_s29 + $0x1e8] sm:$0xff]  ;;  %v133_v21 = vld [vmem:[%s12165_s29 + $0x1f8] sm:$0xff] }
  0x1c   :  { %v5197_v23 = vpack.c.bf16 %v124_v17, %v120_v15  ;;  %v5107_v24 = vpack.c.bf16 %v131_v19, %v127_v18  ;;  %v126_v25 = vld [vmem:[%s12165_s29 + $0x1c0] sm:$0xff]  ;;  %v128_v27 = vld [vmem:[%s12165_s29 + $0x1d0] sm:$0xff]  ;;  %v5199_v28 = vpack.c.bf16 %v133_v21, %v129_v20  ;;  %v135_v30 = vld [vmem:[%s12165_s29 + $0x208] sm:$0xff] }
  0x1d   :  { %5098 = vmatpush1.bf16.msra.mxu0 %v5097_v62  ;;  %v130_v26 = vld [vmem:[%s12165_s29 + $0x1e0] sm:$0xff]  ;;  %v132_v29 = vld [vmem:[%s12165_s29 + $0x1f0] sm:$0xff]  ;;  %v139_v31 = vld [vmem:[%s12165_s29 + $0x228] sm:$0xff] }
  0x1e   :  { %5190 = vmatpush1.bf16.msra.mxu1 %v5189_v63  ;;  %5100 = vmatprep.subr.bf16.mxu0 %v5099_v0  ;;  %v137_v32 = vld [vmem:[%s12165_s29 + $0x218] sm:$0xff]  ;;  %v5109_v34 = vpack.c.bf16 %v130_v26, %v126_v25  ;;  %v5201_v35 = vpack.c.bf16 %v132_v29, %v128_v27  ;;  %v5111_v36 = vpack.c.bf16 %v139_v31, %v135_v30  ;;  %v134_v37 = vld [vmem:[%s12165_s29 + $0x200] sm:$0xff]  ;;  %v136_v39 = vld [vmem:[%s12165_s29 + $0x210] sm:$0xff] }
  0x1f   :  { %5192 = vmatprep.subr.bf16.mxu1 %v5191_v4  ;;  %v141_v33 = vld [vmem:[%s12165_s29 + $0x238] sm:$0xff]  ;;  %v138_v38 = vld [vmem:[%s12165_s29 + $0x220] sm:$0xff]  ;;  %v140_v41 = vld [vmem:[%s12165_s29 + $0x230] sm:$0xff] }
  0x20   :  { %v5203_v40 = vpack.c.bf16 %v141_v33, %v137_v32  ;;  %v143_v42 = vld [vmem:[%s12165_s29 + $0x248] sm:$0xff]  ;;  %v145_v44 = vld [vmem:[%s12165_s29 + $0x258] sm:$0xff]  ;;  %v5113_v46 = vpack.c.bf16 %v138_v38, %v134_v37  ;;  %v5205_v47 = vpack.c.bf16 %v140_v41, %v136_v39  ;;  %v142_v49 = vld [vmem:[%s12165_s29 + $0x240] sm:$0xff] }
  0x21   :  { %5102 = vmatpush1.bf16.msra.mxu0 %v5101_v10  ;;  %v147_v43 = vld [vmem:[%s12165_s29 + $0x268] sm:$0xff]  ;;  %v149_v45 = vld [vmem:[%s12165_s29 + $0x278] sm:$0xff]  ;;  %v146_v50 = vld [vmem:[%s12165_s29 + $0x260] sm:$0xff] }
  0x22   :  { %5194 = vmatpush1.bf16.msra.mxu1 %v5193_v11  ;;  %5104 = vmatprep.subr.bf16.mxu0 %v5103_v12  ;;  %v5115_v48 = vpack.c.bf16 %v147_v43, %v143_v42  ;;  %v144_v51 = vld [vmem:[%s12165_s29 + $0x250] sm:$0xff]  ;;  %v5207_v52 = vpack.c.bf16 %v149_v45, %v145_v44  ;;  %v151_v54 = vld [vmem:[%s12165_s29 + $0x288] sm:$0xff]  ;;  %v153_v56 = vld [vmem:[%s12165_s29 + $0x298] sm:$0xff]  ;;  %v5117_v58 = vpack.c.bf16 %v146_v50, %v142_v49 }
  0x23   :  { %5196 = vmatprep.subr.bf16.mxu1 %v5195_v16  ;;  %v148_v53 = vld [vmem:[%s12165_s29 + $0x270] sm:$0xff]  ;;  %v155_v55 = vld [vmem:[%s12165_s29 + $0x2a8] sm:$0xff]  ;;  %v157_v57 = vld [vmem:[%s12165_s29 + $0x2b8] sm:$0xff] }
  0x24   :  { %v5209_v59 = vpack.c.bf16 %v148_v53, %v144_v51  ;;  %v5119_v60 = vpack.c.bf16 %v155_v55, %v151_v54  ;;  %v150_v61 = vld [vmem:[%s12165_s29 + $0x280] sm:$0xff]  ;;  %v152_v63 = vld [vmem:[%s12165_s29 + $0x290] sm:$0xff]  ;;  %v5211_v0 = vpack.c.bf16 %v157_v57, %v153_v56  ;;  %v159_v2 = vld [vmem:[%s12165_s29 + $0x2c8] sm:$0xff] }
  0x25   :  { %5106 = vmatpush1.bf16.msra.mxu0 %v5105_v22  ;;  %v154_v62 = vld [vmem:[%s12165_s29 + $0x2a0] sm:$0xff]  ;;  %v156_v1 = vld [vmem:[%s12165_s29 + $0x2b0] sm:$0xff]  ;;  %v163_v3 = vld [vmem:[%s12165_s29 + $0x2e8] sm:$0xff] }
  0x26   :  { %5198 = vmatpush1.bf16.msra.mxu1 %v5197_v23  ;;  %5108 = vmatprep.subr.bf16.mxu0 %v5107_v24  ;;  %v161_v4 = vld [vmem:[%s12165_s29 + $0x2d8] sm:$0xff]  ;;  %v5121_v6 = vpack.c.bf16 %v154_v62, %v150_v61  ;;  %v158_v7 = vld [vmem:[%s12165_s29 + $0x2c0] sm:$0xff]  ;;  %v5213_v8 = vpack.c.bf16 %v156_v1, %v152_v63  ;;  %v5123_v9 = vpack.c.bf16 %v163_v3, %v159_v2  ;;  %v160_v11 = vld [vmem:[%s12165_s29 + $0x2d0] sm:$0xff] }
  0x27   :  { %5200 = vmatprep.subr.bf16.mxu1 %v5199_v28  ;;  %v165_v5 = vld [vmem:[%s12165_s29 + $0x2f8] sm:$0xff]  ;;  %v162_v10 = vld [vmem:[%s12165_s29 + $0x2e0] sm:$0xff]  ;;  %v164_v12 = vld [vmem:[%s12165_s29 + $0x2f0] sm:$0xff] }
  0x28   :  { %v5215_v13 = vpack.c.bf16 %v165_v5, %v161_v4  ;;  %v167_v14 = vld [vmem:[%s12165_s29 + $0x308] sm:$0xff]  ;;  %v169_v17 = vld [vmem:[%s12165_s29 + $0x318] sm:$0xff]  ;;  %v5125_v19 = vpack.c.bf16 %v162_v10, %v158_v7  ;;  %v5217_v20 = vpack.c.bf16 %v164_v12, %v160_v11  ;;  %v166_v22 = vld [vmem:[%s12165_s29 + $0x300] sm:$0xff] }
  0x29   :  { %5110 = vmatpush1.bf16.msra.mxu0 %v5109_v34  ;;  %v171_v15 = vld [vmem:[%s12165_s29 + $0x328] sm:$0xff]  ;;  %v173_v18 = vld [vmem:[%s12165_s29 + $0x338] sm:$0xff]  ;;  %v170_v23 = vld [vmem:[%s12165_s29 + $0x320] sm:$0xff] }
  0x2a   :  { %5202 = vmatpush1.bf16.msra.mxu1 %v5201_v35  ;;  %5112 = vmatprep.subr.bf16.mxu0 %v5111_v36  ;;  %v68_v16 = vld [vmem:[%s12166_s30 + $0x8] sm:$0xff]  ;;  %v5127_v21 = vpack.c.bf16 %v171_v15, %v167_v14  ;;  %v168_v24 = vld [vmem:[%s12165_s29 + $0x310] sm:$0xff]  ;;  %v5219_v25 = vpack.c.bf16 %v173_v18, %v169_v17  ;;  %v177_v29 = vld [vmem:[%s12165_s29 + $0x358] sm:$0xff]  ;;  %v5129_v31 = vpack.c.bf16 %v170_v23, %v166_v22 }
  0x2b   :  { %5204 = vmatprep.subr.bf16.mxu1 %v5203_v40  ;;  %361 = vmatprep.mubr.f32.mxu0 %v68_v16  ;;  %v172_v26 = vld [vmem:[%s12165_s29 + $0x330] sm:$0xff]  ;;  %v175_v27 = vld [vmem:[%s12165_s29 + $0x348] sm:$0xff]  ;;  %v181_v30 = vld [vmem:[%s12165_s29 + $0x378] sm:$0xff] }
  0x2c   :  { %503 = vmatprep.mubr.f32.mxu1 %v68_v16  ;;  %v179_v28 = vld [vmem:[%s12165_s29 + $0x368] sm:$0xff]  ;;  %v5221_v32 = vpack.c.bf16 %v172_v26, %v168_v24  ;;  %v174_v34 = vld [vmem:[%s12165_s29 + $0x340] sm:$0xff]  ;;  %v176_v36 = vld [vmem:[%s12165_s29 + $0x350] sm:$0xff]  ;;  %v5223_v37 = vpack.c.bf16 %v181_v30, %v177_v29 }
  0x2d   :  { %5114 = vmatpush1.bf16.msra.mxu0 %v5113_v46  ;;  %v5131_v33 = vpack.c.bf16 %v179_v28, %v175_v27  ;;  %v178_v35 = vld [vmem:[%s12165_s29 + $0x360] sm:$0xff]  ;;  %v180_v38 = vld [vmem:[%s12165_s29 + $0x370] sm:$0xff]  ;;  %v183_v39 = vld [vmem:[%s12165_s29 + $0x388] sm:$0xff] }
  0x2e   :  { %5206 = vmatpush1.bf16.msra.mxu1 %v5205_v47  ;;  %5116 = vmatprep.subr.bf16.mxu0 %v5115_v48  ;;  %v187_v40 = vld [vmem:[%s12165_s29 + $0x3a8] sm:$0xff]  ;;  %v185_v41 = vld [vmem:[%s12165_s29 + $0x398] sm:$0xff]  ;;  %v5133_v43 = vpack.c.bf16 %v178_v35, %v174_v34  ;;  %v5225_v44 = vpack.c.bf16 %v180_v38, %v176_v36  ;;  %v182_v46 = vld [vmem:[%s12165_s29 + $0x380] sm:$0xff]  ;;  %v7180_v38 = vmov 0.0  }
  0x2f   :  { %5208 = vmatprep.subr.bf16.mxu1 %v5207_v52  ;;  %v189_v42 = vld [vmem:[%s12165_s29 + $0x3b8] sm:$0xff]  ;;  %v5135_v45 = vpack.c.bf16 %v187_v40, %v183_v39  ;;  %v186_v47 = vld [vmem:[%s12165_s29 + $0x3a0] sm:$0xff]  ;;  %v184_v48 = vld [vmem:[%s12165_s29 + $0x390] sm:$0xff] }
  0x30   :  { %v5227_v49 = vpack.c.bf16 %v189_v42, %v185_v41  ;;  %v188_v50 = vld [vmem:[%s12165_s29 + $0x3b0] sm:$0xff]  ;;  %v191_v51 = vld [vmem:[%s12165_s29 + $0x3c8] sm:$0xff]  ;;  %v193_v53 = vld [vmem:[%s12165_s29 + $0x3d8] sm:$0xff]  ;;  %v5137_v55 = vpack.c.bf16 %v186_v47, %v182_v46 }
  0x31   :  { %5118 = vmatpush1.bf16.msra.mxu0 %v5117_v58  ;;  %v195_v52 = vld [vmem:[%s12165_s29 + $0x3e8] sm:$0xff]  ;;  %v197_v54 = vld [vmem:[%s12165_s29 + $0x3f8] sm:$0xff]  ;;  %v5229_v56 = vpack.c.bf16 %v188_v50, %v184_v48  ;;  %v190_v58 = vld [vmem:[%s12165_s29 + $0x3c0] sm:$0xff] }
  0x32   :  { %5210 = vmatpush1.bf16.msra.mxu1 %v5209_v59  ;;  %5120 = vmatprep.subr.bf16.mxu0 %v5119_v60  ;;  %v5139_v57 = vpack.c.bf16 %v195_v52, %v191_v51  ;;  %v194_v59 = vld [vmem:[%s12165_s29 + $0x3e0] sm:$0xff]  ;;  %v192_v60 = vld [vmem:[%s12165_s29 + $0x3d0] sm:$0xff]  ;;  %v5231_v61 = vpack.c.bf16 %v197_v54, %v193_v53  ;;  %v199_v63 = vld [vmem:[%s12165_s29 + $0x408] sm:$0xff] }
  0x33   :  { %5212 = vmatprep.subr.bf16.mxu1 %v5211_v0  ;;  %v196_v62 = vld [vmem:[%s12165_s29 + $0x3f0] sm:$0xff]  ;;  %v203_v0 = vld [vmem:[%s12165_s29 + $0x428] sm:$0xff]  ;;  %v201_v1 = vld [vmem:[%s12165_s29 + $0x418] sm:$0xff]  ;;  %v5141_v3 = vpack.c.bf16 %v194_v59, %v190_v58 }
  0x34   :  { %v205_v2 = vld [vmem:[%s12165_s29 + $0x438] sm:$0xff]  ;;  %v5233_v4 = vpack.c.bf16 %v196_v62, %v192_v60  ;;  %v5143_v5 = vpack.c.bf16 %v203_v0, %v199_v63  ;;  %v202_v7 = vld [vmem:[%s12165_s29 + $0x420] sm:$0xff]  ;;  %v204_v10 = vld [vmem:[%s12165_s29 + $0x430] sm:$0xff] }
  0x35   :  { %5122 = vmatpush1.bf16.msra.mxu0 %v5121_v6  ;;  %v198_v6 = vld [vmem:[%s12165_s29 + $0x400] sm:$0xff]  ;;  %v207_v11 = vld [vmem:[%s12165_s29 + $0x448] sm:$0xff]  ;;  %v213_v14 = vld [vmem:[%s12165_s29 + $0x478] sm:$0xff] }
  0x36   :  { %5214 = vmatpush1.bf16.msra.mxu1 %v5213_v8  ;;  %5124 = vmatprep.subr.bf16.mxu0 %v5123_v9  ;;  %v200_v8 = vld [vmem:[%s12165_s29 + $0x410] sm:$0xff]  ;;  %v5235_v9 = vpack.c.bf16 %v205_v2, %v201_v1  ;;  %v211_v12 = vld [vmem:[%s12165_s29 + $0x468] sm:$0xff]  ;;  %v67_v15 = vld [vmem:[%s12166_s30] sm:$0xff]  ;;  %v5145_v16 = vpack.c.bf16 %v202_v7, %v198_v6 }
  0x37   :  { %5216 = vmatprep.subr.bf16.mxu1 %v5215_v13  ;;  %v209_v13 = vld [vmem:[%s12165_s29 + $0x458] sm:$0xff]  ;;  %v5237_v17 = vpack.c.bf16 %v204_v10, %v200_v8  ;;  %v5147_v18 = vpack.c.bf16 %v211_v12, %v207_v11  ;;  %v212_v23 = vld [vmem:[%s12165_s29 + $0x470] sm:$0xff]  ;;  %v215_v24 = vld [vmem:[%s12165_s29 + $0x488] sm:$0xff] }
  0x38   :  { %v5239_v22 = vpack.c.bf16 %v213_v14, %v209_v13  ;;  %v217_v26 = vld [vmem:[%s12165_s29 + $0x498] sm:$0xff]  ;;  %v220_v35 = vld [vmem:[%s12165_s29 + $0x4b0] sm:$0xff]  ;;  %v223_v36 = vld [vmem:[%s12165_s29 + $0x4c8] sm:$0xff] }
  0x39   :  { %5126 = vmatpush1.bf16.msra.mxu0 %v5125_v19  ;;  %v206_v19 = vld [vmem:[%s12165_s29 + $0x440] sm:$0xff]  ;;  %v221_v27 = vld [vmem:[%s12165_s29 + $0x4b8] sm:$0xff]  ;;  %v224_v46 = vld [vmem:[%s12165_s29 + $0x4d0] sm:$0xff] }
  0x3a   :  { %5218 = vmatpush1.bf16.msra.mxu1 %v5217_v20  ;;  %5128 = vmatprep.subr.bf16.mxu0 %v5127_v21  ;;  %v210_v20 = vld [vmem:[%s12165_s29 + $0x460] sm:$0xff]  ;;  %v208_v21 = vld [vmem:[%s12165_s29 + $0x450] sm:$0xff]  ;;  %v5243_v34 = vpack.c.bf16 %v221_v27, %v217_v26  ;;  %v225_v39 = vld [vmem:[%s12165_s29 + $0x4d8] sm:$0xff] }
  0x3b   :  { %5220 = vmatprep.subr.bf16.mxu1 %v5219_v25  ;;  %v219_v25 = vld [vmem:[%s12165_s29 + $0x4a8] sm:$0xff]  ;;  %v5149_v28 = vpack.c.bf16 %v210_v20, %v206_v19  ;;  %v5241_v29 = vpack.c.bf16 %v212_v23, %v208_v21  ;;  %v229_v40 = vld [vmem:[%s12165_s29 + $0x4f8] sm:$0xff]  ;;  %v228_v48 = vld [vmem:[%s12165_s29 + $0x4f0] sm:$0xff] }
  0x3c   :  { %v5151_v30 = vpack.c.bf16 %v219_v25, %v215_v24  ;;  %v5247_v47 = vpack.c.bf16 %v229_v40, %v225_v39  ;;  %v235_v50 = vld [vmem:[%s12165_s29 + $0x528] sm:$0xff]  ;;  %v233_v51 = vld [vmem:[%s12165_s29 + $0x518] sm:$0xff]  ;;  %v5249_v54 = vpack.c.bf16 %v228_v48, %v224_v46  ;;  %v232_v58 = vld [vmem:[%s12165_s29 + $0x510] sm:$0xff] }
  0x3d   :  { %5130 = vmatpush1.bf16.msra.mxu0 %v5129_v31  ;;  %v214_v31 = vld [vmem:[%s12165_s29 + $0x480] sm:$0xff]  ;;  %v237_v52 = vld [vmem:[%s12165_s29 + $0x538] sm:$0xff]  ;;  %v236_v60 = vld [vmem:[%s12165_s29 + $0x530] sm:$0xff] }
  0x3e   :  { %5222 = vmatpush1.bf16.msra.mxu1 %v5221_v32  ;;  %5132 = vmatprep.subr.bf16.mxu0 %v5131_v33  ;;  %v218_v32 = vld [vmem:[%s12165_s29 + $0x4a0] sm:$0xff]  ;;  %v216_v33 = vld [vmem:[%s12165_s29 + $0x490] sm:$0xff]  ;;  %v5251_v59 = vpack.c.bf16 %v237_v52, %v233_v51  ;;  %v243_v62 = vld [vmem:[%s12165_s29 + $0x568] sm:$0xff]  ;;  %v5253_v2 = vpack.c.bf16 %v236_v60, %v232_v58 }
  0x3f   :  { %5224 = vmatprep.subr.bf16.mxu1 %v5223_v37  ;;  %v227_v37 = vld [vmem:[%s12165_s29 + $0x4e8] sm:$0xff]  ;;  %v5153_v41 = vpack.c.bf16 %v218_v32, %v214_v31  ;;  %v5245_v42 = vpack.c.bf16 %v220_v35, %v216_v33  ;;  %v241_v63 = vld [vmem:[%s12165_s29 + $0x558] sm:$0xff]  ;;  %v240_v6 = vld [vmem:[%s12165_s29 + $0x550] sm:$0xff] }
  0x40   :  { %v245_v0 = vld [vmem:[%s12165_s29 + $0x578] sm:$0xff]  ;;  %v244_v8 = vld [vmem:[%s12165_s29 + $0x570] sm:$0xff]  ;;  %v251_v10 = vld [vmem:[%s12165_s29 + $0x5a8] sm:$0xff] }
  0x41   :  { %5134 = vmatpush1.bf16.msra.mxu0 %v5133_v43  ;;  %v5155_v43 = vpack.c.bf16 %v227_v37, %v223_v36  ;;  %v5255_v7 = vpack.c.bf16 %v245_v0, %v241_v63  ;;  %v249_v11 = vld [vmem:[%s12165_s29 + $0x598] sm:$0xff]  ;;  %v5257_v14 = vpack.c.bf16 %v244_v8, %v240_v6  ;;  %v248_v19 = vld [vmem:[%s12165_s29 + $0x590] sm:$0xff]  ;;  %v255_v23 = vld [vmem:[%s12165_s29 + $0x5c8] sm:$0x1f] }
  0x42   :  { %5226 = vmatpush1.bf16.msra.mxu1 %v5225_v44  ;;  %5136 = vmatprep.subr.bf16.mxu0 %v5135_v45  ;;  %v222_v44 = vld [vmem:[%s12165_s29 + $0x4c0] sm:$0xff]  ;;  %v253_v12 = vld [vmem:[%s12165_s29 + $0x5b8] sm:$0xff]  ;;  %v252_v20 = vld [vmem:[%s12165_s29 + $0x5b0] sm:$0xff] }
  0x43   :  { %5228 = vmatprep.subr.bf16.mxu1 %v5227_v49  ;;  %v226_v45 = vld [vmem:[%s12165_s29 + $0x4e0] sm:$0xff]  ;;  %v231_v49 = vld [vmem:[%s12165_s29 + $0x508] sm:$0xff]  ;;  %v257_v24 = vld [vmem:[%s12165_s29 + $0x5d8] sm:$0x1f] }
  0x44   :  { %v5157_v53 = vpack.c.bf16 %v226_v45, %v222_v44  ;;  %v602_v25 = vld [vmem:[%s12167_s27 + $0x8] sm:$0xff]  ;;  %v254_v27 = vld [vmem:[%s12165_s29 + $0x5c0] sm:$0x1f]  ;;  %v603_v32 = vld [vmem:[%s12167_s27 + $0x10] sm:$0xff] }
  0x45   :  { %5138 = vmatpush1.bf16.msra.mxu0 %v5137_v55  ;;  %v5159_v55 = vpack.c.bf16 %v235_v50, %v231_v49  ;;  %v606_v26 = vld [vmem:[%s12167_s27 + $0x28] sm:$0xff]  ;;  %v605_v31 = vld [vmem:[%s12167_s27 + $0x20] sm:$0xff]  ;;  %v256_v37 = vld [vmem:[%s12165_s29 + $0x5d0] sm:$0x1f] }
  0x46   :  { %5230 = vmatpush1.bf16.msra.mxu1 %v5229_v56  ;;  %5140 = vmatprep.subr.bf16.mxu0 %v5139_v57  ;;  %v230_v56 = vld [vmem:[%s12165_s29 + $0x500] sm:$0xff]  ;;  %v5263_v33 = vpack.c.bf16 %v606_v26, %v602_v25  ;;  %v610_v35 = vld [vmem:[%s12167_s27 + $0x48] sm:$0xff]  ;;  %v612_v40 = vld [vmem:[%s12167_s27 + $0x58] sm:$0xff] }
  0x47   :  { %5232 = vmatprep.subr.bf16.mxu1 %v5231_v61  ;;  %v234_v57 = vld [vmem:[%s12165_s29 + $0x520] sm:$0xff]  ;;  %v239_v61 = vld [vmem:[%s12165_s29 + $0x548] sm:$0xff]  ;;  %v611_v48 = vld [vmem:[%s12167_s27 + $0x50] sm:$0xff] }
  0x48   :  { %v5161_v1 = vpack.c.bf16 %v234_v57, %v230_v56  ;;  %v614_v36 = vld [vmem:[%s12167_s27 + $0x68] sm:$0xff]  ;;  %v609_v46 = vld [vmem:[%s12167_s27 + $0x40] sm:$0xff]  ;;  %v615_v50 = vld [vmem:[%s12167_s27 + $0x70] sm:$0xff] }
  0x49   :  { %5142 = vmatpush1.bf16.msra.mxu0 %v5141_v3  ;;  %v5163_v3 = vpack.c.bf16 %v243_v62, %v239_v61  ;;  %v5267_v45 = vpack.c.bf16 %v614_v36, %v610_v35  ;;  %v618_v51 = vld [vmem:[%s12167_s27 + $0x88] sm:$0xff]  ;;  %v5309_v57 = vpack.c.bf16 %v615_v50, %v611_v48  ;;  %v621_v60 = vld [vmem:[%s12167_s27 + $0xa0] sm:$0xff]  ;;  %v619_v61 = vld [vmem:[%s12167_s27 + $0x90] sm:$0xff] }
  0x4a   :  { %5234 = vmatpush1.bf16.msra.mxu1 %v5233_v4  ;;  %5144 = vmatprep.subr.bf16.mxu0 %v5143_v5  ;;  %v238_v4 = vld [vmem:[%s12165_s29 + $0x540] sm:$0xff]  ;;  %v622_v52 = vld [vmem:[%s12167_s27 + $0xa8] sm:$0xff]  ;;  %v623_v63 = vld [vmem:[%s12167_s27 + $0xb0] sm:$0xff] }
  0x4b   :  { %5236 = vmatprep.subr.bf16.mxu1 %v5235_v9  ;;  %v242_v5 = vld [vmem:[%s12165_s29 + $0x560] sm:$0xff]  ;;  %v247_v9 = vld [vmem:[%s12165_s29 + $0x588] sm:$0xff]  ;;  %v5271_v58 = vpack.c.bf16 %v622_v52, %v618_v51  ;;  %v644_v26 = vld [vmem:[%s12167_s27 + $0x158] sm:$0xff] }
  0x4c   :  { %362 = vmatmul.mubr.f32.vlgmr.msra.gmra.mrb[0].mxu0 %v67_v15  ;;  %v5165_v13 = vpack.c.bf16 %v242_v5, %v238_v4  ;;  %v626_v0 = vld [vmem:[%s12167_s27 + $0xc8] sm:$0xff]  ;;  %v5313_v5 = vpack.c.bf16 %v623_v63, %v619_v61  ;;  %v629_v8 = vld [vmem:[%s12167_s27 + $0xe0] sm:$0xff]  ;;  %v647_v35 = vld [vmem:[%s12167_s27 + $0x170] sm:$0xff] }
  0x4d   :  { %5146 = vmatpush1.bf16.msra.mxu0 %v5145_v16  ;;  %504 = vmatmul.mubr.f32.vlgmr.msra.gmra.mrb[0].mxu1 %v67_v15  ;;  %v5167_v15 = vpack.c.bf16 %v251_v10, %v247_v9  ;;  %v246_v16 = vld [vmem:[%s12165_s29 + $0x580] sm:$0xff]  ;;  %v627_v9 = vld [vmem:[%s12167_s27 + $0xd0] sm:$0xff]  ;;  %v646_v25 = vld [vmem:[%s12167_s27 + $0x168] sm:$0xff] }
  0x4e   :  { %5238 = vmatpush1.bf16.msra.mxu1 %v5237_v17  ;;  %5148 = vmatprep.subr.bf16.mxu0 %v5147_v18  ;;  %v250_v17 = vld [vmem:[%s12165_s29 + $0x5a0] sm:$0xff]  ;;  %v5259_v18 = vpack.c.bf16 %v253_v12, %v249_v11  ;;  %v631_v11 = vld [vmem:[%s12167_s27 + $0xf0] sm:$0xff]  ;;  %v634_v12 = vld [vmem:[%s12167_s27 + $0x108] sm:$0xff] }
  0x4f   :  { %5240 = vmatprep.subr.bf16.mxu1 %v5239_v22  ;;  %432 = vmatprep.mubr.f32.mxu0 %v7180_v38  ;;  %v5169_v21 = vpack.c.bf16 %v250_v17, %v246_v16  ;;  %v5261_v22 = vpack.c.bf16 %v252_v20, %v248_v19  ;;  %v5317_v17 = vpack.c.bf16 %v631_v11, %v627_v9  ;;  %v633_v19 = vld [vmem:[%s12167_s27 + $0x100] sm:$0xff]  ;;  %v650_v36 = vld [vmem:[%s12167_s27 + $0x188] sm:$0xff]  ;;  %v655_v48 = vld [vmem:[%s12167_s27 + $0x1b0] sm:$0xff] }
  0x50   :  { %574 = vmatprep.mubr.f32.mxu1 %v7180_v38  ;;  %v637_v20 = vld [vmem:[%s12167_s27 + $0x120] sm:$0xff]  ;;  %v662_v50 = vld [vmem:[%s12167_s27 + $0x1e8] sm:$0xff]  ;;  %v660_v51 = vld [vmem:[%s12167_s27 + $0x1d8] sm:$0xff] }
  0x51   :  { %5150 = vmatpush1.bf16.msra.mxu0 %v5149_v28  ;;  %v604_v28 = vld [vmem:[%s12167_s27 + $0x18] sm:$0xff]  ;;  %v666_v61 = vld [vmem:[%s12167_s27 + $0x208] sm:$0xff] }
  0x52   :  { %5242 = vmatpush1.bf16.msra.mxu1 %v5241_v29  ;;  %5152 = vmatprep.subr.bf16.mxu0 %v5151_v30  ;;  %v608_v29 = vld [vmem:[%s12167_s27 + $0x38] sm:$0xff]  ;;  %v601_v30 = vld [vmem:[%s12167_s27] sm:$0xff]  ;;  %v674_v9 = vld [vmem:[%s12167_s27 + $0x248] sm:$0xff] }
  0x53   :  { %5244 = vmatprep.subr.bf16.mxu1 %v5243_v34  ;;  %v607_v34 = vld [vmem:[%s12167_s27 + $0x30] sm:$0xff]  ;;  %v5303_v39 = vpack.c.bf16 %v608_v29, %v604_v28  ;;  %v5281_v28 = vpack.c.bf16 %v637_v20, %v633_v19  ;;  %v664_v52 = vld [vmem:[%s12167_s27 + $0x1f8] sm:$0xff] }
  0x54   :  { %v5305_v44 = vpack.c.bf16 %v607_v34, %v603_v32  ;;  %v645_v32 = vld [vmem:[%s12167_s27 + $0x160] sm:$0xff]  ;;  %v668_v63 = vld [vmem:[%s12167_s27 + $0x218] sm:$0xff]  ;;  %v675_v19 = vld [vmem:[%s12167_s27 + $0x250] sm:$0xff] }
  0x55   :  { %5154 = vmatpush1.bf16.msra.mxu0 %v5153_v41  ;;  %v616_v41 = vld [vmem:[%s12167_s27 + $0x78] sm:$0xff]  ;;  %v679_v20 = vld [vmem:[%s12167_s27 + $0x270] sm:$0xff] }
  0x56   :  { %5246 = vmatpush1.bf16.msra.mxu1 %v5245_v42  ;;  %5156 = vmatprep.subr.bf16.mxu0 %v5155_v43  ;;  %v69_v42 = vld [vmem:[%s12166_s30 + $0x10] sm:$0xff]  ;;  %v5265_v43 = vpack.c.bf16 %v605_v31, %v601_v30  ;;  %v5307_v49 = vpack.c.bf16 %v616_v41, %v612_v40  ;;  %v641_v31 = vld [vmem:[%s12167_s27 + $0x140] sm:$0xff]  ;;  %v656_v40 = vld [vmem:[%s12167_s27 + $0x1b8] sm:$0xff] }
  0x57   :  { %5248 = vmatprep.subr.bf16.mxu1 %v5247_v47  ;;  %v613_v47 = vld [vmem:[%s12167_s27 + $0x60] sm:$0xff]  ;;  %v5285_v41 = vpack.c.bf16 %v645_v32, %v641_v31  ;;  %v676_v11 = vld [vmem:[%s12167_s27 + $0x258] sm:$0xff]  ;;  %v1037_v32 = vld [vmem:[%s12144_s3 + $0x10] sm:$0xff] }
  0x58   :  { %v5269_v56 = vpack.c.bf16 %v613_v47, %v609_v46  ;;  %v651_v46 = vld [vmem:[%s12167_s27 + $0x190] sm:$0xff]  ;;  %v681_v31 = vld [vmem:[%s12167_s27 + $0x280] sm:$0x3] }
  0x59   :  { %5158 = vmatpush1.bf16.msra.mxu0 %v5157_v53  ;;  %v620_v53 = vld [vmem:[%s12167_s27 + $0x98] sm:$0xff] }
  0x5a   :  { %5250 = vmatpush1.bf16.msra.mxu1 %v5249_v54  ;;  %5160 = vmatprep.subr.bf16.mxu0 %v5159_v55  ;;  %v624_v54 = vld [vmem:[%s12167_s27 + $0xb8] sm:$0xff]  ;;  %v586_v55 = vld [vmem:[%s12143_s0 + $0x8] sm:$0xff] }
  0x5b   :  { %5252 = vmatprep.subr.bf16.mxu1 %v5251_v59  ;;  %v617_v59 = vld [vmem:[%s12167_s27 + $0x80] sm:$0xff]  ;;  %v5311_v62 = vpack.c.bf16 %v624_v54, %v620_v53  ;;  %v5329_v54 = vpack.c.bf16 %v655_v48, %v651_v46  ;;  %v1045_v48 = vld [vmem:[%s12144_s3 + $0x50] sm:$0xff] }
  0x5c   :  { %v5273_v4 = vpack.c.bf16 %v621_v60, %v617_v59  ;;  %v5331_v59 = vpack.c.bf16 %v664_v52, %v660_v51  ;;  %v663_v60 = vld [vmem:[%s12167_s27 + $0x1f0] sm:$0xff]  ;;  %v1047_v46 = vld [vmem:[%s12144_s3 + $0x60] sm:$0xff] }
  0x5d   :  { %5162 = vmatpush1.bf16.msra.mxu0 %v5161_v1  ;;  %v630_v1 = vld [vmem:[%s12167_s27 + $0xe8] sm:$0xff] }
  0x5e   :  { %5254 = vmatpush1.bf16.msra.mxu1 %v5253_v2  ;;  %5164 = vmatprep.subr.bf16.mxu0 %v5163_v3  ;;  %v628_v2 = vld [vmem:[%s12167_s27 + $0xd8] sm:$0xff]  ;;  %v5275_v6 = vpack.c.bf16 %v630_v1, %v626_v0 }
  0x5f   :  { %5256 = vmatprep.subr.bf16.mxu1 %v5255_v7  ;;  %v632_v3 = vld [vmem:[%s12167_s27 + $0xf8] sm:$0xff]  ;;  %v625_v7 = vld [vmem:[%s12167_s27 + $0xc0] sm:$0xff] }
  0x60   :  { %v5315_v10 = vpack.c.bf16 %v632_v3, %v628_v2  ;;  %v5277_v16 = vpack.c.bf16 %v629_v8, %v625_v7  ;;  %v672_v0 = vld [vmem:[%s12167_s27 + $0x238] sm:$0xff]  ;;  %v671_v8 = vld [vmem:[%s12167_s27 + $0x230] sm:$0xff] }
  0x61   :  { %5166 = vmatpush1.bf16.msra.mxu0 %v5165_v13  ;;  %v638_v13 = vld [vmem:[%s12167_s27 + $0x128] sm:$0xff]  ;;  %v5335_v7 = vpack.c.bf16 %v672_v0, %v668_v63  ;;  %v1057_v63 = vld [vmem:[%s12144_s3 + $0xb0] sm:$0xff]  ;;  %v589_v0 = vld [vmem:[%s12143_s0 + $0x20] sm:$0xff] }
  0x62   :  { %5258 = vmatpush1.bf16.msra.mxu1 %v5257_v14  ;;  %5168 = vmatprep.subr.bf16.mxu0 %v5167_v15  ;;  %v636_v14 = vld [vmem:[%s12167_s27 + $0x118] sm:$0xff] }
  0x63   :  { %5260 = vmatprep.subr.bf16.mxu1 %v5259_v18  ;;  %v640_v15 = vld [vmem:[%s12167_s27 + $0x138] sm:$0xff]  ;;  %v5279_v18 = vpack.c.bf16 %v638_v13, %v634_v12 }
  0x64   :  { %v680_v12 = vld [vmem:[%s12167_s27 + $0x278] sm:$0xff] }
  0x65   :  { %5170 = vmatpush1.bf16.msra.mxu0 %v5169_v21  ;;  %v635_v21 = vld [vmem:[%s12167_s27 + $0x110] sm:$0xff] }
  0x66   :  { %5262 = vmatpush1.bf16.msra.mxu1 %v5261_v22  ;;  %5028 = vmatprep.subr.msk.mxu0 %vm284_vm0, %v255_v23  ;;  %v5319_v22 = vpack.c.bf16 %v640_v15, %v636_v14  ;;  %v639_v23 = vld [vmem:[%s12167_s27 + $0x130] sm:$0xff] }
  0x67   :  { %5031 = vmatprep.subr.msk.mxu1 %vm284_vm0, %v257_v24  ;;  %v642_v24 = vld [vmem:[%s12167_s27 + $0x148] sm:$0xff]  ;;  %v5321_v29 = vpack.c.bf16 %v639_v23, %v635_v21 }
  0x68   :  { %v5283_v30 = vpack.c.bf16 %v646_v25, %v642_v24  ;;  %v682_v23 = vld [vmem:[%s12167_s27 + $0x288] sm:$0x3]  ;;  %v684_v24 = vld [vmem:[%s12167_s27 + $0x298] sm:$0x3] }
  0x69   :  { %5029 = vmatpush1.msk.msra.mxu0 %vm284_vm0, %v254_v27  ;;  %v648_v27 = vld [vmem:[%s12167_s27 + $0x178] sm:$0xff]  ;;  %v1036_v25 = vld [vmem:[%s12144_s3 + $0x8] sm:$0xff] }
  0x6a   :  { %5032 = vmatpush1.msk.msra.mxu1 %vm284_vm0, %v256_v37  ;;  %5264 = vmatprep.subr.bf16.mxu0 %v5263_v33  ;;  %v643_v33 = vld [vmem:[%s12167_s27 + $0x150] sm:$0xff]  ;;  %v5323_v34 = vpack.c.bf16 %v648_v27, %v644_v26  ;;  %v654_v37 = vld [vmem:[%s12167_s27 + $0x1a8] sm:$0xff]  ;;  %v1038_v27 = vld [vmem:[%s12144_s3 + $0x18] sm:$0xff] }
  0x6b   :  { %5304 = vmatprep.subr.bf16.mxu1 %v5303_v39  ;;  %5030 = vmatmul.mubr.msk.f32.vlgmr.msra.gmra.mrb[0].mxu0 %vm280_vm1, %v69_v42  ;;  %v652_v39 = vld [vmem:[%s12167_s27 + $0x198] sm:$0xff]  ;;  %v1040_v26 = vld [vmem:[%s12144_s3 + $0x28] sm:$0xff] }
  0x6c   :  { %5033 = vmatmul.mubr.msk.f32.vlgmr.msra.gmra.mrb[0].mxu1 %vm280_vm1, %v69_v42  ;;  %5266 = vmatpush1.bf16.msra.mxu0 %v5265_v43  ;;  %v5325_v42 = vpack.c.bf16 %v647_v35, %v643_v33  ;;  %v5287_v43 = vpack.c.bf16 %v654_v37, %v650_v36  ;;  %v5327_v47 = vpack.c.bf16 %v656_v40, %v652_v39  ;;  %v1041_v33 = vld [vmem:[%s12144_s3 + $0x30] sm:$0xff]  ;;  %v585_v35 = vld [vmem:[%s12143_s0] sm:$0xff]  ;;  %v1044_v40 = vld [vmem:[%s12144_s3 + $0x48] sm:$0xff] }
  0x6d   :  { %5306 = vmatpush1.bf16.msra.mxu1 %v5305_v44  ;;  %5268 = vmatprep.subr.bf16.mxu0 %v5267_v45  ;;  %v649_v44 = vld [vmem:[%s12167_s27 + $0x180] sm:$0xff]  ;;  %v8143_v36 = vpack.c.bf16 %v1040_v26, %v1036_v25  ;;  %v594_v25 = vld [vmem:[%s12143_s0 + $0x48] sm:$0xff]  ;;  %v1069_v26 = vld [vmem:[%s12144_s3 + $0x110] sm:$0xff] }
  0x6e   :  { %5308 = vmatprep.subr.bf16.mxu1 %v5307_v49  ;;  %5036 = vmatprep.mubr.msk.f32.mxu0 %vm685_vm2, %v586_v55  ;;  %v653_v45 = vld [vmem:[%s12167_s27 + $0x1a0] sm:$0xff]  ;;  %v658_v49 = vld [vmem:[%s12167_s27 + $0x1c8] sm:$0xff] }
  0x6f   :  { %5046 = vmatprep.mubr.msk.f32.mxu1 %vm685_vm2, %v586_v55  ;;  %v5289_v53 = vpack.c.bf16 %v653_v45, %v649_v44  ;;  %v5291_v55 = vpack.c.bf16 %v662_v50, %v658_v49  ;;  %v1050_v44 = vld [vmem:[%s12144_s3 + $0x78] sm:$0xff]  ;;  %v1043_v45 = vld [vmem:[%s12144_s3 + $0x40] sm:$0xff]  ;;  %v1049_v49 = vld [vmem:[%s12144_s3 + $0x70] sm:$0xff] }
  0x70   :  { %5270 = vmatpush1.bf16.msra.mxu0 %v5269_v56  ;;  %v657_v56 = vld [vmem:[%s12167_s27 + $0x1c0] sm:$0xff]  ;;  %v587_v50 = vld [vmem:[%s12143_s0 + $0x10] sm:$0xff] }
  0x71   :  { %5310 = vmatpush1.bf16.msra.mxu1 %v5309_v57  ;;  %5272 = vmatprep.subr.bf16.mxu0 %v5271_v58  ;;  %v661_v57 = vld [vmem:[%s12167_s27 + $0x1e0] sm:$0xff]  ;;  %v659_v58 = vld [vmem:[%s12167_s27 + $0x1d0] sm:$0xff] }
  0x72   :  { %5312 = vmatprep.subr.bf16.mxu1 %v5311_v62  ;;  %v670_v62 = vld [vmem:[%s12167_s27 + $0x228] sm:$0xff]  ;;  %v5293_v1 = vpack.c.bf16 %v661_v57, %v657_v56  ;;  %v5333_v2 = vpack.c.bf16 %v663_v60, %v659_v58  ;;  %v1054_v56 = vld [vmem:[%s12144_s3 + $0x98] sm:$0xff]  ;;  %v8203_v57 = vpack.c.bf16 %v1049_v49, %v1045_v48  ;;  %v1055_v60 = vld [vmem:[%s12144_s3 + $0xa0] sm:$0xff] }
  0x73   :  { %v5295_v3 = vpack.c.bf16 %v670_v62, %v666_v61  ;;  %v1058_v58 = vld [vmem:[%s12144_s3 + $0xb8] sm:$0xff]  ;;  %v590_v61 = vld [vmem:[%s12143_s0 + $0x28] sm:$0xff]  ;;  %v1053_v62 = vld [vmem:[%s12144_s3 + $0x90] sm:$0xff] }
  0x74   :  { %5274 = vmatpush1.bf16.msra.mxu0 %v5273_v4  ;;  %v665_v4 = vld [vmem:[%s12167_s27 + $0x200] sm:$0xff] }
  0x75   :  { %5314 = vmatpush1.bf16.msra.mxu1 %v5313_v5  ;;  %5276 = vmatprep.subr.bf16.mxu0 %v5275_v6  ;;  %v669_v5 = vld [vmem:[%s12167_s27 + $0x220] sm:$0xff]  ;;  %v667_v6 = vld [vmem:[%s12167_s27 + $0x210] sm:$0xff] }
  0x76   :  { %5316 = vmatprep.subr.bf16.mxu1 %v5315_v10  ;;  %v678_v10 = vld [vmem:[%s12167_s27 + $0x268] sm:$0xff]  ;;  %v5297_v13 = vpack.c.bf16 %v669_v5, %v665_v4  ;;  %v5337_v14 = vpack.c.bf16 %v671_v8, %v667_v6  ;;  %v1062_v6 = vld [vmem:[%s12144_s3 + $0xd8] sm:$0xff] }
  0x77   :  { %v5299_v15 = vpack.c.bf16 %v678_v10, %v674_v9  ;;  %v1060_v4 = vld [vmem:[%s12144_s3 + $0xc8] sm:$0xff]  ;;  %v1066_v8 = vld [vmem:[%s12144_s3 + $0xf8] sm:$0xff]  ;;  %v1059_v9 = vld [vmem:[%s12144_s3 + $0xc0] sm:$0xff] }
  0x78   :  { %5278 = vmatpush1.bf16.msra.mxu0 %v5277_v16  ;;  %v673_v16 = vld [vmem:[%s12167_s27 + $0x240] sm:$0xff]  ;;  %v1064_v5 = vld [vmem:[%s12144_s3 + $0xe8] sm:$0xff] }
  0x79   :  { %5318 = vmatpush1.bf16.msra.mxu1 %v5317_v17  ;;  %5280 = vmatprep.subr.bf16.mxu0 %v5279_v18  ;;  %v677_v17 = vld [vmem:[%s12167_s27 + $0x260] sm:$0xff]  ;;  %v5339_v18 = vpack.c.bf16 %v680_v12, %v676_v11  ;;  %v592_v11 = vld [vmem:[%s12143_s0 + $0x38] sm:$0xff]  ;;  %v1061_v12 = vld [vmem:[%s12144_s3 + $0xd0] sm:$0xff] }
  0x7a   :  { %5320 = vmatprep.subr.bf16.mxu1 %v5319_v22  ;;  %v5301_v21 = vpack.c.bf16 %v677_v17, %v673_v16  ;;  %v5341_v22 = vpack.c.bf16 %v679_v20, %v675_v19  ;;  %v1063_v10 = vld [vmem:[%s12144_s3 + $0xe0] sm:$0xff]  ;;  %v8276_v16 = vpack.c.bf16 %v1066_v8, %v1062_v6  ;;  %v1072_v19 = vld [vmem:[%s12144_s3 + $0x128] sm:$0xff]  ;;  %v1070_v20 = vld [vmem:[%s12144_s3 + $0x118] sm:$0xff] }
  0x7b   :  { %v8278_v17 = vpack.c.bf16 %v1063_v10, %v1059_v9  ;;  %v1092_v9 = vld [vmem:[%s12144_s3 + $0x1c8] sm:$0xff] }
  0x7c   :  { %5282 = vmatpush1.bf16.msra.mxu0 %v5281_v28  ;;  %v1042_v28 = vld [vmem:[%s12144_s3 + $0x38] sm:$0xff]  ;;  %v1096_v10 = vld [vmem:[%s12144_s3 + $0x1e8] sm:$0xff] }
  0x7d   :  { %5322 = vmatpush1.bf16.msra.mxu1 %v5321_v29  ;;  %5284 = vmatprep.subr.bf16.mxu0 %v5283_v30  ;;  %v1035_v29 = vld [vmem:[%s12144_s3] sm:$0xff]  ;;  %v8145_v37 = vpack.c.bf16 %v1042_v28, %v1038_v27  ;;  %v1073_v27 = vld [vmem:[%s12144_s3 + $0x130] sm:$0xff] }
  0x7e   :  { %5324 = vmatprep.subr.bf16.mxu1 %v5323_v34  ;;  %v1039_v30 = vld [vmem:[%s12144_s3 + $0x20] sm:$0xff]  ;;  %v683_v34 = vld [vmem:[%s12167_s27 + $0x290] sm:$0x3] }
  0x7f   :  { %v8147_v39 = vpack.c.bf16 %v1039_v30, %v1035_v29  ;;  %v593_v28 = vld [vmem:[%s12143_s0 + $0x40] sm:$0xff] }
  0x80   :  { %5286 = vmatpush1.bf16.msra.mxu0 %v5285_v41  ;;  %v1048_v41 = vld [vmem:[%s12144_s3 + $0x68] sm:$0xff] }
  0x81   :  { %5326 = vmatpush1.bf16.msra.mxu1 %v5325_v42  ;;  %5288 = vmatprep.subr.bf16.mxu0 %v5287_v43  ;;  %v1046_v42 = vld [vmem:[%s12144_s3 + $0x58] sm:$0xff]  ;;  %v8159_v43 = vpack.c.bf16 %v1041_v33, %v1037_v32  ;;  %v8184_v51 = vpack.c.bf16 %v1048_v41, %v1044_v40  ;;  %v1076_v32 = vld [vmem:[%s12144_s3 + $0x148] sm:$0xff]  ;;  %v1075_v41 = vld [vmem:[%s12144_s3 + $0x140] sm:$0xff] }
  0x82   :  { %5328 = vmatprep.subr.bf16.mxu1 %v5327_v47  ;;  %v588_v47 = vld [vmem:[%s12143_s0 + $0x18] sm:$0xff]  ;;  %v8188_v52 = vpack.c.bf16 %v1050_v44, %v1046_v42  ;;  %v1080_v33 = vld [vmem:[%s12144_s3 + $0x168] sm:$0xff]  ;;  %v1079_v42 = vld [vmem:[%s12144_s3 + $0x160] sm:$0xff] }
  0x83   :  { %v1082_v40 = vld [vmem:[%s12144_s3 + $0x178] sm:$0xff]  ;;  %v8360_v48 = vpack.c.bf16 %v1080_v33, %v1076_v32 }
  0x84   :  { %5290 = vmatpush1.bf16.msra.mxu0 %v5289_v53  ;;  %v8190_v53 = vpack.c.bf16 %v1047_v46, %v1043_v45  ;;  %v596_v44 = vld [vmem:[%s12143_s0 + $0x58] sm:$0xff]  ;;  %v1077_v45 = vld [vmem:[%s12144_s3 + $0x150] sm:$0xff] }
  0x85   :  { %5330 = vmatpush1.bf16.msra.mxu1 %v5329_v54  ;;  %5292 = vmatprep.subr.bf16.mxu0 %v5291_v55  ;;  %v1052_v54 = vld [vmem:[%s12144_s3 + $0x88] sm:$0xff]  ;;  %v1081_v46 = vld [vmem:[%s12144_s3 + $0x170] sm:$0xff] }
  0x86   :  { %5332 = vmatprep.subr.bf16.mxu1 %v5331_v59  ;;  %v1056_v55 = vld [vmem:[%s12144_s3 + $0xa8] sm:$0xff]  ;;  %v1051_v59 = vld [vmem:[%s12144_s3 + $0x80] sm:$0xff] }
  0x88   :  { %5294 = vmatpush1.bf16.msra.mxu0 %v5293_v1  ;;  %v8228_v1 = vpack.c.bf16 %v1056_v55, %v1052_v54  ;;  %v1084_v54 = vld [vmem:[%s12144_s3 + $0x188] sm:$0xff] }
  0x89   :  { %5334 = vmatpush1.bf16.msra.mxu1 %v5333_v2  ;;  %5296 = vmatprep.subr.bf16.mxu0 %v5295_v3  ;;  %v8232_v2 = vpack.c.bf16 %v1058_v58, %v1054_v56  ;;  %v8234_v3 = vpack.c.bf16 %v1055_v60, %v1051_v59  ;;  %v1088_v55 = vld [vmem:[%s12144_s3 + $0x1a8] sm:$0xff]  ;;  %v1086_v56 = vld [vmem:[%s12144_s3 + $0x198] sm:$0xff]  ;;  %v8379_v58 = vpack.c.bf16 %v1081_v46, %v1077_v45  ;;  %v1083_v60 = vld [vmem:[%s12144_s3 + $0x180] sm:$0xff] }
  0x8a   :  { %5336 = vmatprep.subr.bf16.mxu1 %v5335_v7  ;;  %v8247_v7 = vpack.c.bf16 %v1057_v63, %v1053_v62  ;;  %v1090_v59 = vld [vmem:[%s12144_s3 + $0x1b8] sm:$0xff]  ;;  %v598_v62 = vld [vmem:[%s12143_s0 + $0x68] sm:$0xff]  ;;  %v1085_v63 = vld [vmem:[%s12144_s3 + $0x190] sm:$0xff] }
  0x8b   :  { %v8408_v6 = vpack.c.bf16 %v1090_v59, %v1086_v56 }
  0x8c   :  { %5298 = vmatpush1.bf16.msra.mxu0 %v5297_v13  ;;  %v1065_v13 = vld [vmem:[%s12144_s3 + $0xf0] sm:$0xff] }
  0x8d   :  { %5338 = vmatpush1.bf16.msra.mxu1 %v5337_v14  ;;  %5300 = vmatprep.subr.bf16.mxu0 %v5299_v15  ;;  %v591_v14 = vld [vmem:[%s12143_s0 + $0x30] sm:$0xff]  ;;  %v8272_v15 = vpack.c.bf16 %v1064_v5, %v1060_v4  ;;  %v597_v4 = vld [vmem:[%s12143_s0 + $0x60] sm:$0xff]  ;;  %v8404_v5 = vpack.c.bf16 %v1088_v55, %v1084_v54 }
  0x8e   :  { %5340 = vmatprep.subr.bf16.mxu1 %v5339_v18  ;;  %v1068_v18 = vld [vmem:[%s12144_s3 + $0x108] sm:$0xff] }
  0x8f   :  { %v8316_v29 = vpack.c.bf16 %v1072_v19, %v1068_v18  ;;  %v1095_v18 = vld [vmem:[%s12144_s3 + $0x1e0] sm:$0xff]  ;;  %v600_v19 = vld [vmem:[%s12143_s0 + $0x78] sm:$0xff] }
  0x90   :  { %5302 = vmatpush1.bf16.msra.mxu0 %v5301_v21  ;;  %v8291_v21 = vpack.c.bf16 %v1065_v13, %v1061_v12  ;;  %v1098_v13 = vld [vmem:[%s12144_s3 + $0x1f8] sm:$0xff] }
  0x91   :  { %5342 = vmatpush1.bf16.msra.mxu1 %v5341_v22  ;;  %5034 = vmatprep.subr.msk.mxu0 %vm710_vm3, %v682_v23  ;;  %v1074_v22 = vld [vmem:[%s12144_s3 + $0x138] sm:$0xff]  ;;  %v1067_v23 = vld [vmem:[%s12144_s3 + $0x100] sm:$0xff] }
  0x92   :  { %5044 = vmatprep.subr.msk.mxu1 %vm710_vm3, %v684_v24  ;;  %v1071_v24 = vld [vmem:[%s12144_s3 + $0x120] sm:$0xff]  ;;  %v8320_v30 = vpack.c.bf16 %v1074_v22, %v1070_v20  ;;  %v1093_v20 = vld [vmem:[%s12144_s3 + $0x1d0] sm:$0xff] }
  0x93   :  { %v1097_v22 = vld [vmem:[%s12144_s3 + $0x1f0] sm:$0xff] }
  0x94   :  { %5035 = vmatpush1.msk.msra.mxu0 %vm710_vm3, %v681_v31  ;;  %v8322_v31 = vpack.c.bf16 %v1071_v24, %v1067_v23  ;;  %v599_v23 = vld [vmem:[%s12143_s0 + $0x70] sm:$0xff]  ;;  %v8448_v24 = vpack.c.bf16 %v1096_v10, %v1092_v9 }
  0x95   :  { %5045 = vmatpush1.msk.msra.mxu1 %vm710_vm3, %v683_v34  ;;  %788 = vmatmul.mubr.f32.vlgmr.msra.gmra.mrb[2].mxu0 %v585_v35  ;;  %v1078_v34 = vld [vmem:[%s12144_s3 + $0x158] sm:$0xff] }
  0x96   :  { %901 = vmatmul.mubr.f32.vlgmr.msra.gmra.mrb[2].mxu1 %v585_v35  ;;  %5344 = vmatprep.subr.bf16.mxu0 %v8143_v36  ;;  %v8335_v35 = vpack.c.bf16 %v1073_v27, %v1069_v26  ;;  %v8364_v49 = vpack.c.bf16 %v1082_v40, %v1078_v34  ;;  %v8458_v27 = vpack.c.bf16 %v1097_v22, %v1093_v20  ;;  %v949_v34 = vld [vmem:[%s12145_s4] sm:$0xf] }
  0x97   :  { %5376 = vmatprep.subr.bf16.mxu1 %v8145_v37  ;;  %5346 = vmatpush1.bf16.msra.mxu0 %v8147_v39 }
  0x98   :  { %5378 = vmatpush1.bf16.msra.mxu1 %v8159_v43  ;;  %5037 = vmatprep.mubr.msk.f32.mxu0 %vm685_vm2, %v588_v47 }
  0x99   :  { %5047 = vmatprep.mubr.msk.f32.mxu1 %vm685_vm2, %v588_v47  ;;  %794 = vmatmul.mubr.f32.gmra.mrb[4].mxu0 %v587_v50  ;;  %v595_v47 = vld [vmem:[%s12143_s0 + $0x50] sm:$0xff] }
  0x9a   :  { %907 = vmatmul.mubr.f32.gmra.mrb[4].mxu1 %v587_v50  ;;  %5348 = vmatprep.subr.bf16.mxu0 %v8184_v51  ;;  %v8366_v50 = vpack.c.bf16 %v1079_v42, %v1075_v41 }
  0x9b   :  { %5380 = vmatprep.subr.bf16.mxu1 %v8188_v52  ;;  %5350 = vmatpush1.bf16.msra.mxu0 %v8190_v53 }
  0x9c   :  { %5382 = vmatpush1.bf16.msra.mxu1 %v8203_v57  ;;  %5038 = vmatprep.mubr.msk.f32.mxu0 %vm685_vm2, %v590_v61 }
  0x9d   :  { %5048 = vmatprep.mubr.msk.f32.mxu1 %vm685_vm2, %v590_v61  ;;  %800 = vmatmul.mubr.f32.gmra.mrb[6].mxu0 %v589_v0  ;;  %v1087_v61 = vld [vmem:[%s12144_s3 + $0x1a0] sm:$0xff] }
  0x9e   :  { %913 = vmatmul.mubr.f32.gmra.mrb[6].mxu1 %v589_v0  ;;  %5352 = vmatprep.subr.bf16.mxu0 %v8228_v1  ;;  %v1089_v0 = vld [vmem:[%s12144_s3 + $0x1b0] sm:$0xff]  ;;  %v8410_v8 = vpack.c.bf16 %v1087_v61, %v1083_v60 }
  0x9f   :  { %5384 = vmatprep.subr.bf16.mxu1 %v8232_v2  ;;  %5354 = vmatpush1.bf16.msra.mxu0 %v8234_v3  ;;  %v8423_v12 = vpack.c.bf16 %v1089_v0, %v1085_v63 }
  0xa0   :  { %5386 = vmatpush1.bf16.msra.mxu1 %v8247_v7  ;;  %5039 = vmatprep.mubr.msk.f32.mxu0 %vm685_vm2, %v592_v11 }
  0xa1   :  { %5049 = vmatprep.mubr.msk.f32.mxu1 %vm685_vm2, %v592_v11  ;;  %806 = vmatmul.mubr.f32.gmra.mrb[8].mxu0 %v591_v14  ;;  %v1094_v11 = vld [vmem:[%s12144_s3 + $0x1d8] sm:$0xff] }
  0xa2   :  { %919 = vmatmul.mubr.f32.gmra.mrb[8].mxu1 %v591_v14  ;;  %5356 = vmatprep.subr.bf16.mxu0 %v8272_v15  ;;  %v1091_v14 = vld [vmem:[%s12144_s3 + $0x1c0] sm:$0xff] }
  0xa3   :  { %5388 = vmatprep.subr.bf16.mxu1 %v8276_v16  ;;  %5358 = vmatpush1.bf16.msra.mxu0 %v8278_v17  ;;  %v8454_v26 = vpack.c.bf16 %v1095_v18, %v1091_v14 }
  0xa4   :  { %5390 = vmatpush1.bf16.msra.mxu1 %v8291_v21  ;;  %5040 = vmatprep.mubr.msk.f32.mxu0 %vm685_vm2, %v594_v25 }
  0xa5   :  { %5050 = vmatprep.mubr.msk.f32.mxu1 %vm685_vm2, %v594_v25  ;;  %812 = vmatmul.mubr.f32.gmra.mrb[10].mxu0 %v593_v28  ;;  %v8452_v25 = vpack.c.bf16 %v1098_v13, %v1094_v11 }
  0xa6   :  { %925 = vmatmul.mubr.f32.gmra.mrb[10].mxu1 %v593_v28  ;;  %5360 = vmatprep.subr.bf16.mxu0 %v8316_v29  ;;  %v260_v28 = vlaneseq }
  0xa7   :  { %5392 = vmatprep.subr.bf16.mxu1 %v8320_v30  ;;  %5362 = vmatpush1.bf16.msra.mxu0 %v8322_v31 }
  0xa8   :  { %5394 = vmatpush1.bf16.msra.mxu1 %v8335_v35  ;;  %5041 = vmatprep.mubr.msk.f32.mxu0 %vm685_vm2, %v596_v44  ;;  %v261_v32 = vshrl.u32 %v260_v28, 7 }
  0xa9   :  { %5051 = vmatprep.mubr.msk.f32.mxu1 %vm685_vm2, %v596_v44  ;;  %818 = vmatmul.mubr.f32.gmra.mrb[12].mxu0 %v595_v47 }
  0xaa   :  { %931 = vmatmul.mubr.f32.gmra.mrb[12].mxu1 %v595_v47  ;;  %5364 = vmatprep.subr.bf16.mxu0 %v8360_v48  ;;  %v8505_v33 = vsub.s32 0, %v261_v32  ;;  %v8510_v40 = vsub.s32 1, %v261_v32  ;;  %v8518_v45 = vsub.s32 3, %v261_v32 }
  0xab   :  { %5396 = vmatprep.subr.bf16.mxu1 %v8364_v49  ;;  %5366 = vmatpush1.bf16.msra.mxu0 %v8366_v50 }
  0xac   :  { %5398 = vmatpush1.bf16.msra.mxu1 %v8379_v58  ;;  %5042 = vmatprep.mubr.msk.f32.mxu0 %vm685_vm2, %v598_v62  ;;  %v8513_v41 = vrot.slane %v949_v34, %v8505_v33  ;;  %v8516_v42 = vrot.slane %v949_v34, %v8510_v40  ;;  %v8523_v61 = vrot.slane %v949_v34, %v8518_v45 }
  0xad   :  { %5052 = vmatprep.mubr.msk.f32.mxu1 %vm685_vm2, %v598_v62  ;;  %824 = vmatmul.mubr.f32.gmra.mrb[14].mxu0 %v597_v4  ;;  %v8525_v62 = vsub.s32 2, %v261_v32 }
  0xae   :  { %937 = vmatmul.mubr.f32.gmra.mrb[14].mxu1 %v597_v4  ;;  %5368 = vmatprep.subr.bf16.mxu0 %v8404_v5 }
  0xaf   :  { %5400 = vmatprep.subr.bf16.mxu1 %v8408_v6  ;;  %5370 = vmatpush1.bf16.msra.mxu0 %v8410_v8  ;;  %v8529_v0 = vrot.slane %v949_v34, %v8525_v62 }
  0xb0   :  { %5402 = vmatpush1.bf16.msra.mxu1 %v8423_v12  ;;  %5043 = vmatprep.mubr.msk.f32.mxu0 %vm685_vm2, %v600_v19 }
  0xb1   :  { %5053 = vmatprep.mubr.msk.f32.mxu1 %vm685_vm2, %v600_v19  ;;  %830 = vmatmul.mubr.f32.gmra.mrb[16].mxu0 %v599_v23 }
  0xb2   :  { %943 = vmatmul.mubr.f32.gmra.mrb[16].mxu1 %v599_v23  ;;  %5372 = vmatprep.subr.bf16.mxu0 %v8448_v24 }
  0xb3   :  { %5404 = vmatprep.subr.bf16.mxu1 %v8452_v25  ;;  %5374 = vmatpush1.bf16.msra.mxu0 %v8454_v26 }
  0xb4   :  { %5406 = vmatpush1.bf16.msra.mxu1 %v8458_v27  ;;  %1169 = vmatprep.mubr.f32.mxu0 %v7180_v38 }
  0xb5   :  { %1240 = vmatprep.mubr.f32.mxu1 %v7180_v38  ;;  %5408 = vmatprep.subr.bf16.mxu0 %v8143_v36 }
  0xb6   :  { %1170 = vmatmul.mubr.f32.vlgmr.msra.gmra.mrb[2].mxu0 %v7180_v38  ;;  %5440 = vmatprep.subr.bf16.mxu1 %v8145_v37 }
  0xb7   :  { %1241 = vmatmul.mubr.f32.vlgmr.msra.gmra.mrb[2].mxu1 %v7180_v38  ;;  %5410 = vmatpush1.bf16.msra.mxu0 %v8147_v39 }
  0xb8   :  { %5442 = vmatpush1.bf16.msra.mxu1 %v8159_v43  ;;  %5412 = vmatprep.subr.bf16.mxu0 %v8184_v51 }
  0xb9   :  { %5444 = vmatprep.subr.bf16.mxu1 %v8188_v52  ;;  %1344 = vmatprep.mubr.f32.mxu0 %v7180_v38 }
  0xba   :  { %1415 = vmatprep.mubr.f32.mxu1 %v7180_v38 }
  0xbb   :  { %5414 = vmatpush1.bf16.msra.mxu0 %v8190_v53 }
  0xbc   :  { %5446 = vmatpush1.bf16.msra.mxu1 %v8203_v57  ;;  %5416 = vmatprep.subr.bf16.mxu0 %v8228_v1 }
  0xbd   :  { %5448 = vmatprep.subr.bf16.mxu1 %v8232_v2 }
  0xbf   :  { %5418 = vmatpush1.bf16.msra.mxu0 %v8234_v3 }
  0xc0   :  { %5450 = vmatpush1.bf16.msra.mxu1 %v8247_v7  ;;  %5420 = vmatprep.subr.bf16.mxu0 %v8272_v15 }
  0xc1   :  { %5452 = vmatprep.subr.bf16.mxu1 %v8276_v16 }
  0xc3   :  { %5422 = vmatpush1.bf16.msra.mxu0 %v8278_v17 }
  0xc4   :  { %5454 = vmatpush1.bf16.msra.mxu1 %v8291_v21  ;;  %5424 = vmatprep.subr.bf16.mxu0 %v8316_v29 }
  0xc5   :  { %5456 = vmatprep.subr.bf16.mxu1 %v8320_v30 }
  0xc7   :  { %5426 = vmatpush1.bf16.msra.mxu0 %v8322_v31 }
  0xc8   :  { %5458 = vmatpush1.bf16.msra.mxu1 %v8335_v35  ;;  %5428 = vmatprep.subr.bf16.mxu0 %v8360_v48 }
  0xc9   :  { %5460 = vmatprep.subr.bf16.mxu1 %v8364_v49 }
  0xcb   :  { %5430 = vmatpush1.bf16.msra.mxu0 %v8366_v50 }
  0xcc   :  { %5462 = vmatpush1.bf16.msra.mxu1 %v8379_v58  ;;  %5432 = vmatprep.subr.bf16.mxu0 %v8404_v5 }
  0xcd   :  { %5464 = vmatprep.subr.bf16.mxu1 %v8408_v6 }
  0xcf   :  { %5434 = vmatpush1.bf16.msra.mxu0 %v8410_v8 }
  0xd0   :  { %5466 = vmatpush1.bf16.msra.mxu1 %v8423_v12  ;;  %5436 = vmatprep.subr.bf16.mxu0 %v8448_v24 }
  0xd1   :  { %5468 = vmatprep.subr.bf16.mxu1 %v8452_v25 }
  0xd3   :  { %5438 = vmatpush1.bf16.msra.mxu0 %v8454_v26 }
  0xd4   :  { %5470 = vmatpush1.bf16.msra.mxu1 %v8458_v27  ;;  %5472 = vmatprep.subr.bf16.mxu0 %v8143_v36 }
  0xd5   :  { %5504 = vmatprep.subr.bf16.mxu1 %v8145_v37 }
 0x189   :  { %v1171_v44 = vpop.f32.mrb[2].mxu0 }
 0x18a   :  { %v6947_v46 = vadd.f32 %v1171_v44, %v8513_v41  ;;  %v1242_v47 = vpop.f32.mrb[2].mxu1  ;;  %v1173_v54 = vpop.f32.mrb[3].mxu0 }
 0x18b   :  { %v6948_v55 = vadd.f32 %v1173_v54, %v8516_v42  ;;  %v1244_v56 = vpop.f32.mrb[3].mxu1  ;;  %v6963_v9 = vadd.f32 %v1242_v47, %v8529_v0 }
 0x18c   :  { %v5054_v59 = vmul.f32 -1.442695, %v6947_v46  ;;  %v6964_v63 = vadd.f32 %v1244_v56, %v8523_v61 }
 0x18d   :  { %v5055_v60 = vmul.f32 -1.442695, %v6948_v55 }
 0x18e   :  { %7052 = vpow2.f32 %v5054_v59  ;;  %v5056_v4 = vmul.f32 -1.442695, %v6964_v63 }
 0x18f   :  { %7054 = vpow2.f32 %v5055_v60 }
 0x190   :  { %7056 = vpow2.f32 %v5056_v4 }
 0x191   :  { %7058 = vtanh.f32 %v6963_v9 }
 0x198   :  { %v7053_v10 = vpop.eup %7052 }
 0x199   :  { %v7055_v11 = vpop.eup %7054  ;;  %v1254_v13 = vadd.f32 1.0, %v7053_v10 }
 0x19a   :  { %v1260_v14 = vadd.f32 1.0, %v7055_v11  ;;  %v7057_v18 = vpop.eup %7056 }
 0x19b   :  { %7060 = vrcp.f32 %v1254_v13  ;;  %v7059_v19 = vpop.eup %7058  ;;  %v1267_v28 = vadd.f32 1.0, %v7057_v18 }
 0x19c   :  { %7062 = vrcp.f32 %v1260_v14 }
 0x19d   :  { %7064 = vrcp.f32 %v1267_v28 }
 0x1a5   :  { %v7061_v20 = vpop.eup %7060 }
 0x1a6   :  { %v7063_v22 = vpop.eup %7062  ;;  %v1271_v23 = vmul.f32 %v7061_v20, %v7059_v19 }
 0x1a7   :  { %v1270_v32 = vmul.f32 0.0, %v7063_v22  ;;  %v7065_v44 = vpop.eup %7064 }
 0x1a9   :  { %v8532_v34 = vadd.f32 %v1271_v23, %v1270_v32 }
 0x1ab   :  { %7066 = vtanh.f32 %v8532_v34 }
 0x1b5   :  { %v7067_v46 = vpop.eup %7066 }
 0x1b6   :  { %v1274_v47 = vmul.f32 %v7067_v46, %v7065_v44 }
 0x1b8   :  { %1345 = vmatmul.mubr.f32.vlgmr.msra.gmra.mrb[4].mxu0 %v1274_v47  ;;  %1416 = vmatmul.mubr.f32.vlgmr.msra.gmra.mrb[4].mxu1 %v1274_v47 }
 0x1b9   :  { %5474 = vmatpush1.bf16.msra.mxu0 %v8147_v39  ;;  %5506 = vmatpush1.bf16.msra.mxu1 %v8159_v43 }
 0x1ba   :  { %5476 = vmatprep.subr.bf16.mxu0 %v8184_v51  ;;  %5508 = vmatprep.subr.bf16.mxu1 %v8188_v52 }
 0x1bb   :  { %1519 = vmatprep.mubr.f32.mxu0 %v7180_v38  ;;  %1590 = vmatprep.mubr.f32.mxu1 %v7180_v38 }
 0x1bd   :  { %5478 = vmatpush1.bf16.msra.mxu0 %v8190_v53  ;;  %5510 = vmatpush1.bf16.msra.mxu1 %v8203_v57 }
 0x1be   :  { %5480 = vmatprep.subr.bf16.mxu0 %v8228_v1  ;;  %5512 = vmatprep.subr.bf16.mxu1 %v8232_v2 }
 0x1c1   :  { %5482 = vmatpush1.bf16.msra.mxu0 %v8234_v3  ;;  %5514 = vmatpush1.bf16.msra.mxu1 %v8247_v7 }
 0x1c2   :  { %5484 = vmatprep.subr.bf16.mxu0 %v8272_v15  ;;  %5516 = vmatprep.subr.bf16.mxu1 %v8276_v16 }
 0x1c5   :  { %5486 = vmatpush1.bf16.msra.mxu0 %v8278_v17  ;;  %5518 = vmatpush1.bf16.msra.mxu1 %v8291_v21 }
 0x1c6   :  { %5488 = vmatprep.subr.bf16.mxu0 %v8316_v29  ;;  %5520 = vmatprep.subr.bf16.mxu1 %v8320_v30 }
 0x1c9   :  { %5490 = vmatpush1.bf16.msra.mxu0 %v8322_v31  ;;  %5522 = vmatpush1.bf16.msra.mxu1 %v8335_v35 }
 0x1ca   :  { %5492 = vmatprep.subr.bf16.mxu0 %v8360_v48  ;;  %5524 = vmatprep.subr.bf16.mxu1 %v8364_v49 }
 0x1cd   :  { %5494 = vmatpush1.bf16.msra.mxu0 %v8366_v50  ;;  %5526 = vmatpush1.bf16.msra.mxu1 %v8379_v58 }
 0x1ce   :  { %5496 = vmatprep.subr.bf16.mxu0 %v8404_v5  ;;  %5528 = vmatprep.subr.bf16.mxu1 %v8408_v6 }
 0x1d1   :  { %5498 = vmatpush1.bf16.msra.mxu0 %v8410_v8  ;;  %5530 = vmatpush1.bf16.msra.mxu1 %v8423_v12 }
 0x1d2   :  { %5500 = vmatprep.subr.bf16.mxu0 %v8448_v24  ;;  %5532 = vmatprep.subr.bf16.mxu1 %v8452_v25 }
 0x1d5   :  { %5502 = vmatpush1.bf16.msra.mxu0 %v8454_v26  ;;  %5534 = vmatpush1.bf16.msra.mxu1 %v8458_v27 }
 0x1d6   :  { %5536 = vmatprep.subr.bf16.mxu0 %v8143_v36  ;;  %5568 = vmatprep.subr.bf16.mxu1 %v8145_v37 }
 0x28b   :  { %v1346_v54 = vpop.f32.mrb[4].mxu0  ;;  %v1417_v55 = vpop.f32.mrb[4].mxu1 }
 0x28c   :  { %v6949_v56 = vadd.f32 %v1346_v54, %v8513_v41  ;;  %v1348_v59 = vpop.f32.mrb[5].mxu0  ;;  %v1419_v60 = vpop.f32.mrb[5].mxu1  ;;  %v6965_v13 = vadd.f32 %v1417_v55, %v8529_v0 }
 0x28d   :  { %v6950_v63 = vadd.f32 %v1348_v59, %v8516_v42  ;;  %v6966_v10 = vadd.f32 %v1419_v60, %v8523_v61 }
 0x28e   :  { %v5057_v4 = vmul.f32 -1.442695, %v6949_v56 }
 0x28f   :  { %v5058_v9 = vmul.f32 -1.442695, %v6950_v63  ;;  %v5059_v11 = vmul.f32 -1.442695, %v6966_v10 }
 0x290   :  { %7068 = vpow2.f32 %v5057_v4 }
 0x291   :  { %7070 = vpow2.f32 %v5058_v9 }
 0x292   :  { %7072 = vpow2.f32 %v5059_v11 }
 0x293   :  { %7074 = vtanh.f32 %v6965_v13 }
 0x29a   :  { %v7069_v14 = vpop.eup %7068 }
 0x29b   :  { %v7071_v18 = vpop.eup %7070  ;;  %v1429_v19 = vadd.f32 1.0, %v7069_v14 }
 0x29c   :  { %v1435_v20 = vadd.f32 1.0, %v7071_v18  ;;  %v7073_v22 = vpop.eup %7072 }
 0x29d   :  { %7076 = vrcp.f32 %v1429_v19  ;;  %v7075_v23 = vpop.eup %7074  ;;  %v1442_v46 = vadd.f32 1.0, %v7073_v22 }
 0x29e   :  { %7078 = vrcp.f32 %v1435_v20 }
 0x29f   :  { %7080 = vrcp.f32 %v1442_v46 }
 0x2a7   :  { %v7077_v28 = vpop.eup %7076 }
 0x2a8   :  { %v7079_v32 = vpop.eup %7078  ;;  %v1446_v44 = vmul.f32 %v7077_v28, %v7075_v23 }
 0x2a9   :  { %v1445_v47 = vmul.f32 %v7079_v32, %v8532_v34  ;;  %v7081_v55 = vpop.eup %7080 }
 0x2ab   :  { %v8574_v54 = vadd.f32 %v1446_v44, %v1445_v47 }
 0x2ad   :  { %7082 = vtanh.f32 %v8574_v54 }
 0x2b7   :  { %v7083_v56 = vpop.eup %7082 }
 0x2b8   :  { %v1449_v59 = vmul.f32 %v7083_v56, %v7081_v55 }
 0x2ba   :  { %1520 = vmatmul.mubr.f32.vlgmr.msra.gmra.mrb[6].mxu0 %v1449_v59  ;;  %1591 = vmatmul.mubr.f32.vlgmr.msra.gmra.mrb[6].mxu1 %v1449_v59 }
 0x2bb   :  { %5538 = vmatpush1.bf16.msra.mxu0 %v8147_v39  ;;  %5570 = vmatpush1.bf16.msra.mxu1 %v8159_v43 }
 0x2bc   :  { %5540 = vmatprep.subr.bf16.mxu0 %v8184_v51  ;;  %5572 = vmatprep.subr.bf16.mxu1 %v8188_v52 }
 0x2bd   :  { %1694 = vmatprep.mubr.f32.mxu0 %v7180_v38  ;;  %1765 = vmatprep.mubr.f32.mxu1 %v7180_v38 }
 0x2bf   :  { %5542 = vmatpush1.bf16.msra.mxu0 %v8190_v53  ;;  %5574 = vmatpush1.bf16.msra.mxu1 %v8203_v57 }
 0x2c0   :  { %5544 = vmatprep.subr.bf16.mxu0 %v8228_v1  ;;  %5576 = vmatprep.subr.bf16.mxu1 %v8232_v2 }
 0x2c3   :  { %5546 = vmatpush1.bf16.msra.mxu0 %v8234_v3  ;;  %5578 = vmatpush1.bf16.msra.mxu1 %v8247_v7 }
 0x2c4   :  { %5548 = vmatprep.subr.bf16.mxu0 %v8272_v15  ;;  %5580 = vmatprep.subr.bf16.mxu1 %v8276_v16 }
 0x2c7   :  { %5550 = vmatpush1.bf16.msra.mxu0 %v8278_v17  ;;  %5582 = vmatpush1.bf16.msra.mxu1 %v8291_v21 }
 0x2c8   :  { %5552 = vmatprep.subr.bf16.mxu0 %v8316_v29  ;;  %5584 = vmatprep.subr.bf16.mxu1 %v8320_v30 }
 0x2cb   :  { %5554 = vmatpush1.bf16.msra.mxu0 %v8322_v31  ;;  %5586 = vmatpush1.bf16.msra.mxu1 %v8335_v35 }
 0x2cc   :  { %5556 = vmatprep.subr.bf16.mxu0 %v8360_v48  ;;  %5588 = vmatprep.subr.bf16.mxu1 %v8364_v49 }
 0x2cf   :  { %5558 = vmatpush1.bf16.msra.mxu0 %v8366_v50  ;;  %5590 = vmatpush1.bf16.msra.mxu1 %v8379_v58 }
 0x2d0   :  { %5560 = vmatprep.subr.bf16.mxu0 %v8404_v5  ;;  %5592 = vmatprep.subr.bf16.mxu1 %v8408_v6 }
 0x2d3   :  { %5562 = vmatpush1.bf16.msra.mxu0 %v8410_v8  ;;  %5594 = vmatpush1.bf16.msra.mxu1 %v8423_v12 }
 0x2d4   :  { %5564 = vmatprep.subr.bf16.mxu0 %v8448_v24  ;;  %5596 = vmatprep.subr.bf16.mxu1 %v8452_v25 }
 0x2d7   :  { %5566 = vmatpush1.bf16.msra.mxu0 %v8454_v26  ;;  %5598 = vmatpush1.bf16.msra.mxu1 %v8458_v27 }
 0x2d8   :  { %5600 = vmatprep.subr.bf16.mxu0 %v8143_v36  ;;  %5632 = vmatprep.subr.bf16.mxu1 %v8145_v37 }
 0x38d   :  { %v1521_v34 = vpop.f32.mrb[6].mxu0  ;;  %v1592_v60 = vpop.f32.mrb[6].mxu1 }
 0x38e   :  { %v6951_v63 = vadd.f32 %v1521_v34, %v8513_v41  ;;  %v1523_v4 = vpop.f32.mrb[7].mxu0  ;;  %v1594_v9 = vpop.f32.mrb[7].mxu1  ;;  %v6967_v19 = vadd.f32 %v1592_v60, %v8529_v0 }
 0x38f   :  { %v6952_v10 = vadd.f32 %v1523_v4, %v8516_v42  ;;  %v6968_v14 = vadd.f32 %v1594_v9, %v8523_v61 }
 0x390   :  { %v5060_v11 = vmul.f32 -1.442695, %v6951_v63 }
 0x391   :  { %v5061_v13 = vmul.f32 -1.442695, %v6952_v10  ;;  %v5062_v18 = vmul.f32 -1.442695, %v6968_v14 }
 0x392   :  { %7084 = vpow2.f32 %v5060_v11 }
 0x393   :  { %7086 = vpow2.f32 %v5061_v13 }
 0x394   :  { %7088 = vpow2.f32 %v5062_v18 }
 0x395   :  { %7090 = vtanh.f32 %v6967_v19 }
 0x39c   :  { %v7085_v20 = vpop.eup %7084 }
 0x39d   :  { %v7087_v22 = vpop.eup %7086  ;;  %v1604_v23 = vadd.f32 1.0, %v7085_v20 }
 0x39e   :  { %v1610_v28 = vadd.f32 1.0, %v7087_v22  ;;  %v7089_v32 = vpop.eup %7088 }
 0x39f   :  { %7092 = vrcp.f32 %v1604_v23  ;;  %v7091_v44 = vpop.eup %7090  ;;  %v1617_v56 = vadd.f32 1.0, %v7089_v32 }
 0x3a0   :  { %7094 = vrcp.f32 %v1610_v28 }
 0x3a1   :  { %7096 = vrcp.f32 %v1617_v56 }
 0x3a9   :  { %v7093_v46 = vpop.eup %7092 }
 0x3aa   :  { %v7095_v47 = vpop.eup %7094  ;;  %v1621_v55 = vmul.f32 %v7093_v46, %v7091_v44 }
 0x3ab   :  { %v1620_v59 = vmul.f32 %v7095_v47, %v8574_v54  ;;  %v7097_v60 = vpop.eup %7096 }
 0x3ad   :  { %v8616_v34 = vadd.f32 %v1621_v55, %v1620_v59 }
 0x3af   :  { %7098 = vtanh.f32 %v8616_v34 }
 0x3b9   :  { %v7099_v63 = vpop.eup %7098 }
 0x3ba   :  { %v1624_v4 = vmul.f32 %v7099_v63, %v7097_v60 }
 0x3bc   :  { %1695 = vmatmul.mubr.f32.vlgmr.msra.gmra.mrb[8].mxu0 %v1624_v4  ;;  %1766 = vmatmul.mubr.f32.vlgmr.msra.gmra.mrb[8].mxu1 %v1624_v4 }
 0x3bd   :  { %5602 = vmatpush1.bf16.msra.mxu0 %v8147_v39  ;;  %5634 = vmatpush1.bf16.msra.mxu1 %v8159_v43 }
 0x3be   :  { %5604 = vmatprep.subr.bf16.mxu0 %v8184_v51  ;;  %5636 = vmatprep.subr.bf16.mxu1 %v8188_v52 }
 0x3bf   :  { %1869 = vmatprep.mubr.f32.mxu0 %v7180_v38  ;;  %1940 = vmatprep.mubr.f32.mxu1 %v7180_v38 }
 0x3c1   :  { %5606 = vmatpush1.bf16.msra.mxu0 %v8190_v53  ;;  %5638 = vmatpush1.bf16.msra.mxu1 %v8203_v57 }
 0x3c2   :  { %5608 = vmatprep.subr.bf16.mxu0 %v8228_v1  ;;  %5640 = vmatprep.subr.bf16.mxu1 %v8232_v2 }
 0x3c5   :  { %5610 = vmatpush1.bf16.msra.mxu0 %v8234_v3  ;;  %5642 = vmatpush1.bf16.msra.mxu1 %v8247_v7 }
 0x3c6   :  { %5612 = vmatprep.subr.bf16.mxu0 %v8272_v15  ;;  %5644 = vmatprep.subr.bf16.mxu1 %v8276_v16 }
 0x3c9   :  { %5614 = vmatpush1.bf16.msra.mxu0 %v8278_v17  ;;  %5646 = vmatpush1.bf16.msra.mxu1 %v8291_v21 }
 0x3ca   :  { %5616 = vmatprep.subr.bf16.mxu0 %v8316_v29  ;;  %5648 = vmatprep.subr.bf16.mxu1 %v8320_v30 }
 0x3cd   :  { %5618 = vmatpush1.bf16.msra.mxu0 %v8322_v31  ;;  %5650 = vmatpush1.bf16.msra.mxu1 %v8335_v35 }
 0x3ce   :  { %5620 = vmatprep.subr.bf16.mxu0 %v8360_v48  ;;  %5652 = vmatprep.subr.bf16.mxu1 %v8364_v49 }
 0x3d1   :  { %5622 = vmatpush1.bf16.msra.mxu0 %v8366_v50  ;;  %5654 = vmatpush1.bf16.msra.mxu1 %v8379_v58 }
 0x3d2   :  { %5624 = vmatprep.subr.bf16.mxu0 %v8404_v5  ;;  %5656 = vmatprep.subr.bf16.mxu1 %v8408_v6 }
 0x3d5   :  { %5626 = vmatpush1.bf16.msra.mxu0 %v8410_v8  ;;  %5658 = vmatpush1.bf16.msra.mxu1 %v8423_v12 }
 0x3d6   :  { %5628 = vmatprep.subr.bf16.mxu0 %v8448_v24  ;;  %5660 = vmatprep.subr.bf16.mxu1 %v8452_v25 }
 0x3d9   :  { %5630 = vmatpush1.bf16.msra.mxu0 %v8454_v26  ;;  %5662 = vmatpush1.bf16.msra.mxu1 %v8458_v27 }
 0x3da   :  { %5664 = vmatprep.subr.bf16.mxu0 %v8143_v36  ;;  %5696 = vmatprep.subr.bf16.mxu1 %v8145_v37 }
 0x48f   :  { %v1696_v54 = vpop.f32.mrb[8].mxu0  ;;  %v1767_v9 = vpop.f32.mrb[8].mxu1 }
 0x490   :  { %v6953_v10 = vadd.f32 %v1696_v54, %v8513_v41  ;;  %v1698_v11 = vpop.f32.mrb[9].mxu0  ;;  %v1769_v13 = vpop.f32.mrb[9].mxu1  ;;  %v6969_v23 = vadd.f32 %v1767_v9, %v8529_v0 }
 0x491   :  { %v6954_v14 = vadd.f32 %v1698_v11, %v8516_v42  ;;  %v6970_v20 = vadd.f32 %v1769_v13, %v8523_v61 }
 0x492   :  { %v5063_v18 = vmul.f32 -1.442695, %v6953_v10 }
 0x493   :  { %v5064_v19 = vmul.f32 -1.442695, %v6954_v14  ;;  %v5065_v22 = vmul.f32 -1.442695, %v6970_v20 }
 0x494   :  { %7100 = vpow2.f32 %v5063_v18 }
 0x495   :  { %7102 = vpow2.f32 %v5064_v19 }
 0x496   :  { %7104 = vpow2.f32 %v5065_v22 }
 0x497   :  { %7106 = vtanh.f32 %v6969_v23 }
 0x49e   :  { %v7101_v28 = vpop.eup %7100 }
 0x49f   :  { %v7103_v32 = vpop.eup %7102  ;;  %v1779_v44 = vadd.f32 1.0, %v7101_v28 }
 0x4a0   :  { %v1785_v46 = vadd.f32 1.0, %v7103_v32  ;;  %v7105_v47 = vpop.eup %7104 }
 0x4a1   :  { %7108 = vrcp.f32 %v1779_v44  ;;  %v7107_v55 = vpop.eup %7106  ;;  %v1792_v63 = vadd.f32 1.0, %v7105_v47 }
 0x4a2   :  { %7110 = vrcp.f32 %v1785_v46 }
 0x4a3   :  { %7112 = vrcp.f32 %v1792_v63 }
 0x4ab   :  { %v7109_v56 = vpop.eup %7108 }
 0x4ac   :  { %v7111_v59 = vpop.eup %7110  ;;  %v1796_v60 = vmul.f32 %v7109_v56, %v7107_v55 }
 0x4ad   :  { %v1795_v4 = vmul.f32 %v7111_v59, %v8616_v34  ;;  %v7113_v9 = vpop.eup %7112 }
 0x4af   :  { %v8658_v54 = vadd.f32 %v1796_v60, %v1795_v4 }
 0x4b1   :  { %7114 = vtanh.f32 %v8658_v54 }
 0x4bb   :  { %v7115_v10 = vpop.eup %7114 }
 0x4bc   :  { %v1799_v11 = vmul.f32 %v7115_v10, %v7113_v9 }
 0x4be   :  { %1870 = vmatmul.mubr.f32.vlgmr.msra.gmra.mrb[10].mxu0 %v1799_v11  ;;  %1941 = vmatmul.mubr.f32.vlgmr.msra.gmra.mrb[10].mxu1 %v1799_v11 }
 0x4bf   :  { %5666 = vmatpush1.bf16.msra.mxu0 %v8147_v39  ;;  %5698 = vmatpush1.bf16.msra.mxu1 %v8159_v43 }
 0x4c0   :  { %5668 = vmatprep.subr.bf16.mxu0 %v8184_v51  ;;  %5700 = vmatprep.subr.bf16.mxu1 %v8188_v52 }
 0x4c1   :  { %2044 = vmatprep.mubr.f32.mxu0 %v7180_v38  ;;  %2115 = vmatprep.mubr.f32.mxu1 %v7180_v38 }
 0x4c3   :  { %5670 = vmatpush1.bf16.msra.mxu0 %v8190_v53  ;;  %5702 = vmatpush1.bf16.msra.mxu1 %v8203_v57 }
 0x4c4   :  { %5672 = vmatprep.subr.bf16.mxu0 %v8228_v1  ;;  %5704 = vmatprep.subr.bf16.mxu1 %v8232_v2 }
 0x4c7   :  { %5674 = vmatpush1.bf16.msra.mxu0 %v8234_v3  ;;  %5706 = vmatpush1.bf16.msra.mxu1 %v8247_v7 }
 0x4c8   :  { %5676 = vmatprep.subr.bf16.mxu0 %v8272_v15  ;;  %5708 = vmatprep.subr.bf16.mxu1 %v8276_v16 }
 0x4cb   :  { %5678 = vmatpush1.bf16.msra.mxu0 %v8278_v17  ;;  %5710 = vmatpush1.bf16.msra.mxu1 %v8291_v21 }
 0x4cc   :  { %5680 = vmatprep.subr.bf16.mxu0 %v8316_v29  ;;  %5712 = vmatprep.subr.bf16.mxu1 %v8320_v30 }
 0x4cf   :  { %5682 = vmatpush1.bf16.msra.mxu0 %v8322_v31  ;;  %5714 = vmatpush1.bf16.msra.mxu1 %v8335_v35 }
 0x4d0   :  { %5684 = vmatprep.subr.bf16.mxu0 %v8360_v48  ;;  %5716 = vmatprep.subr.bf16.mxu1 %v8364_v49 }
 0x4d3   :  { %5686 = vmatpush1.bf16.msra.mxu0 %v8366_v50  ;;  %5718 = vmatpush1.bf16.msra.mxu1 %v8379_v58 }
 0x4d4   :  { %5688 = vmatprep.subr.bf16.mxu0 %v8404_v5  ;;  %5720 = vmatprep.subr.bf16.mxu1 %v8408_v6 }
 0x4d7   :  { %5690 = vmatpush1.bf16.msra.mxu0 %v8410_v8  ;;  %5722 = vmatpush1.bf16.msra.mxu1 %v8423_v12 }
 0x4d8   :  { %5692 = vmatprep.subr.bf16.mxu0 %v8448_v24  ;;  %5724 = vmatprep.subr.bf16.mxu1 %v8452_v25 }
 0x4db   :  { %5694 = vmatpush1.bf16.msra.mxu0 %v8454_v26  ;;  %5726 = vmatpush1.bf16.msra.mxu1 %v8458_v27 }
 0x4dc   :  { %5728 = vmatprep.subr.bf16.mxu0 %v8143_v36  ;;  %5760 = vmatprep.subr.bf16.mxu1 %v8145_v37 }
 0x591   :  { %v1871_v34 = vpop.f32.mrb[10].mxu0  ;;  %v1942_v13 = vpop.f32.mrb[10].mxu1 }
 0x592   :  { %v6955_v14 = vadd.f32 %v1871_v34, %v8513_v41  ;;  %v1873_v18 = vpop.f32.mrb[11].mxu0  ;;  %v1944_v19 = vpop.f32.mrb[11].mxu1  ;;  %v6971_v44 = vadd.f32 %v1942_v13, %v8529_v0 }
 0x593   :  { %v6956_v20 = vadd.f32 %v1873_v18, %v8516_v42  ;;  %v6972_v28 = vadd.f32 %v1944_v19, %v8523_v61 }
 0x594   :  { %v5066_v22 = vmul.f32 -1.442695, %v6955_v14 }
 0x595   :  { %v5067_v23 = vmul.f32 -1.442695, %v6956_v20  ;;  %v5068_v32 = vmul.f32 -1.442695, %v6972_v28 }
 0x596   :  { %7116 = vpow2.f32 %v5066_v22 }
 0x597   :  { %7118 = vpow2.f32 %v5067_v23 }
 0x598   :  { %7120 = vpow2.f32 %v5068_v32 }
 0x599   :  { %7122 = vtanh.f32 %v6971_v44 }
 0x5a0   :  { %v7117_v46 = vpop.eup %7116 }
 0x5a1   :  { %v7119_v47 = vpop.eup %7118  ;;  %v1954_v55 = vadd.f32 1.0, %v7117_v46 }
 0x5a2   :  { %v1960_v56 = vadd.f32 1.0, %v7119_v47  ;;  %v7121_v59 = vpop.eup %7120 }
 0x5a3   :  { %7124 = vrcp.f32 %v1954_v55  ;;  %v7123_v60 = vpop.eup %7122  ;;  %v1967_v10 = vadd.f32 1.0, %v7121_v59 }
 0x5a4   :  { %7126 = vrcp.f32 %v1960_v56 }
 0x5a5   :  { %7128 = vrcp.f32 %v1967_v10 }
 0x5ad   :  { %v7125_v63 = vpop.eup %7124 }
 0x5ae   :  { %v7127_v4 = vpop.eup %7126  ;;  %v1971_v9 = vmul.f32 %v7125_v63, %v7123_v60 }
 0x5af   :  { %v1970_v11 = vmul.f32 %v7127_v4, %v8658_v54  ;;  %v7129_v13 = vpop.eup %7128 }
 0x5b1   :  { %v8700_v34 = vadd.f32 %v1971_v9, %v1970_v11 }
 0x5b3   :  { %7130 = vtanh.f32 %v8700_v34 }
 0x5bd   :  { %v7131_v14 = vpop.eup %7130 }
 0x5be   :  { %v1974_v18 = vmul.f32 %v7131_v14, %v7129_v13 }
 0x5c0   :  { %2045 = vmatmul.mubr.f32.vlgmr.msra.gmra.mrb[12].mxu0 %v1974_v18  ;;  %2116 = vmatmul.mubr.f32.vlgmr.msra.gmra.mrb[12].mxu1 %v1974_v18 }
 0x5c1   :  { %5730 = vmatpush1.bf16.msra.mxu0 %v8147_v39  ;;  %5762 = vmatpush1.bf16.msra.mxu1 %v8159_v43 }
 0x5c2   :  { %5732 = vmatprep.subr.bf16.mxu0 %v8184_v51  ;;  %5764 = vmatprep.subr.bf16.mxu1 %v8188_v52 }
 0x5c3   :  { %2219 = vmatprep.mubr.f32.mxu0 %v7180_v38  ;;  %2290 = vmatprep.mubr.f32.mxu1 %v7180_v38 }
 0x5c5   :  { %5734 = vmatpush1.bf16.msra.mxu0 %v8190_v53  ;;  %5766 = vmatpush1.bf16.msra.mxu1 %v8203_v57 }
 0x5c6   :  { %5736 = vmatprep.subr.bf16.mxu0 %v8228_v1  ;;  %5768 = vmatprep.subr.bf16.mxu1 %v8232_v2 }
 0x5c9   :  { %5738 = vmatpush1.bf16.msra.mxu0 %v8234_v3  ;;  %5770 = vmatpush1.bf16.msra.mxu1 %v8247_v7 }
 0x5ca   :  { %5740 = vmatprep.subr.bf16.mxu0 %v8272_v15  ;;  %5772 = vmatprep.subr.bf16.mxu1 %v8276_v16 }
 0x5cd   :  { %5742 = vmatpush1.bf16.msra.mxu0 %v8278_v17  ;;  %5774 = vmatpush1.bf16.msra.mxu1 %v8291_v21 }
 0x5ce   :  { %5744 = vmatprep.subr.bf16.mxu0 %v8316_v29  ;;  %5776 = vmatprep.subr.bf16.mxu1 %v8320_v30 }
 0x5d1   :  { %5746 = vmatpush1.bf16.msra.mxu0 %v8322_v31  ;;  %5778 = vmatpush1.bf16.msra.mxu1 %v8335_v35 }
 0x5d2   :  { %5748 = vmatprep.subr.bf16.mxu0 %v8360_v48  ;;  %5780 = vmatprep.subr.bf16.mxu1 %v8364_v49 }
 0x5d5   :  { %5750 = vmatpush1.bf16.msra.mxu0 %v8366_v50  ;;  %5782 = vmatpush1.bf16.msra.mxu1 %v8379_v58 }
 0x5d6   :  { %5752 = vmatprep.subr.bf16.mxu0 %v8404_v5  ;;  %5784 = vmatprep.subr.bf16.mxu1 %v8408_v6 }
 0x5d9   :  { %5754 = vmatpush1.bf16.msra.mxu0 %v8410_v8  ;;  %5786 = vmatpush1.bf16.msra.mxu1 %v8423_v12 }
 0x5da   :  { %5756 = vmatprep.subr.bf16.mxu0 %v8448_v24  ;;  %5788 = vmatprep.subr.bf16.mxu1 %v8452_v25 }
 0x5dd   :  { %5758 = vmatpush1.bf16.msra.mxu0 %v8454_v26  ;;  %5790 = vmatpush1.bf16.msra.mxu1 %v8458_v27 }
 0x5de   :  { %5792 = vmatprep.subr.bf16.mxu0 %v8143_v36  ;;  %5824 = vmatprep.subr.bf16.mxu1 %v8145_v37 }
 0x693   :  { %v2046_v54 = vpop.f32.mrb[12].mxu0  ;;  %v2117_v19 = vpop.f32.mrb[12].mxu1 }
 0x694   :  { %v6957_v20 = vadd.f32 %v2046_v54, %v8513_v41  ;;  %v2048_v22 = vpop.f32.mrb[13].mxu0  ;;  %v2119_v23 = vpop.f32.mrb[13].mxu1  ;;  %v6973_v55 = vadd.f32 %v2117_v19, %v8529_v0 }
 0x695   :  { %v6958_v28 = vadd.f32 %v2048_v22, %v8516_v42  ;;  %v6974_v46 = vadd.f32 %v2119_v23, %v8523_v61 }
 0x696   :  { %v5069_v32 = vmul.f32 -1.442695, %v6957_v20  ;;  %v2509_v20 = vld [vmem:[%s12146_s5 + $0x20] sm:$0xff] }
 0x697   :  { %v5070_v44 = vmul.f32 -1.442695, %v6958_v28  ;;  %v5071_v47 = vmul.f32 -1.442695, %v6974_v46  ;;  %v2507_v28 = vld [vmem:[%s12146_s5 + $0x10] sm:$0xff]  ;;  %v2514_v46 = vld [vmem:[%s12146_s5 + $0x48] sm:$0xff] }
 0x698   :  { %7132 = vpow2.f32 %v5069_v32  ;;  %v2511_v32 = vld [vmem:[%s12146_s5 + $0x30] sm:$0xff] }
 0x699   :  { %7134 = vpow2.f32 %v5070_v44  ;;  %v5889_v44 = vpack.c.bf16 %v2511_v32, %v2507_v28  ;;  %v2552_v28 = vld [vmem:[%s12146_s5 + $0x178] sm:$0xff]  ;;  %v2545_v32 = vld [vmem:[%s12146_s5 + $0x140] sm:$0xff] }
 0x69a   :  { %7136 = vpow2.f32 %v5071_v47  ;;  %v2518_v47 = vld [vmem:[%s12146_s5 + $0x68] sm:$0xff] }
 0x69b   :  { %7138 = vtanh.f32 %v6973_v55  ;;  %v2516_v55 = vld [vmem:[%s12146_s5 + $0x58] sm:$0xff] }
 0x6a2   :  { %v7133_v36 = vpop.eup %7132 }
 0x6a3   :  { %v7135_v56 = vpop.eup %7134  ;;  %v2129_v37 = vadd.f32 1.0, %v7133_v36  ;;  %v5859_v36 = vpack.c.bf16 %v2518_v47, %v2514_v46 }
 0x6a4   :  { %v2135_v59 = vadd.f32 1.0, %v7135_v56  ;;  %v7137_v60 = vpop.eup %7136  ;;  %v2520_v56 = vld [vmem:[%s12146_s5 + $0x78] sm:$0xff] }
 0x6a5   :  { %7140 = vrcp.f32 %v2129_v37  ;;  %v7139_v63 = vpop.eup %7138  ;;  %v2142_v11 = vadd.f32 1.0, %v7137_v60  ;;  %v2513_v37 = vld [vmem:[%s12146_s5 + $0x40] sm:$0xff]  ;;  %v5891_v60 = vpack.c.bf16 %v2520_v56, %v2516_v55  ;;  %v2547_v55 = vld [vmem:[%s12146_s5 + $0x150] sm:$0xff]  ;;  %v2554_v56 = vld [vmem:[%s12146_s5 + $0x188] sm:$0xff] }
 0x6a6   :  { %7142 = vrcp.f32 %v2135_v59  ;;  %v2517_v59 = vld [vmem:[%s12146_s5 + $0x60] sm:$0xff] }
 0x6a7   :  { %7144 = vrcp.f32 %v2142_v11  ;;  %v2522_v11 = vld [vmem:[%s12146_s5 + $0x88] sm:$0xff] }
 0x6af   :  { %v7141_v4 = vpop.eup %7140 }
 0x6b0   :  { %v7143_v9 = vpop.eup %7142  ;;  %v2146_v10 = vmul.f32 %v7141_v4, %v7139_v63  ;;  %v5861_v63 = vpack.c.bf16 %v2517_v59, %v2513_v37  ;;  %v2515_v4 = vld [vmem:[%s12146_s5 + $0x50] sm:$0xff]  ;;  %v2558_v59 = vld [vmem:[%s12146_s5 + $0x1a8] sm:$0xff] }
 0x6b1   :  { %v2145_v13 = vmul.f32 %v7143_v9, %v8700_v34  ;;  %v7145_v18 = vpop.eup %7144  ;;  %v2512_v34 = vld [vmem:[%s12146_s5 + $0x38] sm:$0xff]  ;;  %v2519_v9 = vld [vmem:[%s12146_s5 + $0x70] sm:$0xff] }
 0x6b3   :  { %v8742_v14 = vadd.f32 %v2146_v10, %v2145_v13  ;;  %v5893_v10 = vpack.c.bf16 %v2519_v9, %v2515_v4  ;;  %v2526_v13 = vld [vmem:[%s12146_s5 + $0xa8] sm:$0xff]  ;;  %v5879_v4 = vpack.c.bf16 %v2558_v59, %v2554_v56  ;;  %v2730_v56 = vld [vmem:[%s12147_s8 + $0x58] sm:$0xff] }
 0x6b5   :  { %7146 = vtanh.f32 %v8742_v14 }
 0x6bf   :  { %v7147_v54 = vpop.eup %7146 }
 0x6c0   :  { %v2149_v19 = vmul.f32 %v7147_v54, %v7145_v18  ;;  %v5863_v18 = vpack.c.bf16 %v2526_v13, %v2522_v11  ;;  %v2528_v54 = vld [vmem:[%s12146_s5 + $0xb8] sm:$0xff]  ;;  %v2557_v11 = vld [vmem:[%s12146_s5 + $0x1a0] sm:$0xff]  ;;  %v2555_v13 = vld [vmem:[%s12146_s5 + $0x190] sm:$0xff] }
 0x6c2   :  { %2220 = vmatmul.mubr.f32.vlgmr.msra.gmra.mrb[14].mxu0 %v2149_v19  ;;  %2291 = vmatmul.mubr.f32.vlgmr.msra.gmra.mrb[14].mxu1 %v2149_v19  ;;  %v2521_v19 = vld [vmem:[%s12146_s5 + $0x80] sm:$0xff] }
 0x6c3   :  { %5794 = vmatpush1.bf16.msra.mxu0 %v8147_v39  ;;  %5826 = vmatpush1.bf16.msra.mxu1 %v8159_v43 }
 0x6c4   :  { %5796 = vmatprep.subr.bf16.mxu0 %v8184_v51  ;;  %5828 = vmatprep.subr.bf16.mxu1 %v8188_v52 }
 0x6c5   :  { %2394 = vmatprep.mubr.f32.mxu0 %v7180_v38  ;;  %2465 = vmatprep.mubr.f32.mxu1 %v7180_v38 }
 0x6c7   :  { %5798 = vmatpush1.bf16.msra.mxu0 %v8190_v53  ;;  %5830 = vmatpush1.bf16.msra.mxu1 %v8203_v57 }
 0x6c8   :  { %5800 = vmatprep.subr.bf16.mxu0 %v8228_v1  ;;  %5832 = vmatprep.subr.bf16.mxu1 %v8232_v2 }
 0x6cb   :  { %5802 = vmatpush1.bf16.msra.mxu0 %v8234_v3  ;;  %5834 = vmatpush1.bf16.msra.mxu1 %v8247_v7 }
 0x6cc   :  { %5804 = vmatprep.subr.bf16.mxu0 %v8272_v15  ;;  %5836 = vmatprep.subr.bf16.mxu1 %v8276_v16 }
 0x6cf   :  { %5806 = vmatpush1.bf16.msra.mxu0 %v8278_v17  ;;  %5838 = vmatpush1.bf16.msra.mxu1 %v8291_v21 }
 0x6d0   :  { %5808 = vmatprep.subr.bf16.mxu0 %v8316_v29  ;;  %5840 = vmatprep.subr.bf16.mxu1 %v8320_v30 }
 0x6d3   :  { %5810 = vmatpush1.bf16.msra.mxu0 %v8322_v31  ;;  %5842 = vmatpush1.bf16.msra.mxu1 %v8335_v35 }
 0x6d4   :  { %5812 = vmatprep.subr.bf16.mxu0 %v8360_v48  ;;  %5844 = vmatprep.subr.bf16.mxu1 %v8364_v49 }
 0x6d7   :  { %5814 = vmatpush1.bf16.msra.mxu0 %v8366_v50  ;;  %5846 = vmatpush1.bf16.msra.mxu1 %v8379_v58 }
 0x6d8   :  { %5816 = vmatprep.subr.bf16.mxu0 %v8404_v5  ;;  %5848 = vmatprep.subr.bf16.mxu1 %v8408_v6 }
 0x6db   :  { %5818 = vmatpush1.bf16.msra.mxu0 %v8410_v8  ;;  %5850 = vmatpush1.bf16.msra.mxu1 %v8423_v12 }
 0x6dc   :  { %5820 = vmatprep.subr.bf16.mxu0 %v8448_v24  ;;  %5852 = vmatprep.subr.bf16.mxu1 %v8452_v25  ;;  %v2506_v24 = vld [vmem:[%s12146_s5 + $0x8] sm:$0xff] }
 0x6dd   :  { %v2510_v25 = vld [vmem:[%s12146_s5 + $0x28] sm:$0xff] }
 0x6df   :  { %5822 = vmatpush1.bf16.msra.mxu0 %v8454_v26  ;;  %5854 = vmatpush1.bf16.msra.mxu1 %v8458_v27  ;;  %v2508_v26 = vld [vmem:[%s12146_s5 + $0x18] sm:$0xff]  ;;  %v5855_v27 = vpack.c.bf16 %v2510_v25, %v2506_v24 }
 0x6e0   :  { %v5887_v22 = vpack.c.bf16 %v2512_v34, %v2508_v26  ;;  %v2539_v26 = vld [vmem:[%s12146_s5 + $0x110] sm:$0xff] }
 0x6e1   :  { %5856 = vmatprep.subr.bf16.mxu0 %v5855_v27  ;;  %v2543_v27 = vld [vmem:[%s12146_s5 + $0x130] sm:$0xff] }
 0x6e2   :  { %5888 = vmatprep.subr.bf16.mxu1 %v5887_v22  ;;  %v5905_v34 = vpack.c.bf16 %v2543_v27, %v2539_v26  ;;  %v2548_v22 = vld [vmem:[%s12146_s5 + $0x158] sm:$0xff] }
 0x6e3   :  { %v5907_v46 = vpack.c.bf16 %v2552_v28, %v2548_v22 }
 0x795   :  { %v2221_v39 = vpop.f32.mrb[14].mxu0  ;;  %v2292_v43 = vpop.f32.mrb[14].mxu1 }
 0x796   :  { %v6959_v51 = vadd.f32 %v2221_v39, %v8513_v41  ;;  %v2223_v52 = vpop.f32.mrb[15].mxu0  ;;  %v2294_v53 = vpop.f32.mrb[15].mxu1  ;;  %v6975_v15 = vadd.f32 %v2292_v43, %v8529_v0  ;;  %v2525_v39 = vld [vmem:[%s12146_s5 + $0xa0] sm:$0xff] }
 0x797   :  { %v6960_v57 = vadd.f32 %v2223_v52, %v8516_v42  ;;  %v6976_v3 = vadd.f32 %v2294_v53, %v8523_v61  ;;  %v2523_v52 = vld [vmem:[%s12146_s5 + $0x90] sm:$0xff] }
 0x798   :  { %v5072_v1 = vmul.f32 -1.442695, %v6959_v51  ;;  %v5865_v51 = vpack.c.bf16 %v2525_v39, %v2521_v19  ;;  %v2527_v53 = vld [vmem:[%s12146_s5 + $0xb0] sm:$0xff]  ;;  %v2566_v19 = vld [vmem:[%s12146_s5 + $0x1e8] sm:$0xff] }
 0x799   :  { %v5073_v2 = vmul.f32 -1.442695, %v6960_v57  ;;  %v5074_v7 = vmul.f32 -1.442695, %v6976_v3  ;;  %v5897_v57 = vpack.c.bf16 %v2527_v53, %v2523_v52  ;;  %v2532_v3 = vld [vmem:[%s12146_s5 + $0xd8] sm:$0xff]  ;;  %v2561_v53 = vld [vmem:[%s12146_s5 + $0x1c0] sm:$0xff] }
 0x79a   :  { %7148 = vpow2.f32 %v5072_v1  ;;  %v2530_v1 = vld [vmem:[%s12146_s5 + $0xc8] sm:$0xff]  ;;  %v2568_v52 = vld [vmem:[%s12146_s5 + $0x1f8] sm:$0xff] }
 0x79b   :  { %7150 = vpow2.f32 %v5073_v2  ;;  %v2534_v2 = vld [vmem:[%s12146_s5 + $0xe8] sm:$0xff] }
 0x79c   :  { %7152 = vpow2.f32 %v5074_v7  ;;  %v5867_v7 = vpack.c.bf16 %v2534_v2, %v2530_v1  ;;  %v2565_v1 = vld [vmem:[%s12146_s5 + $0x1e0] sm:$0xff]  ;;  %v2563_v2 = vld [vmem:[%s12146_s5 + $0x1d0] sm:$0xff] }
 0x79d   :  { %7154 = vtanh.f32 %v6975_v15  ;;  %v2536_v15 = vld [vmem:[%s12146_s5 + $0xf8] sm:$0xff] }
 0x7a4   :  { %v7149_v16 = vpop.eup %7148 }
 0x7a5   :  { %v7151_v17 = vpop.eup %7150  ;;  %v2304_v21 = vadd.f32 1.0, %v7149_v16  ;;  %v2529_v16 = vld [vmem:[%s12146_s5 + $0xc0] sm:$0xff] }
 0x7a6   :  { %v2310_v29 = vadd.f32 1.0, %v7151_v17  ;;  %v7153_v30 = vpop.eup %7152  ;;  %v2533_v17 = vld [vmem:[%s12146_s5 + $0xe0] sm:$0xff] }
 0x7a7   :  { %7156 = vrcp.f32 %v2304_v21  ;;  %v7155_v31 = vpop.eup %7154  ;;  %v2317_v50 = vadd.f32 1.0, %v7153_v30  ;;  %v5899_v21 = vpack.c.bf16 %v2536_v15, %v2532_v3  ;;  %v2531_v30 = vld [vmem:[%s12146_s5 + $0xd0] sm:$0xff] }
 0x7a8   :  { %7158 = vrcp.f32 %v2310_v29  ;;  %v5869_v29 = vpack.c.bf16 %v2533_v17, %v2529_v16  ;;  %v2567_v3 = vld [vmem:[%s12146_s5 + $0x1f0] sm:$0xff]  ;;  %v2720_v16 = vld [vmem:[%s12147_s8 + $0x8] sm:$0xff] }
 0x7a9   :  { %7160 = vrcp.f32 %v2317_v50  ;;  %v2540_v50 = vld [vmem:[%s12146_s5 + $0x118] sm:$0xff]  ;;  %v5917_v15 = vpack.c.bf16 %v2567_v3, %v2563_v2  ;;  %v2724_v17 = vld [vmem:[%s12147_s8 + $0x28] sm:$0xff] }
 0x7b1   :  { %v7157_v35 = vpop.eup %7156 }
 0x7b2   :  { %v7159_v48 = vpop.eup %7158  ;;  %v2321_v49 = vmul.f32 %v7157_v35, %v7155_v31  ;;  %v2535_v31 = vld [vmem:[%s12146_s5 + $0xf0] sm:$0xff] }
 0x7b3   :  { %v2320_v58 = vmul.f32 %v7159_v48, %v8742_v14  ;;  %v7161_v6 = vpop.eup %7160  ;;  %v2524_v14 = vld [vmem:[%s12146_s5 + $0x98] sm:$0xff]  ;;  %v5901_v35 = vpack.c.bf16 %v2535_v31, %v2531_v30  ;;  %v2538_v48 = vld [vmem:[%s12146_s5 + $0x108] sm:$0xff] }
 0x7b4   :  { %v5895_v43 = vpack.c.bf16 %v2528_v54, %v2524_v14  ;;  %v2562_v54 = vld [vmem:[%s12146_s5 + $0x1c8] sm:$0xff]  ;;  %v2726_v30 = vld [vmem:[%s12147_s8 + $0x38] sm:$0xff] }
 0x7b5   :  { %v8782_v5 = vadd.f32 %v2321_v49, %v2320_v58  ;;  %v2542_v49 = vld [vmem:[%s12146_s5 + $0x128] sm:$0xff] }
 0x7b6   :  { %v5871_v58 = vpack.c.bf16 %v2542_v49, %v2538_v48 }
 0x7b7   :  { %7162 = vtanh.f32 %v8782_v5 }
 0x7c1   :  { %v7163_v8 = vpop.eup %7162 }
 0x7c2   :  { %v2324_v12 = vmul.f32 %v7163_v8, %v7161_v6  ;;  %v2544_v6 = vld [vmem:[%s12146_s5 + $0x138] sm:$0xff]  ;;  %v2537_v8 = vld [vmem:[%s12146_s5 + $0x100] sm:$0xff] }
 0x7c3   :  { %v5903_v24 = vpack.c.bf16 %v2544_v6, %v2540_v50 }
 0x7c4   :  { %2395 = vmatmul.mubr.f32.vlgmr.msra.gmra.mrb[16].mxu0 %v2324_v12  ;;  %2466 = vmatmul.mubr.f32.vlgmr.msra.gmra.mrb[16].mxu1 %v2324_v12  ;;  %v2541_v12 = vld [vmem:[%s12146_s5 + $0x120] sm:$0xff] }
 0x7c5   :  { %2637 = vmatprep.mubr.f32.mxu0 %v7180_v38  ;;  %2708 = vmatprep.mubr.f32.mxu1 %v7180_v38  ;;  %v2505_v38 = vld [vmem:[%s12146_s5] sm:$0xff]  ;;  %v5873_v25 = vpack.c.bf16 %v2541_v12, %v2537_v8 }
 0x7c6   :  { %v5857_v23 = vpack.c.bf16 %v2509_v20, %v2505_v38  ;;  %5890 = vmatpush1.bf16.msra.mxu1 %v5889_v44  ;;  %v2546_v38 = vld [vmem:[%s12146_s5 + $0x148] sm:$0xff]  ;;  %v2549_v44 = vld [vmem:[%s12146_s5 + $0x160] sm:$0xff] }
 0x7c7   :  { %5892 = vmatprep.subr.bf16.mxu1 %v5891_v60  ;;  %v2550_v20 = vld [vmem:[%s12146_s5 + $0x168] sm:$0xff]  ;;  %v5877_v47 = vpack.c.bf16 %v2549_v44, %v2545_v32  ;;  %v2556_v60 = vld [vmem:[%s12146_s5 + $0x198] sm:$0xff] }
 0x7c8   :  { %5858 = vmatpush1.bf16.msra.mxu0 %v5857_v23  ;;  %v5875_v23 = vpack.c.bf16 %v2550_v20, %v2546_v38 }
 0x7c9   :  { %5860 = vmatprep.subr.bf16.mxu0 %v5859_v36  ;;  %v2551_v36 = vld [vmem:[%s12146_s5 + $0x170] sm:$0xff] }
 0x7ca   :  { %5894 = vmatpush1.bf16.msra.mxu1 %v5893_v10  ;;  %v5909_v37 = vpack.c.bf16 %v2551_v36, %v2547_v55  ;;  %v2553_v10 = vld [vmem:[%s12146_s5 + $0x180] sm:$0xff]  ;;  %v2725_v55 = vld [vmem:[%s12147_s8 + $0x30] sm:$0xff]  ;;  %v2732_v36 = vld [vmem:[%s12147_s8 + $0x68] sm:$0xff] }
 0x7cb   :  { %5896 = vmatprep.subr.bf16.mxu1 %v5895_v43  ;;  %v5881_v14 = vpack.c.bf16 %v2557_v11, %v2553_v10  ;;  %v5883_v43 = vpack.c.bf16 %v2566_v19, %v2562_v54  ;;  %v2731_v10 = vld [vmem:[%s12147_s8 + $0x60] sm:$0xff]  ;;  %v2733_v54 = vld [vmem:[%s12147_s8 + $0x70] sm:$0xff]  ;;  %v2736_v19 = vld [vmem:[%s12147_s8 + $0x88] sm:$0xff] }
 0x7cc   :  { %5862 = vmatpush1.bf16.msra.mxu0 %v5861_v63  ;;  %v2560_v63 = vld [vmem:[%s12146_s5 + $0x1b8] sm:$0xff] }
 0x7cd   :  { %5864 = vmatprep.subr.bf16.mxu0 %v5863_v18  ;;  %v5911_v9 = vpack.c.bf16 %v2560_v63, %v2556_v60  ;;  %v2559_v18 = vld [vmem:[%s12146_s5 + $0x1b0] sm:$0xff] }
 0x7ce   :  { %5898 = vmatpush1.bf16.msra.mxu1 %v5897_v57  ;;  %v5913_v39 = vpack.c.bf16 %v2559_v18, %v2555_v13  ;;  %v2729_v18 = vld [vmem:[%s12147_s8 + $0x50] sm:$0xff] }
 0x7cf   :  { %5900 = vmatprep.subr.bf16.mxu1 %v5899_v21  ;;  %v2722_v21 = vld [vmem:[%s12147_s8 + $0x18] sm:$0xff] }
 0x7d0   :  { %5866 = vmatpush1.bf16.msra.mxu0 %v5865_v51  ;;  %v2564_v51 = vld [vmem:[%s12146_s5 + $0x1d8] sm:$0xff]  ;;  %v6047_v31 = vpack.c.bf16 %v2726_v30, %v2722_v21 }
 0x7d1   :  { %5868 = vmatprep.subr.bf16.mxu0 %v5867_v7  ;;  %v5915_v57 = vpack.c.bf16 %v2568_v52, %v2564_v51  ;;  %v5885_v7 = vpack.c.bf16 %v2565_v1, %v2561_v53  ;;  %v2742_v51 = vld [vmem:[%s12147_s8 + $0xb8] sm:$0xff]  ;;  %v6053_v53 = vpack.c.bf16 %v2733_v54, %v2729_v18  ;;  %v2739_v1 = vld [vmem:[%s12147_s8 + $0xa0] sm:$0xff]  ;;  %v2769_v18 = vld [vmem:[%s12147_s8 + $0x190] sm:$0xff] }
 0x7d2   :  { %5902 = vmatpush1.bf16.msra.mxu1 %v5901_v35  ;;  %v2746_v21 = vld [vmem:[%s12147_s8 + $0xd8] sm:$0xff]  ;;  %v2773_v54 = vld [vmem:[%s12147_s8 + $0x1b0] sm:$0xff] }
 0x7d3   :  { %5904 = vmatprep.subr.bf16.mxu1 %v5903_v24 }
 0x7d4   :  { %5870 = vmatpush1.bf16.msra.mxu0 %v5869_v29  ;;  %v5919_v29 = vpack.c.bf16 %v2724_v17, %v2720_v16  ;;  %v2744_v16 = vld [vmem:[%s12147_s8 + $0xc8] sm:$0xff] }
 0x7d5   :  { %5872 = vmatprep.subr.bf16.mxu0 %v5871_v58  ;;  %v2748_v17 = vld [vmem:[%s12147_s8 + $0xe8] sm:$0xff] }
 0x7d6   :  { %5906 = vmatpush1.bf16.msra.mxu1 %v5905_v34 }
 0x7d7   :  { %5908 = vmatprep.subr.bf16.mxu1 %v5907_v46  ;;  %v2723_v46 = vld [vmem:[%s12147_s8 + $0x20] sm:$0xff] }
 0x7d8   :  { %5874 = vmatpush1.bf16.msra.mxu0 %v5873_v25 }
 0x7d9   :  { %5876 = vmatprep.subr.bf16.mxu0 %v5875_v23 }
 0x7da   :  { %5910 = vmatpush1.bf16.msra.mxu1 %v5909_v37  ;;  %v2734_v37 = vld [vmem:[%s12147_s8 + $0x78] sm:$0xff] }
 0x7db   :  { %5912 = vmatprep.subr.bf16.mxu1 %v5911_v9  ;;  %v2727_v9 = vld [vmem:[%s12147_s8 + $0x40] sm:$0xff] }
 0x7dc   :  { %5878 = vmatpush1.bf16.msra.mxu0 %v5877_v47  ;;  %v2721_v47 = vld [vmem:[%s12147_s8 + $0x10] sm:$0xff]  ;;  %v5925_v52 = vpack.c.bf16 %v2731_v10, %v2727_v9  ;;  %v2767_v10 = vld [vmem:[%s12147_s8 + $0x180] sm:$0xff] }
 0x7dd   :  { %5880 = vmatprep.subr.bf16.mxu0 %v5879_v4  ;;  %v6049_v4 = vpack.c.bf16 %v2725_v55, %v2721_v47  ;;  %v2763_v47 = vld [vmem:[%s12147_s8 + $0x160] sm:$0xff] }
 0x7de   :  { %5914 = vmatpush1.bf16.msra.mxu1 %v5913_v39  ;;  %v2740_v39 = vld [vmem:[%s12147_s8 + $0xa8] sm:$0xff] }
 0x7df   :  { %5916 = vmatprep.subr.bf16.mxu1 %v5915_v57  ;;  %v2735_v57 = vld [vmem:[%s12147_s8 + $0x80] sm:$0xff]  ;;  %v5927_v2 = vpack.c.bf16 %v2740_v39, %v2736_v19  ;;  %v2776_v19 = vld [vmem:[%s12147_s8 + $0x1c8] sm:$0xff] }
 0x7e0   :  { %5882 = vmatpush1.bf16.msra.mxu0 %v5881_v14  ;;  %v6051_v14 = vpack.c.bf16 %v2734_v37, %v2730_v56  ;;  %v5929_v30 = vpack.c.bf16 %v2739_v1, %v2735_v57  ;;  %v2765_v56 = vld [vmem:[%s12147_s8 + $0x170] sm:$0xff]  ;;  %v2768_v37 = vld [vmem:[%s12147_s8 + $0x188] sm:$0xff]  ;;  %v2775_v57 = vld [vmem:[%s12147_s8 + $0x1c0] sm:$0xff] }
 0x7e1   :  { %5884 = vmatprep.subr.bf16.mxu0 %v5883_v43  ;;  %v2738_v43 = vld [vmem:[%s12147_s8 + $0x98] sm:$0xff]  ;;  %v2780_v39 = vld [vmem:[%s12147_s8 + $0x1e8] sm:$0xff]  ;;  %v2779_v1 = vld [vmem:[%s12147_s8 + $0x1e0] sm:$0xff] }
 0x7e2   :  { %5918 = vmatpush1.bf16.msra.mxu1 %v5917_v15  ;;  %v6055_v3 = vpack.c.bf16 %v2742_v51, %v2738_v43  ;;  %v2741_v15 = vld [vmem:[%s12147_s8 + $0xb0] sm:$0xff]  ;;  %v2778_v43 = vld [vmem:[%s12147_s8 + $0x1d8] sm:$0xff] }
 0x7e3   :  { %6048 = vmatprep.subr.bf16.mxu1 %v6047_v31  ;;  %v2782_v51 = vld [vmem:[%s12147_s8 + $0x1f8] sm:$0xff] }
 0x7e4   :  { %5886 = vmatpush1.bf16.msra.mxu0 %v5885_v7  ;;  %v2737_v7 = vld [vmem:[%s12147_s8 + $0x90] sm:$0xff] }
 0x7e5   :  { %5920 = vmatprep.subr.bf16.mxu0 %v5919_v29  ;;  %v2750_v29 = vld [vmem:[%s12147_s8 + $0xf8] sm:$0xff]  ;;  %v6057_v31 = vpack.c.bf16 %v2741_v15, %v2737_v7  ;;  %v2777_v7 = vld [vmem:[%s12147_s8 + $0x1d0] sm:$0xff] }
 0x7e6   :  { %v2781_v15 = vld [vmem:[%s12147_s8 + $0x1f0] sm:$0xff] }
 0x897   :  { %v2396_v35 = vpop.f32.mrb[16].mxu0  ;;  %v2467_v48 = vpop.f32.mrb[16].mxu1 }
 0x898   :  { %v6961_v49 = vadd.f32 %v2396_v35, %v8513_v41  ;;  %v2398_v50 = vpop.f32.mrb[17].mxu0  ;;  %v2469_v58 = vpop.f32.mrb[17].mxu1  ;;  %v6977_v26 = vadd.f32 %v2467_v48, %v8529_v0  ;;  %v2719_v0 = vld [vmem:[%s12147_s8] sm:$0xff] }
 0x899   :  { %v6962_v6 = vadd.f32 %v2398_v50, %v8516_v42  ;;  %v6978_v24 = vadd.f32 %v2469_v58, %v8523_v61  ;;  %v5921_v63 = vpack.c.bf16 %v2723_v46, %v2719_v0  ;;  %v2743_v35 = vld [vmem:[%s12147_s8 + $0xc0] sm:$0xff]  ;;  %v6059_v50 = vpack.c.bf16 %v2750_v29, %v2746_v21  ;;  %v2745_v58 = vld [vmem:[%s12147_s8 + $0xd0] sm:$0xff]  ;;  %v2786_v21 = vld [vmem:[%s12147_s8 + $0x218] sm:$0xff] }
 0x89a   :  { %v5075_v8 = vmul.f32 -1.442695, %v6961_v49  ;;  %v2747_v48 = vld [vmem:[%s12147_s8 + $0xe0] sm:$0xff]  ;;  %v5931_v49 = vpack.c.bf16 %v2748_v17, %v2744_v16  ;;  %v2784_v16 = vld [vmem:[%s12147_s8 + $0x208] sm:$0xff]  ;;  %v2790_v29 = vld [vmem:[%s12147_s8 + $0x238] sm:$0xff] }
 0x89b   :  { %v5076_v12 = vmul.f32 -1.442695, %v6962_v6  ;;  %v5077_v25 = vmul.f32 -1.442695, %v6978_v24  ;;  %v2749_v6 = vld [vmem:[%s12147_s8 + $0xf0] sm:$0xff]  ;;  %v2754_v24 = vld [vmem:[%s12147_s8 + $0x118] sm:$0xff] }
 0x89c   :  { %7164 = vpow2.f32 %v5075_v8  ;;  %v2752_v8 = vld [vmem:[%s12147_s8 + $0x108] sm:$0xff]  ;;  %v2759_v46 = vld [vmem:[%s12147_s8 + $0x140] sm:$0xff] }
 0x89d   :  { %7166 = vpow2.f32 %v5076_v12  ;;  %v2756_v12 = vld [vmem:[%s12147_s8 + $0x128] sm:$0xff] }
 0x89e   :  { %7168 = vpow2.f32 %v5077_v25  ;;  %v2758_v25 = vld [vmem:[%s12147_s8 + $0x138] sm:$0xff]  ;;  %v2788_v17 = vld [vmem:[%s12147_s8 + $0x228] sm:$0xff] }
 0x89f   :  { %7170 = vtanh.f32 %v6977_v26  ;;  %v5933_v26 = vpack.c.bf16 %v2747_v48, %v2743_v35  ;;  %v2783_v35 = vld [vmem:[%s12147_s8 + $0x200] sm:$0xff] }
 0x8a0   :  { %v2787_v48 = vld [vmem:[%s12147_s8 + $0x220] sm:$0xff] }
 0x8a6   :  { %v7165_v27 = vpop.eup %7164 }
 0x8a7   :  { %v7167_v34 = vpop.eup %7166  ;;  %v2479_v38 = vadd.f32 1.0, %v7165_v27  ;;  %v6061_v27 = vpack.c.bf16 %v2749_v6, %v2745_v58  ;;  %v2785_v58 = vld [vmem:[%s12147_s8 + $0x210] sm:$0xff] }
 0x8a8   :  { %v2485_v20 = vadd.f32 1.0, %v7167_v34  ;;  %v7169_v41 = vpop.eup %7168  ;;  %v2751_v34 = vld [vmem:[%s12147_s8 + $0x100] sm:$0xff]  ;;  %v2789_v6 = vld [vmem:[%s12147_s8 + $0x230] sm:$0xff] }
 0x8a9   :  { %7172 = vrcp.f32 %v2479_v38  ;;  %v7171_v22 = vpop.eup %7170  ;;  %v2492_v32 = vadd.f32 1.0, %v7169_v41  ;;  %v2755_v38 = vld [vmem:[%s12147_s8 + $0x120] sm:$0xff]  ;;  %v6063_v41 = vpack.c.bf16 %v2758_v25, %v2754_v24  ;;  %v2794_v24 = vld [vmem:[%s12147_s8 + $0x258] sm:$0xff] }
 0x8aa   :  { %7174 = vrcp.f32 %v2485_v20  ;;  %v5935_v20 = vpack.c.bf16 %v2756_v12, %v2752_v8  ;;  %v2792_v8 = vld [vmem:[%s12147_s8 + $0x248] sm:$0xff]  ;;  %v2798_v25 = vld [vmem:[%s12147_s8 + $0x278] sm:$0xff] }
 0x8ab   :  { %7176 = vrcp.f32 %v2492_v32  ;;  %v2762_v32 = vld [vmem:[%s12147_s8 + $0x158] sm:$0xff]  ;;  %v2796_v12 = vld [vmem:[%s12147_s8 + $0x268] sm:$0xff] }
 0x8b3   :  { %v7173_v42 = vpop.eup %7172 }
 0x8b4   :  { %v7175_v23 = vpop.eup %7174  ;;  %v2496_v28 = vmul.f32 %v7173_v42, %v7171_v22  ;;  %v2753_v22 = vld [vmem:[%s12147_s8 + $0x110] sm:$0xff] }
 0x8b5   :  { %v2495_v44 = vmul.f32 %v7175_v23, %v8782_v5  ;;  %v2728_v5 = vld [vmem:[%s12147_s8 + $0x48] sm:$0xff]  ;;  %v7177_v59 = vpop.eup %7176  ;;  %v2757_v42 = vld [vmem:[%s12147_s8 + $0x130] sm:$0xff] }
 0x8b6   :  { %v5923_v13 = vpack.c.bf16 %v2732_v36, %v2728_v5  ;;  %v2760_v23 = vld [vmem:[%s12147_s8 + $0x148] sm:$0xff]  ;;  %v6065_v0 = vpack.c.bf16 %v2757_v42, %v2753_v22  ;;  %v2761_v36 = vld [vmem:[%s12147_s8 + $0x150] sm:$0xff] }
 0x8b7   :  { %v2497_v61 = vadd.f32 %v2496_v28, %v2495_v44  ;;  %v2764_v28 = vld [vmem:[%s12147_s8 + $0x168] sm:$0xff]  ;;  %v2766_v44 = vld [vmem:[%s12147_s8 + $0x178] sm:$0xff]  ;;  %v6069_v9 = vpack.c.bf16 %v2765_v56, %v2761_v36  ;;  %v2793_v22 = vld [vmem:[%s12147_s8 + $0x250] sm:$0xff] }
 0x8b8   :  { %v5939_v55 = vpack.c.bf16 %v2764_v28, %v2760_v23  ;;  %v6067_v5 = vpack.c.bf16 %v2766_v44, %v2762_v32  ;;  %v2797_v42 = vld [vmem:[%s12147_s8 + $0x270] sm:$0xff]  ;;  %v2800_v23 = vld [vmem:[%s12147_s8 + $0x288] sm:$0xff]  ;;  %v2802_v32 = vld [vmem:[%s12147_s8 + $0x298] sm:$0xff] }
 0x8b9   :  { %7178 = vtanh.f32 %v2497_v61  ;;  %v5937_v61 = vpack.c.bf16 %v2755_v38, %v2751_v34  ;;  %v2791_v34 = vld [vmem:[%s12147_s8 + $0x240] sm:$0xff]  ;;  %v2804_v28 = vld [vmem:[%s12147_s8 + $0x2a8] sm:$0xff]  ;;  %v2806_v44 = vld [vmem:[%s12147_s8 + $0x2b8] sm:$0xff] }
 0x8ba   :  { %v2795_v38 = vld [vmem:[%s12147_s8 + $0x260] sm:$0xff]  ;;  %v2801_v36 = vld [vmem:[%s12147_s8 + $0x290] sm:$0xff] }
 0x8bb   :  { %v2805_v56 = vld [vmem:[%s12147_s8 + $0x2b0] sm:$0xff] }
 0x8c3   :  { %v7179_v60 = vpop.eup %7178 }
 0x8c4   :  { %v2499_v11 = vmul.f32 %v7179_v60, %v7177_v59  ;;  %v2772_v59 = vld [vmem:[%s12147_s8 + $0x1a8] sm:$0xff]  ;;  %v2770_v60 = vld [vmem:[%s12147_s8 + $0x198] sm:$0xff] }
 0x8c6   :  { %2638 = vmatmul.mubr.f32.vlgmr.msra.gmra.mrb[0].mxu0 %v2499_v11  ;;  %2709 = vmatmul.mubr.f32.vlgmr.msra.gmra.mrb[0].mxu1 %v2499_v11  ;;  %v2771_v11 = vld [vmem:[%s12147_s8 + $0x1a0] sm:$0xff] }
 0x8c7   :  { %5922 = vmatpush1.bf16.msra.mxu0 %v5921_v63  ;;  %6050 = vmatpush1.bf16.msra.mxu1 %v6049_v4  ;;  %v2774_v63 = vld [vmem:[%s12147_s8 + $0x1b8] sm:$0xff]  ;;  %v5941_v4 = vpack.c.bf16 %v2763_v47, %v2759_v46  ;;  %v2799_v46 = vld [vmem:[%s12147_s8 + $0x280] sm:$0xff] }
 0x8c8   :  { %5924 = vmatprep.subr.bf16.mxu0 %v5923_v13  ;;  %6052 = vmatprep.subr.bf16.mxu1 %v6051_v14  ;;  %v5943_v13 = vpack.c.bf16 %v2772_v59, %v2768_v37  ;;  %v6071_v14 = vpack.c.bf16 %v2774_v63, %v2770_v60  ;;  %v2803_v47 = vld [vmem:[%s12147_s8 + $0x2a0] sm:$0xff]  ;;  %v2808_v37 = vld [vmem:[%s12147_s8 + $0x2c8] sm:$0xff]  ;;  %v2810_v60 = vld [vmem:[%s12147_s8 + $0x2d8] sm:$0xff] }
 0x8c9   :  { %v2812_v59 = vld [vmem:[%s12147_s8 + $0x2e8] sm:$0xff]  ;;  %v2814_v63 = vld [vmem:[%s12147_s8 + $0x2f8] sm:$0xff] }
 0x8cb   :  { %5926 = vmatpush1.bf16.msra.mxu0 %v5925_v52  ;;  %6054 = vmatpush1.bf16.msra.mxu1 %v6053_v53  ;;  %v5945_v52 = vpack.c.bf16 %v2771_v11, %v2767_v10  ;;  %v6073_v53 = vpack.c.bf16 %v2773_v54, %v2769_v18  ;;  %v2807_v10 = vld [vmem:[%s12147_s8 + $0x2c0] sm:$0xff]  ;;  %v2809_v18 = vld [vmem:[%s12147_s8 + $0x2d0] sm:$0xff] }
 0x8cc   :  { %5928 = vmatprep.subr.bf16.mxu0 %v5927_v2  ;;  %6056 = vmatprep.subr.bf16.mxu1 %v6055_v3  ;;  %v5947_v2 = vpack.c.bf16 %v2780_v39, %v2776_v19  ;;  %v6075_v3 = vpack.c.bf16 %v2782_v51, %v2778_v43  ;;  %v2811_v11 = vld [vmem:[%s12147_s8 + $0x2e0] sm:$0xff]  ;;  %v2813_v54 = vld [vmem:[%s12147_s8 + $0x2f0] sm:$0xff]  ;;  %v2816_v19 = vld [vmem:[%s12147_s8 + $0x308] sm:$0xff] }
 0x8cd   :  { %v2820_v39 = vld [vmem:[%s12147_s8 + $0x328] sm:$0xff]  ;;  %v2818_v43 = vld [vmem:[%s12147_s8 + $0x318] sm:$0xff] }
 0x8ce   :  { %v2822_v51 = vld [vmem:[%s12147_s8 + $0x338] sm:$0xff] }
 0x8cf   :  { %5930 = vmatpush1.bf16.msra.mxu0 %v5929_v30  ;;  %6058 = vmatpush1.bf16.msra.mxu1 %v6057_v31  ;;  %v5949_v30 = vpack.c.bf16 %v2779_v1, %v2775_v57  ;;  %v6077_v31 = vpack.c.bf16 %v2781_v15, %v2777_v7  ;;  %v2815_v57 = vld [vmem:[%s12147_s8 + $0x300] sm:$0xff]  ;;  %v2817_v7 = vld [vmem:[%s12147_s8 + $0x310] sm:$0xff] }
 0x8d0   :  { %5932 = vmatprep.subr.bf16.mxu0 %v5931_v49  ;;  %6060 = vmatprep.subr.bf16.mxu1 %v6059_v50  ;;  %v5951_v49 = vpack.c.bf16 %v2788_v17, %v2784_v16  ;;  %v6079_v50 = vpack.c.bf16 %v2790_v29, %v2786_v21  ;;  %v2819_v1 = vld [vmem:[%s12147_s8 + $0x320] sm:$0xff]  ;;  %v2821_v15 = vld [vmem:[%s12147_s8 + $0x330] sm:$0xff]  ;;  %v2824_v16 = vld [vmem:[%s12147_s8 + $0x348] sm:$0xff] }
 0x8d1   :  { %v2828_v17 = vld [vmem:[%s12147_s8 + $0x368] sm:$0xff]  ;;  %v2826_v21 = vld [vmem:[%s12147_s8 + $0x358] sm:$0xff] }
 0x8d2   :  { %v2830_v29 = vld [vmem:[%s12147_s8 + $0x378] sm:$0xff] }
 0x8d3   :  { %5934 = vmatpush1.bf16.msra.mxu0 %v5933_v26  ;;  %6062 = vmatpush1.bf16.msra.mxu1 %v6061_v27  ;;  %v5953_v26 = vpack.c.bf16 %v2787_v48, %v2783_v35  ;;  %v6081_v27 = vpack.c.bf16 %v2789_v6, %v2785_v58  ;;  %v2823_v35 = vld [vmem:[%s12147_s8 + $0x340] sm:$0xff]  ;;  %v2825_v58 = vld [vmem:[%s12147_s8 + $0x350] sm:$0xff] }
 0x8d4   :  { %5936 = vmatprep.subr.bf16.mxu0 %v5935_v20  ;;  %6064 = vmatprep.subr.bf16.mxu1 %v6063_v41  ;;  %v5955_v20 = vpack.c.bf16 %v2796_v12, %v2792_v8  ;;  %v6083_v41 = vpack.c.bf16 %v2798_v25, %v2794_v24  ;;  %v2827_v48 = vld [vmem:[%s12147_s8 + $0x360] sm:$0xff]  ;;  %v2829_v6 = vld [vmem:[%s12147_s8 + $0x370] sm:$0xff]  ;;  %v2832_v8 = vld [vmem:[%s12147_s8 + $0x388] sm:$0xff] }
 0x8d5   :  { %v2836_v12 = vld [vmem:[%s12147_s8 + $0x3a8] sm:$0xff]  ;;  %v2834_v24 = vld [vmem:[%s12147_s8 + $0x398] sm:$0xff] }
 0x8d6   :  { %v2838_v25 = vld [vmem:[%s12147_s8 + $0x3b8] sm:$0xff] }
 0x8d7   :  { %5938 = vmatpush1.bf16.msra.mxu0 %v5937_v61  ;;  %6066 = vmatpush1.bf16.msra.mxu1 %v6065_v0  ;;  %v5957_v61 = vpack.c.bf16 %v2795_v38, %v2791_v34  ;;  %v6085_v0 = vpack.c.bf16 %v2797_v42, %v2793_v22  ;;  %v2831_v34 = vld [vmem:[%s12147_s8 + $0x380] sm:$0xff]  ;;  %v5975_v38 = vpack.c.bf16 %v2836_v12, %v2832_v8  ;;  %v2833_v22 = vld [vmem:[%s12147_s8 + $0x390] sm:$0xff] }
 0x8d8   :  { %5940 = vmatprep.subr.bf16.mxu0 %v5939_v55  ;;  %6068 = vmatprep.subr.bf16.mxu1 %v6067_v5  ;;  %v5959_v55 = vpack.c.bf16 %v2804_v28, %v2800_v23  ;;  %v6087_v5 = vpack.c.bf16 %v2806_v44, %v2802_v32  ;;  %v2837_v42 = vld [vmem:[%s12147_s8 + $0x3b0] sm:$0xff]  ;;  %v2840_v32 = vld [vmem:[%s12147_s8 + $0x3c8] sm:$0xff] }
 0x8d9   :  { %v6105_v28 = vpack.c.bf16 %v2837_v42, %v2833_v22  ;;  %v2844_v44 = vld [vmem:[%s12147_s8 + $0x3e8] sm:$0xff] }
 0x8db   :  { %5942 = vmatpush1.bf16.msra.mxu0 %v5941_v4  ;;  %6070 = vmatpush1.bf16.msra.mxu1 %v6069_v9  ;;  %v5961_v4 = vpack.c.bf16 %v2803_v47, %v2799_v46  ;;  %v6089_v9 = vpack.c.bf16 %v2805_v56, %v2801_v36  ;;  %v2846_v46 = vld [vmem:[%s12147_s8 + $0x3f8] sm:$0xff]  ;;  %v2839_v47 = vld [vmem:[%s12147_s8 + $0x3c0] sm:$0xff]  ;;  %v2841_v56 = vld [vmem:[%s12147_s8 + $0x3d0] sm:$0xff] }
 0x8dc   :  { %5944 = vmatprep.subr.bf16.mxu0 %v5943_v13  ;;  %6072 = vmatprep.subr.bf16.mxu1 %v6071_v14  ;;  %v5963_v13 = vpack.c.bf16 %v2812_v59, %v2808_v37  ;;  %v6091_v14 = vpack.c.bf16 %v2814_v63, %v2810_v60  ;;  %v2845_v37 = vld [vmem:[%s12147_s8 + $0x3f0] sm:$0xff]  ;;  %v2848_v60 = vld [vmem:[%s12147_s8 + $0x408] sm:$0xff] }
 0x8dd   :  { %v6109_v59 = vpack.c.bf16 %v2845_v37, %v2841_v56  ;;  %v2852_v63 = vld [vmem:[%s12147_s8 + $0x428] sm:$0xff]  ;;  %v2873_v37 = vld [vmem:[%s12147_s8 + $0x4d0] sm:$0xff] }
 0x8df   :  { %5946 = vmatpush1.bf16.msra.mxu0 %v5945_v52  ;;  %6074 = vmatpush1.bf16.msra.mxu1 %v6073_v53  ;;  %v5965_v52 = vpack.c.bf16 %v2811_v11, %v2807_v10  ;;  %v6093_v53 = vpack.c.bf16 %v2813_v54, %v2809_v18  ;;  %v2854_v10 = vld [vmem:[%s12147_s8 + $0x438] sm:$0xff] }
 0x8e0   :  { %5948 = vmatprep.subr.bf16.mxu0 %v5947_v2  ;;  %6076 = vmatprep.subr.bf16.mxu1 %v6075_v3  ;;  %v5967_v2 = vpack.c.bf16 %v2820_v39, %v2816_v19  ;;  %v6095_v3 = vpack.c.bf16 %v2822_v51, %v2818_v43  ;;  %v2847_v43 = vld [vmem:[%s12147_s8 + $0x400] sm:$0xff] }
 0x8e3   :  { %5950 = vmatpush1.bf16.msra.mxu0 %v5949_v30  ;;  %6078 = vmatpush1.bf16.msra.mxu1 %v6077_v31  ;;  %v5969_v30 = vpack.c.bf16 %v2819_v1, %v2815_v57  ;;  %v6097_v31 = vpack.c.bf16 %v2821_v15, %v2817_v7  ;;  %v2851_v57 = vld [vmem:[%s12147_s8 + $0x420] sm:$0xff]  ;;  %v2849_v1 = vld [vmem:[%s12147_s8 + $0x410] sm:$0xff]  ;;  %v2856_v7 = vld [vmem:[%s12147_s8 + $0x448] sm:$0xff] }
 0x8e4   :  { %5952 = vmatprep.subr.bf16.mxu0 %v5951_v49  ;;  %6080 = vmatprep.subr.bf16.mxu1 %v6079_v50  ;;  %v5971_v49 = vpack.c.bf16 %v2828_v17, %v2824_v16  ;;  %v6099_v50 = vpack.c.bf16 %v2830_v29, %v2826_v21  ;;  %v2860_v16 = vld [vmem:[%s12147_s8 + $0x468] sm:$0xff]  ;;  %v2858_v17 = vld [vmem:[%s12147_s8 + $0x458] sm:$0xff] }
 0x8e5   :  { %v2862_v21 = vld [vmem:[%s12147_s8 + $0x478] sm:$0xff]  ;;  %v5987_v8 = vpack.c.bf16 %v2860_v16, %v2856_v7  ;;  %v2887_v7 = vld [vmem:[%s12147_s8 + $0x540] sm:$0xff] }
 0x8e6   :  { %v6115_v12 = vpack.c.bf16 %v2862_v21, %v2858_v17  ;;  %v2889_v21 = vld [vmem:[%s12147_s8 + $0x550] sm:$0xff] }
 0x8e7   :  { %5954 = vmatpush1.bf16.msra.mxu0 %v5953_v26  ;;  %6082 = vmatpush1.bf16.msra.mxu1 %v6081_v27  ;;  %v5973_v26 = vpack.c.bf16 %v2827_v48, %v2823_v35  ;;  %v6101_v27 = vpack.c.bf16 %v2829_v6, %v2825_v58  ;;  %v2855_v35 = vld [vmem:[%s12147_s8 + $0x440] sm:$0xff]  ;;  %v2861_v58 = vld [vmem:[%s12147_s8 + $0x470] sm:$0xff]  ;;  %v2864_v6 = vld [vmem:[%s12147_s8 + $0x488] sm:$0xff] }
 0x8e8   :  { %5956 = vmatprep.subr.bf16.mxu0 %v5955_v20  ;;  %6084 = vmatprep.subr.bf16.mxu1 %v6083_v41  ;;  %v6103_v20 = vpack.c.bf16 %v2838_v25, %v2834_v24  ;;  %v2835_v41 = vld [vmem:[%s12147_s8 + $0x3a0] sm:$0xff]  ;;  %v2868_v24 = vld [vmem:[%s12147_s8 + $0x4a8] sm:$0xff]  ;;  %v2866_v25 = vld [vmem:[%s12147_s8 + $0x498] sm:$0xff] }
 0x8e9   :  { %v5977_v23 = vpack.c.bf16 %v2835_v41, %v2831_v34  ;;  %v2859_v48 = vld [vmem:[%s12147_s8 + $0x460] sm:$0xff]  ;;  %v5991_v22 = vpack.c.bf16 %v2868_v24, %v2864_v6  ;;  %v2897_v24 = vld [vmem:[%s12147_s8 + $0x590] sm:$0xff] }
 0x8ea   :  { %v5989_v34 = vpack.c.bf16 %v2859_v48, %v2855_v35  ;;  %v2867_v41 = vld [vmem:[%s12147_s8 + $0x4a0] sm:$0xff]  ;;  %v2898_v35 = vld [vmem:[%s12147_s8 + $0x598] sm:$0xff] }
 0x8eb   :  { %5958 = vmatpush1.bf16.msra.mxu0 %v5957_v61  ;;  %6086 = vmatpush1.bf16.msra.mxu1 %v6085_v0  ;;  %v2842_v61 = vld [vmem:[%s12147_s8 + $0x3d8] sm:$0xff]  ;;  %v5979_v0 = vpack.c.bf16 %v2844_v44, %v2840_v32  ;;  %v2872_v32 = vld [vmem:[%s12147_s8 + $0x4c8] sm:$0xff]  ;;  %v2899_v6 = vld [vmem:[%s12147_s8 + $0x5a0] sm:$0xff] }
 0x8ec   :  { %5960 = vmatprep.subr.bf16.mxu0 %v5959_v55  ;;  %6088 = vmatprep.subr.bf16.mxu1 %v6087_v5  ;;  %v2843_v55 = vld [vmem:[%s12147_s8 + $0x3e0] sm:$0xff]  ;;  %v6107_v5 = vpack.c.bf16 %v2846_v46, %v2842_v61  ;;  %v2876_v44 = vld [vmem:[%s12147_s8 + $0x4e8] sm:$0xff]  ;;  %v2874_v61 = vld [vmem:[%s12147_s8 + $0x4d8] sm:$0xff] }
 0x8ed   :  { %v5981_v36 = vpack.c.bf16 %v2843_v55, %v2839_v47  ;;  %v2871_v55 = vld [vmem:[%s12147_s8 + $0x4c0] sm:$0xff]  ;;  %v2902_v48 = vld [vmem:[%s12147_s8 + $0x5b8] sm:$0xff] }
 0x8ef   :  { %5962 = vmatpush1.bf16.msra.mxu0 %v5961_v4  ;;  %6090 = vmatpush1.bf16.msra.mxu1 %v6089_v9  ;;  %v2850_v4 = vld [vmem:[%s12147_s8 + $0x418] sm:$0xff]  ;;  %v5983_v9 = vpack.c.bf16 %v2852_v63, %v2848_v60  ;;  %v2880_v60 = vld [vmem:[%s12147_s8 + $0x508] sm:$0xff] }
 0x8f0   :  { %5964 = vmatprep.subr.bf16.mxu0 %v5963_v13  ;;  %6092 = vmatprep.subr.bf16.mxu1 %v6091_v14  ;;  %v6111_v11 = vpack.c.bf16 %v2854_v10, %v2850_v4  ;;  %v9383_v13 = vld [vmem:[%s12148_s7] sm:$0xf]  ;;  %v2884_v63 = vld [vmem:[%s12147_s8 + $0x528] sm:$0xff]  ;;  %v2882_v4 = vld [vmem:[%s12147_s8 + $0x518] sm:$0xff] }
 0x8f1   :  { %v263_v14 = vrot.slane %v9383_v13, %v8505_v33  ;;  %v267_v18 = vrot.slane %v9383_v13, %v8510_v40  ;;  %v275_v54 = vrot.slane %v9383_v13, %v8518_v45 }
 0x8f3   :  { %5966 = vmatpush1.bf16.msra.mxu0 %v5965_v52  ;;  %6094 = vmatpush1.bf16.msra.mxu1 %v6093_v53 }
 0x8f4   :  { %5968 = vmatprep.subr.bf16.mxu0 %v5967_v2  ;;  %6096 = vmatprep.subr.bf16.mxu1 %v6095_v3  ;;  %v2853_v2 = vld [vmem:[%s12147_s8 + $0x430] sm:$0xff] }
 0x8f7   :  { %5970 = vmatpush1.bf16.msra.mxu0 %v5969_v30  ;;  %6098 = vmatpush1.bf16.msra.mxu1 %v6097_v31  ;;  %v5985_v30 = vpack.c.bf16 %v2851_v57, %v2847_v43  ;;  %v6113_v31 = vpack.c.bf16 %v2853_v2, %v2849_v1  ;;  %v2881_v43 = vld [vmem:[%s12147_s8 + $0x510] sm:$0xff]  ;;  %v2890_v57 = vld [vmem:[%s12147_s8 + $0x558] sm:$0xff] }
 0x8f8   :  { %5972 = vmatprep.subr.bf16.mxu0 %v5971_v49  ;;  %6100 = vmatprep.subr.bf16.mxu1 %v6099_v50  ;;  %v2857_v50 = vld [vmem:[%s12147_s8 + $0x450] sm:$0xff]  ;;  %v2894_v1 = vld [vmem:[%s12147_s8 + $0x578] sm:$0xff] }
 0x8f9   :  { %v6131_v17 = vpack.c.bf16 %v2894_v1, %v2890_v57  ;;  %v2928_v57 = vld [vmem:[%s12147_s8 + $0x688] sm:$0xff] }
 0x8fa   :  { %v2932_v1 = vld [vmem:[%s12147_s8 + $0x6a8] sm:$0xff] }
 0x8fb   :  { %5974 = vmatpush1.bf16.msra.mxu0 %v5973_v26  ;;  %6102 = vmatpush1.bf16.msra.mxu1 %v6101_v27  ;;  %v2870_v26 = vld [vmem:[%s12147_s8 + $0x4b8] sm:$0xff] }
 0x8fc   :  { %5976 = vmatprep.subr.bf16.mxu0 %v5975_v38  ;;  %6104 = vmatprep.subr.bf16.mxu1 %v6103_v20  ;;  %v6117_v38 = vpack.c.bf16 %v2861_v58, %v2857_v50  ;;  %v2863_v20 = vld [vmem:[%s12147_s8 + $0x480] sm:$0xff]  ;;  %v6119_v42 = vpack.c.bf16 %v2870_v26, %v2866_v25  ;;  %v2901_v25 = vld [vmem:[%s12147_s8 + $0x5b0] sm:$0xff]  ;;  %v2904_v26 = vld [vmem:[%s12147_s8 + $0x5c8] sm:$0xff] }
 0x8fd   :  { %v5993_v46 = vpack.c.bf16 %v2867_v41, %v2863_v20  ;;  %v2895_v58 = vld [vmem:[%s12147_s8 + $0x580] sm:$0xff]  ;;  %v6137_v41 = vpack.c.bf16 %v2901_v25, %v2897_v24 }
 0x8fe   :  { %v6009_v20 = vpack.c.bf16 %v2899_v6, %v2895_v58 }
 0x8ff   :  { %5978 = vmatpush1.bf16.msra.mxu0 %v5977_v23  ;;  %6106 = vmatpush1.bf16.msra.mxu1 %v6105_v28  ;;  %v2865_v23 = vld [vmem:[%s12147_s8 + $0x490] sm:$0xff] }
 0x900   :  { %5980 = vmatprep.subr.bf16.mxu0 %v5979_v0  ;;  %6108 = vmatprep.subr.bf16.mxu1 %v6107_v5  ;;  %v2869_v28 = vld [vmem:[%s12147_s8 + $0x4b0] sm:$0xff]  ;;  %v2878_v0 = vld [vmem:[%s12147_s8 + $0x4f8] sm:$0xff]  ;;  %v2875_v5 = vld [vmem:[%s12147_s8 + $0x4e0] sm:$0xff] }
 0x901   :  { %v6121_v47 = vpack.c.bf16 %v2869_v28, %v2865_v23  ;;  %v6123_v56 = vpack.c.bf16 %v2878_v0, %v2874_v61  ;;  %v5997_v10 = vpack.c.bf16 %v2875_v5, %v2871_v55  ;;  %v2912_v61 = vld [vmem:[%s12147_s8 + $0x608] sm:$0xff] }
 0x902   :  { %v2916_v0 = vld [vmem:[%s12147_s8 + $0x628] sm:$0xff] }
 0x903   :  { %5982 = vmatpush1.bf16.msra.mxu0 %v5981_v36  ;;  %6110 = vmatpush1.bf16.msra.mxu1 %v6109_v59  ;;  %v5995_v36 = vpack.c.bf16 %v2876_v44, %v2872_v32  ;;  %v2877_v59 = vld [vmem:[%s12147_s8 + $0x4f0] sm:$0xff] }
 0x904   :  { %5984 = vmatprep.subr.bf16.mxu0 %v5983_v9  ;;  %6112 = vmatprep.subr.bf16.mxu1 %v6111_v11  ;;  %v2886_v9 = vld [vmem:[%s12147_s8 + $0x538] sm:$0xff]  ;;  %v6125_v11 = vpack.c.bf16 %v2877_v59, %v2873_v37  ;;  %v2905_v32 = vld [vmem:[%s12147_s8 + $0x5d0] sm:$0xff]  ;;  %v6015_v37 = vpack.c.bf16 %v2916_v0, %v2912_v61 }
 0x905   :  { %v2909_v44 = vld [vmem:[%s12147_s8 + $0x5f0] sm:$0xff] }
 0x906   :  { %v6141_v5 = vpack.c.bf16 %v2909_v44, %v2905_v32  ;;  %v2945_v61 = vld [vmem:[%s12147_s8 + $0x710] sm:$0xff] }
 0x907   :  { %v2949_v0 = vld [vmem:[%s12147_s8 + $0x730] sm:$0xff] }
 0x999   :  { %v2639_v19 = vpop.f32.mrb[0].mxu0  ;;  %v9391_v39 = vpop.f32.mrb[0].mxu1 }
 0x99a   :  { %v6943_v51 = vadd.f32 %v2639_v19, %v263_v14  ;;  %v2641_v52 = vpop.f32.mrb[1].mxu0  ;;  %v2712_v53 = vpop.f32.mrb[1].mxu1  ;;  %v2879_v14 = vld [vmem:[%s12147_s8 + $0x500] sm:$0xff]  ;;  %v6127_v19 = vpack.c.bf16 %v2886_v9, %v2882_v4  ;;  %v2920_v4 = vld [vmem:[%s12147_s8 + $0x648] sm:$0xff] }
 0x99b   :  { %v6944_v3 = vadd.f32 %v2641_v52, %v267_v18  ;;  %v6946_v15 = vadd.f32 %v2712_v53, %v275_v54  ;;  %v2883_v18 = vld [vmem:[%s12147_s8 + $0x520] sm:$0xff]  ;;  %v5999_v54 = vpack.c.bf16 %v2884_v63, %v2880_v60  ;;  %v2888_v52 = vld [vmem:[%s12147_s8 + $0x548] sm:$0xff]  ;;  %v2913_v60 = vld [vmem:[%s12147_s8 + $0x610] sm:$0xff] }
 0x99c   :  { %v2715_v49 = vmax.f32 %v6943_v51, 0.0  ;;  %v2885_v51 = vld [vmem:[%s12147_s8 + $0x530] sm:$0xff]  ;;  %v2892_v53 = vld [vmem:[%s12147_s8 + $0x568] sm:$0xff]  ;;  %v6001_v2 = vpack.c.bf16 %v2883_v18, %v2879_v14 }
 0x99d   :  { %v2716_v29 = vmax.f32 %v6944_v3, 0.0  ;;  %v2718_v27 = vmax.f32 %v6946_v15, 0.0  ;;  %v6129_v3 = vpack.c.bf16 %v2885_v51, %v2881_v43  ;;  %v2891_v15 = vld [vmem:[%s12147_s8 + $0x560] sm:$0xff]  ;;  %v6003_v16 = vpack.c.bf16 %v2892_v53, %v2888_v52  ;;  %v2917_v63 = vld [vmem:[%s12147_s8 + $0x630] sm:$0xff]  ;;  %v2924_v9 = vld [vmem:[%s12147_s8 + $0x668] sm:$0xff] }
 0x99e   :  { %v6145_v18 = vpack.c.bf16 %v2917_v63, %v2913_v60  ;;  %v6019_v43 = vpack.c.bf16 %v2924_v9, %v2920_v4  ;;  %v2921_v52 = vld [vmem:[%s12147_s8 + $0x650] sm:$0xff] }
 0x99f   :  { %3061 = vmatprep.mubr.f32.mxu0 %v2716_v29  ;;  %3203 = vmatprep.mubr.f32.mxu1 %v2716_v29  ;;  %v2893_v29 = vld [vmem:[%s12147_s8 + $0x570] sm:$0xff] }
 0x9a0   :  { %3062 = vmatmul.mubr.f32.vlgmr.msra.gmra.mrb[18].mxu0 %v2715_v49  ;;  %3204 = vmatmul.mubr.f32.vlgmr.msra.gmra.mrb[18].mxu1 %v2715_v49  ;;  %v6005_v49 = vpack.c.bf16 %v2891_v15, %v2887_v7  ;;  %v6133_v50 = vpack.c.bf16 %v2893_v29, %v2889_v21  ;;  %v2925_v53 = vld [vmem:[%s12147_s8 + $0x670] sm:$0xff]  ;;  %v6023_v21 = vpack.c.bf16 %v2932_v1, %v2928_v57 }
 0x9a1   :  { %5986 = vmatpush1.bf16.msra.mxu0 %v5985_v30  ;;  %6114 = vmatpush1.bf16.msra.mxu1 %v6113_v31  ;;  %v2896_v30 = vld [vmem:[%s12147_s8 + $0x588] sm:$0xff]  ;;  %v6149_v15 = vpack.c.bf16 %v2925_v53, %v2921_v52  ;;  %v2953_v4 = vld [vmem:[%s12147_s8 + $0x750] sm:$0xff] }
 0x9a2   :  { %3132 = vmatprep.mubr.f32.mxu0 %v2718_v27  ;;  %3274 = vmatprep.mubr.f32.mxu1 %v2718_v27  ;;  %v2900_v31 = vld [vmem:[%s12147_s8 + $0x5a8] sm:$0xff]  ;;  %v2957_v9 = vld [vmem:[%s12147_s8 + $0x770] sm:$0xff] }
 0x9a3   :  { %5988 = vmatprep.subr.bf16.mxu0 %v5987_v8  ;;  %6116 = vmatprep.subr.bf16.mxu1 %v6115_v12  ;;  %v6007_v8 = vpack.c.bf16 %v2900_v31, %v2896_v30  ;;  %v6135_v12 = vpack.c.bf16 %v2902_v48, %v2898_v35  ;;  %v2908_v27 = vld [vmem:[%s12147_s8 + $0x5e8] sm:$0xff]  ;;  %v2929_v30 = vld [vmem:[%s12147_s8 + $0x690] sm:$0xff] }
 0x9a4   :  { %v6011_v23 = vpack.c.bf16 %v2908_v27, %v2904_v26  ;;  %v2933_v31 = vld [vmem:[%s12147_s8 + $0x6b0] sm:$0xff]  ;;  %v2936_v35 = vld [vmem:[%s12147_s8 + $0x6c8] sm:$0xff] }
 0x9a5   :  { %5990 = vmatpush1.bf16.msra.mxu0 %v5989_v34  ;;  %6118 = vmatpush1.bf16.msra.mxu1 %v6117_v38  ;;  %v2906_v34 = vld [vmem:[%s12147_s8 + $0x5d8] sm:$0xff]  ;;  %v2940_v48 = vld [vmem:[%s12147_s8 + $0x6e8] sm:$0xff]  ;;  %v6153_v6 = vpack.c.bf16 %v2933_v31, %v2929_v30  ;;  %v2937_v26 = vld [vmem:[%s12147_s8 + $0x6d0] sm:$0xff]  ;;  %v271_v30 = vrot.slane %v9383_v13, %v8525_v62 }
 0x9a6   :  { %5992 = vmatprep.subr.bf16.mxu0 %v5991_v22  ;;  %6120 = vmatprep.subr.bf16.mxu1 %v6119_v42  ;;  %v2910_v38 = vld [vmem:[%s12147_s8 + $0x5f8] sm:$0xff]  ;;  %v2903_v22 = vld [vmem:[%s12147_s8 + $0x5c0] sm:$0xff]  ;;  %v6027_v24 = vpack.c.bf16 %v2940_v48, %v2936_v35  ;;  %v2941_v27 = vld [vmem:[%s12147_s8 + $0x6f0] sm:$0xff] }
 0x9a7   :  { %v2907_v42 = vld [vmem:[%s12147_s8 + $0x5e0] sm:$0xff]  ;;  %v6139_v28 = vpack.c.bf16 %v2910_v38, %v2906_v34  ;;  %v2944_v34 = vld [vmem:[%s12147_s8 + $0x708] sm:$0xff]  ;;  %v2961_v57 = vld [vmem:[%s12147_s8 + $0x790] sm:$0xff] }
 0x9a8   :  { %v6013_v55 = vpack.c.bf16 %v2907_v42, %v2903_v22  ;;  %v2948_v38 = vld [vmem:[%s12147_s8 + $0x728] sm:$0xff]  ;;  %v6157_v42 = vpack.c.bf16 %v2941_v27, %v2937_v26  ;;  %v2965_v1 = vld [vmem:[%s12147_s8 + $0x7b0] sm:$0xff]  ;;  %v6945_v26 = vadd.f32 %v9391_v39, %v271_v30 }
 0x9a9   :  { %5994 = vmatpush1.bf16.msra.mxu0 %v5993_v46  ;;  %6122 = vmatpush1.bf16.msra.mxu1 %v6121_v47  ;;  %v2914_v46 = vld [vmem:[%s12147_s8 + $0x618] sm:$0xff]  ;;  %v6031_v32 = vpack.c.bf16 %v2948_v38, %v2944_v34  ;;  %v2969_v48 = vld [vmem:[%s12147_s8 + $0x7d0] sm:$0xff]  ;;  %v3290_v13 = vld [vmem:[%s12149_s10 + $0x28] sm:$0xff] }
 0x9aa   :  { %5996 = vmatprep.subr.bf16.mxu0 %v5995_v36  ;;  %6124 = vmatprep.subr.bf16.mxu1 %v6123_v56  ;;  %v2918_v47 = vld [vmem:[%s12147_s8 + $0x638] sm:$0xff]  ;;  %v2911_v36 = vld [vmem:[%s12147_s8 + $0x600] sm:$0xff]  ;;  %v3287_v38 = vld [vmem:[%s12149_s10 + $0x10] sm:$0xff] }
 0x9ab   :  { %v2915_v56 = vld [vmem:[%s12147_s8 + $0x620] sm:$0xff]  ;;  %v6143_v59 = vpack.c.bf16 %v2918_v47, %v2914_v46  ;;  %v2952_v46 = vld [vmem:[%s12147_s8 + $0x748] sm:$0xff] }
 0x9ac   :  { %v6017_v14 = vpack.c.bf16 %v2915_v56, %v2911_v36  ;;  %v2956_v47 = vld [vmem:[%s12147_s8 + $0x768] sm:$0xff]  ;;  %v6161_v56 = vpack.c.bf16 %v2949_v0, %v2945_v61  ;;  %v2717_v61 = vmax.f32 %v6945_v26, 0.0  ;;  %v3325_v26 = vld [vmem:[%s12149_s10 + $0x140] sm:$0xff] }
 0x9ad   :  { %5998 = vmatpush1.bf16.msra.mxu0 %v5997_v10  ;;  %6126 = vmatpush1.bf16.msra.mxu1 %v6125_v11  ;;  %v2922_v10 = vld [vmem:[%s12147_s8 + $0x658] sm:$0xff]  ;;  %v6035_v60 = vpack.c.bf16 %v2956_v47, %v2952_v46  ;;  %v3298_v39 = vld [vmem:[%s12149_s10 + $0x68] sm:$0xff]  ;;  %v3295_v47 = vld [vmem:[%s12149_s10 + $0x50] sm:$0xff] }
 0x9ae   :  { %6000 = vmatprep.subr.bf16.mxu0 %v5999_v54  ;;  %6128 = vmatprep.subr.bf16.mxu1 %v6127_v19  ;;  %v2926_v11 = vld [vmem:[%s12147_s8 + $0x678] sm:$0xff]  ;;  %v2919_v54 = vld [vmem:[%s12147_s8 + $0x640] sm:$0xff] }
 0x9af   :  { %v2923_v19 = vld [vmem:[%s12147_s8 + $0x660] sm:$0xff]  ;;  %v6147_v51 = vpack.c.bf16 %v2926_v11, %v2922_v10  ;;  %v2960_v10 = vld [vmem:[%s12147_s8 + $0x788] sm:$0xff] }
 0x9b0   :  { %v6021_v7 = vpack.c.bf16 %v2923_v19, %v2919_v54  ;;  %v2964_v11 = vld [vmem:[%s12147_s8 + $0x7a8] sm:$0xff]  ;;  %v6165_v19 = vpack.c.bf16 %v2957_v9, %v2953_v4  ;;  %v3305_v4 = vld [vmem:[%s12149_s10 + $0xa0] sm:$0xff] }
 0x9b1   :  { %6002 = vmatpush1.bf16.msra.mxu0 %v6001_v2  ;;  %6130 = vmatpush1.bf16.msra.mxu1 %v6129_v3  ;;  %v2930_v2 = vld [vmem:[%s12147_s8 + $0x698] sm:$0xff]  ;;  %v6039_v52 = vpack.c.bf16 %v2964_v11, %v2960_v10  ;;  %v3303_v11 = vld [vmem:[%s12149_s10 + $0x90] sm:$0xff] }
 0x9b2   :  { %6004 = vmatprep.subr.bf16.mxu0 %v6003_v16  ;;  %6132 = vmatprep.subr.bf16.mxu1 %v6131_v17  ;;  %v2934_v3 = vld [vmem:[%s12147_s8 + $0x6b8] sm:$0xff]  ;;  %v2927_v16 = vld [vmem:[%s12147_s8 + $0x680] sm:$0xff] }
 0x9b3   :  { %v2931_v17 = vld [vmem:[%s12147_s8 + $0x6a0] sm:$0xff]  ;;  %v6151_v29 = vpack.c.bf16 %v2934_v3, %v2930_v2  ;;  %v2968_v2 = vld [vmem:[%s12147_s8 + $0x7c8] sm:$0xff] }
 0x9b4   :  { %v6025_v58 = vpack.c.bf16 %v2931_v17, %v2927_v16  ;;  %v2972_v3 = vld [vmem:[%s12147_s8 + $0x7e8] sm:$0xff]  ;;  %v6169_v17 = vpack.c.bf16 %v2965_v1, %v2961_v57  ;;  %v3313_v57 = vld [vmem:[%s12149_s10 + $0xe0] sm:$0xff] }
 0x9b5   :  { %6006 = vmatpush1.bf16.msra.mxu0 %v6005_v49  ;;  %6134 = vmatpush1.bf16.msra.mxu1 %v6133_v50  ;;  %v2938_v49 = vld [vmem:[%s12147_s8 + $0x6d8] sm:$0xff]  ;;  %v6043_v31 = vpack.c.bf16 %v2972_v3, %v2968_v2  ;;  %v3311_v3 = vld [vmem:[%s12149_s10 + $0xd0] sm:$0xff] }
 0x9b6   :  { %6008 = vmatprep.subr.bf16.mxu0 %v6007_v8  ;;  %6136 = vmatprep.subr.bf16.mxu1 %v6135_v12  ;;  %v2942_v50 = vld [vmem:[%s12147_s8 + $0x6f8] sm:$0xff]  ;;  %v2935_v8 = vld [vmem:[%s12147_s8 + $0x6c0] sm:$0xff] }
 0x9b7   :  { %v2939_v12 = vld [vmem:[%s12147_s8 + $0x6e0] sm:$0xff]  ;;  %v6155_v25 = vpack.c.bf16 %v2942_v50, %v2938_v49  ;;  %v2973_v49 = vld [vmem:[%s12147_s8 + $0x7f0] sm:$0xff]  ;;  %v3286_v50 = vld [vmem:[%s12149_s10 + $0x8] sm:$0xff] }
 0x9b8   :  { %v6029_v22 = vpack.c.bf16 %v2939_v12, %v2935_v8  ;;  %v6173_v12 = vpack.c.bf16 %v2973_v49, %v2969_v48  ;;  %v6175_v27 = vpack.c.bf16 %v3290_v13, %v3286_v50  ;;  %v3319_v50 = vld [vmem:[%s12149_s10 + $0x110] sm:$0xff] }
 0x9b9   :  { %6010 = vmatpush1.bf16.msra.mxu0 %v6009_v20  ;;  %6138 = vmatpush1.bf16.msra.mxu1 %v6137_v41  ;;  %v2946_v20 = vld [vmem:[%s12147_s8 + $0x718] sm:$0xff]  ;;  %v3323_v13 = vld [vmem:[%s12149_s10 + $0x130] sm:$0xff] }
 0x9ba   :  { %6012 = vmatprep.subr.bf16.mxu0 %v6011_v23  ;;  %6140 = vmatprep.subr.bf16.mxu1 %v6139_v28  ;;  %v2950_v41 = vld [vmem:[%s12147_s8 + $0x738] sm:$0xff]  ;;  %v2943_v23 = vld [vmem:[%s12147_s8 + $0x700] sm:$0xff] }
 0x9bb   :  { %v2947_v28 = vld [vmem:[%s12147_s8 + $0x720] sm:$0xff]  ;;  %v6159_v44 = vpack.c.bf16 %v2950_v41, %v2946_v20  ;;  %v3291_v20 = vld [vmem:[%s12149_s10 + $0x30] sm:$0xff]  ;;  %v3294_v41 = vld [vmem:[%s12149_s10 + $0x48] sm:$0xff] }
 0x9bc   :  { %v6033_v36 = vpack.c.bf16 %v2947_v28, %v2943_v23  ;;  %v6305_v28 = vpack.c.bf16 %v3291_v20, %v3287_v38  ;;  %v6179_v0 = vpack.c.bf16 %v3298_v39, %v3294_v41  ;;  %v3327_v20 = vld [vmem:[%s12149_s10 + $0x150] sm:$0xff]  ;;  %v3334_v39 = vld [vmem:[%s12149_s10 + $0x188] sm:$0xff] }
 0x9bd   :  { %6014 = vmatpush1.bf16.msra.mxu0 %v6013_v55  ;;  %6142 = vmatpush1.bf16.msra.mxu1 %v6141_v5  ;;  %v2954_v55 = vld [vmem:[%s12147_s8 + $0x758] sm:$0xff]  ;;  %v3331_v41 = vld [vmem:[%s12149_s10 + $0x170] sm:$0xff] }
 0x9be   :  { %6016 = vmatprep.subr.bf16.mxu0 %v6015_v37  ;;  %6144 = vmatprep.subr.bf16.mxu1 %v6143_v59  ;;  %v2958_v5 = vld [vmem:[%s12147_s8 + $0x778] sm:$0xff]  ;;  %v2951_v37 = vld [vmem:[%s12147_s8 + $0x740] sm:$0xff] }
 0x9bf   :  { %v2955_v59 = vld [vmem:[%s12147_s8 + $0x760] sm:$0xff]  ;;  %v6163_v63 = vpack.c.bf16 %v2958_v5, %v2954_v55  ;;  %v3299_v55 = vld [vmem:[%s12149_s10 + $0x70] sm:$0xff]  ;;  %v3302_v5 = vld [vmem:[%s12149_s10 + $0x88] sm:$0xff] }
 0x9c0   :  { %v6037_v54 = vpack.c.bf16 %v2955_v59, %v2951_v37  ;;  %v3308_v37 = vld [vmem:[%s12149_s10 + $0xb8] sm:$0xff] }
 0x9c1   :  { %6018 = vmatpush1.bf16.msra.mxu0 %v6017_v14  ;;  %6146 = vmatpush1.bf16.msra.mxu1 %v6145_v18  ;;  %v2962_v14 = vld [vmem:[%s12147_s8 + $0x798] sm:$0xff] }
 0x9c2   :  { %6020 = vmatprep.subr.bf16.mxu0 %v6019_v43  ;;  %6148 = vmatprep.subr.bf16.mxu1 %v6147_v51  ;;  %v2966_v18 = vld [vmem:[%s12147_s8 + $0x7b8] sm:$0xff]  ;;  %v2959_v43 = vld [vmem:[%s12147_s8 + $0x780] sm:$0xff] }
 0x9c3   :  { %v2963_v51 = vld [vmem:[%s12147_s8 + $0x7a0] sm:$0xff]  ;;  %v6167_v53 = vpack.c.bf16 %v2966_v18, %v2962_v14  ;;  %v3307_v14 = vld [vmem:[%s12149_s10 + $0xb0] sm:$0xff]  ;;  %v3310_v18 = vld [vmem:[%s12149_s10 + $0xc8] sm:$0xff] }
 0x9c4   :  { %v6041_v16 = vpack.c.bf16 %v2963_v51, %v2959_v43  ;;  %v3316_v43 = vld [vmem:[%s12149_s10 + $0xf8] sm:$0xff] }
 0x9c5   :  { %6022 = vmatpush1.bf16.msra.mxu0 %v6021_v7  ;;  %6150 = vmatpush1.bf16.msra.mxu1 %v6149_v15  ;;  %v2970_v7 = vld [vmem:[%s12147_s8 + $0x7d8] sm:$0xff] }
 0x9c6   :  { %6024 = vmatprep.subr.bf16.mxu0 %v6023_v21  ;;  %6152 = vmatprep.subr.bf16.mxu1 %v6151_v29  ;;  %v2974_v15 = vld [vmem:[%s12147_s8 + $0x7f8] sm:$0xff]  ;;  %v2967_v21 = vld [vmem:[%s12147_s8 + $0x7c0] sm:$0xff] }
 0x9c7   :  { %v2971_v29 = vld [vmem:[%s12147_s8 + $0x7e0] sm:$0xff]  ;;  %v6171_v35 = vpack.c.bf16 %v2974_v15, %v2970_v7  ;;  %v3315_v7 = vld [vmem:[%s12149_s10 + $0xf0] sm:$0xff]  ;;  %v3318_v15 = vld [vmem:[%s12149_s10 + $0x108] sm:$0xff] }
 0x9c8   :  { %v6045_v8 = vpack.c.bf16 %v2971_v29, %v2967_v21  ;;  %v3324_v21 = vld [vmem:[%s12149_s10 + $0x138] sm:$0xff]  ;;  %v6317_v30 = vpack.c.bf16 %v3315_v7, %v3311_v3  ;;  %v3351_v3 = vld [vmem:[%s12149_s10 + $0x210] sm:$0xff] }
 0x9c9   :  { %6026 = vmatpush1.bf16.msra.mxu0 %v6025_v58  ;;  %6154 = vmatpush1.bf16.msra.mxu1 %v6153_v6  ;;  %v3288_v58 = vld [vmem:[%s12149_s10 + $0x18] sm:$0xff]  ;;  %v3355_v7 = vld [vmem:[%s12149_s10 + $0x230] sm:$0xff] }
 0x9ca   :  { %6028 = vmatprep.subr.bf16.mxu0 %v6027_v24  ;;  %6156 = vmatprep.subr.bf16.mxu1 %v6155_v25  ;;  %v3292_v6 = vld [vmem:[%s12149_s10 + $0x38] sm:$0xff]  ;;  %v3285_v24 = vld [vmem:[%s12149_s10] sm:$0xff] }
 0x9cb   :  { %v3289_v25 = vld [vmem:[%s12149_s10 + $0x20] sm:$0xff]  ;;  %v6303_v34 = vpack.c.bf16 %v3292_v6, %v3288_v58  ;;  %v3326_v58 = vld [vmem:[%s12149_s10 + $0x148] sm:$0xff] }
 0x9cc   :  { %v6177_v23 = vpack.c.bf16 %v3289_v25, %v3285_v24  ;;  %v3330_v6 = vld [vmem:[%s12149_s10 + $0x168] sm:$0xff]  ;;  %v6321_v25 = vpack.c.bf16 %v3323_v13, %v3319_v50  ;;  %v3359_v50 = vld [vmem:[%s12149_s10 + $0x250] sm:$0xff] }
 0x9cd   :  { %6030 = vmatpush1.bf16.msra.mxu0 %v6029_v22  ;;  %6158 = vmatpush1.bf16.msra.mxu1 %v6157_v42  ;;  %v3296_v22 = vld [vmem:[%s12149_s10 + $0x58] sm:$0xff]  ;;  %v3363_v13 = vld [vmem:[%s12149_s10 + $0x270] sm:$0xff] }
 0x9ce   :  { %6032 = vmatprep.subr.bf16.mxu0 %v6031_v32  ;;  %6160 = vmatprep.subr.bf16.mxu1 %v6159_v44  ;;  %v3300_v42 = vld [vmem:[%s12149_s10 + $0x78] sm:$0xff]  ;;  %v3293_v32 = vld [vmem:[%s12149_s10 + $0x40] sm:$0xff] }
 0x9cf   :  { %v3297_v44 = vld [vmem:[%s12149_s10 + $0x60] sm:$0xff]  ;;  %v6307_v46 = vpack.c.bf16 %v3300_v42, %v3296_v22  ;;  %v3338_v22 = vld [vmem:[%s12149_s10 + $0x1a8] sm:$0xff]  ;;  %v3336_v42 = vld [vmem:[%s12149_s10 + $0x198] sm:$0xff] }
 0x9d0   :  { %v6181_v59 = vpack.c.bf16 %v3297_v44, %v3293_v32  ;;  %v6325_v32 = vpack.c.bf16 %v3331_v41, %v3327_v20  ;;  %v3333_v44 = vld [vmem:[%s12149_s10 + $0x180] sm:$0xff]  ;;  %v3367_v20 = vld [vmem:[%s12149_s10 + $0x290] sm:$0xff] }
 0x9d1   :  { %6034 = vmatpush1.bf16.msra.mxu0 %v6033_v36  ;;  %6162 = vmatpush1.bf16.msra.mxu1 %v6161_v56  ;;  %v3306_v36 = vld [vmem:[%s12149_s10 + $0xa8] sm:$0xff]  ;;  %v3304_v56 = vld [vmem:[%s12149_s10 + $0x98] sm:$0xff]  ;;  %v3371_v41 = vld [vmem:[%s12149_s10 + $0x2b0] sm:$0xff] }
 0x9d2   :  { %6036 = vmatprep.subr.bf16.mxu0 %v6035_v60  ;;  %6164 = vmatprep.subr.bf16.mxu1 %v6163_v63  ;;  %v6309_v60 = vpack.c.bf16 %v3299_v55, %v3295_v47  ;;  %v3301_v63 = vld [vmem:[%s12149_s10 + $0x80] sm:$0xff]  ;;  %v6183_v9 = vpack.c.bf16 %v3306_v36, %v3302_v5  ;;  %v6311_v10 = vpack.c.bf16 %v3308_v37, %v3304_v56  ;;  %v3335_v47 = vld [vmem:[%s12149_s10 + $0x190] sm:$0xff]  ;;  %v3342_v5 = vld [vmem:[%s12149_s10 + $0x1c8] sm:$0xff] }
 0x9d3   :  { %v6185_v51 = vpack.c.bf16 %v3305_v4, %v3301_v63  ;;  %v3339_v55 = vld [vmem:[%s12149_s10 + $0x1b0] sm:$0xff]  ;;  %v3346_v36 = vld [vmem:[%s12149_s10 + $0x1e8] sm:$0xff]  ;;  %v3344_v56 = vld [vmem:[%s12149_s10 + $0x1d8] sm:$0xff] }
 0x9d4   :  { %v3348_v37 = vld [vmem:[%s12149_s10 + $0x1f8] sm:$0xff]  ;;  %v3341_v63 = vld [vmem:[%s12149_s10 + $0x1c0] sm:$0xff] }
 0x9d5   :  { %6038 = vmatpush1.bf16.msra.mxu0 %v6037_v54  ;;  %6166 = vmatpush1.bf16.msra.mxu1 %v6165_v19  ;;  %v3314_v54 = vld [vmem:[%s12149_s10 + $0xe8] sm:$0xff]  ;;  %v3312_v19 = vld [vmem:[%s12149_s10 + $0xd8] sm:$0xff]  ;;  %v3345_v4 = vld [vmem:[%s12149_s10 + $0x1e0] sm:$0xff] }
 0x9d6   :  { %6040 = vmatprep.subr.bf16.mxu0 %v6039_v52  ;;  %6168 = vmatprep.subr.bf16.mxu1 %v6167_v53  ;;  %v6313_v52 = vpack.c.bf16 %v3307_v14, %v3303_v11  ;;  %v3309_v53 = vld [vmem:[%s12149_s10 + $0xc0] sm:$0xff]  ;;  %v6187_v1 = vpack.c.bf16 %v3314_v54, %v3310_v18  ;;  %v6315_v2 = vpack.c.bf16 %v3316_v43, %v3312_v19  ;;  %v3343_v11 = vld [vmem:[%s12149_s10 + $0x1d0] sm:$0xff]  ;;  %v3350_v18 = vld [vmem:[%s12149_s10 + $0x208] sm:$0xff] }
 0x9d7   :  { %v6189_v29 = vpack.c.bf16 %v3313_v57, %v3309_v53  ;;  %v3347_v14 = vld [vmem:[%s12149_s10 + $0x1f0] sm:$0xff]  ;;  %v3354_v54 = vld [vmem:[%s12149_s10 + $0x228] sm:$0xff]  ;;  %v3352_v19 = vld [vmem:[%s12149_s10 + $0x218] sm:$0xff] }
 0x9d8   :  { %v3356_v43 = vld [vmem:[%s12149_s10 + $0x238] sm:$0xff]  ;;  %v3349_v53 = vld [vmem:[%s12149_s10 + $0x200] sm:$0xff] }
 0x9d9   :  { %6042 = vmatpush1.bf16.msra.mxu0 %v6041_v16  ;;  %6170 = vmatpush1.bf16.msra.mxu1 %v6169_v17  ;;  %v3322_v16 = vld [vmem:[%s12149_s10 + $0x128] sm:$0xff]  ;;  %v3320_v17 = vld [vmem:[%s12149_s10 + $0x118] sm:$0xff]  ;;  %v3353_v57 = vld [vmem:[%s12149_s10 + $0x220] sm:$0xff] }
 0x9da   :  { %6044 = vmatprep.subr.bf16.mxu0 %v6043_v31  ;;  %6172 = vmatprep.subr.bf16.mxu1 %v6171_v35  ;;  %v3317_v31 = vld [vmem:[%s12149_s10 + $0x100] sm:$0xff]  ;;  %v6191_v48 = vpack.c.bf16 %v3322_v16, %v3318_v15  ;;  %v6319_v49 = vpack.c.bf16 %v3324_v21, %v3320_v17  ;;  %v3358_v15 = vld [vmem:[%s12149_s10 + $0x248] sm:$0xff]  ;;  %v3360_v17 = vld [vmem:[%s12149_s10 + $0x258] sm:$0xff] }
 0x9db   :  { %v3321_v35 = vld [vmem:[%s12149_s10 + $0x120] sm:$0xff]  ;;  %v3362_v16 = vld [vmem:[%s12149_s10 + $0x268] sm:$0xff]  ;;  %v3364_v21 = vld [vmem:[%s12149_s10 + $0x278] sm:$0xff] }
 0x9dc   :  { %v6193_v24 = vpack.c.bf16 %v3321_v35, %v3317_v31  ;;  %v3357_v31 = vld [vmem:[%s12149_s10 + $0x240] sm:$0xff] }
 0x9dd   :  { %6046 = vmatpush1.bf16.msra.mxu0 %v6045_v8  ;;  %6174 = vmatpush1.bf16.msra.mxu1 %v6173_v12  ;;  %v3328_v8 = vld [vmem:[%s12149_s10 + $0x158] sm:$0xff]  ;;  %v3361_v35 = vld [vmem:[%s12149_s10 + $0x260] sm:$0xff] }
 0x9de   :  { %6176 = vmatprep.subr.bf16.mxu0 %v6175_v27  ;;  %6304 = vmatprep.subr.bf16.mxu1 %v6303_v34  ;;  %v3332_v12 = vld [vmem:[%s12149_s10 + $0x178] sm:$0xff]  ;;  %v3329_v27 = vld [vmem:[%s12149_s10 + $0x160] sm:$0xff]  ;;  %v6195_v34 = vpack.c.bf16 %v3330_v6, %v3326_v58  ;;  %v3366_v58 = vld [vmem:[%s12149_s10 + $0x288] sm:$0xff] }
 0x9df   :  { %v6323_v38 = vpack.c.bf16 %v3332_v12, %v3328_v8  ;;  %v3370_v6 = vld [vmem:[%s12149_s10 + $0x2a8] sm:$0xff]  ;;  %v3368_v8 = vld [vmem:[%s12149_s10 + $0x298] sm:$0xff] }
 0x9e0   :  { %3133 = vmatmul.mubr.f32.vlgmr.msra.gmra.mrb[18].mxu0 %v2717_v61  ;;  %3275 = vmatmul.mubr.f32.vlgmr.msra.gmra.mrb[18].mxu1 %v2717_v61  ;;  %v3337_v61 = vld [vmem:[%s12149_s10 + $0x1a0] sm:$0xff]  ;;  %v3372_v12 = vld [vmem:[%s12149_s10 + $0x2b8] sm:$0xff] }
 0x9e1   :  { %6178 = vmatpush1.bf16.msra.mxu0 %v6177_v23  ;;  %6306 = vmatpush1.bf16.msra.mxu1 %v6305_v28  ;;  %v3340_v23 = vld [vmem:[%s12149_s10 + $0x1b8] sm:$0xff]  ;;  %v6197_v28 = vpack.c.bf16 %v3329_v27, %v3325_v26  ;;  %v3365_v26 = vld [vmem:[%s12149_s10 + $0x280] sm:$0xff] }
 0x9e2   :  { %6180 = vmatprep.subr.bf16.mxu0 %v6179_v0  ;;  %6308 = vmatprep.subr.bf16.mxu1 %v6307_v46  ;;  %v6199_v0 = vpack.c.bf16 %v3338_v22, %v3334_v39  ;;  %v6327_v46 = vpack.c.bf16 %v3340_v23, %v3336_v42  ;;  %v3369_v27 = vld [vmem:[%s12149_s10 + $0x2a0] sm:$0xff]  ;;  %v3374_v39 = vld [vmem:[%s12149_s10 + $0x2c8] sm:$0xff]  ;;  %v3376_v42 = vld [vmem:[%s12149_s10 + $0x2d8] sm:$0xff] }
 0x9e3   :  { %v3378_v22 = vld [vmem:[%s12149_s10 + $0x2e8] sm:$0xff]  ;;  %v3380_v23 = vld [vmem:[%s12149_s10 + $0x2f8] sm:$0xff] }
 0x9e5   :  { %6182 = vmatpush1.bf16.msra.mxu0 %v6181_v59  ;;  %6310 = vmatpush1.bf16.msra.mxu1 %v6309_v60  ;;  %v6201_v59 = vpack.c.bf16 %v3337_v61, %v3333_v44  ;;  %v6329_v60 = vpack.c.bf16 %v3339_v55, %v3335_v47  ;;  %v3373_v44 = vld [vmem:[%s12149_s10 + $0x2c0] sm:$0xff]  ;;  %v3375_v47 = vld [vmem:[%s12149_s10 + $0x2d0] sm:$0xff] }
 0x9e6   :  { %6184 = vmatprep.subr.bf16.mxu0 %v6183_v9  ;;  %6312 = vmatprep.subr.bf16.mxu1 %v6311_v10  ;;  %v6203_v9 = vpack.c.bf16 %v3346_v36, %v3342_v5  ;;  %v6331_v10 = vpack.c.bf16 %v3348_v37, %v3344_v56  ;;  %v3377_v61 = vld [vmem:[%s12149_s10 + $0x2e0] sm:$0xff]  ;;  %v3379_v55 = vld [vmem:[%s12149_s10 + $0x2f0] sm:$0xff]  ;;  %v3382_v5 = vld [vmem:[%s12149_s10 + $0x308] sm:$0xff] }
 0x9e7   :  { %v3386_v36 = vld [vmem:[%s12149_s10 + $0x328] sm:$0xff]  ;;  %v3384_v56 = vld [vmem:[%s12149_s10 + $0x318] sm:$0xff] }
 0x9e8   :  { %v3388_v37 = vld [vmem:[%s12149_s10 + $0x338] sm:$0xff] }
 0x9e9   :  { %6186 = vmatpush1.bf16.msra.mxu0 %v6185_v51  ;;  %6314 = vmatpush1.bf16.msra.mxu1 %v6313_v52  ;;  %v6205_v51 = vpack.c.bf16 %v3345_v4, %v3341_v63  ;;  %v6333_v52 = vpack.c.bf16 %v3347_v14, %v3343_v11  ;;  %v3381_v63 = vld [vmem:[%s12149_s10 + $0x300] sm:$0xff]  ;;  %v3383_v11 = vld [vmem:[%s12149_s10 + $0x310] sm:$0xff] }
 0x9ea   :  { %6188 = vmatprep.subr.bf16.mxu0 %v6187_v1  ;;  %6316 = vmatprep.subr.bf16.mxu1 %v6315_v2  ;;  %v6207_v1 = vpack.c.bf16 %v3354_v54, %v3350_v18  ;;  %v6335_v2 = vpack.c.bf16 %v3356_v43, %v3352_v19  ;;  %v3385_v4 = vld [vmem:[%s12149_s10 + $0x320] sm:$0xff]  ;;  %v3387_v14 = vld [vmem:[%s12149_s10 + $0x330] sm:$0xff]  ;;  %v3390_v18 = vld [vmem:[%s12149_s10 + $0x348] sm:$0xff] }
 0x9eb   :  { %v3394_v54 = vld [vmem:[%s12149_s10 + $0x368] sm:$0xff]  ;;  %v3392_v19 = vld [vmem:[%s12149_s10 + $0x358] sm:$0xff] }
 0x9ec   :  { %v3396_v43 = vld [vmem:[%s12149_s10 + $0x378] sm:$0xff] }
 0x9ed   :  { %6190 = vmatpush1.bf16.msra.mxu0 %v6189_v29  ;;  %6318 = vmatpush1.bf16.msra.mxu1 %v6317_v30  ;;  %v6209_v29 = vpack.c.bf16 %v3353_v57, %v3349_v53  ;;  %v6337_v30 = vpack.c.bf16 %v3355_v7, %v3351_v3  ;;  %v3389_v53 = vld [vmem:[%s12149_s10 + $0x340] sm:$0xff]  ;;  %v3391_v3 = vld [vmem:[%s12149_s10 + $0x350] sm:$0xff] }
 0x9ee   :  { %6192 = vmatprep.subr.bf16.mxu0 %v6191_v48  ;;  %6320 = vmatprep.subr.bf16.mxu1 %v6319_v49  ;;  %v6211_v48 = vpack.c.bf16 %v3362_v16, %v3358_v15  ;;  %v6339_v49 = vpack.c.bf16 %v3364_v21, %v3360_v17  ;;  %v3393_v57 = vld [vmem:[%s12149_s10 + $0x360] sm:$0xff]  ;;  %v3395_v7 = vld [vmem:[%s12149_s10 + $0x370] sm:$0xff]  ;;  %v3398_v15 = vld [vmem:[%s12149_s10 + $0x388] sm:$0xff] }
 0x9ef   :  { %v3402_v16 = vld [vmem:[%s12149_s10 + $0x3a8] sm:$0xff]  ;;  %v3400_v17 = vld [vmem:[%s12149_s10 + $0x398] sm:$0xff] }
 0x9f0   :  { %v3404_v21 = vld [vmem:[%s12149_s10 + $0x3b8] sm:$0xff] }
 0x9f1   :  { %6194 = vmatpush1.bf16.msra.mxu0 %v6193_v24  ;;  %6322 = vmatpush1.bf16.msra.mxu1 %v6321_v25  ;;  %v6213_v24 = vpack.c.bf16 %v3361_v35, %v3357_v31  ;;  %v6341_v25 = vpack.c.bf16 %v3363_v13, %v3359_v50  ;;  %v3397_v31 = vld [vmem:[%s12149_s10 + $0x380] sm:$0xff]  ;;  %v6231_v35 = vpack.c.bf16 %v3402_v16, %v3398_v15  ;;  %v3399_v50 = vld [vmem:[%s12149_s10 + $0x390] sm:$0xff] }
 0x9f2   :  { %6196 = vmatprep.subr.bf16.mxu0 %v6195_v34  ;;  %6324 = vmatprep.subr.bf16.mxu1 %v6323_v38  ;;  %v6215_v34 = vpack.c.bf16 %v3370_v6, %v3366_v58  ;;  %v6343_v38 = vpack.c.bf16 %v3372_v12, %v3368_v8  ;;  %v3403_v13 = vld [vmem:[%s12149_s10 + $0x3b0] sm:$0xff]  ;;  %v3406_v8 = vld [vmem:[%s12149_s10 + $0x3c8] sm:$0xff] }
 0x9f3   :  { %v6361_v6 = vpack.c.bf16 %v3403_v13, %v3399_v50  ;;  %v3410_v12 = vld [vmem:[%s12149_s10 + $0x3e8] sm:$0xff] }
 0x9f5   :  { %6198 = vmatpush1.bf16.msra.mxu0 %v6197_v28  ;;  %6326 = vmatpush1.bf16.msra.mxu1 %v6325_v32  ;;  %v6217_v28 = vpack.c.bf16 %v3369_v27, %v3365_v26  ;;  %v6345_v32 = vpack.c.bf16 %v3371_v41, %v3367_v20  ;;  %v3412_v26 = vld [vmem:[%s12149_s10 + $0x3f8] sm:$0xff]  ;;  %v3405_v27 = vld [vmem:[%s12149_s10 + $0x3c0] sm:$0xff]  ;;  %v3407_v41 = vld [vmem:[%s12149_s10 + $0x3d0] sm:$0xff] }
 0x9f6   :  { %6200 = vmatprep.subr.bf16.mxu0 %v6199_v0  ;;  %6328 = vmatprep.subr.bf16.mxu1 %v6327_v46  ;;  %v6219_v0 = vpack.c.bf16 %v3378_v22, %v3374_v39  ;;  %v6347_v46 = vpack.c.bf16 %v3380_v23, %v3376_v42  ;;  %v3411_v39 = vld [vmem:[%s12149_s10 + $0x3f0] sm:$0xff]  ;;  %v3414_v42 = vld [vmem:[%s12149_s10 + $0x408] sm:$0xff] }
 0x9f7   :  { %v6365_v22 = vpack.c.bf16 %v3411_v39, %v3407_v41  ;;  %v3418_v23 = vld [vmem:[%s12149_s10 + $0x428] sm:$0xff]  ;;  %v3439_v39 = vld [vmem:[%s12149_s10 + $0x4d0] sm:$0xff] }
 0x9f9   :  { %6202 = vmatpush1.bf16.msra.mxu0 %v6201_v59  ;;  %6330 = vmatpush1.bf16.msra.mxu1 %v6329_v60  ;;  %v6221_v59 = vpack.c.bf16 %v3377_v61, %v3373_v44  ;;  %v6349_v60 = vpack.c.bf16 %v3379_v55, %v3375_v47  ;;  %v3420_v44 = vld [vmem:[%s12149_s10 + $0x438] sm:$0xff] }
 0x9fa   :  { %6204 = vmatprep.subr.bf16.mxu0 %v6203_v9  ;;  %6332 = vmatprep.subr.bf16.mxu1 %v6331_v10  ;;  %v6223_v9 = vpack.c.bf16 %v3386_v36, %v3382_v5  ;;  %v6351_v10 = vpack.c.bf16 %v3388_v37, %v3384_v56  ;;  %v3413_v56 = vld [vmem:[%s12149_s10 + $0x400] sm:$0xff] }
 0x9fd   :  { %6206 = vmatpush1.bf16.msra.mxu0 %v6205_v51  ;;  %6334 = vmatpush1.bf16.msra.mxu1 %v6333_v52  ;;  %v6225_v51 = vpack.c.bf16 %v3385_v4, %v3381_v63  ;;  %v6353_v52 = vpack.c.bf16 %v3387_v14, %v3383_v11  ;;  %v3417_v63 = vld [vmem:[%s12149_s10 + $0x420] sm:$0xff]  ;;  %v3415_v4 = vld [vmem:[%s12149_s10 + $0x410] sm:$0xff]  ;;  %v3422_v11 = vld [vmem:[%s12149_s10 + $0x448] sm:$0xff] }
 0x9fe   :  { %6208 = vmatprep.subr.bf16.mxu0 %v6207_v1  ;;  %6336 = vmatprep.subr.bf16.mxu1 %v6335_v2  ;;  %v6227_v1 = vpack.c.bf16 %v3394_v54, %v3390_v18  ;;  %v6355_v2 = vpack.c.bf16 %v3396_v43, %v3392_v19  ;;  %v3426_v18 = vld [vmem:[%s12149_s10 + $0x468] sm:$0xff]  ;;  %v3424_v54 = vld [vmem:[%s12149_s10 + $0x458] sm:$0xff] }
 0x9ff   :  { %v3428_v19 = vld [vmem:[%s12149_s10 + $0x478] sm:$0xff]  ;;  %v6243_v15 = vpack.c.bf16 %v3426_v18, %v3422_v11  ;;  %v3453_v11 = vld [vmem:[%s12149_s10 + $0x540] sm:$0xff] }
 0xa00   :  { %v6371_v16 = vpack.c.bf16 %v3428_v19, %v3424_v54  ;;  %v3455_v19 = vld [vmem:[%s12149_s10 + $0x550] sm:$0xff] }
 0xa01   :  { %6210 = vmatpush1.bf16.msra.mxu0 %v6209_v29  ;;  %6338 = vmatpush1.bf16.msra.mxu1 %v6337_v30  ;;  %v6229_v29 = vpack.c.bf16 %v3393_v57, %v3389_v53  ;;  %v6357_v30 = vpack.c.bf16 %v3395_v7, %v3391_v3  ;;  %v3421_v53 = vld [vmem:[%s12149_s10 + $0x440] sm:$0xff]  ;;  %v3427_v3 = vld [vmem:[%s12149_s10 + $0x470] sm:$0xff]  ;;  %v3430_v7 = vld [vmem:[%s12149_s10 + $0x488] sm:$0xff] }
 0xa02   :  { %6212 = vmatprep.subr.bf16.mxu0 %v6211_v48  ;;  %6340 = vmatprep.subr.bf16.mxu1 %v6339_v49  ;;  %v6359_v48 = vpack.c.bf16 %v3404_v21, %v3400_v17  ;;  %v3401_v49 = vld [vmem:[%s12149_s10 + $0x3a0] sm:$0xff]  ;;  %v3434_v17 = vld [vmem:[%s12149_s10 + $0x4a8] sm:$0xff]  ;;  %v3432_v21 = vld [vmem:[%s12149_s10 + $0x498] sm:$0xff] }
 0xa03   :  { %v6233_v58 = vpack.c.bf16 %v3401_v49, %v3397_v31  ;;  %v3425_v57 = vld [vmem:[%s12149_s10 + $0x460] sm:$0xff]  ;;  %v6247_v50 = vpack.c.bf16 %v3434_v17, %v3430_v7  ;;  %v3463_v17 = vld [vmem:[%s12149_s10 + $0x590] sm:$0xff] }
 0xa04   :  { %v6245_v31 = vpack.c.bf16 %v3425_v57, %v3421_v53  ;;  %v3433_v49 = vld [vmem:[%s12149_s10 + $0x4a0] sm:$0xff]  ;;  %v3464_v53 = vld [vmem:[%s12149_s10 + $0x598] sm:$0xff] }
 0xa05   :  { %6214 = vmatpush1.bf16.msra.mxu0 %v6213_v24  ;;  %6342 = vmatpush1.bf16.msra.mxu1 %v6341_v25  ;;  %v3408_v24 = vld [vmem:[%s12149_s10 + $0x3d8] sm:$0xff]  ;;  %v6235_v25 = vpack.c.bf16 %v3410_v12, %v3406_v8  ;;  %v3438_v8 = vld [vmem:[%s12149_s10 + $0x4c8] sm:$0xff]  ;;  %v3465_v7 = vld [vmem:[%s12149_s10 + $0x5a0] sm:$0xff] }
 0xa06   :  { %6216 = vmatprep.subr.bf16.mxu0 %v6215_v34  ;;  %6344 = vmatprep.subr.bf16.mxu1 %v6343_v38  ;;  %v3409_v34 = vld [vmem:[%s12149_s10 + $0x3e0] sm:$0xff]  ;;  %v6363_v38 = vpack.c.bf16 %v3412_v26, %v3408_v24  ;;  %v3442_v12 = vld [vmem:[%s12149_s10 + $0x4e8] sm:$0xff]  ;;  %v3440_v24 = vld [vmem:[%s12149_s10 + $0x4d8] sm:$0xff] }
 0xa07   :  { %v6237_v20 = vpack.c.bf16 %v3409_v34, %v3405_v27  ;;  %v3437_v34 = vld [vmem:[%s12149_s10 + $0x4c0] sm:$0xff]  ;;  %v3468_v57 = vld [vmem:[%s12149_s10 + $0x5b8] sm:$0xff] }
 0xa09   :  { %6218 = vmatpush1.bf16.msra.mxu0 %v6217_v28  ;;  %6346 = vmatpush1.bf16.msra.mxu1 %v6345_v32  ;;  %v3416_v28 = vld [vmem:[%s12149_s10 + $0x418] sm:$0xff]  ;;  %v6239_v32 = vpack.c.bf16 %v3418_v23, %v3414_v42  ;;  %v3446_v42 = vld [vmem:[%s12149_s10 + $0x508] sm:$0xff] }
 0xa0a   :  { %6220 = vmatprep.subr.bf16.mxu0 %v6219_v0  ;;  %6348 = vmatprep.subr.bf16.mxu1 %v6347_v46  ;;  %v6367_v61 = vpack.c.bf16 %v3420_v44, %v3416_v28  ;;  %v10167_v0 = vld [vmem:[%s12150_s9] sm:$0xf]  ;;  %v3450_v23 = vld [vmem:[%s12149_s10 + $0x528] sm:$0xff]  ;;  %v3448_v28 = vld [vmem:[%s12149_s10 + $0x518] sm:$0xff] }
 0xa0b   :  { %v2980_v46 = vrot.slane %v10167_v0, %v8505_v33  ;;  %v2984_v47 = vrot.slane %v10167_v0, %v8510_v40  ;;  %v2992_v55 = vrot.slane %v10167_v0, %v8518_v45 }
 0xa0d   :  { %6222 = vmatpush1.bf16.msra.mxu0 %v6221_v59  ;;  %6350 = vmatpush1.bf16.msra.mxu1 %v6349_v60 }
 0xa0e   :  { %6224 = vmatprep.subr.bf16.mxu0 %v6223_v9  ;;  %6352 = vmatprep.subr.bf16.mxu1 %v6351_v10  ;;  %v3419_v9 = vld [vmem:[%s12149_s10 + $0x430] sm:$0xff] }
 0xa11   :  { %6226 = vmatpush1.bf16.msra.mxu0 %v6225_v51  ;;  %6354 = vmatpush1.bf16.msra.mxu1 %v6353_v52  ;;  %v6241_v51 = vpack.c.bf16 %v3417_v63, %v3413_v56  ;;  %v6369_v52 = vpack.c.bf16 %v3419_v9, %v3415_v4  ;;  %v3447_v56 = vld [vmem:[%s12149_s10 + $0x510] sm:$0xff]  ;;  %v3456_v63 = vld [vmem:[%s12149_s10 + $0x558] sm:$0xff] }
 0xa12   :  { %6228 = vmatprep.subr.bf16.mxu0 %v6227_v1  ;;  %6356 = vmatprep.subr.bf16.mxu1 %v6355_v2  ;;  %v3423_v2 = vld [vmem:[%s12149_s10 + $0x450] sm:$0xff]  ;;  %v3460_v4 = vld [vmem:[%s12149_s10 + $0x578] sm:$0xff] }
 0xa13   :  { %v6387_v54 = vpack.c.bf16 %v3460_v4, %v3456_v63  ;;  %v3494_v63 = vld [vmem:[%s12149_s10 + $0x688] sm:$0xff] }
 0xa14   :  { %v3498_v4 = vld [vmem:[%s12149_s10 + $0x6a8] sm:$0xff] }
 0xa15   :  { %6230 = vmatpush1.bf16.msra.mxu0 %v6229_v29  ;;  %6358 = vmatpush1.bf16.msra.mxu1 %v6357_v30  ;;  %v3436_v29 = vld [vmem:[%s12149_s10 + $0x4b8] sm:$0xff] }
 0xa16   :  { %6232 = vmatprep.subr.bf16.mxu0 %v6231_v35  ;;  %6360 = vmatprep.subr.bf16.mxu1 %v6359_v48  ;;  %v6373_v35 = vpack.c.bf16 %v3427_v3, %v3423_v2  ;;  %v3429_v48 = vld [vmem:[%s12149_s10 + $0x480] sm:$0xff]  ;;  %v6375_v13 = vpack.c.bf16 %v3436_v29, %v3432_v21  ;;  %v3467_v21 = vld [vmem:[%s12149_s10 + $0x5b0] sm:$0xff]  ;;  %v3470_v29 = vld [vmem:[%s12149_s10 + $0x5c8] sm:$0xff] }
 0xa17   :  { %v6249_v26 = vpack.c.bf16 %v3433_v49, %v3429_v48  ;;  %v3461_v3 = vld [vmem:[%s12149_s10 + $0x580] sm:$0xff]  ;;  %v6393_v49 = vpack.c.bf16 %v3467_v21, %v3463_v17 }
 0xa18   :  { %v6265_v48 = vpack.c.bf16 %v3465_v7, %v3461_v3 }
 0xa19   :  { %6234 = vmatpush1.bf16.msra.mxu0 %v6233_v58  ;;  %6362 = vmatpush1.bf16.msra.mxu1 %v6361_v6  ;;  %v3431_v58 = vld [vmem:[%s12149_s10 + $0x490] sm:$0xff] }
 0xa1a   :  { %6236 = vmatprep.subr.bf16.mxu0 %v6235_v25  ;;  %6364 = vmatprep.subr.bf16.mxu1 %v6363_v38  ;;  %v3435_v6 = vld [vmem:[%s12149_s10 + $0x4b0] sm:$0xff]  ;;  %v3444_v25 = vld [vmem:[%s12149_s10 + $0x4f8] sm:$0xff]  ;;  %v3441_v38 = vld [vmem:[%s12149_s10 + $0x4e0] sm:$0xff] }
 0xa1b   :  { %v6377_v27 = vpack.c.bf16 %v3435_v6, %v3431_v58  ;;  %v6379_v41 = vpack.c.bf16 %v3444_v25, %v3440_v24  ;;  %v6253_v44 = vpack.c.bf16 %v3441_v38, %v3437_v34  ;;  %v3478_v24 = vld [vmem:[%s12149_s10 + $0x608] sm:$0xff] }
 0xa1c   :  { %v3482_v25 = vld [vmem:[%s12149_s10 + $0x628] sm:$0xff] }
 0xa1d   :  { %6238 = vmatpush1.bf16.msra.mxu0 %v6237_v20  ;;  %6366 = vmatpush1.bf16.msra.mxu1 %v6365_v22  ;;  %v6251_v20 = vpack.c.bf16 %v3442_v12, %v3438_v8  ;;  %v3443_v22 = vld [vmem:[%s12149_s10 + $0x4f0] sm:$0xff] }
 0xa1e   :  { %6240 = vmatprep.subr.bf16.mxu0 %v6239_v32  ;;  %6368 = vmatprep.subr.bf16.mxu1 %v6367_v61  ;;  %v3452_v32 = vld [vmem:[%s12149_s10 + $0x538] sm:$0xff]  ;;  %v6381_v61 = vpack.c.bf16 %v3443_v22, %v3439_v39  ;;  %v3471_v8 = vld [vmem:[%s12149_s10 + $0x5d0] sm:$0xff]  ;;  %v6271_v39 = vpack.c.bf16 %v3482_v25, %v3478_v24 }
 0xa1f   :  { %v3475_v12 = vld [vmem:[%s12149_s10 + $0x5f0] sm:$0xff] }
 0xa20   :  { %v6397_v38 = vpack.c.bf16 %v3475_v12, %v3471_v8  ;;  %v3511_v24 = vld [vmem:[%s12149_s10 + $0x710] sm:$0xff] }
 0xa21   :  { %v3515_v25 = vld [vmem:[%s12149_s10 + $0x730] sm:$0xff] }
 0xab3   :  { %v3134_v5 = vpop.f32.mrb[18].mxu0  ;;  %v10175_v36 = vpop.f32.mrb[18].mxu1 }
 0xab4   :  { %v6979_v37 = vadd.f32 %v3134_v5, %v2980_v46  ;;  %v3136_v59 = vpop.f32.mrb[19].mxu0  ;;  %v3278_v60 = vpop.f32.mrb[19].mxu1  ;;  %v3445_v46 = vld [vmem:[%s12149_s10 + $0x500] sm:$0xff]  ;;  %v6383_v5 = vpack.c.bf16 %v3452_v32, %v3448_v28  ;;  %v3486_v28 = vld [vmem:[%s12149_s10 + $0x648] sm:$0xff] }
 0xab5   :  { %v6980_v10 = vadd.f32 %v3136_v59, %v2984_v47  ;;  %v6982_v14 = vadd.f32 %v3278_v60, %v2992_v55  ;;  %v3449_v47 = vld [vmem:[%s12149_s10 + $0x520] sm:$0xff]  ;;  %v6255_v55 = vpack.c.bf16 %v3450_v23, %v3446_v42  ;;  %v3454_v59 = vld [vmem:[%s12149_s10 + $0x548] sm:$0xff]  ;;  %v3479_v42 = vld [vmem:[%s12149_s10 + $0x610] sm:$0xff] }
 0xab6   :  { %v3281_v1 = vmax.f32 %v6979_v37, 0.0  ;;  %v3451_v37 = vld [vmem:[%s12149_s10 + $0x530] sm:$0xff]  ;;  %v3458_v60 = vld [vmem:[%s12149_s10 + $0x568] sm:$0xff]  ;;  %v6257_v9 = vpack.c.bf16 %v3449_v47, %v3445_v46 }
 0xab7   :  { %v3282_v43 = vmax.f32 %v6980_v10, 0.0  ;;  %v3284_v30 = vmax.f32 %v6982_v14, 0.0  ;;  %v6385_v10 = vpack.c.bf16 %v3451_v37, %v3447_v56  ;;  %v3457_v14 = vld [vmem:[%s12149_s10 + $0x560] sm:$0xff]  ;;  %v6259_v18 = vpack.c.bf16 %v3458_v60, %v3454_v59  ;;  %v3483_v23 = vld [vmem:[%s12149_s10 + $0x630] sm:$0xff]  ;;  %v3490_v32 = vld [vmem:[%s12149_s10 + $0x668] sm:$0xff] }
 0xab8   :  { %v6401_v47 = vpack.c.bf16 %v3483_v23, %v3479_v42  ;;  %v6275_v56 = vpack.c.bf16 %v3490_v32, %v3486_v28  ;;  %v3487_v59 = vld [vmem:[%s12149_s10 + $0x650] sm:$0xff] }
 0xab9   :  { %3627 = vmatprep.mubr.f32.mxu0 %v3282_v43  ;;  %3769 = vmatprep.mubr.f32.mxu1 %v3282_v43  ;;  %v3459_v43 = vld [vmem:[%s12149_s10 + $0x570] sm:$0xff] }
 0xaba   :  { %3628 = vmatmul.mubr.f32.vlgmr.msra.gmra.mrb[20].mxu0 %v3281_v1  ;;  %3770 = vmatmul.mubr.f32.vlgmr.msra.gmra.mrb[20].mxu1 %v3281_v1  ;;  %v6261_v1 = vpack.c.bf16 %v3457_v14, %v3453_v11  ;;  %v6389_v2 = vpack.c.bf16 %v3459_v43, %v3455_v19  ;;  %v3491_v60 = vld [vmem:[%s12149_s10 + $0x670] sm:$0xff]  ;;  %v6279_v19 = vpack.c.bf16 %v3498_v4, %v3494_v63 }
 0xabb   :  { %6242 = vmatpush1.bf16.msra.mxu0 %v6241_v51  ;;  %6370 = vmatpush1.bf16.msra.mxu1 %v6369_v52  ;;  %v3462_v51 = vld [vmem:[%s12149_s10 + $0x588] sm:$0xff]  ;;  %v6405_v14 = vpack.c.bf16 %v3491_v60, %v3487_v59  ;;  %v3519_v28 = vld [vmem:[%s12149_s10 + $0x750] sm:$0xff] }
 0xabc   :  { %3698 = vmatprep.mubr.f32.mxu0 %v3284_v30  ;;  %3840 = vmatprep.mubr.f32.mxu1 %v3284_v30  ;;  %v3466_v52 = vld [vmem:[%s12149_s10 + $0x5a8] sm:$0xff]  ;;  %v3523_v32 = vld [vmem:[%s12149_s10 + $0x770] sm:$0xff] }
 0xabd   :  { %6244 = vmatprep.subr.bf16.mxu0 %v6243_v15  ;;  %6372 = vmatprep.subr.bf16.mxu1 %v6371_v16  ;;  %v6263_v15 = vpack.c.bf16 %v3466_v52, %v3462_v51  ;;  %v6391_v16 = vpack.c.bf16 %v3468_v57, %v3464_v53  ;;  %v3474_v30 = vld [vmem:[%s12149_s10 + $0x5e8] sm:$0xff]  ;;  %v3495_v51 = vld [vmem:[%s12149_s10 + $0x690] sm:$0xff] }
 0xabe   :  { %v6267_v58 = vpack.c.bf16 %v3474_v30, %v3470_v29  ;;  %v3499_v52 = vld [vmem:[%s12149_s10 + $0x6b0] sm:$0xff]  ;;  %v3502_v53 = vld [vmem:[%s12149_s10 + $0x6c8] sm:$0xff] }
 0xabf   :  { %6246 = vmatpush1.bf16.msra.mxu0 %v6245_v31  ;;  %6374 = vmatpush1.bf16.msra.mxu1 %v6373_v35  ;;  %v3472_v31 = vld [vmem:[%s12149_s10 + $0x5d8] sm:$0xff]  ;;  %v3506_v57 = vld [vmem:[%s12149_s10 + $0x6e8] sm:$0xff]  ;;  %v6409_v7 = vpack.c.bf16 %v3499_v52, %v3495_v51  ;;  %v3503_v29 = vld [vmem:[%s12149_s10 + $0x6d0] sm:$0xff]  ;;  %v2988_v51 = vrot.slane %v10167_v0, %v8525_v62 }
 0xac0   :  { %6248 = vmatprep.subr.bf16.mxu0 %v6247_v50  ;;  %6376 = vmatprep.subr.bf16.mxu1 %v6375_v13  ;;  %v3476_v35 = vld [vmem:[%s12149_s10 + $0x5f8] sm:$0xff]  ;;  %v3469_v50 = vld [vmem:[%s12149_s10 + $0x5c0] sm:$0xff]  ;;  %v6283_v17 = vpack.c.bf16 %v3506_v57, %v3502_v53  ;;  %v3507_v30 = vld [vmem:[%s12149_s10 + $0x6f0] sm:$0xff] }
 0xac1   :  { %v3473_v13 = vld [vmem:[%s12149_s10 + $0x5e0] sm:$0xff]  ;;  %v6395_v6 = vpack.c.bf16 %v3476_v35, %v3472_v31  ;;  %v3510_v31 = vld [vmem:[%s12149_s10 + $0x708] sm:$0xff]  ;;  %v3527_v63 = vld [vmem:[%s12149_s10 + $0x790] sm:$0xff] }
 0xac2   :  { %v6269_v34 = vpack.c.bf16 %v3473_v13, %v3469_v50  ;;  %v3514_v35 = vld [vmem:[%s12149_s10 + $0x728] sm:$0xff]  ;;  %v6413_v13 = vpack.c.bf16 %v3507_v30, %v3503_v29  ;;  %v3531_v4 = vld [vmem:[%s12149_s10 + $0x7b0] sm:$0xff]  ;;  %v6981_v29 = vadd.f32 %v10175_v36, %v2988_v51 }
 0xac3   :  { %6250 = vmatpush1.bf16.msra.mxu0 %v6249_v26  ;;  %6378 = vmatpush1.bf16.msra.mxu1 %v6377_v27  ;;  %v3480_v26 = vld [vmem:[%s12149_s10 + $0x618] sm:$0xff]  ;;  %v6287_v8 = vpack.c.bf16 %v3514_v35, %v3510_v31  ;;  %v3535_v57 = vld [vmem:[%s12149_s10 + $0x7d0] sm:$0xff]  ;;  %v3856_v0 = vld [vmem:[%s12151_s12 + $0x28] sm:$0xff] }
 0xac4   :  { %6252 = vmatprep.subr.bf16.mxu0 %v6251_v20  ;;  %6380 = vmatprep.subr.bf16.mxu1 %v6379_v41  ;;  %v3484_v27 = vld [vmem:[%s12149_s10 + $0x638] sm:$0xff]  ;;  %v3477_v20 = vld [vmem:[%s12149_s10 + $0x600] sm:$0xff]  ;;  %v3853_v35 = vld [vmem:[%s12151_s12 + $0x10] sm:$0xff] }
 0xac5   :  { %v3481_v41 = vld [vmem:[%s12149_s10 + $0x620] sm:$0xff]  ;;  %v6399_v22 = vpack.c.bf16 %v3484_v27, %v3480_v26  ;;  %v3518_v26 = vld [vmem:[%s12149_s10 + $0x748] sm:$0xff] }
 0xac6   :  { %v6273_v46 = vpack.c.bf16 %v3481_v41, %v3477_v20  ;;  %v3522_v27 = vld [vmem:[%s12149_s10 + $0x768] sm:$0xff]  ;;  %v6417_v41 = vpack.c.bf16 %v3515_v25, %v3511_v24  ;;  %v3283_v24 = vmax.f32 %v6981_v29, 0.0  ;;  %v3891_v29 = vld [vmem:[%s12151_s12 + $0x140] sm:$0xff] }
 0xac7   :  { %6254 = vmatpush1.bf16.msra.mxu0 %v6253_v44  ;;  %6382 = vmatpush1.bf16.msra.mxu1 %v6381_v61  ;;  %v3488_v44 = vld [vmem:[%s12149_s10 + $0x658] sm:$0xff]  ;;  %v6291_v42 = vpack.c.bf16 %v3522_v27, %v3518_v26  ;;  %v3864_v36 = vld [vmem:[%s12151_s12 + $0x68] sm:$0xff]  ;;  %v3861_v27 = vld [vmem:[%s12151_s12 + $0x50] sm:$0xff] }
 0xac8   :  { %6256 = vmatprep.subr.bf16.mxu0 %v6255_v55  ;;  %6384 = vmatprep.subr.bf16.mxu1 %v6383_v5  ;;  %v3492_v61 = vld [vmem:[%s12149_s10 + $0x678] sm:$0xff]  ;;  %v3485_v55 = vld [vmem:[%s12149_s10 + $0x640] sm:$0xff] }
 0xac9   :  { %v3489_v5 = vld [vmem:[%s12149_s10 + $0x660] sm:$0xff]  ;;  %v6403_v37 = vpack.c.bf16 %v3492_v61, %v3488_v44  ;;  %v3526_v44 = vld [vmem:[%s12149_s10 + $0x788] sm:$0xff] }
 0xaca   :  { %v6277_v11 = vpack.c.bf16 %v3489_v5, %v3485_v55  ;;  %v3530_v61 = vld [vmem:[%s12149_s10 + $0x7a8] sm:$0xff]  ;;  %v6421_v5 = vpack.c.bf16 %v3523_v32, %v3519_v28  ;;  %v3871_v28 = vld [vmem:[%s12151_s12 + $0xa0] sm:$0xff] }
 0xacb   :  { %6258 = vmatpush1.bf16.msra.mxu0 %v6257_v9  ;;  %6386 = vmatpush1.bf16.msra.mxu1 %v6385_v10  ;;  %v3496_v9 = vld [vmem:[%s12149_s10 + $0x698] sm:$0xff]  ;;  %v6295_v59 = vpack.c.bf16 %v3530_v61, %v3526_v44  ;;  %v3869_v61 = vld [vmem:[%s12151_s12 + $0x90] sm:$0xff] }
 0xacc   :  { %6260 = vmatprep.subr.bf16.mxu0 %v6259_v18  ;;  %6388 = vmatprep.subr.bf16.mxu1 %v6387_v54  ;;  %v3500_v10 = vld [vmem:[%s12149_s10 + $0x6b8] sm:$0xff]  ;;  %v3493_v18 = vld [vmem:[%s12149_s10 + $0x680] sm:$0xff] }
 0xacd   :  { %v3497_v54 = vld [vmem:[%s12149_s10 + $0x6a0] sm:$0xff]  ;;  %v6407_v43 = vpack.c.bf16 %v3500_v10, %v3496_v9  ;;  %v3534_v9 = vld [vmem:[%s12149_s10 + $0x7c8] sm:$0xff] }
 0xace   :  { %v6281_v3 = vpack.c.bf16 %v3497_v54, %v3493_v18  ;;  %v3538_v10 = vld [vmem:[%s12149_s10 + $0x7e8] sm:$0xff]  ;;  %v6425_v54 = vpack.c.bf16 %v3531_v4, %v3527_v63  ;;  %v3879_v63 = vld [vmem:[%s12151_s12 + $0xe0] sm:$0xff] }
 0xacf   :  { %6262 = vmatpush1.bf16.msra.mxu0 %v6261_v1  ;;  %6390 = vmatpush1.bf16.msra.mxu1 %v6389_v2  ;;  %v3504_v1 = vld [vmem:[%s12149_s10 + $0x6d8] sm:$0xff]  ;;  %v6299_v52 = vpack.c.bf16 %v3538_v10, %v3534_v9  ;;  %v3877_v10 = vld [vmem:[%s12151_s12 + $0xd0] sm:$0xff] }
 0xad0   :  { %6264 = vmatprep.subr.bf16.mxu0 %v6263_v15  ;;  %6392 = vmatprep.subr.bf16.mxu1 %v6391_v16  ;;  %v3508_v2 = vld [vmem:[%s12149_s10 + $0x6f8] sm:$0xff]  ;;  %v3501_v15 = vld [vmem:[%s12149_s10 + $0x6c0] sm:$0xff] }
 0xad1   :  { %v3505_v16 = vld [vmem:[%s12149_s10 + $0x6e0] sm:$0xff]  ;;  %v6411_v21 = vpack.c.bf16 %v3508_v2, %v3504_v1  ;;  %v3539_v1 = vld [vmem:[%s12149_s10 + $0x7f0] sm:$0xff]  ;;  %v3852_v2 = vld [vmem:[%s12151_s12 + $0x8] sm:$0xff] }
 0xad2   :  { %v6285_v50 = vpack.c.bf16 %v3505_v16, %v3501_v15  ;;  %v6429_v16 = vpack.c.bf16 %v3539_v1, %v3535_v57  ;;  %v6431_v30 = vpack.c.bf16 %v3856_v0, %v3852_v2  ;;  %v3885_v2 = vld [vmem:[%s12151_s12 + $0x110] sm:$0xff] }
 0xad3   :  { %6266 = vmatpush1.bf16.msra.mxu0 %v6265_v48  ;;  %6394 = vmatpush1.bf16.msra.mxu1 %v6393_v49  ;;  %v3512_v48 = vld [vmem:[%s12149_s10 + $0x718] sm:$0xff]  ;;  %v3889_v0 = vld [vmem:[%s12151_s12 + $0x130] sm:$0xff] }
 0xad4   :  { %6268 = vmatprep.subr.bf16.mxu0 %v6267_v58  ;;  %6396 = vmatprep.subr.bf16.mxu1 %v6395_v6  ;;  %v3516_v49 = vld [vmem:[%s12149_s10 + $0x738] sm:$0xff]  ;;  %v3509_v58 = vld [vmem:[%s12149_s10 + $0x700] sm:$0xff] }
 0xad5   :  { %v3513_v6 = vld [vmem:[%s12149_s10 + $0x720] sm:$0xff]  ;;  %v6415_v12 = vpack.c.bf16 %v3516_v49, %v3512_v48  ;;  %v3857_v48 = vld [vmem:[%s12151_s12 + $0x30] sm:$0xff]  ;;  %v3860_v49 = vld [vmem:[%s12151_s12 + $0x48] sm:$0xff] }
 0xad6   :  { %v6289_v20 = vpack.c.bf16 %v3513_v6, %v3509_v58  ;;  %v6561_v6 = vpack.c.bf16 %v3857_v48, %v3853_v35  ;;  %v6435_v25 = vpack.c.bf16 %v3864_v36, %v3860_v49  ;;  %v3893_v48 = vld [vmem:[%s12151_s12 + $0x150] sm:$0xff]  ;;  %v3900_v36 = vld [vmem:[%s12151_s12 + $0x188] sm:$0xff] }
 0xad7   :  { %6270 = vmatpush1.bf16.msra.mxu0 %v6269_v34  ;;  %6398 = vmatpush1.bf16.msra.mxu1 %v6397_v38  ;;  %v3520_v34 = vld [vmem:[%s12149_s10 + $0x758] sm:$0xff]  ;;  %v3897_v49 = vld [vmem:[%s12151_s12 + $0x170] sm:$0xff] }
 0xad8   :  { %6272 = vmatprep.subr.bf16.mxu0 %v6271_v39  ;;  %6400 = vmatprep.subr.bf16.mxu1 %v6399_v22  ;;  %v3524_v38 = vld [vmem:[%s12149_s10 + $0x778] sm:$0xff]  ;;  %v3517_v39 = vld [vmem:[%s12149_s10 + $0x740] sm:$0xff] }
 0xad9   :  { %v3521_v22 = vld [vmem:[%s12149_s10 + $0x760] sm:$0xff]  ;;  %v6419_v23 = vpack.c.bf16 %v3524_v38, %v3520_v34  ;;  %v3865_v34 = vld [vmem:[%s12151_s12 + $0x70] sm:$0xff]  ;;  %v3868_v38 = vld [vmem:[%s12151_s12 + $0x88] sm:$0xff] }
 0xada   :  { %v6293_v55 = vpack.c.bf16 %v3521_v22, %v3517_v39  ;;  %v3874_v39 = vld [vmem:[%s12151_s12 + $0xb8] sm:$0xff] }
 0xadb   :  { %6274 = vmatpush1.bf16.msra.mxu0 %v6273_v46  ;;  %6402 = vmatpush1.bf16.msra.mxu1 %v6401_v47  ;;  %v3528_v46 = vld [vmem:[%s12149_s10 + $0x798] sm:$0xff] }
 0xadc   :  { %6276 = vmatprep.subr.bf16.mxu0 %v6275_v56  ;;  %6404 = vmatprep.subr.bf16.mxu1 %v6403_v37  ;;  %v3532_v47 = vld [vmem:[%s12149_s10 + $0x7b8] sm:$0xff]  ;;  %v3525_v56 = vld [vmem:[%s12149_s10 + $0x780] sm:$0xff] }
 0xadd   :  { %v3529_v37 = vld [vmem:[%s12149_s10 + $0x7a0] sm:$0xff]  ;;  %v6423_v60 = vpack.c.bf16 %v3532_v47, %v3528_v46  ;;  %v3873_v46 = vld [vmem:[%s12151_s12 + $0xb0] sm:$0xff]  ;;  %v3876_v47 = vld [vmem:[%s12151_s12 + $0xc8] sm:$0xff] }
 0xade   :  { %v6297_v18 = vpack.c.bf16 %v3529_v37, %v3525_v56  ;;  %v3882_v56 = vld [vmem:[%s12151_s12 + $0xf8] sm:$0xff] }
 0xadf   :  { %6278 = vmatpush1.bf16.msra.mxu0 %v6277_v11  ;;  %6406 = vmatpush1.bf16.msra.mxu1 %v6405_v14  ;;  %v3536_v11 = vld [vmem:[%s12149_s10 + $0x7d8] sm:$0xff] }
 0xae0   :  { %6280 = vmatprep.subr.bf16.mxu0 %v6279_v19  ;;  %6408 = vmatprep.subr.bf16.mxu1 %v6407_v43  ;;  %v3540_v14 = vld [vmem:[%s12149_s10 + $0x7f8] sm:$0xff]  ;;  %v3533_v19 = vld [vmem:[%s12149_s10 + $0x7c0] sm:$0xff] }
 0xae1   :  { %v3537_v43 = vld [vmem:[%s12149_s10 + $0x7e0] sm:$0xff]  ;;  %v6427_v53 = vpack.c.bf16 %v3540_v14, %v3536_v11  ;;  %v3881_v11 = vld [vmem:[%s12151_s12 + $0xf0] sm:$0xff]  ;;  %v3884_v14 = vld [vmem:[%s12151_s12 + $0x108] sm:$0xff] }
 0xae2   :  { %v6301_v15 = vpack.c.bf16 %v3537_v43, %v3533_v19  ;;  %v3890_v19 = vld [vmem:[%s12151_s12 + $0x138] sm:$0xff]  ;;  %v6573_v51 = vpack.c.bf16 %v3881_v11, %v3877_v10  ;;  %v3917_v10 = vld [vmem:[%s12151_s12 + $0x210] sm:$0xff] }
 0xae3   :  { %6282 = vmatpush1.bf16.msra.mxu0 %v6281_v3  ;;  %6410 = vmatpush1.bf16.msra.mxu1 %v6409_v7  ;;  %v3854_v3 = vld [vmem:[%s12151_s12 + $0x18] sm:$0xff]  ;;  %v3921_v11 = vld [vmem:[%s12151_s12 + $0x230] sm:$0xff] }
 0xae4   :  { %6284 = vmatprep.subr.bf16.mxu0 %v6283_v17  ;;  %6412 = vmatprep.subr.bf16.mxu1 %v6411_v21  ;;  %v3858_v7 = vld [vmem:[%s12151_s12 + $0x38] sm:$0xff]  ;;  %v3851_v17 = vld [vmem:[%s12151_s12] sm:$0xff] }
 0xae5   :  { %v3855_v21 = vld [vmem:[%s12151_s12 + $0x20] sm:$0xff]  ;;  %v6559_v31 = vpack.c.bf16 %v3858_v7, %v3854_v3  ;;  %v3892_v3 = vld [vmem:[%s12151_s12 + $0x148] sm:$0xff] }
 0xae6   :  { %v6433_v58 = vpack.c.bf16 %v3855_v21, %v3851_v17  ;;  %v3896_v7 = vld [vmem:[%s12151_s12 + $0x168] sm:$0xff]  ;;  %v6577_v21 = vpack.c.bf16 %v3889_v0, %v3885_v2  ;;  %v3925_v2 = vld [vmem:[%s12151_s12 + $0x250] sm:$0xff] }
 0xae7   :  { %6286 = vmatpush1.bf16.msra.mxu0 %v6285_v50  ;;  %6414 = vmatpush1.bf16.msra.mxu1 %v6413_v13  ;;  %v3862_v50 = vld [vmem:[%s12151_s12 + $0x58] sm:$0xff]  ;;  %v3929_v0 = vld [vmem:[%s12151_s12 + $0x270] sm:$0xff] }
 0xae8   :  { %6288 = vmatprep.subr.bf16.mxu0 %v6287_v8  ;;  %6416 = vmatprep.subr.bf16.mxu1 %v6415_v12  ;;  %v3866_v13 = vld [vmem:[%s12151_s12 + $0x78] sm:$0xff]  ;;  %v3859_v8 = vld [vmem:[%s12151_s12 + $0x40] sm:$0xff] }
 0xae9   :  { %v3863_v12 = vld [vmem:[%s12151_s12 + $0x60] sm:$0xff]  ;;  %v6563_v26 = vpack.c.bf16 %v3866_v13, %v3862_v50  ;;  %v3904_v50 = vld [vmem:[%s12151_s12 + $0x1a8] sm:$0xff]  ;;  %v3902_v13 = vld [vmem:[%s12151_s12 + $0x198] sm:$0xff] }
 0xaea   :  { %v6437_v22 = vpack.c.bf16 %v3863_v12, %v3859_v8  ;;  %v6581_v8 = vpack.c.bf16 %v3897_v49, %v3893_v48  ;;  %v3899_v12 = vld [vmem:[%s12151_s12 + $0x180] sm:$0xff]  ;;  %v3933_v48 = vld [vmem:[%s12151_s12 + $0x290] sm:$0xff] }
 0xaeb   :  { %6290 = vmatpush1.bf16.msra.mxu0 %v6289_v20  ;;  %6418 = vmatpush1.bf16.msra.mxu1 %v6417_v41  ;;  %v3872_v20 = vld [vmem:[%s12151_s12 + $0xa8] sm:$0xff]  ;;  %v3870_v41 = vld [vmem:[%s12151_s12 + $0x98] sm:$0xff]  ;;  %v3937_v49 = vld [vmem:[%s12151_s12 + $0x2b0] sm:$0xff] }
 0xaec   :  { %6292 = vmatprep.subr.bf16.mxu0 %v6291_v42  ;;  %6420 = vmatprep.subr.bf16.mxu1 %v6419_v23  ;;  %v6565_v42 = vpack.c.bf16 %v3865_v34, %v3861_v27  ;;  %v3867_v23 = vld [vmem:[%s12151_s12 + $0x80] sm:$0xff]  ;;  %v6439_v32 = vpack.c.bf16 %v3872_v20, %v3868_v38  ;;  %v6567_v44 = vpack.c.bf16 %v3874_v39, %v3870_v41  ;;  %v3901_v27 = vld [vmem:[%s12151_s12 + $0x190] sm:$0xff]  ;;  %v3908_v38 = vld [vmem:[%s12151_s12 + $0x1c8] sm:$0xff] }
 0xaed   :  { %v6441_v37 = vpack.c.bf16 %v3871_v28, %v3867_v23  ;;  %v3905_v34 = vld [vmem:[%s12151_s12 + $0x1b0] sm:$0xff]  ;;  %v3912_v20 = vld [vmem:[%s12151_s12 + $0x1e8] sm:$0xff]  ;;  %v3910_v41 = vld [vmem:[%s12151_s12 + $0x1d8] sm:$0xff] }
 0xaee   :  { %v3914_v39 = vld [vmem:[%s12151_s12 + $0x1f8] sm:$0xff]  ;;  %v3907_v23 = vld [vmem:[%s12151_s12 + $0x1c0] sm:$0xff] }
 0xaef   :  { %6294 = vmatpush1.bf16.msra.mxu0 %v6293_v55  ;;  %6422 = vmatpush1.bf16.msra.mxu1 %v6421_v5  ;;  %v3880_v55 = vld [vmem:[%s12151_s12 + $0xe8] sm:$0xff]  ;;  %v3878_v5 = vld [vmem:[%s12151_s12 + $0xd8] sm:$0xff]  ;;  %v3911_v28 = vld [vmem:[%s12151_s12 + $0x1e0] sm:$0xff] }
 0xaf0   :  { %6296 = vmatprep.subr.bf16.mxu0 %v6295_v59  ;;  %6424 = vmatprep.subr.bf16.mxu1 %v6423_v60  ;;  %v6569_v59 = vpack.c.bf16 %v3873_v46, %v3869_v61  ;;  %v3875_v60 = vld [vmem:[%s12151_s12 + $0xc0] sm:$0xff]  ;;  %v6443_v4 = vpack.c.bf16 %v3880_v55, %v3876_v47  ;;  %v6571_v9 = vpack.c.bf16 %v3882_v56, %v3878_v5  ;;  %v3909_v61 = vld [vmem:[%s12151_s12 + $0x1d0] sm:$0xff]  ;;  %v3916_v47 = vld [vmem:[%s12151_s12 + $0x208] sm:$0xff] }
 0xaf1   :  { %v6445_v43 = vpack.c.bf16 %v3879_v63, %v3875_v60  ;;  %v3913_v46 = vld [vmem:[%s12151_s12 + $0x1f0] sm:$0xff]  ;;  %v3920_v55 = vld [vmem:[%s12151_s12 + $0x228] sm:$0xff]  ;;  %v3918_v5 = vld [vmem:[%s12151_s12 + $0x218] sm:$0xff] }
 0xaf2   :  { %v3922_v56 = vld [vmem:[%s12151_s12 + $0x238] sm:$0xff]  ;;  %v3915_v60 = vld [vmem:[%s12151_s12 + $0x200] sm:$0xff] }
 0xaf3   :  { %6298 = vmatpush1.bf16.msra.mxu0 %v6297_v18  ;;  %6426 = vmatpush1.bf16.msra.mxu1 %v6425_v54  ;;  %v3888_v18 = vld [vmem:[%s12151_s12 + $0x128] sm:$0xff]  ;;  %v3886_v54 = vld [vmem:[%s12151_s12 + $0x118] sm:$0xff]  ;;  %v3919_v63 = vld [vmem:[%s12151_s12 + $0x220] sm:$0xff] }
 0xaf4   :  { %6300 = vmatprep.subr.bf16.mxu0 %v6299_v52  ;;  %6428 = vmatprep.subr.bf16.mxu1 %v6427_v53  ;;  %v3883_v52 = vld [vmem:[%s12151_s12 + $0x100] sm:$0xff]  ;;  %v6447_v57 = vpack.c.bf16 %v3888_v18, %v3884_v14  ;;  %v6575_v1 = vpack.c.bf16 %v3890_v19, %v3886_v54  ;;  %v3924_v14 = vld [vmem:[%s12151_s12 + $0x248] sm:$0xff]  ;;  %v3926_v54 = vld [vmem:[%s12151_s12 + $0x258] sm:$0xff] }
 0xaf5   :  { %v3887_v53 = vld [vmem:[%s12151_s12 + $0x120] sm:$0xff]  ;;  %v3928_v18 = vld [vmem:[%s12151_s12 + $0x268] sm:$0xff]  ;;  %v3930_v19 = vld [vmem:[%s12151_s12 + $0x278] sm:$0xff] }
 0xaf6   :  { %v6449_v17 = vpack.c.bf16 %v3887_v53, %v3883_v52  ;;  %v3923_v52 = vld [vmem:[%s12151_s12 + $0x240] sm:$0xff] }
 0xaf7   :  { %6302 = vmatpush1.bf16.msra.mxu0 %v6301_v15  ;;  %6430 = vmatpush1.bf16.msra.mxu1 %v6429_v16  ;;  %v3894_v15 = vld [vmem:[%s12151_s12 + $0x158] sm:$0xff]  ;;  %v3927_v53 = vld [vmem:[%s12151_s12 + $0x260] sm:$0xff] }
 0xaf8   :  { %6432 = vmatprep.subr.bf16.mxu0 %v6431_v30  ;;  %6560 = vmatprep.subr.bf16.mxu1 %v6559_v31  ;;  %v3898_v16 = vld [vmem:[%s12151_s12 + $0x178] sm:$0xff]  ;;  %v3895_v30 = vld [vmem:[%s12151_s12 + $0x160] sm:$0xff]  ;;  %v6451_v31 = vpack.c.bf16 %v3896_v7, %v3892_v3  ;;  %v3932_v3 = vld [vmem:[%s12151_s12 + $0x288] sm:$0xff] }
 0xaf9   :  { %v6579_v35 = vpack.c.bf16 %v3898_v16, %v3894_v15  ;;  %v3936_v7 = vld [vmem:[%s12151_s12 + $0x2a8] sm:$0xff]  ;;  %v3934_v15 = vld [vmem:[%s12151_s12 + $0x298] sm:$0xff] }
 0xafa   :  { %3699 = vmatmul.mubr.f32.vlgmr.msra.gmra.mrb[20].mxu0 %v3283_v24  ;;  %3841 = vmatmul.mubr.f32.vlgmr.msra.gmra.mrb[20].mxu1 %v3283_v24  ;;  %v3903_v24 = vld [vmem:[%s12151_s12 + $0x1a0] sm:$0xff]  ;;  %v3938_v16 = vld [vmem:[%s12151_s12 + $0x2b8] sm:$0xff] }
 0xafb   :  { %6434 = vmatpush1.bf16.msra.mxu0 %v6433_v58  ;;  %6562 = vmatpush1.bf16.msra.mxu1 %v6561_v6  ;;  %v3906_v58 = vld [vmem:[%s12151_s12 + $0x1b8] sm:$0xff]  ;;  %v6453_v6 = vpack.c.bf16 %v3895_v30, %v3891_v29  ;;  %v3931_v29 = vld [vmem:[%s12151_s12 + $0x280] sm:$0xff] }
 0xafc   :  { %6436 = vmatprep.subr.bf16.mxu0 %v6435_v25  ;;  %6564 = vmatprep.subr.bf16.mxu1 %v6563_v26  ;;  %v6455_v25 = vpack.c.bf16 %v3904_v50, %v3900_v36  ;;  %v6583_v26 = vpack.c.bf16 %v3906_v58, %v3902_v13  ;;  %v3935_v30 = vld [vmem:[%s12151_s12 + $0x2a0] sm:$0xff]  ;;  %v3940_v36 = vld [vmem:[%s12151_s12 + $0x2c8] sm:$0xff]  ;;  %v3942_v13 = vld [vmem:[%s12151_s12 + $0x2d8] sm:$0xff] }
 0xafd   :  { %v3944_v50 = vld [vmem:[%s12151_s12 + $0x2e8] sm:$0xff]  ;;  %v3946_v58 = vld [vmem:[%s12151_s12 + $0x2f8] sm:$0xff] }
 0xaff   :  { %6438 = vmatpush1.bf16.msra.mxu0 %v6437_v22  ;;  %6566 = vmatpush1.bf16.msra.mxu1 %v6565_v42  ;;  %v6457_v22 = vpack.c.bf16 %v3903_v24, %v3899_v12  ;;  %v6585_v42 = vpack.c.bf16 %v3905_v34, %v3901_v27  ;;  %v3939_v12 = vld [vmem:[%s12151_s12 + $0x2c0] sm:$0xff]  ;;  %v3941_v27 = vld [vmem:[%s12151_s12 + $0x2d0] sm:$0xff] }
 0xb00   :  { %6440 = vmatprep.subr.bf16.mxu0 %v6439_v32  ;;  %6568 = vmatprep.subr.bf16.mxu1 %v6567_v44  ;;  %v6459_v32 = vpack.c.bf16 %v3912_v20, %v3908_v38  ;;  %v6587_v44 = vpack.c.bf16 %v3914_v39, %v3910_v41  ;;  %v3943_v24 = vld [vmem:[%s12151_s12 + $0x2e0] sm:$0xff]  ;;  %v3945_v34 = vld [vmem:[%s12151_s12 + $0x2f0] sm:$0xff]  ;;  %v3948_v38 = vld [vmem:[%s12151_s12 + $0x308] sm:$0xff] }
 0xb01   :  { %v3952_v20 = vld [vmem:[%s12151_s12 + $0x328] sm:$0xff]  ;;  %v3950_v41 = vld [vmem:[%s12151_s12 + $0x318] sm:$0xff] }
 0xb02   :  { %v3954_v39 = vld [vmem:[%s12151_s12 + $0x338] sm:$0xff] }
 0xb03   :  { %6442 = vmatpush1.bf16.msra.mxu0 %v6441_v37  ;;  %6570 = vmatpush1.bf16.msra.mxu1 %v6569_v59  ;;  %v6461_v37 = vpack.c.bf16 %v3911_v28, %v3907_v23  ;;  %v6589_v59 = vpack.c.bf16 %v3913_v46, %v3909_v61  ;;  %v3947_v23 = vld [vmem:[%s12151_s12 + $0x300] sm:$0xff]  ;;  %v3949_v61 = vld [vmem:[%s12151_s12 + $0x310] sm:$0xff] }
 0xb04   :  { %6444 = vmatprep.subr.bf16.mxu0 %v6443_v4  ;;  %6572 = vmatprep.subr.bf16.mxu1 %v6571_v9  ;;  %v6463_v4 = vpack.c.bf16 %v3920_v55, %v3916_v47  ;;  %v6591_v9 = vpack.c.bf16 %v3922_v56, %v3918_v5  ;;  %v3951_v28 = vld [vmem:[%s12151_s12 + $0x320] sm:$0xff]  ;;  %v3953_v46 = vld [vmem:[%s12151_s12 + $0x330] sm:$0xff]  ;;  %v3956_v47 = vld [vmem:[%s12151_s12 + $0x348] sm:$0xff] }
 0xb05   :  { %v3960_v55 = vld [vmem:[%s12151_s12 + $0x368] sm:$0xff]  ;;  %v3958_v5 = vld [vmem:[%s12151_s12 + $0x358] sm:$0xff] }
 0xb06   :  { %v3962_v56 = vld [vmem:[%s12151_s12 + $0x378] sm:$0xff] }
 0xb07   :  { %6446 = vmatpush1.bf16.msra.mxu0 %v6445_v43  ;;  %6574 = vmatpush1.bf16.msra.mxu1 %v6573_v51  ;;  %v6465_v43 = vpack.c.bf16 %v3919_v63, %v3915_v60  ;;  %v6593_v51 = vpack.c.bf16 %v3921_v11, %v3917_v10  ;;  %v3955_v60 = vld [vmem:[%s12151_s12 + $0x340] sm:$0xff]  ;;  %v3957_v10 = vld [vmem:[%s12151_s12 + $0x350] sm:$0xff] }
 0xb08   :  { %6448 = vmatprep.subr.bf16.mxu0 %v6447_v57  ;;  %6576 = vmatprep.subr.bf16.mxu1 %v6575_v1  ;;  %v6467_v57 = vpack.c.bf16 %v3928_v18, %v3924_v14  ;;  %v6595_v1 = vpack.c.bf16 %v3930_v19, %v3926_v54  ;;  %v3959_v63 = vld [vmem:[%s12151_s12 + $0x360] sm:$0xff]  ;;  %v3961_v11 = vld [vmem:[%s12151_s12 + $0x370] sm:$0xff]  ;;  %v3964_v14 = vld [vmem:[%s12151_s12 + $0x388] sm:$0xff] }
 0xb09   :  { %v3968_v18 = vld [vmem:[%s12151_s12 + $0x3a8] sm:$0xff]  ;;  %v3966_v54 = vld [vmem:[%s12151_s12 + $0x398] sm:$0xff] }
 0xb0a   :  { %v3970_v19 = vld [vmem:[%s12151_s12 + $0x3b8] sm:$0xff] }
 0xb0b   :  { %6450 = vmatpush1.bf16.msra.mxu0 %v6449_v17  ;;  %6578 = vmatpush1.bf16.msra.mxu1 %v6577_v21  ;;  %v6469_v17 = vpack.c.bf16 %v3927_v53, %v3923_v52  ;;  %v6597_v21 = vpack.c.bf16 %v3929_v0, %v3925_v2  ;;  %v3963_v52 = vld [vmem:[%s12151_s12 + $0x380] sm:$0xff]  ;;  %v6487_v53 = vpack.c.bf16 %v3968_v18, %v3964_v14  ;;  %v3965_v2 = vld [vmem:[%s12151_s12 + $0x390] sm:$0xff] }
 0xb0c   :  { %6452 = vmatprep.subr.bf16.mxu0 %v6451_v31  ;;  %6580 = vmatprep.subr.bf16.mxu1 %v6579_v35  ;;  %v6471_v31 = vpack.c.bf16 %v3936_v7, %v3932_v3  ;;  %v6599_v35 = vpack.c.bf16 %v3938_v16, %v3934_v15  ;;  %v3969_v0 = vld [vmem:[%s12151_s12 + $0x3b0] sm:$0xff]  ;;  %v3972_v15 = vld [vmem:[%s12151_s12 + $0x3c8] sm:$0xff] }
 0xb0d   :  { %v6617_v7 = vpack.c.bf16 %v3969_v0, %v3965_v2  ;;  %v3976_v16 = vld [vmem:[%s12151_s12 + $0x3e8] sm:$0xff] }
 0xb0f   :  { %6454 = vmatpush1.bf16.msra.mxu0 %v6453_v6  ;;  %6582 = vmatpush1.bf16.msra.mxu1 %v6581_v8  ;;  %v6473_v6 = vpack.c.bf16 %v3935_v30, %v3931_v29  ;;  %v6601_v8 = vpack.c.bf16 %v3937_v49, %v3933_v48  ;;  %v3978_v29 = vld [vmem:[%s12151_s12 + $0x3f8] sm:$0xff]  ;;  %v3971_v30 = vld [vmem:[%s12151_s12 + $0x3c0] sm:$0xff]  ;;  %v3973_v49 = vld [vmem:[%s12151_s12 + $0x3d0] sm:$0xff] }
 0xb10   :  { %6456 = vmatprep.subr.bf16.mxu0 %v6455_v25  ;;  %6584 = vmatprep.subr.bf16.mxu1 %v6583_v26  ;;  %v6475_v25 = vpack.c.bf16 %v3944_v50, %v3940_v36  ;;  %v6603_v26 = vpack.c.bf16 %v3946_v58, %v3942_v13  ;;  %v3977_v36 = vld [vmem:[%s12151_s12 + $0x3f0] sm:$0xff]  ;;  %v3980_v13 = vld [vmem:[%s12151_s12 + $0x408] sm:$0xff] }
 0xb11   :  { %v6621_v50 = vpack.c.bf16 %v3977_v36, %v3973_v49  ;;  %v3984_v58 = vld [vmem:[%s12151_s12 + $0x428] sm:$0xff]  ;;  %v4005_v36 = vld [vmem:[%s12151_s12 + $0x4d0] sm:$0xff] }
 0xb13   :  { %6458 = vmatpush1.bf16.msra.mxu0 %v6457_v22  ;;  %6586 = vmatpush1.bf16.msra.mxu1 %v6585_v42  ;;  %v6477_v22 = vpack.c.bf16 %v3943_v24, %v3939_v12  ;;  %v6605_v42 = vpack.c.bf16 %v3945_v34, %v3941_v27  ;;  %v3986_v12 = vld [vmem:[%s12151_s12 + $0x438] sm:$0xff] }
 0xb14   :  { %6460 = vmatprep.subr.bf16.mxu0 %v6459_v32  ;;  %6588 = vmatprep.subr.bf16.mxu1 %v6587_v44  ;;  %v6479_v32 = vpack.c.bf16 %v3952_v20, %v3948_v38  ;;  %v6607_v44 = vpack.c.bf16 %v3954_v39, %v3950_v41  ;;  %v3979_v41 = vld [vmem:[%s12151_s12 + $0x400] sm:$0xff] }
 0xb17   :  { %6462 = vmatpush1.bf16.msra.mxu0 %v6461_v37  ;;  %6590 = vmatpush1.bf16.msra.mxu1 %v6589_v59  ;;  %v6481_v37 = vpack.c.bf16 %v3951_v28, %v3947_v23  ;;  %v6609_v59 = vpack.c.bf16 %v3953_v46, %v3949_v61  ;;  %v3983_v23 = vld [vmem:[%s12151_s12 + $0x420] sm:$0xff]  ;;  %v3981_v28 = vld [vmem:[%s12151_s12 + $0x410] sm:$0xff]  ;;  %v3988_v61 = vld [vmem:[%s12151_s12 + $0x448] sm:$0xff] }
 0xb18   :  { %6464 = vmatprep.subr.bf16.mxu0 %v6463_v4  ;;  %6592 = vmatprep.subr.bf16.mxu1 %v6591_v9  ;;  %v6483_v4 = vpack.c.bf16 %v3960_v55, %v3956_v47  ;;  %v6611_v9 = vpack.c.bf16 %v3962_v56, %v3958_v5  ;;  %v3992_v47 = vld [vmem:[%s12151_s12 + $0x468] sm:$0xff]  ;;  %v3990_v55 = vld [vmem:[%s12151_s12 + $0x458] sm:$0xff] }
 0xb19   :  { %v3994_v5 = vld [vmem:[%s12151_s12 + $0x478] sm:$0xff]  ;;  %v6499_v14 = vpack.c.bf16 %v3992_v47, %v3988_v61  ;;  %v4019_v61 = vld [vmem:[%s12151_s12 + $0x540] sm:$0xff] }
 0xb1a   :  { %v6627_v18 = vpack.c.bf16 %v3994_v5, %v3990_v55  ;;  %v4021_v5 = vld [vmem:[%s12151_s12 + $0x550] sm:$0xff] }
 0xb1b   :  { %6466 = vmatpush1.bf16.msra.mxu0 %v6465_v43  ;;  %6594 = vmatpush1.bf16.msra.mxu1 %v6593_v51  ;;  %v6485_v43 = vpack.c.bf16 %v3959_v63, %v3955_v60  ;;  %v6613_v51 = vpack.c.bf16 %v3961_v11, %v3957_v10  ;;  %v3987_v60 = vld [vmem:[%s12151_s12 + $0x440] sm:$0xff]  ;;  %v3993_v10 = vld [vmem:[%s12151_s12 + $0x470] sm:$0xff]  ;;  %v3996_v11 = vld [vmem:[%s12151_s12 + $0x488] sm:$0xff] }
 0xb1c   :  { %6468 = vmatprep.subr.bf16.mxu0 %v6467_v57  ;;  %6596 = vmatprep.subr.bf16.mxu1 %v6595_v1  ;;  %v6615_v57 = vpack.c.bf16 %v3970_v19, %v3966_v54  ;;  %v3967_v1 = vld [vmem:[%s12151_s12 + $0x3a0] sm:$0xff]  ;;  %v4000_v54 = vld [vmem:[%s12151_s12 + $0x4a8] sm:$0xff]  ;;  %v3998_v19 = vld [vmem:[%s12151_s12 + $0x498] sm:$0xff] }
 0xb1d   :  { %v6489_v3 = vpack.c.bf16 %v3967_v1, %v3963_v52  ;;  %v3991_v63 = vld [vmem:[%s12151_s12 + $0x460] sm:$0xff]  ;;  %v6503_v2 = vpack.c.bf16 %v4000_v54, %v3996_v11  ;;  %v4029_v54 = vld [vmem:[%s12151_s12 + $0x590] sm:$0xff] }
 0xb1e   :  { %v6501_v52 = vpack.c.bf16 %v3991_v63, %v3987_v60  ;;  %v3999_v1 = vld [vmem:[%s12151_s12 + $0x4a0] sm:$0xff]  ;;  %v4030_v60 = vld [vmem:[%s12151_s12 + $0x598] sm:$0xff] }
 0xb1f   :  { %6470 = vmatpush1.bf16.msra.mxu0 %v6469_v17  ;;  %6598 = vmatpush1.bf16.msra.mxu1 %v6597_v21  ;;  %v3974_v17 = vld [vmem:[%s12151_s12 + $0x3d8] sm:$0xff]  ;;  %v6491_v21 = vpack.c.bf16 %v3976_v16, %v3972_v15  ;;  %v4004_v15 = vld [vmem:[%s12151_s12 + $0x4c8] sm:$0xff]  ;;  %v4031_v11 = vld [vmem:[%s12151_s12 + $0x5a0] sm:$0xff] }
 0xb20   :  { %6472 = vmatprep.subr.bf16.mxu0 %v6471_v31  ;;  %6600 = vmatprep.subr.bf16.mxu1 %v6599_v35  ;;  %v3975_v31 = vld [vmem:[%s12151_s12 + $0x3e0] sm:$0xff]  ;;  %v6619_v35 = vpack.c.bf16 %v3978_v29, %v3974_v17  ;;  %v4008_v16 = vld [vmem:[%s12151_s12 + $0x4e8] sm:$0xff]  ;;  %v4006_v17 = vld [vmem:[%s12151_s12 + $0x4d8] sm:$0xff] }
 0xb21   :  { %v6493_v48 = vpack.c.bf16 %v3975_v31, %v3971_v30  ;;  %v4003_v31 = vld [vmem:[%s12151_s12 + $0x4c0] sm:$0xff]  ;;  %v4034_v63 = vld [vmem:[%s12151_s12 + $0x5b8] sm:$0xff] }
 0xb23   :  { %6474 = vmatpush1.bf16.msra.mxu0 %v6473_v6  ;;  %6602 = vmatpush1.bf16.msra.mxu1 %v6601_v8  ;;  %v3982_v6 = vld [vmem:[%s12151_s12 + $0x418] sm:$0xff]  ;;  %v6495_v8 = vpack.c.bf16 %v3984_v58, %v3980_v13  ;;  %v4012_v13 = vld [vmem:[%s12151_s12 + $0x508] sm:$0xff] }
 0xb24   :  { %6476 = vmatprep.subr.bf16.mxu0 %v6475_v25  ;;  %6604 = vmatprep.subr.bf16.mxu1 %v6603_v26  ;;  %v6623_v24 = vpack.c.bf16 %v3986_v12, %v3982_v6  ;;  %v10951_v25 = vld [vmem:[%s12152_s11] sm:$0xf]  ;;  %v4016_v58 = vld [vmem:[%s12151_s12 + $0x528] sm:$0xff]  ;;  %v4014_v6 = vld [vmem:[%s12151_s12 + $0x518] sm:$0xff] }
 0xb25   :  { %v3546_v26 = vrot.slane %v10951_v25, %v8505_v33  ;;  %v3550_v27 = vrot.slane %v10951_v25, %v8510_v40  ;;  %v3558_v34 = vrot.slane %v10951_v25, %v8518_v45 }
 0xb27   :  { %6478 = vmatpush1.bf16.msra.mxu0 %v6477_v22  ;;  %6606 = vmatpush1.bf16.msra.mxu1 %v6605_v42 }
 0xb28   :  { %6480 = vmatprep.subr.bf16.mxu0 %v6479_v32  ;;  %6608 = vmatprep.subr.bf16.mxu1 %v6607_v44  ;;  %v3985_v32 = vld [vmem:[%s12151_s12 + $0x430] sm:$0xff] }
 0xb2b   :  { %6482 = vmatpush1.bf16.msra.mxu0 %v6481_v37  ;;  %6610 = vmatpush1.bf16.msra.mxu1 %v6609_v59  ;;  %v6497_v37 = vpack.c.bf16 %v3983_v23, %v3979_v41  ;;  %v6625_v59 = vpack.c.bf16 %v3985_v32, %v3981_v28  ;;  %v4013_v41 = vld [vmem:[%s12151_s12 + $0x510] sm:$0xff]  ;;  %v4022_v23 = vld [vmem:[%s12151_s12 + $0x558] sm:$0xff] }
 0xb2c   :  { %6484 = vmatprep.subr.bf16.mxu0 %v6483_v4  ;;  %6612 = vmatprep.subr.bf16.mxu1 %v6611_v9  ;;  %v3989_v9 = vld [vmem:[%s12151_s12 + $0x450] sm:$0xff]  ;;  %v4026_v28 = vld [vmem:[%s12151_s12 + $0x578] sm:$0xff] }
 0xb2d   :  { %v6643_v55 = vpack.c.bf16 %v4026_v28, %v4022_v23  ;;  %v4060_v23 = vld [vmem:[%s12151_s12 + $0x688] sm:$0xff] }
 0xb2e   :  { %v4064_v28 = vld [vmem:[%s12151_s12 + $0x6a8] sm:$0xff] }
 0xb2f   :  { %6486 = vmatpush1.bf16.msra.mxu0 %v6485_v43  ;;  %6614 = vmatpush1.bf16.msra.mxu1 %v6613_v51  ;;  %v4002_v43 = vld [vmem:[%s12151_s12 + $0x4b8] sm:$0xff] }
 0xb30   :  { %6488 = vmatprep.subr.bf16.mxu0 %v6487_v53  ;;  %6616 = vmatprep.subr.bf16.mxu1 %v6615_v57  ;;  %v6629_v53 = vpack.c.bf16 %v3993_v10, %v3989_v9  ;;  %v3995_v57 = vld [vmem:[%s12151_s12 + $0x480] sm:$0xff]  ;;  %v6631_v0 = vpack.c.bf16 %v4002_v43, %v3998_v19  ;;  %v4033_v19 = vld [vmem:[%s12151_s12 + $0x5b0] sm:$0xff]  ;;  %v4036_v43 = vld [vmem:[%s12151_s12 + $0x5c8] sm:$0xff] }
 0xb31   :  { %v6505_v29 = vpack.c.bf16 %v3999_v1, %v3995_v57  ;;  %v4027_v10 = vld [vmem:[%s12151_s12 + $0x580] sm:$0xff]  ;;  %v6649_v1 = vpack.c.bf16 %v4033_v19, %v4029_v54 }
 0xb32   :  { %v6521_v57 = vpack.c.bf16 %v4031_v11, %v4027_v10 }
 0xb33   :  { %6490 = vmatpush1.bf16.msra.mxu0 %v6489_v3  ;;  %6618 = vmatpush1.bf16.msra.mxu1 %v6617_v7  ;;  %v3997_v3 = vld [vmem:[%s12151_s12 + $0x490] sm:$0xff] }
 0xb34   :  { %6492 = vmatprep.subr.bf16.mxu0 %v6491_v21  ;;  %6620 = vmatprep.subr.bf16.mxu1 %v6619_v35  ;;  %v4001_v7 = vld [vmem:[%s12151_s12 + $0x4b0] sm:$0xff]  ;;  %v4010_v21 = vld [vmem:[%s12151_s12 + $0x4f8] sm:$0xff]  ;;  %v4007_v35 = vld [vmem:[%s12151_s12 + $0x4e0] sm:$0xff] }
 0xb35   :  { %v6633_v30 = vpack.c.bf16 %v4001_v7, %v3997_v3  ;;  %v6635_v49 = vpack.c.bf16 %v4010_v21, %v4006_v17  ;;  %v6509_v12 = vpack.c.bf16 %v4007_v35, %v4003_v31  ;;  %v4044_v17 = vld [vmem:[%s12151_s12 + $0x608] sm:$0xff] }
 0xb36   :  { %v4048_v21 = vld [vmem:[%s12151_s12 + $0x628] sm:$0xff] }
 0xb37   :  { %6494 = vmatpush1.bf16.msra.mxu0 %v6493_v48  ;;  %6622 = vmatpush1.bf16.msra.mxu1 %v6621_v50  ;;  %v6507_v48 = vpack.c.bf16 %v4008_v16, %v4004_v15  ;;  %v4009_v50 = vld [vmem:[%s12151_s12 + $0x4f0] sm:$0xff] }
 0xb38   :  { %6496 = vmatprep.subr.bf16.mxu0 %v6495_v8  ;;  %6624 = vmatprep.subr.bf16.mxu1 %v6623_v24  ;;  %v4018_v8 = vld [vmem:[%s12151_s12 + $0x538] sm:$0xff]  ;;  %v6637_v24 = vpack.c.bf16 %v4009_v50, %v4005_v36  ;;  %v4037_v15 = vld [vmem:[%s12151_s12 + $0x5d0] sm:$0xff]  ;;  %v6527_v36 = vpack.c.bf16 %v4048_v21, %v4044_v17 }
 0xb39   :  { %v4041_v16 = vld [vmem:[%s12151_s12 + $0x5f0] sm:$0xff] }
 0xb3a   :  { %v6653_v35 = vpack.c.bf16 %v4041_v16, %v4037_v15  ;;  %v4077_v17 = vld [vmem:[%s12151_s12 + $0x710] sm:$0xff] }
 0xb3b   :  { %v4081_v21 = vld [vmem:[%s12151_s12 + $0x730] sm:$0xff] }
 0xbcd   :  { %v3700_v38 = vpop.f32.mrb[20].mxu0  ;;  %v10959_v20 = vpop.f32.mrb[20].mxu1 }
 0xbce   :  { %v6983_v39 = vadd.f32 %v3700_v38, %v3546_v26  ;;  %v3702_v22 = vpop.f32.mrb[21].mxu0  ;;  %v3844_v42 = vpop.f32.mrb[21].mxu1  ;;  %v4011_v26 = vld [vmem:[%s12151_s12 + $0x500] sm:$0xff]  ;;  %v6639_v38 = vpack.c.bf16 %v4018_v8, %v4014_v6  ;;  %v4052_v6 = vld [vmem:[%s12151_s12 + $0x648] sm:$0xff] }
 0xbcf   :  { %v6984_v44 = vadd.f32 %v3702_v22, %v3550_v27  ;;  %v6986_v46 = vadd.f32 %v3844_v42, %v3558_v34  ;;  %v4015_v27 = vld [vmem:[%s12151_s12 + $0x520] sm:$0xff]  ;;  %v6511_v34 = vpack.c.bf16 %v4016_v58, %v4012_v13  ;;  %v4020_v22 = vld [vmem:[%s12151_s12 + $0x548] sm:$0xff]  ;;  %v4045_v13 = vld [vmem:[%s12151_s12 + $0x610] sm:$0xff] }
 0xbd0   :  { %v3847_v4 = vmax.f32 %v6983_v39, 0.0  ;;  %v4017_v39 = vld [vmem:[%s12151_s12 + $0x530] sm:$0xff]  ;;  %v4024_v42 = vld [vmem:[%s12151_s12 + $0x568] sm:$0xff]  ;;  %v6513_v32 = vpack.c.bf16 %v4015_v27, %v4011_v26 }
 0xbd1   :  { %v3848_v56 = vmax.f32 %v6984_v44, 0.0  ;;  %v3850_v51 = vmax.f32 %v6986_v46, 0.0  ;;  %v6641_v44 = vpack.c.bf16 %v4017_v39, %v4013_v41  ;;  %v4023_v46 = vld [vmem:[%s12151_s12 + $0x560] sm:$0xff]  ;;  %v6515_v47 = vpack.c.bf16 %v4024_v42, %v4020_v22  ;;  %v4049_v58 = vld [vmem:[%s12151_s12 + $0x630] sm:$0xff]  ;;  %v4056_v8 = vld [vmem:[%s12151_s12 + $0x668] sm:$0xff] }
 0xbd2   :  { %v6657_v27 = vpack.c.bf16 %v4049_v58, %v4045_v13  ;;  %v6531_v41 = vpack.c.bf16 %v4056_v8, %v4052_v6  ;;  %v4053_v22 = vld [vmem:[%s12151_s12 + $0x650] sm:$0xff] }
 0xbd3   :  { %4193 = vmatprep.mubr.f32.mxu0 %v3848_v56  ;;  %4335 = vmatprep.mubr.f32.mxu1 %v3848_v56  ;;  %v4025_v56 = vld [vmem:[%s12151_s12 + $0x570] sm:$0xff] }
 0xbd4   :  { %4194 = vmatmul.mubr.f32.vlgmr.msra.gmra.mrb[22].mxu0 %v3847_v4  ;;  %4336 = vmatmul.mubr.f32.vlgmr.msra.gmra.mrb[22].mxu1 %v3847_v4  ;;  %v6517_v4 = vpack.c.bf16 %v4023_v46, %v4019_v61  ;;  %v6645_v9 = vpack.c.bf16 %v4025_v56, %v4021_v5  ;;  %v4057_v42 = vld [vmem:[%s12151_s12 + $0x670] sm:$0xff]  ;;  %v6535_v5 = vpack.c.bf16 %v4064_v28, %v4060_v23 }
 0xbd5   :  { %6498 = vmatpush1.bf16.msra.mxu0 %v6497_v37  ;;  %6626 = vmatpush1.bf16.msra.mxu1 %v6625_v59  ;;  %v4028_v37 = vld [vmem:[%s12151_s12 + $0x588] sm:$0xff]  ;;  %v6661_v46 = vpack.c.bf16 %v4057_v42, %v4053_v22  ;;  %v4085_v6 = vld [vmem:[%s12151_s12 + $0x750] sm:$0xff] }
 0xbd6   :  { %4264 = vmatprep.mubr.f32.mxu0 %v3850_v51  ;;  %4406 = vmatprep.mubr.f32.mxu1 %v3850_v51  ;;  %v4032_v59 = vld [vmem:[%s12151_s12 + $0x5a8] sm:$0xff]  ;;  %v4089_v8 = vld [vmem:[%s12151_s12 + $0x770] sm:$0xff] }
 0xbd7   :  { %6500 = vmatprep.subr.bf16.mxu0 %v6499_v14  ;;  %6628 = vmatprep.subr.bf16.mxu1 %v6627_v18  ;;  %v6519_v14 = vpack.c.bf16 %v4032_v59, %v4028_v37  ;;  %v6647_v18 = vpack.c.bf16 %v4034_v63, %v4030_v60  ;;  %v4040_v51 = vld [vmem:[%s12151_s12 + $0x5e8] sm:$0xff]  ;;  %v4061_v37 = vld [vmem:[%s12151_s12 + $0x690] sm:$0xff] }
 0xbd8   :  { %v6523_v3 = vpack.c.bf16 %v4040_v51, %v4036_v43  ;;  %v4065_v59 = vld [vmem:[%s12151_s12 + $0x6b0] sm:$0xff]  ;;  %v4068_v60 = vld [vmem:[%s12151_s12 + $0x6c8] sm:$0xff] }
 0xbd9   :  { %6502 = vmatpush1.bf16.msra.mxu0 %v6501_v52  ;;  %6630 = vmatpush1.bf16.msra.mxu1 %v6629_v53  ;;  %v4038_v52 = vld [vmem:[%s12151_s12 + $0x5d8] sm:$0xff]  ;;  %v4072_v63 = vld [vmem:[%s12151_s12 + $0x6e8] sm:$0xff]  ;;  %v6665_v11 = vpack.c.bf16 %v4065_v59, %v4061_v37  ;;  %v4069_v43 = vld [vmem:[%s12151_s12 + $0x6d0] sm:$0xff]  ;;  %v3554_v37 = vrot.slane %v10951_v25, %v8525_v62 }
 0xbda   :  { %6504 = vmatprep.subr.bf16.mxu0 %v6503_v2  ;;  %6632 = vmatprep.subr.bf16.mxu1 %v6631_v0  ;;  %v4042_v53 = vld [vmem:[%s12151_s12 + $0x5f8] sm:$0xff]  ;;  %v4035_v2 = vld [vmem:[%s12151_s12 + $0x5c0] sm:$0xff]  ;;  %v6539_v54 = vpack.c.bf16 %v4072_v63, %v4068_v60  ;;  %v4073_v51 = vld [vmem:[%s12151_s12 + $0x6f0] sm:$0xff] }
 0xbdb   :  { %v4039_v0 = vld [vmem:[%s12151_s12 + $0x5e0] sm:$0xff]  ;;  %v6651_v7 = vpack.c.bf16 %v4042_v53, %v4038_v52  ;;  %v4076_v52 = vld [vmem:[%s12151_s12 + $0x708] sm:$0xff]  ;;  %v4093_v23 = vld [vmem:[%s12151_s12 + $0x790] sm:$0xff] }
 0xbdc   :  { %v6525_v31 = vpack.c.bf16 %v4039_v0, %v4035_v2  ;;  %v4080_v53 = vld [vmem:[%s12151_s12 + $0x728] sm:$0xff]  ;;  %v6669_v0 = vpack.c.bf16 %v4073_v51, %v4069_v43  ;;  %v4097_v28 = vld [vmem:[%s12151_s12 + $0x7b0] sm:$0xff]  ;;  %v6985_v43 = vadd.f32 %v10959_v20, %v3554_v37 }
 0xbdd   :  { %6506 = vmatpush1.bf16.msra.mxu0 %v6505_v29  ;;  %6634 = vmatpush1.bf16.msra.mxu1 %v6633_v30  ;;  %v4046_v29 = vld [vmem:[%s12151_s12 + $0x618] sm:$0xff]  ;;  %v6543_v15 = vpack.c.bf16 %v4080_v53, %v4076_v52  ;;  %v4101_v63 = vld [vmem:[%s12151_s12 + $0x7d0] sm:$0xff]  ;;  %v4422_v25 = vld [vmem:[%s12153_s14 + $0x28] sm:$0xff] }
 0xbde   :  { %6508 = vmatprep.subr.bf16.mxu0 %v6507_v48  ;;  %6636 = vmatprep.subr.bf16.mxu1 %v6635_v49  ;;  %v4050_v30 = vld [vmem:[%s12151_s12 + $0x638] sm:$0xff]  ;;  %v4043_v48 = vld [vmem:[%s12151_s12 + $0x600] sm:$0xff]  ;;  %v4419_v53 = vld [vmem:[%s12153_s14 + $0x10] sm:$0xff] }
 0xbdf   :  { %v4047_v49 = vld [vmem:[%s12151_s12 + $0x620] sm:$0xff]  ;;  %v6655_v50 = vpack.c.bf16 %v4050_v30, %v4046_v29  ;;  %v4084_v29 = vld [vmem:[%s12151_s12 + $0x748] sm:$0xff] }
 0xbe0   :  { %v6529_v26 = vpack.c.bf16 %v4047_v49, %v4043_v48  ;;  %v4088_v30 = vld [vmem:[%s12151_s12 + $0x768] sm:$0xff]  ;;  %v6673_v49 = vpack.c.bf16 %v4081_v21, %v4077_v17  ;;  %v3849_v17 = vmax.f32 %v6985_v43, 0.0  ;;  %v4457_v43 = vld [vmem:[%s12153_s14 + $0x140] sm:$0xff] }
 0xbe1   :  { %6510 = vmatpush1.bf16.msra.mxu0 %v6509_v12  ;;  %6638 = vmatpush1.bf16.msra.mxu1 %v6637_v24  ;;  %v4054_v12 = vld [vmem:[%s12151_s12 + $0x658] sm:$0xff]  ;;  %v6547_v13 = vpack.c.bf16 %v4088_v30, %v4084_v29  ;;  %v4430_v20 = vld [vmem:[%s12153_s14 + $0x68] sm:$0xff]  ;;  %v4427_v30 = vld [vmem:[%s12153_s14 + $0x50] sm:$0xff] }
 0xbe2   :  { %6512 = vmatprep.subr.bf16.mxu0 %v6511_v34  ;;  %6640 = vmatprep.subr.bf16.mxu1 %v6639_v38  ;;  %v4058_v24 = vld [vmem:[%s12151_s12 + $0x678] sm:$0xff]  ;;  %v4051_v34 = vld [vmem:[%s12151_s12 + $0x640] sm:$0xff] }
 0xbe3   :  { %v4055_v38 = vld [vmem:[%s12151_s12 + $0x660] sm:$0xff]  ;;  %v6659_v39 = vpack.c.bf16 %v4058_v24, %v4054_v12  ;;  %v4092_v12 = vld [vmem:[%s12151_s12 + $0x788] sm:$0xff] }
 0xbe4   :  { %v6533_v61 = vpack.c.bf16 %v4055_v38, %v4051_v34  ;;  %v4096_v24 = vld [vmem:[%s12151_s12 + $0x7a8] sm:$0xff]  ;;  %v6677_v38 = vpack.c.bf16 %v4089_v8, %v4085_v6  ;;  %v4437_v6 = vld [vmem:[%s12153_s14 + $0xa0] sm:$0xff] }
 0xbe5   :  { %6514 = vmatpush1.bf16.msra.mxu0 %v6513_v32  ;;  %6642 = vmatpush1.bf16.msra.mxu1 %v6641_v44  ;;  %v4062_v32 = vld [vmem:[%s12151_s12 + $0x698] sm:$0xff]  ;;  %v6551_v22 = vpack.c.bf16 %v4096_v24, %v4092_v12  ;;  %v4435_v24 = vld [vmem:[%s12153_s14 + $0x90] sm:$0xff] }
 0xbe6   :  { %6516 = vmatprep.subr.bf16.mxu0 %v6515_v47  ;;  %6644 = vmatprep.subr.bf16.mxu1 %v6643_v55  ;;  %v4066_v44 = vld [vmem:[%s12151_s12 + $0x6b8] sm:$0xff]  ;;  %v4059_v47 = vld [vmem:[%s12151_s12 + $0x680] sm:$0xff] }
 0xbe7   :  { %v4063_v55 = vld [vmem:[%s12151_s12 + $0x6a0] sm:$0xff]  ;;  %v6663_v56 = vpack.c.bf16 %v4066_v44, %v4062_v32  ;;  %v4100_v32 = vld [vmem:[%s12151_s12 + $0x7c8] sm:$0xff] }
 0xbe8   :  { %v6537_v10 = vpack.c.bf16 %v4063_v55, %v4059_v47  ;;  %v4104_v44 = vld [vmem:[%s12151_s12 + $0x7e8] sm:$0xff]  ;;  %v6681_v55 = vpack.c.bf16 %v4097_v28, %v4093_v23  ;;  %v4445_v23 = vld [vmem:[%s12153_s14 + $0xe0] sm:$0xff] }
 0xbe9   :  { %6518 = vmatpush1.bf16.msra.mxu0 %v6517_v4  ;;  %6646 = vmatpush1.bf16.msra.mxu1 %v6645_v9  ;;  %v4070_v4 = vld [vmem:[%s12151_s12 + $0x6d8] sm:$0xff]  ;;  %v6555_v59 = vpack.c.bf16 %v4104_v44, %v4100_v32  ;;  %v4443_v44 = vld [vmem:[%s12153_s14 + $0xd0] sm:$0xff] }
 0xbea   :  { %6520 = vmatprep.subr.bf16.mxu0 %v6519_v14  ;;  %6648 = vmatprep.subr.bf16.mxu1 %v6647_v18  ;;  %v4074_v9 = vld [vmem:[%s12151_s12 + $0x6f8] sm:$0xff]  ;;  %v4067_v14 = vld [vmem:[%s12151_s12 + $0x6c0] sm:$0xff] }
 0xbeb   :  { %v4071_v18 = vld [vmem:[%s12151_s12 + $0x6e0] sm:$0xff]  ;;  %v6667_v19 = vpack.c.bf16 %v4074_v9, %v4070_v4  ;;  %v4105_v4 = vld [vmem:[%s12151_s12 + $0x7f0] sm:$0xff]  ;;  %v4418_v9 = vld [vmem:[%s12153_s14 + $0x8] sm:$0xff] }
 0xbec   :  { %v6541_v2 = vpack.c.bf16 %v4071_v18, %v4067_v14  ;;  %v6685_v18 = vpack.c.bf16 %v4105_v4, %v4101_v63  ;;  %v6687_v51 = vpack.c.bf16 %v4422_v25, %v4418_v9  ;;  %v4451_v9 = vld [vmem:[%s12153_s14 + $0x110] sm:$0xff] }
 0xbed   :  { %6522 = vmatpush1.bf16.msra.mxu0 %v6521_v57  ;;  %6650 = vmatpush1.bf16.msra.mxu1 %v6649_v1  ;;  %v4078_v57 = vld [vmem:[%s12151_s12 + $0x718] sm:$0xff]  ;;  %v4455_v25 = vld [vmem:[%s12153_s14 + $0x130] sm:$0xff] }
 0xbee   :  { %6524 = vmatprep.subr.bf16.mxu0 %v6523_v3  ;;  %6652 = vmatprep.subr.bf16.mxu1 %v6651_v7  ;;  %v4082_v1 = vld [vmem:[%s12151_s12 + $0x738] sm:$0xff]  ;;  %v4075_v3 = vld [vmem:[%s12151_s12 + $0x700] sm:$0xff] }
 0xbef   :  { %v4079_v7 = vld [vmem:[%s12151_s12 + $0x720] sm:$0xff]  ;;  %v6671_v16 = vpack.c.bf16 %v4082_v1, %v4078_v57  ;;  %v4423_v57 = vld [vmem:[%s12153_s14 + $0x30] sm:$0xff]  ;;  %v4426_v1 = vld [vmem:[%s12153_s14 + $0x48] sm:$0xff] }
 0xbf0   :  { %v6545_v48 = vpack.c.bf16 %v4079_v7, %v4075_v3  ;;  %v6817_v7 = vpack.c.bf16 %v4423_v57, %v4419_v53  ;;  %v6691_v21 = vpack.c.bf16 %v4430_v20, %v4426_v1  ;;  %v4459_v57 = vld [vmem:[%s12153_s14 + $0x150] sm:$0xff]  ;;  %v4466_v20 = vld [vmem:[%s12153_s14 + $0x188] sm:$0xff] }
 0xbf1   :  { %6526 = vmatpush1.bf16.msra.mxu0 %v6525_v31  ;;  %6654 = vmatpush1.bf16.msra.mxu1 %v6653_v35  ;;  %v4086_v31 = vld [vmem:[%s12151_s12 + $0x758] sm:$0xff]  ;;  %v4463_v1 = vld [vmem:[%s12153_s14 + $0x170] sm:$0xff] }
 0xbf2   :  { %6528 = vmatprep.subr.bf16.mxu0 %v6527_v36  ;;  %6656 = vmatprep.subr.bf16.mxu1 %v6655_v50  ;;  %v4090_v35 = vld [vmem:[%s12151_s12 + $0x778] sm:$0xff]  ;;  %v4083_v36 = vld [vmem:[%s12151_s12 + $0x740] sm:$0xff] }
 0xbf3   :  { %v4087_v50 = vld [vmem:[%s12151_s12 + $0x760] sm:$0xff]  ;;  %v6675_v58 = vpack.c.bf16 %v4090_v35, %v4086_v31  ;;  %v4431_v31 = vld [vmem:[%s12153_s14 + $0x70] sm:$0xff]  ;;  %v4434_v35 = vld [vmem:[%s12153_s14 + $0x88] sm:$0xff] }
 0xbf4   :  { %v6549_v34 = vpack.c.bf16 %v4087_v50, %v4083_v36  ;;  %v4440_v36 = vld [vmem:[%s12153_s14 + $0xb8] sm:$0xff] }
 0xbf5   :  { %6530 = vmatpush1.bf16.msra.mxu0 %v6529_v26  ;;  %6658 = vmatpush1.bf16.msra.mxu1 %v6657_v27  ;;  %v4094_v26 = vld [vmem:[%s12151_s12 + $0x798] sm:$0xff] }
 0xbf6   :  { %6532 = vmatprep.subr.bf16.mxu0 %v6531_v41  ;;  %6660 = vmatprep.subr.bf16.mxu1 %v6659_v39  ;;  %v4098_v27 = vld [vmem:[%s12151_s12 + $0x7b8] sm:$0xff]  ;;  %v4091_v41 = vld [vmem:[%s12151_s12 + $0x780] sm:$0xff] }
 0xbf7   :  { %v4095_v39 = vld [vmem:[%s12151_s12 + $0x7a0] sm:$0xff]  ;;  %v6679_v42 = vpack.c.bf16 %v4098_v27, %v4094_v26  ;;  %v4439_v26 = vld [vmem:[%s12153_s14 + $0xb0] sm:$0xff]  ;;  %v4442_v27 = vld [vmem:[%s12153_s14 + $0xc8] sm:$0xff] }
 0xbf8   :  { %v6553_v47 = vpack.c.bf16 %v4095_v39, %v4091_v41  ;;  %v4448_v41 = vld [vmem:[%s12153_s14 + $0xf8] sm:$0xff] }
 0xbf9   :  { %6534 = vmatpush1.bf16.msra.mxu0 %v6533_v61  ;;  %6662 = vmatpush1.bf16.msra.mxu1 %v6661_v46  ;;  %v4102_v61 = vld [vmem:[%s12151_s12 + $0x7d8] sm:$0xff] }
 0xbfa   :  { %6536 = vmatprep.subr.bf16.mxu0 %v6535_v5  ;;  %6664 = vmatprep.subr.bf16.mxu1 %v6663_v56  ;;  %v4106_v46 = vld [vmem:[%s12151_s12 + $0x7f8] sm:$0xff]  ;;  %v4099_v5 = vld [vmem:[%s12151_s12 + $0x7c0] sm:$0xff] }
 0xbfb   :  { %v4103_v56 = vld [vmem:[%s12151_s12 + $0x7e0] sm:$0xff]  ;;  %v6683_v60 = vpack.c.bf16 %v4106_v46, %v4102_v61  ;;  %v4447_v61 = vld [vmem:[%s12153_s14 + $0xf0] sm:$0xff]  ;;  %v4450_v46 = vld [vmem:[%s12153_s14 + $0x108] sm:$0xff] }
 0xbfc   :  { %v6557_v14 = vpack.c.bf16 %v4103_v56, %v4099_v5  ;;  %v4456_v5 = vld [vmem:[%s12153_s14 + $0x138] sm:$0xff]  ;;  %v6829_v37 = vpack.c.bf16 %v4447_v61, %v4443_v44  ;;  %v4483_v44 = vld [vmem:[%s12153_s14 + $0x210] sm:$0xff] }
 0xbfd   :  { %6538 = vmatpush1.bf16.msra.mxu0 %v6537_v10  ;;  %6666 = vmatpush1.bf16.msra.mxu1 %v6665_v11  ;;  %v4420_v10 = vld [vmem:[%s12153_s14 + $0x18] sm:$0xff]  ;;  %v4487_v61 = vld [vmem:[%s12153_s14 + $0x230] sm:$0xff] }
 0xbfe   :  { %6540 = vmatprep.subr.bf16.mxu0 %v6539_v54  ;;  %6668 = vmatprep.subr.bf16.mxu1 %v6667_v19  ;;  %v4424_v11 = vld [vmem:[%s12153_s14 + $0x38] sm:$0xff]  ;;  %v4417_v54 = vld [vmem:[%s12153_s14] sm:$0xff] }
 0xbff   :  { %v4421_v19 = vld [vmem:[%s12153_s14 + $0x20] sm:$0xff]  ;;  %v6815_v52 = vpack.c.bf16 %v4424_v11, %v4420_v10  ;;  %v4458_v10 = vld [vmem:[%s12153_s14 + $0x148] sm:$0xff] }
 0xc00   :  { %v6689_v3 = vpack.c.bf16 %v4421_v19, %v4417_v54  ;;  %v4462_v11 = vld [vmem:[%s12153_s14 + $0x168] sm:$0xff]  ;;  %v6833_v19 = vpack.c.bf16 %v4455_v25, %v4451_v9  ;;  %v4491_v9 = vld [vmem:[%s12153_s14 + $0x250] sm:$0xff] }
 0xc01   :  { %6542 = vmatpush1.bf16.msra.mxu0 %v6541_v2  ;;  %6670 = vmatpush1.bf16.msra.mxu1 %v6669_v0  ;;  %v4428_v2 = vld [vmem:[%s12153_s14 + $0x58] sm:$0xff]  ;;  %v4495_v25 = vld [vmem:[%s12153_s14 + $0x270] sm:$0xff] }
 0xc02   :  { %6544 = vmatprep.subr.bf16.mxu0 %v6543_v15  ;;  %6672 = vmatprep.subr.bf16.mxu1 %v6671_v16  ;;  %v4432_v0 = vld [vmem:[%s12153_s14 + $0x78] sm:$0xff]  ;;  %v4425_v15 = vld [vmem:[%s12153_s14 + $0x40] sm:$0xff] }
 0xc03   :  { %v4429_v16 = vld [vmem:[%s12153_s14 + $0x60] sm:$0xff]  ;;  %v6819_v29 = vpack.c.bf16 %v4432_v0, %v4428_v2  ;;  %v4470_v2 = vld [vmem:[%s12153_s14 + $0x1a8] sm:$0xff]  ;;  %v4468_v0 = vld [vmem:[%s12153_s14 + $0x198] sm:$0xff] }
 0xc04   :  { %v6693_v50 = vpack.c.bf16 %v4429_v16, %v4425_v15  ;;  %v6837_v15 = vpack.c.bf16 %v4463_v1, %v4459_v57  ;;  %v4465_v16 = vld [vmem:[%s12153_s14 + $0x180] sm:$0xff]  ;;  %v4499_v57 = vld [vmem:[%s12153_s14 + $0x290] sm:$0xff] }
 0xc05   :  { %6546 = vmatpush1.bf16.msra.mxu0 %v6545_v48  ;;  %6674 = vmatpush1.bf16.msra.mxu1 %v6673_v49  ;;  %v4438_v48 = vld [vmem:[%s12153_s14 + $0xa8] sm:$0xff]  ;;  %v4436_v49 = vld [vmem:[%s12153_s14 + $0x98] sm:$0xff]  ;;  %v4503_v1 = vld [vmem:[%s12153_s14 + $0x2b0] sm:$0xff] }
 0xc06   :  { %6548 = vmatprep.subr.bf16.mxu0 %v6547_v13  ;;  %6676 = vmatprep.subr.bf16.mxu1 %v6675_v58  ;;  %v6821_v13 = vpack.c.bf16 %v4431_v31, %v4427_v30  ;;  %v4433_v58 = vld [vmem:[%s12153_s14 + $0x80] sm:$0xff]  ;;  %v6695_v8 = vpack.c.bf16 %v4438_v48, %v4434_v35  ;;  %v6823_v12 = vpack.c.bf16 %v4440_v36, %v4436_v49  ;;  %v4467_v30 = vld [vmem:[%s12153_s14 + $0x190] sm:$0xff]  ;;  %v4474_v35 = vld [vmem:[%s12153_s14 + $0x1c8] sm:$0xff] }
 0xc07   :  { %v6697_v39 = vpack.c.bf16 %v4437_v6, %v4433_v58  ;;  %v4471_v31 = vld [vmem:[%s12153_s14 + $0x1b0] sm:$0xff]  ;;  %v4478_v48 = vld [vmem:[%s12153_s14 + $0x1e8] sm:$0xff]  ;;  %v4476_v49 = vld [vmem:[%s12153_s14 + $0x1d8] sm:$0xff] }
 0xc08   :  { %v4480_v36 = vld [vmem:[%s12153_s14 + $0x1f8] sm:$0xff]  ;;  %v4473_v58 = vld [vmem:[%s12153_s14 + $0x1c0] sm:$0xff] }
 0xc09   :  { %6550 = vmatpush1.bf16.msra.mxu0 %v6549_v34  ;;  %6678 = vmatpush1.bf16.msra.mxu1 %v6677_v38  ;;  %v4446_v34 = vld [vmem:[%s12153_s14 + $0xe8] sm:$0xff]  ;;  %v4444_v38 = vld [vmem:[%s12153_s14 + $0xd8] sm:$0xff]  ;;  %v4477_v6 = vld [vmem:[%s12153_s14 + $0x1e0] sm:$0xff] }
 0xc0a   :  { %6552 = vmatprep.subr.bf16.mxu0 %v6551_v22  ;;  %6680 = vmatprep.subr.bf16.mxu1 %v6679_v42  ;;  %v6825_v22 = vpack.c.bf16 %v4439_v26, %v4435_v24  ;;  %v4441_v42 = vld [vmem:[%s12153_s14 + $0xc0] sm:$0xff]  ;;  %v6699_v28 = vpack.c.bf16 %v4446_v34, %v4442_v27  ;;  %v6827_v32 = vpack.c.bf16 %v4448_v41, %v4444_v38  ;;  %v4475_v24 = vld [vmem:[%s12153_s14 + $0x1d0] sm:$0xff]  ;;  %v4482_v27 = vld [vmem:[%s12153_s14 + $0x208] sm:$0xff] }
 0xc0b   :  { %v6701_v56 = vpack.c.bf16 %v4445_v23, %v4441_v42  ;;  %v4479_v26 = vld [vmem:[%s12153_s14 + $0x1f0] sm:$0xff]  ;;  %v4486_v34 = vld [vmem:[%s12153_s14 + $0x228] sm:$0xff]  ;;  %v4484_v38 = vld [vmem:[%s12153_s14 + $0x218] sm:$0xff] }
 0xc0c   :  { %v4488_v41 = vld [vmem:[%s12153_s14 + $0x238] sm:$0xff]  ;;  %v4481_v42 = vld [vmem:[%s12153_s14 + $0x200] sm:$0xff] }
 0xc0d   :  { %6554 = vmatpush1.bf16.msra.mxu0 %v6553_v47  ;;  %6682 = vmatpush1.bf16.msra.mxu1 %v6681_v55  ;;  %v4454_v47 = vld [vmem:[%s12153_s14 + $0x128] sm:$0xff]  ;;  %v4452_v55 = vld [vmem:[%s12153_s14 + $0x118] sm:$0xff]  ;;  %v4485_v23 = vld [vmem:[%s12153_s14 + $0x220] sm:$0xff] }
 0xc0e   :  { %6556 = vmatprep.subr.bf16.mxu0 %v6555_v59  ;;  %6684 = vmatprep.subr.bf16.mxu1 %v6683_v60  ;;  %v4449_v59 = vld [vmem:[%s12153_s14 + $0x100] sm:$0xff]  ;;  %v6703_v63 = vpack.c.bf16 %v4454_v47, %v4450_v46  ;;  %v6831_v4 = vpack.c.bf16 %v4456_v5, %v4452_v55  ;;  %v4490_v46 = vld [vmem:[%s12153_s14 + $0x248] sm:$0xff]  ;;  %v4492_v55 = vld [vmem:[%s12153_s14 + $0x258] sm:$0xff] }
 0xc0f   :  { %v4453_v60 = vld [vmem:[%s12153_s14 + $0x120] sm:$0xff]  ;;  %v4494_v47 = vld [vmem:[%s12153_s14 + $0x268] sm:$0xff]  ;;  %v4496_v5 = vld [vmem:[%s12153_s14 + $0x278] sm:$0xff] }
 0xc10   :  { %v6705_v54 = vpack.c.bf16 %v4453_v60, %v4449_v59  ;;  %v4489_v59 = vld [vmem:[%s12153_s14 + $0x240] sm:$0xff] }
 0xc11   :  { %6558 = vmatpush1.bf16.msra.mxu0 %v6557_v14  ;;  %6686 = vmatpush1.bf16.msra.mxu1 %v6685_v18  ;;  %v4460_v14 = vld [vmem:[%s12153_s14 + $0x158] sm:$0xff]  ;;  %v4493_v60 = vld [vmem:[%s12153_s14 + $0x260] sm:$0xff] }
 0xc12   :  { %6688 = vmatprep.subr.bf16.mxu0 %v6687_v51  ;;  %6816 = vmatprep.subr.bf16.mxu1 %v6815_v52  ;;  %v4464_v18 = vld [vmem:[%s12153_s14 + $0x178] sm:$0xff]  ;;  %v4461_v51 = vld [vmem:[%s12153_s14 + $0x160] sm:$0xff]  ;;  %v6707_v52 = vpack.c.bf16 %v4462_v11, %v4458_v10  ;;  %v4498_v10 = vld [vmem:[%s12153_s14 + $0x288] sm:$0xff] }
 0xc13   :  { %v6835_v53 = vpack.c.bf16 %v4464_v18, %v4460_v14  ;;  %v4502_v11 = vld [vmem:[%s12153_s14 + $0x2a8] sm:$0xff]  ;;  %v4500_v14 = vld [vmem:[%s12153_s14 + $0x298] sm:$0xff] }
 0xc14   :  { %4265 = vmatmul.mubr.f32.vlgmr.msra.gmra.mrb[22].mxu0 %v3849_v17  ;;  %4407 = vmatmul.mubr.f32.vlgmr.msra.gmra.mrb[22].mxu1 %v3849_v17  ;;  %v4469_v17 = vld [vmem:[%s12153_s14 + $0x1a0] sm:$0xff]  ;;  %v4504_v18 = vld [vmem:[%s12153_s14 + $0x2b8] sm:$0xff] }
 0xc15   :  { %6690 = vmatpush1.bf16.msra.mxu0 %v6689_v3  ;;  %6818 = vmatpush1.bf16.msra.mxu1 %v6817_v7  ;;  %v4472_v3 = vld [vmem:[%s12153_s14 + $0x1b8] sm:$0xff]  ;;  %v6709_v7 = vpack.c.bf16 %v4461_v51, %v4457_v43  ;;  %v4497_v43 = vld [vmem:[%s12153_s14 + $0x280] sm:$0xff] }
 0xc16   :  { %6692 = vmatprep.subr.bf16.mxu0 %v6691_v21  ;;  %6820 = vmatprep.subr.bf16.mxu1 %v6819_v29  ;;  %v6711_v21 = vpack.c.bf16 %v4470_v2, %v4466_v20  ;;  %v6839_v29 = vpack.c.bf16 %v4472_v3, %v4468_v0  ;;  %v4501_v51 = vld [vmem:[%s12153_s14 + $0x2a0] sm:$0xff]  ;;  %v4506_v20 = vld [vmem:[%s12153_s14 + $0x2c8] sm:$0xff]  ;;  %v4508_v0 = vld [vmem:[%s12153_s14 + $0x2d8] sm:$0xff] }
 0xc17   :  { %v4510_v2 = vld [vmem:[%s12153_s14 + $0x2e8] sm:$0xff]  ;;  %v4512_v3 = vld [vmem:[%s12153_s14 + $0x2f8] sm:$0xff] }
 0xc19   :  { %6694 = vmatpush1.bf16.msra.mxu0 %v6693_v50  ;;  %6822 = vmatpush1.bf16.msra.mxu1 %v6821_v13  ;;  %v6713_v50 = vpack.c.bf16 %v4469_v17, %v4465_v16  ;;  %v6841_v13 = vpack.c.bf16 %v4471_v31, %v4467_v30  ;;  %v4505_v16 = vld [vmem:[%s12153_s14 + $0x2c0] sm:$0xff]  ;;  %v4507_v30 = vld [vmem:[%s12153_s14 + $0x2d0] sm:$0xff] }
 0xc1a   :  { %6696 = vmatprep.subr.bf16.mxu0 %v6695_v8  ;;  %6824 = vmatprep.subr.bf16.mxu1 %v6823_v12  ;;  %v6715_v8 = vpack.c.bf16 %v4478_v48, %v4474_v35  ;;  %v6843_v12 = vpack.c.bf16 %v4480_v36, %v4476_v49  ;;  %v4509_v17 = vld [vmem:[%s12153_s14 + $0x2e0] sm:$0xff]  ;;  %v4511_v31 = vld [vmem:[%s12153_s14 + $0x2f0] sm:$0xff]  ;;  %v4514_v35 = vld [vmem:[%s12153_s14 + $0x308] sm:$0xff] }
 0xc1b   :  { %v4518_v48 = vld [vmem:[%s12153_s14 + $0x328] sm:$0xff]  ;;  %v4516_v49 = vld [vmem:[%s12153_s14 + $0x318] sm:$0xff] }
 0xc1c   :  { %v4520_v36 = vld [vmem:[%s12153_s14 + $0x338] sm:$0xff] }
 0xc1d   :  { %6698 = vmatpush1.bf16.msra.mxu0 %v6697_v39  ;;  %6826 = vmatpush1.bf16.msra.mxu1 %v6825_v22  ;;  %v6717_v39 = vpack.c.bf16 %v4477_v6, %v4473_v58  ;;  %v6845_v22 = vpack.c.bf16 %v4479_v26, %v4475_v24  ;;  %v4513_v58 = vld [vmem:[%s12153_s14 + $0x300] sm:$0xff]  ;;  %v4515_v24 = vld [vmem:[%s12153_s14 + $0x310] sm:$0xff] }
 0xc1e   :  { %6700 = vmatprep.subr.bf16.mxu0 %v6699_v28  ;;  %6828 = vmatprep.subr.bf16.mxu1 %v6827_v32  ;;  %v6719_v28 = vpack.c.bf16 %v4486_v34, %v4482_v27  ;;  %v6847_v32 = vpack.c.bf16 %v4488_v41, %v4484_v38  ;;  %v4517_v6 = vld [vmem:[%s12153_s14 + $0x320] sm:$0xff]  ;;  %v4519_v26 = vld [vmem:[%s12153_s14 + $0x330] sm:$0xff]  ;;  %v4522_v27 = vld [vmem:[%s12153_s14 + $0x348] sm:$0xff] }
 0xc1f   :  { %v4526_v34 = vld [vmem:[%s12153_s14 + $0x368] sm:$0xff]  ;;  %v4524_v38 = vld [vmem:[%s12153_s14 + $0x358] sm:$0xff] }
 0xc20   :  { %v4528_v41 = vld [vmem:[%s12153_s14 + $0x378] sm:$0xff] }
 0xc21   :  { %6702 = vmatpush1.bf16.msra.mxu0 %v6701_v56  ;;  %6830 = vmatpush1.bf16.msra.mxu1 %v6829_v37  ;;  %v6721_v56 = vpack.c.bf16 %v4485_v23, %v4481_v42  ;;  %v6849_v37 = vpack.c.bf16 %v4487_v61, %v4483_v44  ;;  %v4521_v42 = vld [vmem:[%s12153_s14 + $0x340] sm:$0xff]  ;;  %v4523_v44 = vld [vmem:[%s12153_s14 + $0x350] sm:$0xff] }
 0xc22   :  { %6704 = vmatprep.subr.bf16.mxu0 %v6703_v63  ;;  %6832 = vmatprep.subr.bf16.mxu1 %v6831_v4  ;;  %v6723_v63 = vpack.c.bf16 %v4494_v47, %v4490_v46  ;;  %v6851_v4 = vpack.c.bf16 %v4496_v5, %v4492_v55  ;;  %v4525_v23 = vld [vmem:[%s12153_s14 + $0x360] sm:$0xff]  ;;  %v4527_v61 = vld [vmem:[%s12153_s14 + $0x370] sm:$0xff]  ;;  %v4530_v46 = vld [vmem:[%s12153_s14 + $0x388] sm:$0xff] }
 0xc23   :  { %v4534_v47 = vld [vmem:[%s12153_s14 + $0x3a8] sm:$0xff]  ;;  %v4532_v55 = vld [vmem:[%s12153_s14 + $0x398] sm:$0xff] }
 0xc24   :  { %v4536_v5 = vld [vmem:[%s12153_s14 + $0x3b8] sm:$0xff] }
 0xc25   :  { %6706 = vmatpush1.bf16.msra.mxu0 %v6705_v54  ;;  %6834 = vmatpush1.bf16.msra.mxu1 %v6833_v19  ;;  %v6725_v54 = vpack.c.bf16 %v4493_v60, %v4489_v59  ;;  %v6853_v19 = vpack.c.bf16 %v4495_v25, %v4491_v9  ;;  %v4529_v59 = vld [vmem:[%s12153_s14 + $0x380] sm:$0xff]  ;;  %v6743_v60 = vpack.c.bf16 %v4534_v47, %v4530_v46  ;;  %v4531_v9 = vld [vmem:[%s12153_s14 + $0x390] sm:$0xff] }
 0xc26   :  { %6708 = vmatprep.subr.bf16.mxu0 %v6707_v52  ;;  %6836 = vmatprep.subr.bf16.mxu1 %v6835_v53  ;;  %v6727_v52 = vpack.c.bf16 %v4502_v11, %v4498_v10  ;;  %v6855_v53 = vpack.c.bf16 %v4504_v18, %v4500_v14  ;;  %v4535_v25 = vld [vmem:[%s12153_s14 + $0x3b0] sm:$0xff]  ;;  %v4538_v14 = vld [vmem:[%s12153_s14 + $0x3c8] sm:$0xff] }
 0xc27   :  { %v6873_v11 = vpack.c.bf16 %v4535_v25, %v4531_v9  ;;  %v4542_v18 = vld [vmem:[%s12153_s14 + $0x3e8] sm:$0xff] }
 0xc29   :  { %6710 = vmatpush1.bf16.msra.mxu0 %v6709_v7  ;;  %6838 = vmatpush1.bf16.msra.mxu1 %v6837_v15  ;;  %v6729_v7 = vpack.c.bf16 %v4501_v51, %v4497_v43  ;;  %v6857_v15 = vpack.c.bf16 %v4503_v1, %v4499_v57  ;;  %v4544_v43 = vld [vmem:[%s12153_s14 + $0x3f8] sm:$0xff]  ;;  %v4537_v51 = vld [vmem:[%s12153_s14 + $0x3c0] sm:$0xff]  ;;  %v4539_v1 = vld [vmem:[%s12153_s14 + $0x3d0] sm:$0xff] }
 0xc2a   :  { %6712 = vmatprep.subr.bf16.mxu0 %v6711_v21  ;;  %6840 = vmatprep.subr.bf16.mxu1 %v6839_v29  ;;  %v6731_v21 = vpack.c.bf16 %v4510_v2, %v4506_v20  ;;  %v6859_v29 = vpack.c.bf16 %v4512_v3, %v4508_v0  ;;  %v4543_v20 = vld [vmem:[%s12153_s14 + $0x3f0] sm:$0xff]  ;;  %v4546_v0 = vld [vmem:[%s12153_s14 + $0x408] sm:$0xff] }
 0xc2b   :  { %v6877_v2 = vpack.c.bf16 %v4543_v20, %v4539_v1  ;;  %v4550_v3 = vld [vmem:[%s12153_s14 + $0x428] sm:$0xff]  ;;  %v4571_v20 = vld [vmem:[%s12153_s14 + $0x4d0] sm:$0xff] }
 0xc2d   :  { %6714 = vmatpush1.bf16.msra.mxu0 %v6713_v50  ;;  %6842 = vmatpush1.bf16.msra.mxu1 %v6841_v13  ;;  %v6733_v50 = vpack.c.bf16 %v4509_v17, %v4505_v16  ;;  %v6861_v13 = vpack.c.bf16 %v4511_v31, %v4507_v30  ;;  %v4552_v16 = vld [vmem:[%s12153_s14 + $0x438] sm:$0xff] }
 0xc2e   :  { %6716 = vmatprep.subr.bf16.mxu0 %v6715_v8  ;;  %6844 = vmatprep.subr.bf16.mxu1 %v6843_v12  ;;  %v6735_v8 = vpack.c.bf16 %v4518_v48, %v4514_v35  ;;  %v6863_v12 = vpack.c.bf16 %v4520_v36, %v4516_v49  ;;  %v4545_v49 = vld [vmem:[%s12153_s14 + $0x400] sm:$0xff] }
 0xc31   :  { %6718 = vmatpush1.bf16.msra.mxu0 %v6717_v39  ;;  %6846 = vmatpush1.bf16.msra.mxu1 %v6845_v22  ;;  %v6737_v39 = vpack.c.bf16 %v4517_v6, %v4513_v58  ;;  %v6865_v22 = vpack.c.bf16 %v4519_v26, %v4515_v24  ;;  %v4549_v58 = vld [vmem:[%s12153_s14 + $0x420] sm:$0xff]  ;;  %v4547_v6 = vld [vmem:[%s12153_s14 + $0x410] sm:$0xff]  ;;  %v4554_v24 = vld [vmem:[%s12153_s14 + $0x448] sm:$0xff] }
 0xc32   :  { %6720 = vmatprep.subr.bf16.mxu0 %v6719_v28  ;;  %6848 = vmatprep.subr.bf16.mxu1 %v6847_v32  ;;  %v6739_v28 = vpack.c.bf16 %v4526_v34, %v4522_v27  ;;  %v6867_v32 = vpack.c.bf16 %v4528_v41, %v4524_v38  ;;  %v4558_v27 = vld [vmem:[%s12153_s14 + $0x468] sm:$0xff]  ;;  %v4556_v34 = vld [vmem:[%s12153_s14 + $0x458] sm:$0xff] }
 0xc33   :  { %v4560_v38 = vld [vmem:[%s12153_s14 + $0x478] sm:$0xff]  ;;  %v6755_v46 = vpack.c.bf16 %v4558_v27, %v4554_v24  ;;  %v4585_v24 = vld [vmem:[%s12153_s14 + $0x540] sm:$0xff] }
 0xc34   :  { %v6883_v47 = vpack.c.bf16 %v4560_v38, %v4556_v34  ;;  %v4587_v38 = vld [vmem:[%s12153_s14 + $0x550] sm:$0xff] }
 0xc35   :  { %6722 = vmatpush1.bf16.msra.mxu0 %v6721_v56  ;;  %6850 = vmatpush1.bf16.msra.mxu1 %v6849_v37  ;;  %v6741_v56 = vpack.c.bf16 %v4525_v23, %v4521_v42  ;;  %v6869_v37 = vpack.c.bf16 %v4527_v61, %v4523_v44  ;;  %v4553_v42 = vld [vmem:[%s12153_s14 + $0x440] sm:$0xff]  ;;  %v4559_v44 = vld [vmem:[%s12153_s14 + $0x470] sm:$0xff]  ;;  %v4562_v61 = vld [vmem:[%s12153_s14 + $0x488] sm:$0xff] }
 0xc36   :  { %6724 = vmatprep.subr.bf16.mxu0 %v6723_v63  ;;  %6852 = vmatprep.subr.bf16.mxu1 %v6851_v4  ;;  %v6871_v63 = vpack.c.bf16 %v4536_v5, %v4532_v55  ;;  %v4533_v4 = vld [vmem:[%s12153_s14 + $0x3a0] sm:$0xff]  ;;  %v4566_v55 = vld [vmem:[%s12153_s14 + $0x4a8] sm:$0xff]  ;;  %v4564_v5 = vld [vmem:[%s12153_s14 + $0x498] sm:$0xff] }
 0xc37   :  { %v6745_v10 = vpack.c.bf16 %v4533_v4, %v4529_v59  ;;  %v4557_v23 = vld [vmem:[%s12153_s14 + $0x460] sm:$0xff]  ;;  %v6759_v9 = vpack.c.bf16 %v4566_v55, %v4562_v61  ;;  %v4595_v55 = vld [vmem:[%s12153_s14 + $0x590] sm:$0xff] }
 0xc38   :  { %v6757_v59 = vpack.c.bf16 %v4557_v23, %v4553_v42  ;;  %v4565_v4 = vld [vmem:[%s12153_s14 + $0x4a0] sm:$0xff]  ;;  %v4596_v42 = vld [vmem:[%s12153_s14 + $0x598] sm:$0xff] }
 0xc39   :  { %6726 = vmatpush1.bf16.msra.mxu0 %v6725_v54  ;;  %6854 = vmatpush1.bf16.msra.mxu1 %v6853_v19  ;;  %v4540_v54 = vld [vmem:[%s12153_s14 + $0x3d8] sm:$0xff]  ;;  %v6747_v19 = vpack.c.bf16 %v4542_v18, %v4538_v14  ;;  %v4570_v14 = vld [vmem:[%s12153_s14 + $0x4c8] sm:$0xff]  ;;  %v4597_v61 = vld [vmem:[%s12153_s14 + $0x5a0] sm:$0xff] }
 0xc3a   :  { %6728 = vmatprep.subr.bf16.mxu0 %v6727_v52  ;;  %6856 = vmatprep.subr.bf16.mxu1 %v6855_v53  ;;  %v4541_v52 = vld [vmem:[%s12153_s14 + $0x3e0] sm:$0xff]  ;;  %v6875_v53 = vpack.c.bf16 %v4544_v43, %v4540_v54  ;;  %v4574_v18 = vld [vmem:[%s12153_s14 + $0x4e8] sm:$0xff]  ;;  %v4572_v54 = vld [vmem:[%s12153_s14 + $0x4d8] sm:$0xff] }
 0xc3b   :  { %v6749_v57 = vpack.c.bf16 %v4541_v52, %v4537_v51  ;;  %v4569_v52 = vld [vmem:[%s12153_s14 + $0x4c0] sm:$0xff]  ;;  %v4600_v23 = vld [vmem:[%s12153_s14 + $0x5b8] sm:$0xff] }
 0xc3d   :  { %6730 = vmatpush1.bf16.msra.mxu0 %v6729_v7  ;;  %6858 = vmatpush1.bf16.msra.mxu1 %v6857_v15  ;;  %v4548_v7 = vld [vmem:[%s12153_s14 + $0x418] sm:$0xff]  ;;  %v6751_v15 = vpack.c.bf16 %v4550_v3, %v4546_v0  ;;  %v4578_v0 = vld [vmem:[%s12153_s14 + $0x508] sm:$0xff] }
 0xc3e   :  { %6732 = vmatprep.subr.bf16.mxu0 %v6731_v21  ;;  %6860 = vmatprep.subr.bf16.mxu1 %v6859_v29  ;;  %v6879_v17 = vpack.c.bf16 %v4552_v16, %v4548_v7  ;;  %v11735_v21 = vld [vmem:[%s12154_s13] sm:$0xf]  ;;  %v4582_v3 = vld [vmem:[%s12153_s14 + $0x528] sm:$0xff]  ;;  %v4580_v7 = vld [vmem:[%s12153_s14 + $0x518] sm:$0xff] }
 0xc3f   :  { %v4112_v29 = vrot.slane %v11735_v21, %v8505_v33  ;;  %v4116_v30 = vrot.slane %v11735_v21, %v8510_v40  ;;  %v4124_v31 = vrot.slane %v11735_v21, %v8518_v45 }
 0xc41   :  { %6734 = vmatpush1.bf16.msra.mxu0 %v6733_v50  ;;  %6862 = vmatpush1.bf16.msra.mxu1 %v6861_v13 }
 0xc42   :  { %6736 = vmatprep.subr.bf16.mxu0 %v6735_v8  ;;  %6864 = vmatprep.subr.bf16.mxu1 %v6863_v12  ;;  %v4551_v8 = vld [vmem:[%s12153_s14 + $0x430] sm:$0xff] }
 0xc45   :  { %6738 = vmatpush1.bf16.msra.mxu0 %v6737_v39  ;;  %6866 = vmatpush1.bf16.msra.mxu1 %v6865_v22  ;;  %v6753_v39 = vpack.c.bf16 %v4549_v58, %v4545_v49  ;;  %v6881_v22 = vpack.c.bf16 %v4551_v8, %v4547_v6  ;;  %v4579_v49 = vld [vmem:[%s12153_s14 + $0x510] sm:$0xff]  ;;  %v4588_v58 = vld [vmem:[%s12153_s14 + $0x558] sm:$0xff] }
 0xc46   :  { %6740 = vmatprep.subr.bf16.mxu0 %v6739_v28  ;;  %6868 = vmatprep.subr.bf16.mxu1 %v6867_v32  ;;  %v4555_v32 = vld [vmem:[%s12153_s14 + $0x450] sm:$0xff]  ;;  %v4592_v6 = vld [vmem:[%s12153_s14 + $0x578] sm:$0xff] }
 0xc47   :  { %v6899_v34 = vpack.c.bf16 %v4592_v6, %v4588_v58  ;;  %v4626_v58 = vld [vmem:[%s12153_s14 + $0x688] sm:$0xff] }
 0xc48   :  { %v4630_v6 = vld [vmem:[%s12153_s14 + $0x6a8] sm:$0xff] }
 0xc49   :  { %6742 = vmatpush1.bf16.msra.mxu0 %v6741_v56  ;;  %6870 = vmatpush1.bf16.msra.mxu1 %v6869_v37  ;;  %v4568_v56 = vld [vmem:[%s12153_s14 + $0x4b8] sm:$0xff] }
 0xc4a   :  { %6744 = vmatprep.subr.bf16.mxu0 %v6743_v60  ;;  %6872 = vmatprep.subr.bf16.mxu1 %v6871_v63  ;;  %v6885_v60 = vpack.c.bf16 %v4559_v44, %v4555_v32  ;;  %v4561_v63 = vld [vmem:[%s12153_s14 + $0x480] sm:$0xff]  ;;  %v6887_v25 = vpack.c.bf16 %v4568_v56, %v4564_v5  ;;  %v4599_v5 = vld [vmem:[%s12153_s14 + $0x5b0] sm:$0xff]  ;;  %v4602_v56 = vld [vmem:[%s12153_s14 + $0x5c8] sm:$0xff] }
 0xc4b   :  { %v6761_v43 = vpack.c.bf16 %v4565_v4, %v4561_v63  ;;  %v4593_v44 = vld [vmem:[%s12153_s14 + $0x580] sm:$0xff]  ;;  %v6905_v4 = vpack.c.bf16 %v4599_v5, %v4595_v55 }
 0xc4c   :  { %v6777_v63 = vpack.c.bf16 %v4597_v61, %v4593_v44 }
 0xc4d   :  { %6746 = vmatpush1.bf16.msra.mxu0 %v6745_v10  ;;  %6874 = vmatpush1.bf16.msra.mxu1 %v6873_v11  ;;  %v4563_v10 = vld [vmem:[%s12153_s14 + $0x490] sm:$0xff] }
 0xc4e   :  { %6748 = vmatprep.subr.bf16.mxu0 %v6747_v19  ;;  %6876 = vmatprep.subr.bf16.mxu1 %v6875_v53  ;;  %v4567_v11 = vld [vmem:[%s12153_s14 + $0x4b0] sm:$0xff]  ;;  %v4576_v19 = vld [vmem:[%s12153_s14 + $0x4f8] sm:$0xff]  ;;  %v4573_v53 = vld [vmem:[%s12153_s14 + $0x4e0] sm:$0xff] }
 0xc4f   :  { %v6889_v51 = vpack.c.bf16 %v4567_v11, %v4563_v10  ;;  %v6891_v1 = vpack.c.bf16 %v4576_v19, %v4572_v54  ;;  %v6765_v16 = vpack.c.bf16 %v4573_v53, %v4569_v52  ;;  %v4610_v54 = vld [vmem:[%s12153_s14 + $0x608] sm:$0xff] }
 0xc50   :  { %v4614_v19 = vld [vmem:[%s12153_s14 + $0x628] sm:$0xff] }
 0xc51   :  { %6750 = vmatpush1.bf16.msra.mxu0 %v6749_v57  ;;  %6878 = vmatpush1.bf16.msra.mxu1 %v6877_v2  ;;  %v6763_v57 = vpack.c.bf16 %v4574_v18, %v4570_v14  ;;  %v4575_v2 = vld [vmem:[%s12153_s14 + $0x4f0] sm:$0xff] }
 0xc52   :  { %6752 = vmatprep.subr.bf16.mxu0 %v6751_v15  ;;  %6880 = vmatprep.subr.bf16.mxu1 %v6879_v17  ;;  %v4584_v15 = vld [vmem:[%s12153_s14 + $0x538] sm:$0xff]  ;;  %v6893_v17 = vpack.c.bf16 %v4575_v2, %v4571_v20  ;;  %v4603_v14 = vld [vmem:[%s12153_s14 + $0x5d0] sm:$0xff]  ;;  %v6783_v20 = vpack.c.bf16 %v4614_v19, %v4610_v54 }
 0xc53   :  { %v4607_v18 = vld [vmem:[%s12153_s14 + $0x5f0] sm:$0xff] }
 0xc54   :  { %v6909_v53 = vpack.c.bf16 %v4607_v18, %v4603_v14  ;;  %v4643_v54 = vld [vmem:[%s12153_s14 + $0x710] sm:$0xff] }
 0xc55   :  { %v4647_v19 = vld [vmem:[%s12153_s14 + $0x730] sm:$0xff] }
 0xce7   :  { %v4266_v35 = vpop.f32.mrb[22].mxu0  ;;  %v11743_v48 = vpop.f32.mrb[22].mxu1 }
 0xce8   :  { %v6987_v36 = vadd.f32 %v4266_v35, %v4112_v29  ;;  %v4268_v50 = vpop.f32.mrb[23].mxu0  ;;  %v4410_v13 = vpop.f32.mrb[23].mxu1  ;;  %v4577_v29 = vld [vmem:[%s12153_s14 + $0x500] sm:$0xff]  ;;  %v6895_v35 = vpack.c.bf16 %v4584_v15, %v4580_v7  ;;  %v4618_v7 = vld [vmem:[%s12153_s14 + $0x648] sm:$0xff] }
 0xce9   :  { %v6988_v12 = vadd.f32 %v4268_v50, %v4116_v30  ;;  %v6990_v26 = vadd.f32 %v4410_v13, %v4124_v31  ;;  %v4581_v30 = vld [vmem:[%s12153_s14 + $0x520] sm:$0xff]  ;;  %v6767_v31 = vpack.c.bf16 %v4582_v3, %v4578_v0  ;;  %v4586_v50 = vld [vmem:[%s12153_s14 + $0x548] sm:$0xff]  ;;  %v4611_v0 = vld [vmem:[%s12153_s14 + $0x610] sm:$0xff] }
 0xcea   :  { %v4413_v28 = vmax.f32 %v6987_v36, 0.0  ;;  %v4583_v36 = vld [vmem:[%s12153_s14 + $0x530] sm:$0xff]  ;;  %v4590_v13 = vld [vmem:[%s12153_s14 + $0x568] sm:$0xff]  ;;  %v6769_v8 = vpack.c.bf16 %v4581_v30, %v4577_v29 }
 0xceb   :  { %v4414_v41 = vmax.f32 %v6988_v12, 0.0  ;;  %v4416_v37 = vmax.f32 %v6990_v26, 0.0  ;;  %v6897_v12 = vpack.c.bf16 %v4583_v36, %v4579_v49  ;;  %v4589_v26 = vld [vmem:[%s12153_s14 + $0x560] sm:$0xff]  ;;  %v6771_v27 = vpack.c.bf16 %v4590_v13, %v4586_v50  ;;  %v4615_v3 = vld [vmem:[%s12153_s14 + $0x630] sm:$0xff]  ;;  %v4622_v15 = vld [vmem:[%s12153_s14 + $0x668] sm:$0xff] }
 0xcec   :  { %v6913_v30 = vpack.c.bf16 %v4615_v3, %v4611_v0  ;;  %v6787_v49 = vpack.c.bf16 %v4622_v15, %v4618_v7  ;;  %v4619_v50 = vld [vmem:[%s12153_s14 + $0x650] sm:$0xff] }
 0xced   :  { %4759 = vmatprep.mubr.f32.mxu0 %v4414_v41  ;;  %4901 = vmatprep.mubr.f32.mxu1 %v4414_v41  ;;  %v4591_v41 = vld [vmem:[%s12153_s14 + $0x570] sm:$0xff] }
 0xcee   :  { %4760 = vmatmul.mubr.f32.vlgmr.msra.gmra.mrb[24].mxu0 %v4413_v28  ;;  %4902 = vmatmul.mubr.f32.vlgmr.msra.gmra.mrb[24].mxu1 %v4413_v28  ;;  %v6773_v28 = vpack.c.bf16 %v4589_v26, %v4585_v24  ;;  %v6901_v32 = vpack.c.bf16 %v4591_v41, %v4587_v38  ;;  %v4623_v13 = vld [vmem:[%s12153_s14 + $0x670] sm:$0xff]  ;;  %v6791_v38 = vpack.c.bf16 %v4630_v6, %v4626_v58 }
 0xcef   :  { %6754 = vmatpush1.bf16.msra.mxu0 %v6753_v39  ;;  %6882 = vmatpush1.bf16.msra.mxu1 %v6881_v22  ;;  %v4594_v39 = vld [vmem:[%s12153_s14 + $0x588] sm:$0xff]  ;;  %v6917_v26 = vpack.c.bf16 %v4623_v13, %v4619_v50  ;;  %v4651_v7 = vld [vmem:[%s12153_s14 + $0x750] sm:$0xff] }
 0xcf0   :  { %4830 = vmatprep.mubr.f32.mxu0 %v4416_v37  ;;  %4972 = vmatprep.mubr.f32.mxu1 %v4416_v37  ;;  %v4598_v22 = vld [vmem:[%s12153_s14 + $0x5a8] sm:$0xff]  ;;  %v4655_v15 = vld [vmem:[%s12153_s14 + $0x770] sm:$0xff] }
 0xcf1   :  { %6756 = vmatprep.subr.bf16.mxu0 %v6755_v46  ;;  %6884 = vmatprep.subr.bf16.mxu1 %v6883_v47  ;;  %v6775_v46 = vpack.c.bf16 %v4598_v22, %v4594_v39  ;;  %v6903_v47 = vpack.c.bf16 %v4600_v23, %v4596_v42  ;;  %v4606_v37 = vld [vmem:[%s12153_s14 + $0x5e8] sm:$0xff]  ;;  %v4627_v39 = vld [vmem:[%s12153_s14 + $0x690] sm:$0xff] }
 0xcf2   :  { %v6779_v10 = vpack.c.bf16 %v4606_v37, %v4602_v56  ;;  %v4631_v22 = vld [vmem:[%s12153_s14 + $0x6b0] sm:$0xff]  ;;  %v4634_v42 = vld [vmem:[%s12153_s14 + $0x6c8] sm:$0xff] }
 0xcf3   :  { %6758 = vmatpush1.bf16.msra.mxu0 %v6757_v59  ;;  %6886 = vmatpush1.bf16.msra.mxu1 %v6885_v60  ;;  %v4604_v59 = vld [vmem:[%s12153_s14 + $0x5d8] sm:$0xff]  ;;  %v4638_v23 = vld [vmem:[%s12153_s14 + $0x6e8] sm:$0xff]  ;;  %v6921_v61 = vpack.c.bf16 %v4631_v22, %v4627_v39  ;;  %v4635_v56 = vld [vmem:[%s12153_s14 + $0x6d0] sm:$0xff] }
 0xcf4   :  { %6760 = vmatprep.subr.bf16.mxu0 %v6759_v9  ;;  %6888 = vmatprep.subr.bf16.mxu1 %v6887_v25  ;;  %v4608_v60 = vld [vmem:[%s12153_s14 + $0x5f8] sm:$0xff]  ;;  %v4601_v9 = vld [vmem:[%s12153_s14 + $0x5c0] sm:$0xff]  ;;  %v6795_v55 = vpack.c.bf16 %v4638_v23, %v4634_v42  ;;  %v4639_v37 = vld [vmem:[%s12153_s14 + $0x6f0] sm:$0xff] }
 0xcf5   :  { %v4605_v25 = vld [vmem:[%s12153_s14 + $0x5e0] sm:$0xff]  ;;  %v6907_v11 = vpack.c.bf16 %v4608_v60, %v4604_v59  ;;  %v4642_v59 = vld [vmem:[%s12153_s14 + $0x708] sm:$0xff]  ;;  %v4659_v58 = vld [vmem:[%s12153_s14 + $0x790] sm:$0xff] }
 0xcf6   :  { %v6781_v52 = vpack.c.bf16 %v4605_v25, %v4601_v9  ;;  %v4646_v60 = vld [vmem:[%s12153_s14 + $0x728] sm:$0xff]  ;;  %v6925_v25 = vpack.c.bf16 %v4639_v37, %v4635_v56  ;;  %v4663_v6 = vld [vmem:[%s12153_s14 + $0x7b0] sm:$0xff]  ;;  %v4669_v42 = vld [vmem:[%s12153_s14 + $0x7e0] sm:$0xff] }
 0xcf7   :  { %6762 = vmatpush1.bf16.msra.mxu0 %v6761_v43  ;;  %6890 = vmatpush1.bf16.msra.mxu1 %v6889_v51  ;;  %v4612_v43 = vld [vmem:[%s12153_s14 + $0x618] sm:$0xff]  ;;  %v6799_v14 = vpack.c.bf16 %v4646_v60, %v4642_v59  ;;  %v4667_v23 = vld [vmem:[%s12153_s14 + $0x7d0] sm:$0xff] }
 0xcf8   :  { %6764 = vmatprep.subr.bf16.mxu0 %v6763_v57  ;;  %6892 = vmatprep.subr.bf16.mxu1 %v6891_v1  ;;  %v4616_v51 = vld [vmem:[%s12153_s14 + $0x638] sm:$0xff]  ;;  %v4609_v57 = vld [vmem:[%s12153_s14 + $0x600] sm:$0xff] }
 0xcf9   :  { %v4613_v1 = vld [vmem:[%s12153_s14 + $0x620] sm:$0xff]  ;;  %v6911_v2 = vpack.c.bf16 %v4616_v51, %v4612_v43  ;;  %v4650_v43 = vld [vmem:[%s12153_s14 + $0x748] sm:$0xff] }
 0xcfa   :  { %v6785_v29 = vpack.c.bf16 %v4613_v1, %v4609_v57  ;;  %v4654_v51 = vld [vmem:[%s12153_s14 + $0x768] sm:$0xff]  ;;  %v6929_v1 = vpack.c.bf16 %v4647_v19, %v4643_v54 }
 0xcfb   :  { %6766 = vmatpush1.bf16.msra.mxu0 %v6765_v16  ;;  %6894 = vmatpush1.bf16.msra.mxu1 %v6893_v17  ;;  %v4620_v16 = vld [vmem:[%s12153_s14 + $0x658] sm:$0xff]  ;;  %v6803_v0 = vpack.c.bf16 %v4654_v51, %v4650_v43 }
 0xcfc   :  { %6768 = vmatprep.subr.bf16.mxu0 %v6767_v31  ;;  %6896 = vmatprep.subr.bf16.mxu1 %v6895_v35  ;;  %v4624_v17 = vld [vmem:[%s12153_s14 + $0x678] sm:$0xff]  ;;  %v4617_v31 = vld [vmem:[%s12153_s14 + $0x640] sm:$0xff] }
 0xcfd   :  { %v4621_v35 = vld [vmem:[%s12153_s14 + $0x660] sm:$0xff]  ;;  %v6915_v36 = vpack.c.bf16 %v4624_v17, %v4620_v16  ;;  %v4658_v16 = vld [vmem:[%s12153_s14 + $0x788] sm:$0xff] }
 0xcfe   :  { %v6789_v24 = vpack.c.bf16 %v4621_v35, %v4617_v31  ;;  %v4662_v17 = vld [vmem:[%s12153_s14 + $0x7a8] sm:$0xff]  ;;  %v6933_v35 = vpack.c.bf16 %v4655_v15, %v4651_v7 }
 0xcff   :  { %6770 = vmatpush1.bf16.msra.mxu0 %v6769_v8  ;;  %6898 = vmatpush1.bf16.msra.mxu1 %v6897_v12  ;;  %v4628_v8 = vld [vmem:[%s12153_s14 + $0x698] sm:$0xff]  ;;  %v6807_v50 = vpack.c.bf16 %v4662_v17, %v4658_v16 }
 0xd00   :  { %6772 = vmatprep.subr.bf16.mxu0 %v6771_v27  ;;  %6900 = vmatprep.subr.bf16.mxu1 %v6899_v34  ;;  %v4632_v12 = vld [vmem:[%s12153_s14 + $0x6b8] sm:$0xff]  ;;  %v4625_v27 = vld [vmem:[%s12153_s14 + $0x680] sm:$0xff] }
 0xd01   :  { %v4629_v34 = vld [vmem:[%s12153_s14 + $0x6a0] sm:$0xff]  ;;  %v6919_v41 = vpack.c.bf16 %v4632_v12, %v4628_v8  ;;  %v4666_v8 = vld [vmem:[%s12153_s14 + $0x7c8] sm:$0xff] }
 0xd02   :  { %v6793_v44 = vpack.c.bf16 %v4629_v34, %v4625_v27  ;;  %v4670_v12 = vld [vmem:[%s12153_s14 + $0x7e8] sm:$0xff]  ;;  %v6937_v34 = vpack.c.bf16 %v4663_v6, %v4659_v58 }
 0xd03   :  { %6774 = vmatpush1.bf16.msra.mxu0 %v6773_v28  ;;  %6902 = vmatpush1.bf16.msra.mxu1 %v6901_v32  ;;  %v4636_v28 = vld [vmem:[%s12153_s14 + $0x6d8] sm:$0xff]  ;;  %v6811_v39 = vpack.c.bf16 %v4670_v12, %v4666_v8 }
 0xd04   :  { %6776 = vmatprep.subr.bf16.mxu0 %v6775_v46  ;;  %6904 = vmatprep.subr.bf16.mxu1 %v6903_v47  ;;  %v4640_v32 = vld [vmem:[%s12153_s14 + $0x6f8] sm:$0xff]  ;;  %v4633_v46 = vld [vmem:[%s12153_s14 + $0x6c0] sm:$0xff] }
 0xd05   :  { %v4637_v47 = vld [vmem:[%s12153_s14 + $0x6e0] sm:$0xff]  ;;  %v6923_v5 = vpack.c.bf16 %v4640_v32, %v4636_v28  ;;  %v4671_v28 = vld [vmem:[%s12153_s14 + $0x7f0] sm:$0xff] }
 0xd06   :  { %v6797_v9 = vpack.c.bf16 %v4637_v47, %v4633_v46  ;;  %v23_v46 = vstv %s12155_s17  ;;  %v4673_v47 = vld [vmem:[%s12156_s15] sm:$0xf] }
 0xd07   :  { %6778 = vmatpush1.bf16.msra.mxu0 %v6777_v63  ;;  %6906 = vmatpush1.bf16.msra.mxu1 %v6905_v4  ;;  %v4644_v63 = vld [vmem:[%s12153_s14 + $0x718] sm:$0xff]  ;;  %24 = vst [vmem:[#allocation6] sm:$0x1] %v23_v46  ;;  %v4682_v56 = vrot.slane %v4673_v47, %v8510_v40  ;;  %v4690_v37 = vrot.slane %v4673_v47, %v8518_v45 }
 0xd08   :  { %6780 = vmatprep.subr.bf16.mxu0 %v6779_v10  ;;  %6908 = vmatprep.subr.bf16.mxu1 %v6907_v11  ;;  %v4648_v4 = vld [vmem:[%s12153_s14 + $0x738] sm:$0xff]  ;;  %v4641_v10 = vld [vmem:[%s12153_s14 + $0x700] sm:$0xff] }
 0xd09   :  { %v4645_v11 = vld [vmem:[%s12153_s14 + $0x720] sm:$0xff]  ;;  %v6927_v18 = vpack.c.bf16 %v4648_v4, %v4644_v63 }
 0xd0a   :  { %v6801_v57 = vpack.c.bf16 %v4645_v11, %v4641_v10 }
 0xd0b   :  { %6782 = vmatpush1.bf16.msra.mxu0 %v6781_v52  ;;  %6910 = vmatpush1.bf16.msra.mxu1 %v6909_v53  ;;  %v4652_v52 = vld [vmem:[%s12153_s14 + $0x758] sm:$0xff] }
 0xd0c   :  { %6784 = vmatprep.subr.bf16.mxu0 %v6783_v20  ;;  %6912 = vmatprep.subr.bf16.mxu1 %v6911_v2  ;;  %v4656_v53 = vld [vmem:[%s12153_s14 + $0x778] sm:$0xff]  ;;  %v4649_v20 = vld [vmem:[%s12153_s14 + $0x740] sm:$0xff] }
 0xd0d   :  { %v4653_v2 = vld [vmem:[%s12153_s14 + $0x760] sm:$0xff]  ;;  %v6931_v3 = vpack.c.bf16 %v4656_v53, %v4652_v52 }
 0xd0e   :  { %v6805_v31 = vpack.c.bf16 %v4653_v2, %v4649_v20  ;;  %v5078_v7 = vld [vmem:[#allocation6] ss:$0 sm:$0xff] }
 0xd0f   :  { %6786 = vmatpush1.bf16.msra.mxu0 %v6785_v29  ;;  %6914 = vmatpush1.bf16.msra.mxu1 %v6913_v30  ;;  %v4660_v29 = vld [vmem:[%s12153_s14 + $0x798] sm:$0xff] }
 0xd10   :  { %6788 = vmatprep.subr.bf16.mxu0 %v6787_v49  ;;  %6916 = vmatprep.subr.bf16.mxu1 %v6915_v36  ;;  %v4664_v30 = vld [vmem:[%s12153_s14 + $0x7b8] sm:$0xff]  ;;  %v4657_v49 = vld [vmem:[%s12153_s14 + $0x780] sm:$0xff] }
 0xd11   :  { %v4661_v36 = vld [vmem:[%s12153_s14 + $0x7a0] sm:$0xff]  ;;  %v6935_v13 = vpack.c.bf16 %v4664_v30, %v4660_v29 }
 0xd12   :  { %v6809_v27 = vpack.c.bf16 %v4661_v36, %v4657_v49 }
 0xd13   :  { %6790 = vmatpush1.bf16.msra.mxu0 %v6789_v24  ;;  %6918 = vmatpush1.bf16.msra.mxu1 %v6917_v26  ;;  %v4668_v24 = vld [vmem:[%s12153_s14 + $0x7d8] sm:$0xff] }
 0xd14   :  { %6792 = vmatprep.subr.bf16.mxu0 %v6791_v38  ;;  %6920 = vmatprep.subr.bf16.mxu1 %v6919_v41  ;;  %v4672_v26 = vld [vmem:[%s12153_s14 + $0x7f8] sm:$0xff]  ;;  %v4665_v38 = vld [vmem:[%s12153_s14 + $0x7c0] sm:$0xff]  ;;  %v4120_v41 = vrot.slane %v11735_v21, %v8525_v62  ;;  %v6941_v21 = vpack.c.bf16 %v4671_v28, %v4667_v23 }
 0xd15   :  { %v6939_v22 = vpack.c.bf16 %v4672_v26, %v4668_v24  ;;  %v6813_v32 = vpack.c.bf16 %v4669_v42, %v4665_v38 }
 0xd17   :  { %6794 = vmatpush1.bf16.msra.mxu0 %v6793_v44  ;;  %6922 = vmatpush1.bf16.msra.mxu1 %v6921_v61  ;;  %v6989_v44 = vadd.f32 %v11743_v48, %v4120_v41  ;;  %v4686_v48 = vrot.slane %v4673_v47, %v8525_v62 }
 0xd18   :  { %6796 = vmatprep.subr.bf16.mxu0 %v6795_v55  ;;  %6924 = vmatprep.subr.bf16.mxu1 %v6923_v5  ;;  %v4678_v55 = vrot.slane %v4673_v47, %v8505_v33  ;;  %v4983_v5 = vld [vmem:[%s12157_s16] sm:$0xf] }
 0xd19   :  { %v4415_v61 = vmax.f32 %v6989_v44, 0.0  ;;  %v4988_v4 = vrot.slane %v4983_v5, %v8505_v33  ;;  %v4996_v43 = vrot.slane %v4983_v5, %v8525_v62 }
 0xd1b   :  { %6798 = vmatpush1.bf16.msra.mxu0 %v6797_v9  ;;  %6926 = vmatpush1.bf16.msra.mxu1 %v6925_v25 }
 0xd1c   :  { %6800 = vmatprep.subr.bf16.mxu0 %v6799_v14  ;;  %6928 = vmatprep.subr.bf16.mxu1 %v6927_v18  ;;  %v4992_v14 = vrot.slane %v4983_v5, %v8510_v40 }
 0xd1f   :  { %6802 = vmatpush1.bf16.msra.mxu0 %v6801_v57  ;;  %6930 = vmatpush1.bf16.msra.mxu1 %v6929_v1  ;;  %v5000_v1 = vrot.slane %v4983_v5, %v8518_v45 }
 0xd20   :  { %6804 = vmatprep.subr.bf16.mxu0 %v6803_v0  ;;  %6932 = vmatprep.subr.bf16.mxu1 %v6931_v3 }
 0xd23   :  { %6806 = vmatpush1.bf16.msra.mxu0 %v6805_v31  ;;  %6934 = vmatpush1.bf16.msra.mxu1 %v6933_v35 }
 0xd24   :  { %6808 = vmatprep.subr.bf16.mxu0 %v6807_v50  ;;  %6936 = vmatprep.subr.bf16.mxu1 %v6935_v13 }
 0xd27   :  { %6810 = vmatpush1.bf16.msra.mxu0 %v6809_v27  ;;  %6938 = vmatpush1.bf16.msra.mxu1 %v6937_v34 }
 0xd28   :  { %6812 = vmatprep.subr.bf16.mxu0 %v6811_v39  ;;  %6940 = vmatprep.subr.bf16.mxu1 %v6939_v22 }
 0xd2b   :  { %6814 = vmatpush1.bf16.msra.mxu0 %v6813_v32  ;;  %6942 = vmatpush1.bf16.msra.mxu1 %v6941_v21 }
 0xd2e   :  { %4831 = vmatmul.mubr.f32.vlgmr.msra.gmra.mrb[24].mxu0 %v4415_v61  ;;  %4973 = vmatmul.mubr.f32.vlgmr.msra.gmra.mrb[24].mxu1 %v4415_v61 }
 0xe01   :  { %v4832_v59 = vpop.f32.mrb[24].mxu0  ;;  %v4974_v60 = vpop.f32.mrb[24].mxu1 }
 0xe02   :  { %v6991_v63 = vadd.f32 %v4832_v59, %v4678_v55  ;;  %v6993_v9 = vadd.f32 %v4974_v60, %v4686_v48  ;;  %v4834_v25 = vpop.f32.mrb[25].mxu0  ;;  %v4976_v10 = vpop.f32.mrb[25].mxu1 }
 0xe03   :  { %v6992_v11 = vadd.f32 %v4834_v25, %v4682_v56  ;;  %v6994_v18 = vadd.f32 %v4976_v10, %v4690_v37 }
 0xe04   :  { %v4979_v54 = vmax.f32 %v6991_v63, 0.0  ;;  %v4981_v19 = vmax.f32 %v6993_v9, 0.0 }
 0xe05   :  { %v4980_v51 = vmax.f32 %v6992_v11, 0.0  ;;  %v4982_v57 = vmax.f32 %v6994_v18, 0.0 }
 0xe06   :  { %v5005_v52 = vmul.f32 %v4988_v4, %v4979_v54  ;;  %v5007_v20 = vmul.f32 %v4996_v43, %v4981_v19 }
 0xe07   :  { %v5006_v53 = vmul.f32 %v4992_v14, %v4980_v51  ;;  %v5008_v33 = vmul.f32 %v5000_v1, %v4982_v57 }
 0xe09   :  { %v5009_v2 = vadd.f32 %v5006_v53, %v5005_v52 }
 0xe0b   :  { %v5010_v0 = vadd.f32 %v5009_v2, %v5007_v20 }
 0xe0d   :  { %v5011_v3 = vadd.f32 %v5010_v0, %v5008_v33 }
 0xe0f   :  { %5012 = vadd.xlane.f32.xlu0 %v5011_v3 }
 0xe9c   :  { %v5013_v15 = vpop.xlane.xlu0 %5012 }
 0xe9d   :  { %v5021_v40 = vadd.f32 %v5078_v7, %v5013_v15 }
 0xe9f   :  { %5023 = vst.msk [vmem:[%s12158_s18] sm:$0xff] %vm5022_vm4, %v5021_v40 }

</bundles_post_ra>
